<compile_context>
chip_gen: v7x
topology: tpu7x:2x2x1
jax: 0.10.0
libtpu: 0.0.40
codegen_flags: <defaults>
</compile_context>

<pallas_src>
import functools

import jax
import jax.numpy as jnp
from jax import lax
from jax.experimental import pallas as pl
from jax.experimental.pallas import tpu as pltpu


_CMAX = 128   # packed (re+im) hidden channel width
_TAPS = 9     # 3x3 taps


def _round_up(x, k):
    return (x + k - 1) // k * k


def _fused_mc_cnn_kernel(x_ref, mask_ref, w1_ref, b1_ref, w2_ref, b2_ref,
                         w3_ref, b3_ref, w4_ref, b4_ref, o_ref,
                         slab_a, slab_b, patches, *, wp, halo, tm, n_strips):
    """Fused [conv3x3+ReLU]x3 -> conv1x1 for one image, strip-tiled over rows.

    x_ref    : (1, m_pad, 128) bf16  flattened padded rows; lanes >= 16 are zero
    mask_ref : (m_pad, 1)      f32   1.0 on real pixels, 0.0 on pad columns/rows
    w*_ref   : (1152, 128)/(128, 128) bf16 block-complex weights (tap-major rows)
    b*_ref   : (1, 128)        f32
    o_ref    : (1, m_pad, 128) bf16  lane-dense output (real channels 0..15)
    slab_a/b : (halo + m_pad + halo, 128) f32 ping-pong activation slabs
    patches  : (tm, 9*128) bf16 per-strip im2col scratch
    """
    m_pad = n_strips * tm
    offs = tuple(oy * wp + ox for oy in (-1, 0, 1) for ox in (-1, 0, 1))

    # Per-step init: zero ONLY the halo bands (interiors are fully overwritten
    # by the x fill / per-layer strip stores).  Done every step so it is safe
    # under megacore sharding of the "parallel" image axis.
    zband = jnp.zeros((halo, _CMAX), jnp.float32)
    slab_a[0:halo, :] = zband
    slab_a[halo + m_pad:halo + m_pad + halo, :] = zband
    slab_b[0:halo, :] = zband
    slab_b[halo + m_pad:halo + m_pad + halo, :] = zband

    # Fill slab A's interior with this image (single aligned full-width store;
    # x already carries the zero pad columns / pad rows / zero lanes).
    slab_a[halo:halo + m_pad, :] = x_ref[0].astype(jnp.float32)

    def conv3x3(src, w_ref, b_ref, r0):
        # Strip im2col: 9 row-shifted (tm, 128) slab windows packed side by
        # side (128-lane aligned) in the bf16 scratch -> one wide-K MXU matmul
        # (K = 1152 keeps the 256-deep v6e/v7x MXU full; the small per-strip
        # patches stores hide under the MXU on v5e).
        for t, off in enumerate(offs):
            patches[:, t * _CMAX:(t + 1) * _CMAX] = (
                src[pl.ds(halo + off + r0, tm), :].astype(jnp.bfloat16))
        h = jnp.dot(patches[...], w_ref[...],
                    preferred_element_type=jnp.float32)          # (tm, 128) f32
        return jnp.maximum(h + b_ref[...], 0.0)

    def hidden_layer(s, src, dst, w_ref, b_ref):
        r0 = pl.multiple_of(s * tm, 8)
        h = conv3x3(src, w_ref, b_ref, r0)
        # Re-zero the pad-column / pad-row positions so the next 3x3 layer's
        # taps read zeros there (emulates "same" zero padding).
        dst[pl.ds(halo + r0, tm), :] = h * mask_ref[pl.ds(r0, tm), :]

    def body1(s, c):
        hidden_layer(s, slab_a, slab_b, w1_ref, b1_ref)
        return c

    def body2(s, c):
        hidden_layer(s, slab_b, slab_a, w2_ref, b2_ref)
        return c

    def body3(s, c):
        # Layer 3 (3x3 + ReLU) fused with the final 1x1 complex conv: its
        # output never needs to round-trip through a slab; no mask needed
        # (pad rows are sliced off in the wrapper; 1x1 has no spatial mixing).
        r0 = pl.multiple_of(s * tm, 8)
        h = conv3x3(slab_a, w3_ref, b3_ref, r0)
        out = jnp.dot(h.astype(jnp.bfloat16), w4_ref[...],
                      preferred_element_type=jnp.float32) + b4_ref[...]
        o_ref[0, pl.ds(r0, tm), :] = out.astype(o_ref.dtype)
        return c

    lax.fori_loop(0, n_strips, body1, 0)
    lax.fori_loop(0, n_strips, body2, 0)
    lax.fori_loop(0, n_strips, body3, 0)


@jax.jit
def mc_cnn_layer(x, params):
    """x: (N, Cc, H, W, 2) float32 -> (N, Cc, H, W, 2) float32."""
    n, cc, h_dim, w_dim, _ = x.shape
    c0 = 2 * cc                                   # packed re+im channels (16)
    wp = _round_up(w_dim + 2, 8)                  # padded row pitch (mult of 8)
    m = h_dim * wp                                # flattened rows per image
    halo = _round_up(wp + 1, 8)                   # zero row-halo (>= wp + 1)
    tm = 512 if m >= 512 else _round_up(m, 16)    # strip height (mult of 16)
    n_strips = -(-m // tm)
    m_pad = n_strips * tm

    # Honest per-step VMEM footprint: two f32 slabs, bf16 strip scratch,
    # double-buffered x/out blocks, lane-padded mask block, bf16 weights.
    vmem_est = (
        2 * (m_pad + 2 * halo) * _CMAX * 4          # two f32 activation slabs
        + tm * _TAPS * _CMAX * 2                    # bf16 im2col strip scratch
        + 2 * m_pad * _CMAX * 2                     # double-buffered bf16 x block
        + 2 * m_pad * _CMAX * 2                     # double-buffered bf16 out block
        + 2 * m_pad * 128 * 4                       # (m_pad,1) f32 mask (lane-padded)
        + 2 * (3 * _TAPS + 1) * _CMAX * _CMAX * 2   # bf16 weights (double-buffered)
    )
    assert vmem_est <= 48 * 1024 * 1024, (
        "image too large for whole-image-per-step; add H-strip grid tiling")

    # Pack (re, im) -> channels [re..., im...], fold the W "same" zero padding
    # (plus alignment pad columns) into the flattened row axis, pad channels
    # 16 -> 128 and rows m -> m_pad, ship as bf16.
    xp = jnp.transpose(x, (0, 2, 3, 4, 1)).reshape(n, h_dim, w_dim, c0)
    xp = jnp.pad(xp, ((0, 0), (0, 0), (1, wp - 1 - w_dim), (0, 0)))
    xp = xp.reshape(n, m, c0)
    xp = jnp.pad(xp, ((0, 0), (0, m_pad - m), (0, _CMAX - c0))).astype(jnp.bfloat16)

    # Per-row validity mask: 1.0 on real pixels, 0.0 on pad columns / pad rows.
    col = jnp.arange(wp, dtype=jnp.int32)
    interior = ((col >= 1) & (col <= w_dim)).astype(jnp.float32)
    mask = jnp.tile(interior, (h_dim,))
    mask = jnp.pad(mask, (0, m_pad - m)).reshape(m_pad, 1)

    (w1, b1), (w2, b2), (w3, b3), (w4, b4) = params
    c_out = w4.shape[-1]                            # 16 packed output channels

    # Layer-1 weights: zero-pad input channels 16 -> 128 so every 3x3 layer
    # uses the same full-width, lane-aligned im2col path (the zero rows also
    # make any stale upper lanes of the recycled slab harmless).
    w1p = jnp.pad(w1.reshape(_TAPS, c0, _CMAX),
                  ((0, 0), (0, _CMAX - c0), (0, 0))).reshape(_TAPS * _CMAX, _CMAX)
    # Final 1x1 weights/bias: zero-pad outputs 16 -> 128 so the output block is
    # lane-dense (unmasked stores); the wrapper slices the 16 channels back out.
    w4p = jnp.pad(w4, ((0, 0), (0, _CMAX - c_out)))
    b4p = jnp.pad(b4, ((0, 0), (0, _CMAX - c_out)))

    kernel = functools.partial(_fused_mc_cnn_kernel, wp=wp, halo=halo, tm=tm,
                               n_strips=n_strips)
    const = lambda i: (0, 0)

    out = pl.pallas_call(
        kernel,
        out_shape=jax.ShapeDtypeStruct((n, m_pad, _CMAX), jnp.bfloat16),
        grid=(n,),
        in_specs=[
            pl.BlockSpec((1, m_pad, _CMAX), lambda i: (i, 0, 0)),
            pl.BlockSpec((m_pad, 1), const),
            pl.BlockSpec(w1p.shape, const), pl.BlockSpec(b1.shape, const),
            pl.BlockSpec(w2.shape, const), pl.BlockSpec(b2.shape, const),
            pl.BlockSpec(w3.shape, const), pl.BlockSpec(b3.shape, const),
            pl.BlockSpec(w4p.shape, const), pl.BlockSpec(b4p.shape, const),
        ],
        out_specs=pl.BlockSpec((1, m_pad, _CMAX), lambda i: (i, 0, 0)),
        scratch_shapes=[
            pltpu.VMEM((m_pad + 2 * halo, _CMAX), jnp.float32),   # slab A
            pltpu.VMEM((m_pad + 2 * halo, _CMAX), jnp.float32),   # slab B
            pltpu.VMEM((tm, _TAPS * _CMAX), jnp.bfloat16),        # im2col strip
        ],
        compiler_params=pltpu.CompilerParams(
            dimension_semantics=("parallel",),
            vmem_limit_bytes=64 * 1024 * 1024),
    )(xp, mask, w1p, b1, w2, b2, w3, b3, w4p, b4p)

    # Drop pad rows / columns / lanes and unpack back to (N, Cc, H, W, 2).
    out = out[:, :m, :c_out].astype(jnp.float32)
    out = out.reshape(n, h_dim, wp, c_out)[:, :, 1:w_dim + 1, :]
    out = out.reshape(n, h_dim, w_dim, 2, c_out // 2)
    return jnp.transpose(out, (0, 4, 1, 2, 3))


def init_complex_conv(key, cin, cout, k):
    """Init mimicking nn.Conv2d default (uniform +-1/sqrt(fan_in)); bf16 weights."""
    k1, k2, k3, k4 = jax.random.split(key, 4)
    scale = 1.0 / (cin * k * k) ** 0.5
    w_re = jax.random.uniform(k1, (k, k, cin, cout), jnp.float32, -scale, scale)
    w_im = jax.random.uniform(k2, (k, k, cin, cout), jnp.float32, -scale, scale)
    b_re = jax.random.uniform(k3, (cout,), jnp.float32, -scale, scale)
    b_im = jax.random.uniform(k4, (cout,), jnp.float32, -scale, scale)
    top = jnp.concatenate([w_re, w_im], axis=-1)       # real-input rows
    bot = jnp.concatenate([-w_im, w_re], axis=-1)      # imag-input rows
    w_comb = jnp.concatenate([top, bot], axis=-2)      # (k, k, 2cin, 2cout)
    w_flat = w_comb.reshape(k * k * 2 * cin, 2 * cout).astype(jnp.bfloat16)
    b_comb = jnp.concatenate([b_re, b_im]).reshape(1, 2 * cout)  # f32
    return w_flat, b_comb


def init_mc_cnn_params(key):
    keys = jax.random.split(key, 4)
    return [
        init_complex_conv(keys[0], 8, 64, 3),
        init_complex_conv(keys[1], 64, 64, 3),
        init_complex_conv(keys[2], 64, 64, 3),
        init_complex_conv(keys[3], 64, 8, 1),
    ]


def _reference_forward(x, params):
    """Pure-JAX reference (lax conv with the same bf16 operand rounding)."""
    h = jnp.concatenate([x[..., 0], x[..., 1]], axis=1)    # NCHW, C = 16
    n_layers = len(params)
    for i, (w_flat, b) in enumerate(params):
        cout = w_flat.shape[-1]
        k = 3 if i < n_layers - 1 else 1
        cin = w_flat.shape[0] // (k * k)
        w = w_flat.reshape(k, k, cin, cout)                # bf16
        pad = (k - 1) // 2
        h = jax.lax.conv_general_dilated(
            h.astype(jnp.bfloat16), w, (1, 1), [(pad, pad), (pad, pad)],
            dimension_numbers=("NCHW", "HWIO", "NCHW"),
            preferred_element_type=jnp.float32,
        ) + b.reshape(1, cout, 1, 1)
        if i < n_layers - 1:
            h = jnp.maximum(h, 0.0)
    cc = cout // 2
    return jnp.stack([h[:, :cc], h[:, cc:]], axis=-1)


if __name__ == "__main__":
    key = jax.random.PRNGKey(0)
    k_x, k_p = jax.random.split(key)

    N, C, H, W = 2, 8, 16, 16
    x = jax.random.normal(k_x, (N, C, H, W, 2), jnp.float32)
    params = init_mc_cnn_params(k_p)

    out = jax.block_until_ready(mc_cnn_layer(x, params))
    ref = jax.block_until_ready(_reference_forward(x, params))

    assert out.shape == (N, C, H, W, 2), out.shape
    max_err = float(jnp.max(jnp.abs(out - ref)))
    assert jnp.allclose(out, ref, rtol=1e-2, atol=1e-2), max_err

    print("KERNEL_OK")
</pallas_src>

<mosaic_0001>
module attributes {stable_mosaic.version = 11 : i64} {
  func.func @_fused_mc_cnn_kernel(%arg0: i32, %arg1: memref<1x384x128xbf16, #tpu.memory_space<vmem>>, %arg2: memref<384x1xf32, #tpu.memory_space<vmem>>, %arg3: memref<1152x128xbf16, #tpu.memory_space<vmem>>, %arg4: memref<1x128xf32, #tpu.memory_space<vmem>>, %arg5: memref<1152x128xbf16, #tpu.memory_space<vmem>>, %arg6: memref<1x128xf32, #tpu.memory_space<vmem>>, %arg7: memref<1152x128xbf16, #tpu.memory_space<vmem>>, %arg8: memref<1x128xf32, #tpu.memory_space<vmem>>, %arg9: memref<128x128xbf16, #tpu.memory_space<vmem>>, %arg10: memref<1x128xf32, #tpu.memory_space<vmem>>, %arg11: memref<1x384x128xbf16, #tpu.memory_space<vmem>>, %arg12: memref<448x128xf32, #tpu.memory_space<vmem>>, %arg13: memref<448x128xf32, #tpu.memory_space<vmem>>, %arg14: memref<384x1152xbf16, #tpu.memory_space<vmem>>) attributes {dimension_semantics = [#tpu.dimension_semantics<parallel>], iteration_bounds = array<i64: 2>, scalar_prefetch = 0 : i64, scratch_operands = 3 : i64, tpu.core_type = #tpu.core_type<tc>, window_params = [{transform_indices = @transform_0, window_bounds = array<i64: 1, 384, 128>}, {pipeline_mode = #tpu.pipeline_mode<synchronous>, transform_indices = @transform_1, window_bounds = array<i64: 384, 1>}, {pipeline_mode = #tpu.pipeline_mode<synchronous>, transform_indices = @transform_2, window_bounds = array<i64: 1152, 128>}, {pipeline_mode = #tpu.pipeline_mode<synchronous>, transform_indices = @transform_3, window_bounds = array<i64: 1, 128>}, {pipeline_mode = #tpu.pipeline_mode<synchronous>, transform_indices = @transform_4, window_bounds = array<i64: 1152, 128>}, {pipeline_mode = #tpu.pipeline_mode<synchronous>, transform_indices = @transform_5, window_bounds = array<i64: 1, 128>}, {pipeline_mode = #tpu.pipeline_mode<synchronous>, transform_indices = @transform_6, window_bounds = array<i64: 1152, 128>}, {pipeline_mode = #tpu.pipeline_mode<synchronous>, transform_indices = @transform_7, window_bounds = array<i64: 1, 128>}, {pipeline_mode = #tpu.pipeline_mode<synchronous>, transform_indices = @transform_8, window_bounds = array<i64: 128, 128>}, {pipeline_mode = #tpu.pipeline_mode<synchronous>, transform_indices = @transform_9, window_bounds = array<i64: 1, 128>}, {transform_indices = @transform_10, window_bounds = array<i64: 1, 384, 128>}]} {
    %cst = arith.constant 0.000000e+00 : f32
    %0 = vector.broadcast %cst : f32 to vector<32x128xf32>
    %c0 = arith.constant 0 : index
    %c0_0 = arith.constant 0 : index
    %1 = vector.load %arg12[%c0, %c0_0] : memref<448x128xf32, #tpu.memory_space<vmem>>, vector<32x128xf32>
    tpu.vector_store %arg12[%c0, %c0_0], %0 {strides = array<i32>} : memref<448x128xf32, #tpu.memory_space<vmem>>, vector<32x128xf32>,
    %c416 = arith.constant 416 : index
    %c0_1 = arith.constant 0 : index
    %2 = vector.load %arg12[%c416, %c0_1] : memref<448x128xf32, #tpu.memory_space<vmem>>, vector<32x128xf32>
    tpu.vector_store %arg12[%c416, %c0_1], %0 {strides = array<i32>} : memref<448x128xf32, #tpu.memory_space<vmem>>, vector<32x128xf32>,
    %c0_2 = arith.constant 0 : index
    %c0_3 = arith.constant 0 : index
    %3 = vector.load %arg13[%c0_2, %c0_3] : memref<448x128xf32, #tpu.memory_space<vmem>>, vector<32x128xf32>
    tpu.vector_store %arg13[%c0_2, %c0_3], %0 {strides = array<i32>} : memref<448x128xf32, #tpu.memory_space<vmem>>, vector<32x128xf32>,
    %c416_4 = arith.constant 416 : index
    %c0_5 = arith.constant 0 : index
    %4 = vector.load %arg13[%c416_4, %c0_5] : memref<448x128xf32, #tpu.memory_space<vmem>>, vector<32x128xf32>
    tpu.vector_store %arg13[%c416_4, %c0_5], %0 {strides = array<i32>} : memref<448x128xf32, #tpu.memory_space<vmem>>, vector<32x128xf32>,
    %c0_6 = arith.constant 0 : index
    %c0_7 = arith.constant 0 : index
    %c0_8 = arith.constant 0 : index
    %5 = vector.load %arg1[%c0_6, %c0_7, %c0_8] : memref<1x384x128xbf16, #tpu.memory_space<vmem>>, vector<1x384x128xbf16>
    %6 = vector.shape_cast %5 : vector<1x384x128xbf16> to vector<384x128xbf16>
    %7 = arith.extf %6 : vector<384x128xbf16> to vector<384x128xf32>
    %c32 = arith.constant 32 : index
    %c0_9 = arith.constant 0 : index
    %8 = vector.load %arg12[%c32, %c0_9] : memref<448x128xf32, #tpu.memory_space<vmem>>, vector<384x128xf32>
    tpu.vector_store %arg12[%c32, %c0_9], %7 {strides = array<i32>} : memref<448x128xf32, #tpu.memory_space<vmem>>, vector<384x128xf32>,
    %c0_i32 = arith.constant 0 : i32
    %c384_i32 = arith.constant 384 : i32
    %9 = arith.muli %c0_i32, %c384_i32 : i32
    %10 = tpu.assume_multiple %9, 8 : i32
    %c7_i32 = arith.constant 7 : i32
    %11 = arith.addi %c7_i32, %10 : i32
    %12 = arith.index_cast %11 : i32 to index
    %c0_10 = arith.constant 0 : index
    %13 = vector.load %arg12[%12, %c0_10] : memref<448x128xf32, #tpu.memory_space<vmem>>, vector<384x128xf32>
    %14 = arith.truncf %13 : vector<384x128xf32> to vector<384x128xbf16>
    %c0_11 = arith.constant 0 : index
    %c0_12 = arith.constant 0 : index
    %15 = vector.load %arg14[%c0_11, %c0_12] : memref<384x1152xbf16, #tpu.memory_space<vmem>>, vector<384x128xbf16>
    tpu.vector_store %arg14[%c0_11, %c0_12], %14 {strides = array<i32>} : memref<384x1152xbf16, #tpu.memory_space<vmem>>, vector<384x128xbf16>,
    %c8_i32 = arith.constant 8 : i32
    %16 = arith.addi %c8_i32, %10 : i32
    %17 = arith.index_cast %16 : i32 to index
    %c0_13 = arith.constant 0 : index
    %18 = vector.load %arg12[%17, %c0_13] : memref<448x128xf32, #tpu.memory_space<vmem>>, vector<384x128xf32>
    %19 = arith.truncf %18 : vector<384x128xf32> to vector<384x128xbf16>
    %c0_14 = arith.constant 0 : index
    %c128 = arith.constant 128 : index
    %20 = vector.load %arg14[%c0_14, %c128] : memref<384x1152xbf16, #tpu.memory_space<vmem>>, vector<384x128xbf16>
    tpu.vector_store %arg14[%c0_14, %c128], %19 {strides = array<i32>} : memref<384x1152xbf16, #tpu.memory_space<vmem>>, vector<384x128xbf16>,
    %c9_i32 = arith.constant 9 : i32
    %21 = arith.addi %c9_i32, %10 : i32
    %22 = arith.index_cast %21 : i32 to index
    %c0_15 = arith.constant 0 : index
    %23 = vector.load %arg12[%22, %c0_15] : memref<448x128xf32, #tpu.memory_space<vmem>>, vector<384x128xf32>
    %24 = arith.truncf %23 : vector<384x128xf32> to vector<384x128xbf16>
    %c0_16 = arith.constant 0 : index
    %c256 = arith.constant 256 : index
    %25 = vector.load %arg14[%c0_16, %c256] : memref<384x1152xbf16, #tpu.memory_space<vmem>>, vector<384x128xbf16>
    tpu.vector_store %arg14[%c0_16, %c256], %24 {strides = array<i32>} : memref<384x1152xbf16, #tpu.memory_space<vmem>>, vector<384x128xbf16>,
    %c31_i32 = arith.constant 31 : i32
    %26 = arith.addi %c31_i32, %10 : i32
    %27 = arith.index_cast %26 : i32 to index
    %c0_17 = arith.constant 0 : index
    %28 = vector.load %arg12[%27, %c0_17] : memref<448x128xf32, #tpu.memory_space<vmem>>, vector<384x128xf32>
    %29 = arith.truncf %28 : vector<384x128xf32> to vector<384x128xbf16>
    %c0_18 = arith.constant 0 : index
    %c384 = arith.constant 384 : index
    %30 = vector.load %arg14[%c0_18, %c384] : memref<384x1152xbf16, #tpu.memory_space<vmem>>, vector<384x128xbf16>
    tpu.vector_store %arg14[%c0_18, %c384], %29 {strides = array<i32>} : memref<384x1152xbf16, #tpu.memory_space<vmem>>, vector<384x128xbf16>,
    %c32_i32 = arith.constant 32 : i32
    %31 = arith.addi %c32_i32, %10 : i32
    %32 = arith.index_cast %31 : i32 to index
    %c0_19 = arith.constant 0 : index
    %33 = vector.load %arg12[%32, %c0_19] : memref<448x128xf32, #tpu.memory_space<vmem>>, vector<384x128xf32>
    %34 = arith.truncf %33 : vector<384x128xf32> to vector<384x128xbf16>
    %c0_20 = arith.constant 0 : index
    %c512 = arith.constant 512 : index
    %35 = vector.load %arg14[%c0_20, %c512] : memref<384x1152xbf16, #tpu.memory_space<vmem>>, vector<384x128xbf16>
    tpu.vector_store %arg14[%c0_20, %c512], %34 {strides = array<i32>} : memref<384x1152xbf16, #tpu.memory_space<vmem>>, vector<384x128xbf16>,
    %c33_i32 = arith.constant 33 : i32
    %36 = arith.addi %c33_i32, %10 : i32
    %37 = arith.index_cast %36 : i32 to index
    %c0_21 = arith.constant 0 : index
    %38 = vector.load %arg12[%37, %c0_21] : memref<448x128xf32, #tpu.memory_space<vmem>>, vector<384x128xf32>
    %39 = arith.truncf %38 : vector<384x128xf32> to vector<384x128xbf16>
    %c0_22 = arith.constant 0 : index
    %c640 = arith.constant 640 : index
    %40 = vector.load %arg14[%c0_22, %c640] : memref<384x1152xbf16, #tpu.memory_space<vmem>>, vector<384x128xbf16>
    tpu.vector_store %arg14[%c0_22, %c640], %39 {strides = array<i32>} : memref<384x1152xbf16, #tpu.memory_space<vmem>>, vector<384x128xbf16>,
    %c55_i32 = arith.constant 55 : i32
    %41 = arith.addi %c55_i32, %10 : i32
    %42 = arith.index_cast %41 : i32 to index
    %c0_23 = arith.constant 0 : index
    %43 = vector.load %arg12[%42, %c0_23] : memref<448x128xf32, #tpu.memory_space<vmem>>, vector<384x128xf32>
    %44 = arith.truncf %43 : vector<384x128xf32> to vector<384x128xbf16>
    %c0_24 = arith.constant 0 : index
    %c768 = arith.constant 768 : index
    %45 = vector.load %arg14[%c0_24, %c768] : memref<384x1152xbf16, #tpu.memory_space<vmem>>, vector<384x128xbf16>
    tpu.vector_store %arg14[%c0_24, %c768], %44 {strides = array<i32>} : memref<384x1152xbf16, #tpu.memory_space<vmem>>, vector<384x128xbf16>,
    %c56_i32 = arith.constant 56 : i32
    %46 = arith.addi %c56_i32, %10 : i32
    %47 = arith.index_cast %46 : i32 to index
    %c0_25 = arith.constant 0 : index
    %48 = vector.load %arg12[%47, %c0_25] : memref<448x128xf32, #tpu.memory_space<vmem>>, vector<384x128xf32>
    %49 = arith.truncf %48 : vector<384x128xf32> to vector<384x128xbf16>
    %c0_26 = arith.constant 0 : index
    %c896 = arith.constant 896 : index
    %50 = vector.load %arg14[%c0_26, %c896] : memref<384x1152xbf16, #tpu.memory_space<vmem>>, vector<384x128xbf16>
    tpu.vector_store %arg14[%c0_26, %c896], %49 {strides = array<i32>} : memref<384x1152xbf16, #tpu.memory_space<vmem>>, vector<384x128xbf16>,
    %c57_i32 = arith.constant 57 : i32
    %51 = arith.addi %c57_i32, %10 : i32
    %52 = arith.index_cast %51 : i32 to index
    %c0_27 = arith.constant 0 : index
    %53 = vector.load %arg12[%52, %c0_27] : memref<448x128xf32, #tpu.memory_space<vmem>>, vector<384x128xf32>
    %54 = arith.truncf %53 : vector<384x128xf32> to vector<384x128xbf16>
    %c0_28 = arith.constant 0 : index
    %c1024 = arith.constant 1024 : index
    %55 = vector.load %arg14[%c0_28, %c1024] : memref<384x1152xbf16, #tpu.memory_space<vmem>>, vector<384x128xbf16>
    tpu.vector_store %arg14[%c0_28, %c1024], %54 {strides = array<i32>} : memref<384x1152xbf16, #tpu.memory_space<vmem>>, vector<384x128xbf16>,
    %c0_29 = arith.constant 0 : index
    %c0_30 = arith.constant 0 : index
    %56 = vector.load %arg14[%c0_29, %c0_30] : memref<384x1152xbf16, #tpu.memory_space<vmem>>, vector<384x1152xbf16>
    %c0_31 = arith.constant 0 : index
    %c0_32 = arith.constant 0 : index
    %57 = vector.load %arg3[%c0_31, %c0_32] : memref<1152x128xbf16, #tpu.memory_space<vmem>>, vector<1152x128xbf16>
    %cst_33 = arith.constant dense<0.000000e+00> : vector<384x128xf32>
    %58 = tpu.matmul %56, %57, %cst_33 {dimension_numbers = #tpu.dot_dimension_numbers<[1], [0], [0], [1], [0, 0, 1, 1], [], []>} : vector<384x1152xbf16>, vector<1152x128xbf16>, vector<384x128xf32> -> vector<384x128xf32>
    %c0_34 = arith.constant 0 : index
    %c0_35 = arith.constant 0 : index
    %59 = vector.load %arg4[%c0_34, %c0_35] : memref<1x128xf32, #tpu.memory_space<vmem>>, vector<1x128xf32>
    %60 = vector.broadcast %59 : vector<1x128xf32> to vector<384x128xf32>
    %61 = arith.addf %58, %60 : vector<384x128xf32>
    %cst_36 = arith.constant 0.000000e+00 : f32
    %62 = vector.broadcast %cst_36 : f32 to vector<384x128xf32>
    %63 = arith.maximumf %61, %62 : vector<384x128xf32>
    %64 = arith.index_cast %10 : i32 to index
    %c0_37 = arith.constant 0 : index
    %65 = vector.load %arg2[%64, %c0_37] : memref<384x1xf32, #tpu.memory_space<vmem>>, vector<384x1xf32>
    %66 = vector.broadcast %65 : vector<384x1xf32> to vector<384x128xf32>
    %67 = arith.mulf %63, %66 : vector<384x128xf32>
    %c32_i32_38 = arith.constant 32 : i32
    %68 = arith.addi %c32_i32_38, %10 : i32
    %69 = arith.index_cast %68 : i32 to index
    %c0_39 = arith.constant 0 : index
    %70 = vector.load %arg13[%69, %c0_39] : memref<448x128xf32, #tpu.memory_space<vmem>>, vector<384x128xf32>
    tpu.vector_store %arg13[%69, %c0_39], %67 {strides = array<i32>} : memref<448x128xf32, #tpu.memory_space<vmem>>, vector<384x128xf32>,
    %c1_i32 = arith.constant 1 : i32
    %c0_i32_40 = arith.constant 0 : i32
    %c384_i32_41 = arith.constant 384 : i32
    %71 = arith.muli %c0_i32_40, %c384_i32_41 : i32
    %72 = tpu.assume_multiple %71, 8 : i32
    %c7_i32_42 = arith.constant 7 : i32
    %73 = arith.addi %c7_i32_42, %72 : i32
    %74 = arith.index_cast %73 : i32 to index
    %c0_43 = arith.constant 0 : index
    %75 = vector.load %arg13[%74, %c0_43] : memref<448x128xf32, #tpu.memory_space<vmem>>, vector<384x128xf32>
    %76 = arith.truncf %75 : vector<384x128xf32> to vector<384x128xbf16>
    %c0_44 = arith.constant 0 : index
    %c0_45 = arith.constant 0 : index
    %77 = vector.load %arg14[%c0_44, %c0_45] : memref<384x1152xbf16, #tpu.memory_space<vmem>>, vector<384x128xbf16>
    tpu.vector_store %arg14[%c0_44, %c0_45], %76 {strides = array<i32>} : memref<384x1152xbf16, #tpu.memory_space<vmem>>, vector<384x128xbf16>,
    %c8_i32_46 = arith.constant 8 : i32
    %78 = arith.addi %c8_i32_46, %72 : i32
    %79 = arith.index_cast %78 : i32 to index
    %c0_47 = arith.constant 0 : index
    %80 = vector.load %arg13[%79, %c0_47] : memref<448x128xf32, #tpu.memory_space<vmem>>, vector<384x128xf32>
    %81 = arith.truncf %80 : vector<384x128xf32> to vector<384x128xbf16>
    %c0_48 = arith.constant 0 : index
    %c128_49 = arith.constant 128 : index
    %82 = vector.load %arg14[%c0_48, %c128_49] : memref<384x1152xbf16, #tpu.memory_space<vmem>>, vector<384x128xbf16>
    tpu.vector_store %arg14[%c0_48, %c128_49], %81 {strides = array<i32>} : memref<384x1152xbf16, #tpu.memory_space<vmem>>, vector<384x128xbf16>,
    %c9_i32_50 = arith.constant 9 : i32
    %83 = arith.addi %c9_i32_50, %72 : i32
    %84 = arith.index_cast %83 : i32 to index
    %c0_51 = arith.constant 0 : index
    %85 = vector.load %arg13[%84, %c0_51] : memref<448x128xf32, #tpu.memory_space<vmem>>, vector<384x128xf32>
    %86 = arith.truncf %85 : vector<384x128xf32> to vector<384x128xbf16>
    %c0_52 = arith.constant 0 : index
    %c256_53 = arith.constant 256 : index
    %87 = vector.load %arg14[%c0_52, %c256_53] : memref<384x1152xbf16, #tpu.memory_space<vmem>>, vector<384x128xbf16>
    tpu.vector_store %arg14[%c0_52, %c256_53], %86 {strides = array<i32>} : memref<384x1152xbf16, #tpu.memory_space<vmem>>, vector<384x128xbf16>,
    %c31_i32_54 = arith.constant 31 : i32
    %88 = arith.addi %c31_i32_54, %72 : i32
    %89 = arith.index_cast %88 : i32 to index
    %c0_55 = arith.constant 0 : index
    %90 = vector.load %arg13[%89, %c0_55] : memref<448x128xf32, #tpu.memory_space<vmem>>, vector<384x128xf32>
    %91 = arith.truncf %90 : vector<384x128xf32> to vector<384x128xbf16>
    %c0_56 = arith.constant 0 : index
    %c384_57 = arith.constant 384 : index
    %92 = vector.load %arg14[%c0_56, %c384_57] : memref<384x1152xbf16, #tpu.memory_space<vmem>>, vector<384x128xbf16>
    tpu.vector_store %arg14[%c0_56, %c384_57], %91 {strides = array<i32>} : memref<384x1152xbf16, #tpu.memory_space<vmem>>, vector<384x128xbf16>,
    %c32_i32_58 = arith.constant 32 : i32
    %93 = arith.addi %c32_i32_58, %72 : i32
    %94 = arith.index_cast %93 : i32 to index
    %c0_59 = arith.constant 0 : index
    %95 = vector.load %arg13[%94, %c0_59] : memref<448x128xf32, #tpu.memory_space<vmem>>, vector<384x128xf32>
    %96 = arith.truncf %95 : vector<384x128xf32> to vector<384x128xbf16>
    %c0_60 = arith.constant 0 : index
    %c512_61 = arith.constant 512 : index
    %97 = vector.load %arg14[%c0_60, %c512_61] : memref<384x1152xbf16, #tpu.memory_space<vmem>>, vector<384x128xbf16>
    tpu.vector_store %arg14[%c0_60, %c512_61], %96 {strides = array<i32>} : memref<384x1152xbf16, #tpu.memory_space<vmem>>, vector<384x128xbf16>,
    %c33_i32_62 = arith.constant 33 : i32
    %98 = arith.addi %c33_i32_62, %72 : i32
    %99 = arith.index_cast %98 : i32 to index
    %c0_63 = arith.constant 0 : index
    %100 = vector.load %arg13[%99, %c0_63] : memref<448x128xf32, #tpu.memory_space<vmem>>, vector<384x128xf32>
    %101 = arith.truncf %100 : vector<384x128xf32> to vector<384x128xbf16>
    %c0_64 = arith.constant 0 : index
    %c640_65 = arith.constant 640 : index
    %102 = vector.load %arg14[%c0_64, %c640_65] : memref<384x1152xbf16, #tpu.memory_space<vmem>>, vector<384x128xbf16>
    tpu.vector_store %arg14[%c0_64, %c640_65], %101 {strides = array<i32>} : memref<384x1152xbf16, #tpu.memory_space<vmem>>, vector<384x128xbf16>,
    %c55_i32_66 = arith.constant 55 : i32
    %103 = arith.addi %c55_i32_66, %72 : i32
    %104 = arith.index_cast %103 : i32 to index
    %c0_67 = arith.constant 0 : index
    %105 = vector.load %arg13[%104, %c0_67] : memref<448x128xf32, #tpu.memory_space<vmem>>, vector<384x128xf32>
    %106 = arith.truncf %105 : vector<384x128xf32> to vector<384x128xbf16>
    %c0_68 = arith.constant 0 : index
    %c768_69 = arith.constant 768 : index
    %107 = vector.load %arg14[%c0_68, %c768_69] : memref<384x1152xbf16, #tpu.memory_space<vmem>>, vector<384x128xbf16>
    tpu.vector_store %arg14[%c0_68, %c768_69], %106 {strides = array<i32>} : memref<384x1152xbf16, #tpu.memory_space<vmem>>, vector<384x128xbf16>,
    %c56_i32_70 = arith.constant 56 : i32
    %108 = arith.addi %c56_i32_70, %72 : i32
    %109 = arith.index_cast %108 : i32 to index
    %c0_71 = arith.constant 0 : index
    %110 = vector.load %arg13[%109, %c0_71] : memref<448x128xf32, #tpu.memory_space<vmem>>, vector<384x128xf32>
    %111 = arith.truncf %110 : vector<384x128xf32> to vector<384x128xbf16>
    %c0_72 = arith.constant 0 : index
    %c896_73 = arith.constant 896 : index
    %112 = vector.load %arg14[%c0_72, %c896_73] : memref<384x1152xbf16, #tpu.memory_space<vmem>>, vector<384x128xbf16>
    tpu.vector_store %arg14[%c0_72, %c896_73], %111 {strides = array<i32>} : memref<384x1152xbf16, #tpu.memory_space<vmem>>, vector<384x128xbf16>,
    %c57_i32_74 = arith.constant 57 : i32
    %113 = arith.addi %c57_i32_74, %72 : i32
    %114 = arith.index_cast %113 : i32 to index
    %c0_75 = arith.constant 0 : index
    %115 = vector.load %arg13[%114, %c0_75] : memref<448x128xf32, #tpu.memory_space<vmem>>, vector<384x128xf32>
    %116 = arith.truncf %115 : vector<384x128xf32> to vector<384x128xbf16>
    %c0_76 = arith.constant 0 : index
    %c1024_77 = arith.constant 1024 : index
    %117 = vector.load %arg14[%c0_76, %c1024_77] : memref<384x1152xbf16, #tpu.memory_space<vmem>>, vector<384x128xbf16>
    tpu.vector_store %arg14[%c0_76, %c1024_77], %116 {strides = array<i32>} : memref<384x1152xbf16, #tpu.memory_space<vmem>>, vector<384x128xbf16>,
    %c0_78 = arith.constant 0 : index
    %c0_79 = arith.constant 0 : index
    %118 = vector.load %arg14[%c0_78, %c0_79] : memref<384x1152xbf16, #tpu.memory_space<vmem>>, vector<384x1152xbf16>
    %c0_80 = arith.constant 0 : index
    %c0_81 = arith.constant 0 : index
    %119 = vector.load %arg5[%c0_80, %c0_81] : memref<1152x128xbf16, #tpu.memory_space<vmem>>, vector<1152x128xbf16>
    %cst_82 = arith.constant dense<0.000000e+00> : vector<384x128xf32>
    %120 = tpu.matmul %118, %119, %cst_82 {dimension_numbers = #tpu.dot_dimension_numbers<[1], [0], [0], [1], [0, 0, 1, 1], [], []>} : vector<384x1152xbf16>, vector<1152x128xbf16>, vector<384x128xf32> -> vector<384x128xf32>
    %c0_83 = arith.constant 0 : index
    %c0_84 = arith.constant 0 : index
    %121 = vector.load %arg6[%c0_83, %c0_84] : memref<1x128xf32, #tpu.memory_space<vmem>>, vector<1x128xf32>
    %122 = vector.broadcast %121 : vector<1x128xf32> to vector<384x128xf32>
    %123 = arith.addf %120, %122 : vector<384x128xf32>
    %cst_85 = arith.constant 0.000000e+00 : f32
    %124 = vector.broadcast %cst_85 : f32 to vector<384x128xf32>
    %125 = arith.maximumf %123, %124 : vector<384x128xf32>
    %126 = arith.index_cast %72 : i32 to index
    %c0_86 = arith.constant 0 : index
    %127 = vector.load %arg2[%126, %c0_86] : memref<384x1xf32, #tpu.memory_space<vmem>>, vector<384x1xf32>
    %128 = vector.broadcast %127 : vector<384x1xf32> to vector<384x128xf32>
    %129 = arith.mulf %125, %128 : vector<384x128xf32>
    %c32_i32_87 = arith.constant 32 : i32
    %130 = arith.addi %c32_i32_87, %72 : i32
    %131 = arith.index_cast %130 : i32 to index
    %c0_88 = arith.constant 0 : index
    %132 = vector.load %arg12[%131, %c0_88] : memref<448x128xf32, #tpu.memory_space<vmem>>, vector<384x128xf32>
    tpu.vector_store %arg12[%131, %c0_88], %129 {strides = array<i32>} : memref<448x128xf32, #tpu.memory_space<vmem>>, vector<384x128xf32>,
    %c1_i32_89 = arith.constant 1 : i32
    %c0_i32_90 = arith.constant 0 : i32
    %c384_i32_91 = arith.constant 384 : i32
    %133 = arith.muli %c0_i32_90, %c384_i32_91 : i32
    %134 = tpu.assume_multiple %133, 8 : i32
    %c7_i32_92 = arith.constant 7 : i32
    %135 = arith.addi %c7_i32_92, %134 : i32
    %136 = arith.index_cast %135 : i32 to index
    %c0_93 = arith.constant 0 : index
    %137 = vector.load %arg12[%136, %c0_93] : memref<448x128xf32, #tpu.memory_space<vmem>>, vector<384x128xf32>
    %138 = arith.truncf %137 : vector<384x128xf32> to vector<384x128xbf16>
    %c0_94 = arith.constant 0 : index
    %c0_95 = arith.constant 0 : index
    %139 = vector.load %arg14[%c0_94, %c0_95] : memref<384x1152xbf16, #tpu.memory_space<vmem>>, vector<384x128xbf16>
    tpu.vector_store %arg14[%c0_94, %c0_95], %138 {strides = array<i32>} : memref<384x1152xbf16, #tpu.memory_space<vmem>>, vector<384x128xbf16>,
    %c8_i32_96 = arith.constant 8 : i32
    %140 = arith.addi %c8_i32_96, %134 : i32
    %141 = arith.index_cast %140 : i32 to index
    %c0_97 = arith.constant 0 : index
    %142 = vector.load %arg12[%141, %c0_97] : memref<448x128xf32, #tpu.memory_space<vmem>>, vector<384x128xf32>
    %143 = arith.truncf %142 : vector<384x128xf32> to vector<384x128xbf16>
    %c0_98 = arith.constant 0 : index
    %c128_99 = arith.constant 128 : index
    %144 = vector.load %arg14[%c0_98, %c128_99] : memref<384x1152xbf16, #tpu.memory_space<vmem>>, vector<384x128xbf16>
    tpu.vector_store %arg14[%c0_98, %c128_99], %143 {strides = array<i32>} : memref<384x1152xbf16, #tpu.memory_space<vmem>>, vector<384x128xbf16>,
    %c9_i32_100 = arith.constant 9 : i32
    %145 = arith.addi %c9_i32_100, %134 : i32
    %146 = arith.index_cast %145 : i32 to index
    %c0_101 = arith.constant 0 : index
    %147 = vector.load %arg12[%146, %c0_101] : memref<448x128xf32, #tpu.memory_space<vmem>>, vector<384x128xf32>
    %148 = arith.truncf %147 : vector<384x128xf32> to vector<384x128xbf16>
    %c0_102 = arith.constant 0 : index
    %c256_103 = arith.constant 256 : index
    %149 = vector.load %arg14[%c0_102, %c256_103] : memref<384x1152xbf16, #tpu.memory_space<vmem>>, vector<384x128xbf16>
    tpu.vector_store %arg14[%c0_102, %c256_103], %148 {strides = array<i32>} : memref<384x1152xbf16, #tpu.memory_space<vmem>>, vector<384x128xbf16>,
    %c31_i32_104 = arith.constant 31 : i32
    %150 = arith.addi %c31_i32_104, %134 : i32
    %151 = arith.index_cast %150 : i32 to index
    %c0_105 = arith.constant 0 : index
    %152 = vector.load %arg12[%151, %c0_105] : memref<448x128xf32, #tpu.memory_space<vmem>>, vector<384x128xf32>
    %153 = arith.truncf %152 : vector<384x128xf32> to vector<384x128xbf16>
    %c0_106 = arith.constant 0 : index
    %c384_107 = arith.constant 384 : index
    %154 = vector.load %arg14[%c0_106, %c384_107] : memref<384x1152xbf16, #tpu.memory_space<vmem>>, vector<384x128xbf16>
    tpu.vector_store %arg14[%c0_106, %c384_107], %153 {strides = array<i32>} : memref<384x1152xbf16, #tpu.memory_space<vmem>>, vector<384x128xbf16>,
    %c32_i32_108 = arith.constant 32 : i32
    %155 = arith.addi %c32_i32_108, %134 : i32
    %156 = arith.index_cast %155 : i32 to index
    %c0_109 = arith.constant 0 : index
    %157 = vector.load %arg12[%156, %c0_109] : memref<448x128xf32, #tpu.memory_space<vmem>>, vector<384x128xf32>
    %158 = arith.truncf %157 : vector<384x128xf32> to vector<384x128xbf16>
    %c0_110 = arith.constant 0 : index
    %c512_111 = arith.constant 512 : index
    %159 = vector.load %arg14[%c0_110, %c512_111] : memref<384x1152xbf16, #tpu.memory_space<vmem>>, vector<384x128xbf16>
    tpu.vector_store %arg14[%c0_110, %c512_111], %158 {strides = array<i32>} : memref<384x1152xbf16, #tpu.memory_space<vmem>>, vector<384x128xbf16>,
    %c33_i32_112 = arith.constant 33 : i32
    %160 = arith.addi %c33_i32_112, %134 : i32
    %161 = arith.index_cast %160 : i32 to index
    %c0_113 = arith.constant 0 : index
    %162 = vector.load %arg12[%161, %c0_113] : memref<448x128xf32, #tpu.memory_space<vmem>>, vector<384x128xf32>
    %163 = arith.truncf %162 : vector<384x128xf32> to vector<384x128xbf16>
    %c0_114 = arith.constant 0 : index
    %c640_115 = arith.constant 640 : index
    %164 = vector.load %arg14[%c0_114, %c640_115] : memref<384x1152xbf16, #tpu.memory_space<vmem>>, vector<384x128xbf16>
    tpu.vector_store %arg14[%c0_114, %c640_115], %163 {strides = array<i32>} : memref<384x1152xbf16, #tpu.memory_space<vmem>>, vector<384x128xbf16>,
    %c55_i32_116 = arith.constant 55 : i32
    %165 = arith.addi %c55_i32_116, %134 : i32
    %166 = arith.index_cast %165 : i32 to index
    %c0_117 = arith.constant 0 : index
    %167 = vector.load %arg12[%166, %c0_117] : memref<448x128xf32, #tpu.memory_space<vmem>>, vector<384x128xf32>
    %168 = arith.truncf %167 : vector<384x128xf32> to vector<384x128xbf16>
    %c0_118 = arith.constant 0 : index
    %c768_119 = arith.constant 768 : index
    %169 = vector.load %arg14[%c0_118, %c768_119] : memref<384x1152xbf16, #tpu.memory_space<vmem>>, vector<384x128xbf16>
    tpu.vector_store %arg14[%c0_118, %c768_119], %168 {strides = array<i32>} : memref<384x1152xbf16, #tpu.memory_space<vmem>>, vector<384x128xbf16>,
    %c56_i32_120 = arith.constant 56 : i32
    %170 = arith.addi %c56_i32_120, %134 : i32
    %171 = arith.index_cast %170 : i32 to index
    %c0_121 = arith.constant 0 : index
    %172 = vector.load %arg12[%171, %c0_121] : memref<448x128xf32, #tpu.memory_space<vmem>>, vector<384x128xf32>
    %173 = arith.truncf %172 : vector<384x128xf32> to vector<384x128xbf16>
    %c0_122 = arith.constant 0 : index
    %c896_123 = arith.constant 896 : index
    %174 = vector.load %arg14[%c0_122, %c896_123] : memref<384x1152xbf16, #tpu.memory_space<vmem>>, vector<384x128xbf16>
    tpu.vector_store %arg14[%c0_122, %c896_123], %173 {strides = array<i32>} : memref<384x1152xbf16, #tpu.memory_space<vmem>>, vector<384x128xbf16>,
    %c57_i32_124 = arith.constant 57 : i32
    %175 = arith.addi %c57_i32_124, %134 : i32
    %176 = arith.index_cast %175 : i32 to index
    %c0_125 = arith.constant 0 : index
    %177 = vector.load %arg12[%176, %c0_125] : memref<448x128xf32, #tpu.memory_space<vmem>>, vector<384x128xf32>
    %178 = arith.truncf %177 : vector<384x128xf32> to vector<384x128xbf16>
    %c0_126 = arith.constant 0 : index
    %c1024_127 = arith.constant 1024 : index
    %179 = vector.load %arg14[%c0_126, %c1024_127] : memref<384x1152xbf16, #tpu.memory_space<vmem>>, vector<384x128xbf16>
    tpu.vector_store %arg14[%c0_126, %c1024_127], %178 {strides = array<i32>} : memref<384x1152xbf16, #tpu.memory_space<vmem>>, vector<384x128xbf16>,
    %c0_128 = arith.constant 0 : index
    %c0_129 = arith.constant 0 : index
    %180 = vector.load %arg14[%c0_128, %c0_129] : memref<384x1152xbf16, #tpu.memory_space<vmem>>, vector<384x1152xbf16>
    %c0_130 = arith.constant 0 : index
    %c0_131 = arith.constant 0 : index
    %181 = vector.load %arg7[%c0_130, %c0_131] : memref<1152x128xbf16, #tpu.memory_space<vmem>>, vector<1152x128xbf16>
    %cst_132 = arith.constant dense<0.000000e+00> : vector<384x128xf32>
    %182 = tpu.matmul %180, %181, %cst_132 {dimension_numbers = #tpu.dot_dimension_numbers<[1], [0], [0], [1], [0, 0, 1, 1], [], []>} : vector<384x1152xbf16>, vector<1152x128xbf16>, vector<384x128xf32> -> vector<384x128xf32>
    %c0_133 = arith.constant 0 : index
    %c0_134 = arith.constant 0 : index
    %183 = vector.load %arg8[%c0_133, %c0_134] : memref<1x128xf32, #tpu.memory_space<vmem>>, vector<1x128xf32>
    %184 = vector.broadcast %183 : vector<1x128xf32> to vector<384x128xf32>
    %185 = arith.addf %182, %184 : vector<384x128xf32>
    %cst_135 = arith.constant 0.000000e+00 : f32
    %186 = vector.broadcast %cst_135 : f32 to vector<384x128xf32>
    %187 = arith.maximumf %185, %186 : vector<384x128xf32>
    %188 = arith.truncf %187 : vector<384x128xf32> to vector<384x128xbf16>
    %c0_136 = arith.constant 0 : index
    %c0_137 = arith.constant 0 : index
    %189 = vector.load %arg9[%c0_136, %c0_137] : memref<128x128xbf16, #tpu.memory_space<vmem>>, vector<128x128xbf16>
    %cst_138 = arith.constant dense<0.000000e+00> : vector<384x128xf32>
    %190 = tpu.matmul %188, %189, %cst_138 {dimension_numbers = #tpu.dot_dimension_numbers<[1], [0], [0], [1], [0, 0, 1, 1], [], []>} : vector<384x128xbf16>, vector<128x128xbf16>, vector<384x128xf32> -> vector<384x128xf32>
    %c0_139 = arith.constant 0 : index
    %c0_140 = arith.constant 0 : index
    %191 = vector.load %arg10[%c0_139, %c0_140] : memref<1x128xf32, #tpu.memory_space<vmem>>, vector<1x128xf32>
    %192 = vector.broadcast %191 : vector<1x128xf32> to vector<384x128xf32>
    %193 = arith.addf %190, %192 : vector<384x128xf32>
    %194 = arith.truncf %193 : vector<384x128xf32> to vector<384x128xbf16>
    %c0_141 = arith.constant 0 : index
    %195 = arith.index_cast %134 : i32 to index
    %c0_142 = arith.constant 0 : index
    %196 = vector.load %arg11[%c0_141, %195, %c0_142] : memref<1x384x128xbf16, #tpu.memory_space<vmem>>, vector<1x384x128xbf16>
    %197 = vector.shape_cast %196 : vector<1x384x128xbf16> to vector<384x128xbf16>
    %198 = vector.shape_cast %194 : vector<384x128xbf16> to vector<1x384x128xbf16>
    tpu.vector_store %arg11[%c0_141, %195, %c0_142], %198 {strides = array<i32>} : memref<1x384x128xbf16, #tpu.memory_space<vmem>>, vector<1x384x128xbf16>,
    %c1_i32_143 = arith.constant 1 : i32
    return
  }
  func.func @transform_0(%arg0: i32) -> (i32, i32, i32) {
    %c0_i32 = arith.constant 0 : i32
    %c0_i32_0 = arith.constant 0 : i32
    %c0_i32_1 = arith.constant 0 : i32
    return %arg0, %c0_i32, %c0_i32_0 : i32, i32, i32
  }
  func.func @transform_1(%arg0: i32) -> (i32, i32) {
    %c0_i32 = arith.constant 0 : i32
    %c0_i32_0 = arith.constant 0 : i32
    %c0_i32_1 = arith.constant 0 : i32
    return %c0_i32, %c0_i32_0 : i32, i32
  }
  func.func @transform_2(%arg0: i32) -> (i32, i32) {
    %c0_i32 = arith.constant 0 : i32
    %c0_i32_0 = arith.constant 0 : i32
    %c0_i32_1 = arith.constant 0 : i32
    return %c0_i32, %c0_i32_0 : i32, i32
  }
  func.func @transform_3(%arg0: i32) -> (i32, i32) {
    %c0_i32 = arith.constant 0 : i32
    %c0_i32_0 = arith.constant 0 : i32
    %c0_i32_1 = arith.constant 0 : i32
    return %c0_i32, %c0_i32_0 : i32, i32
  }
  func.func @transform_4(%arg0: i32) -> (i32, i32) {
    %c0_i32 = arith.constant 0 : i32
    %c0_i32_0 = arith.constant 0 : i32
    %c0_i32_1 = arith.constant 0 : i32
    return %c0_i32, %c0_i32_0 : i32, i32
  }
  func.func @transform_5(%arg0: i32) -> (i32, i32) {
    %c0_i32 = arith.constant 0 : i32
    %c0_i32_0 = arith.constant 0 : i32
    %c0_i32_1 = arith.constant 0 : i32
    return %c0_i32, %c0_i32_0 : i32, i32
  }
  func.func @transform_6(%arg0: i32) -> (i32, i32) {
    %c0_i32 = arith.constant 0 : i32
    %c0_i32_0 = arith.constant 0 : i32
    %c0_i32_1 = arith.constant 0 : i32
    return %c0_i32, %c0_i32_0 : i32, i32
  }
  func.func @transform_7(%arg0: i32) -> (i32, i32) {
    %c0_i32 = arith.constant 0 : i32
    %c0_i32_0 = arith.constant 0 : i32
    %c0_i32_1 = arith.constant 0 : i32
    return %c0_i32, %c0_i32_0 : i32, i32
  }
  func.func @transform_8(%arg0: i32) -> (i32, i32) {
    %c0_i32 = arith.constant 0 : i32
    %c0_i32_0 = arith.constant 0 : i32
    %c0_i32_1 = arith.constant 0 : i32
    return %c0_i32, %c0_i32_0 : i32, i32
  }
  func.func @transform_9(%arg0: i32) -> (i32, i32) {
    %c0_i32 = arith.constant 0 : i32
    %c0_i32_0 = arith.constant 0 : i32
    %c0_i32_1 = arith.constant 0 : i32
    return %c0_i32, %c0_i32_0 : i32, i32
  }
  func.func @transform_10(%arg0: i32) -> (i32, i32, i32) {
    %c0_i32 = arith.constant 0 : i32
    %c0_i32_0 = arith.constant 0 : i32
    %c0_i32_1 = arith.constant 0 : i32
    return %arg0, %c0_i32, %c0_i32_0 : i32, i32, i32
  }
}

</mosaic_0001>

<bundles_post_ra>
// kernel: tile.8
= control target key start
LH: loop header
LB: loop body
LE: loop exit
PB: predicated region body
PF: predicated region fallthrough
CT: control target
= control target key end

     0   :  { %s28_s0 = inlined_call_operand.vmem [shape: f32[24], index: 0, kind: input, shape index: {}]   ;;  %s29_s1 = inlined_call_operand.vmem [shape: f32[16,24], index: 1, kind: output, shape index: {}]  }
   0x1   :  { %v4_v0 = vld [vmem:[%s28_s0] ss:$0 sm:$0xff] }
   0x2   :  { %5 = vst [vmem:[%s29_s1] sm:$0xff] %v4_v0  ;;  %8 = vst [vmem:[%s29_s1 + $0x8] sm:$0xff] %v4_v0 }

// kernel: mc_cnn_layer.1
= control target key start
LH: loop header
LB: loop body
LE: loop exit
PB: predicated region body
PF: predicated region fallthrough
CT: control target
= control target key end

     0   :  { %s16826_s0 = inlined_call_operand.hbm [shape: bf16[2,384,128], index: 0, kind: input, shape index: {}]   ;;  %s16827_s1 = inlined_call_operand.hbm [shape: f32[384,1], index: 1, kind: input, shape index: {}]   ;;  %s16828_s2 = inlined_call_operand.hbm [shape: bf16[1152,128], index: 2, kind: input, shape index: {}]   ;;  %s16829_s3 = inlined_call_operand.hbm [shape: f32[1,128], index: 3, kind: input, shape index: {}]   ;;  %s16830_s4 = inlined_call_operand.hbm [shape: bf16[1152,128], index: 4, kind: input, shape index: {}]   ;;  %s16831_s5 = inlined_call_operand.hbm [shape: f32[1,128], index: 5, kind: input, shape index: {}]   ;;  %s16832_s6 = inlined_call_operand.hbm [shape: bf16[1152,128], index: 6, kind: input, shape index: {}]   ;;  %s16833_s7 = inlined_call_operand.hbm [shape: f32[1,128], index: 7, kind: input, shape index: {}]   ;;  %s16834_s8 = inlined_call_operand.hbm [shape: bf16[128,128], index: 8, kind: input, shape index: {}]   ;;  %s16835_s9 = inlined_call_operand.hbm [shape: f32[1,128], index: 9, kind: input, shape index: {}]   ;;  %s16836_s10 = inlined_call_operand.hbm [shape: bf16[2,384,128], index: 10, kind: output, shape index: {}]  }
   0x1   :  { %16965 = sst [smem:[#allocation104_spill]] %s16827_s1 }
   0x2   :  { %16966 = sst [smem:[#allocation105_spill]] %s16829_s3 }
   0x3   :  { %16967 = sst [smem:[#allocation106_spill]] %s16836_s10 }
   0x4   :  { %15 = vsyncpa [#allocation6], 0 }
   0x5   :  { %17 = vsyncpa [#allocation6 + $0x1], 0 }
   0x6   :  { %18 = vsyncpa [#allocation9], 0 }
   0x7   :  { %19 = vsyncpa [#allocation12], 0 }
   0x8   :  { %20 = vsyncpa [#allocation15], 0 }
   0x9   :  { %21 = vsyncpa [#allocation18], 0 }
   0xa   :  { %22 = vsyncpa [#allocation21], 0 }
   0xb   :  { %23 = vsyncpa [#allocation7], 0 }
   0xc   :  { %25 = vsyncpa [#allocation7 + $0x1], 0  ;;  %s13627_s13 = smov 0   ;;  %s13629_s14 = smov 0  }
   0xd   :  { %s13631_s15 = smov 0   ;;  %s13633_s16 = smov 0  }
   0xe LB: > { %s13552_s17 = smov [#allocation8]   ;;  %s13648_s19 = sadd.s32 4294967295, %s13550_s16   ;;  %s13550_s16 = sphi %s13633_s16, %s17451_s16   ;;  %s13546_s15 = sphi %s13631_s15, %s17450_s15   ;;  %s13542_s14 = sphi %s13629_s14, %s17449_s14   ;;  %s13538_s13 = sphi %s13627_s13, %s17448_s13  }
   0xf   : > { %s289_s18 = sshll.u32 %s13552_s17, 4  ;;  %p10717_p0 = scmp.ge.s32.totalorder %s13550_s16, 1  ;;  %s13653_s18 = int_to_ptr.vmem [resolvable:$true] %s289_s18 }
  0x10   : > { %p16839_p1 = scmp.eq.s32.totalorder %s13648_s19, 0  ;;  %p277_p2 = scmp.lt.s32.totalorder %s13550_s16, 3 }
  0x11   : > { %s13553_s21 = smov [#allocation11]   ;;  %s13554_s24 = smov [#allocation14]  }
  0x12   : > { %p13655_p3 = pnand %p10717_p0, %p277_p2  ;;  %s316_s22 = sshll.u32 %s13553_s21, 4  ;;  %s13668_s22 = int_to_ptr.vmem [resolvable:$true] %s316_s22 }
  0x13   : > { %s340_s25 = sshll.u32 %s13554_s24, 4  ;;  %s16971_s1 = sld [smem:[#allocation104_spill]]  ;;  %s13670_s25 = int_to_ptr.vmem [resolvable:$true] %s340_s25 }
  0x14   : > { %s16968_s20 = scalar_select %p13655_p3, 1, 0 }
  0x15   : > { %p12748_p5 = pneg %p13655_p3 }
  0x16   : > { %16969 = sst [smem:[#allocation30_spill]] %s16968_s20 }
  0x17   : > { %p13664_p6 = pnand %p12748_p5, %p16839_p1 }
  0x19   : > { %s13182_s28 = scalar_lea.hbm %s16971_s1, 6144  ;;  %p13680_p8 = pneg %p13664_p6 }
  0x1a   : > { %p13183_p7 = scmp.ne.s32.totalorder %s16971_s1, %s13182_s28  ;;  %p13189_p11 = scmp.lt.u32.totalorder %s13182_s28, %s16971_s1 }
  0x1c   : > { %p13185_p9 = pnand %p13680_p8, %p13183_p7 }
  0x1e   : > { %p13186_p10 = pneg %p13185_p9 }
  0x20   : > { %p13191_p12 = pnand %p13189_p11, %p13186_p10 }
  0x22   : > { %13194 = shalt.err (!%p13191_p12)
}
  0x23   : > { %s13195_s21 = scalar_lea.vmem %s13653_s18, 6144  ;;  %p13203_p5 = scmp.lt.s32.totalorder %s13653_s18, %s13653_s18 }
  0x24   : > { %p13196_p13 = scmp.ne.s32.totalorder %s13653_s18, %s13195_s21  ;;  %p13204_p4 = scmp.lt.s32.totalorder %s13195_s21, %s13195_s21 }
  0x26   : > { %p13198_p0 = pnand %p13196_p13, %p13680_p8  ;;  %p13205_p7 = por %p13204_p4, %p13203_p5 }
  0x28   : > { %p13199_p2 = pneg %p13198_p0 }
  0x2a   : > { %p13206_p9 = pnand %p13205_p7, %p13199_p2 }
  0x2c   : > { %13209 = shalt.err (!%p13206_p9)
}
  0x2d   : > { %s13555_s24 = smov 128   ;;  %s13556_s26 = smov 8  }
  0x2e   : > { %12751 = dma.hbm_to_vmem [thread:$0]  (!%p13664_p6), %s16971_s1, 6144, %s13653_s18, [#allocation9], %s13555_s24, %s13555_s24, %s13556_s26  }
  0x2f   : > { %s16973_s3 = sld [smem:[#allocation105_spill]] }
  0x35   : > { %s13210_s12 = scalar_lea.hbm %s16973_s3, 16 }
  0x36   : > { %p13211_p4 = scmp.ne.s32.totalorder %s16973_s3, %s13210_s12  ;;  %p13217_p12 = scmp.lt.u32.totalorder %s13210_s12, %s16973_s3 }
  0x38   : > { %p13213_p10 = pnand %p13211_p4, %p13680_p8 }
  0x3a   : > { %p13214_p11 = pneg %p13213_p10 }
  0x3c   : > { %p13219_p13 = pnand %p13217_p12, %p13214_p11 }
  0x3e   : > { %13222 = shalt.err (!%p13219_p13)
}
  0x3f   : > { %s13223_s18 = scalar_lea.vmem %s13668_s22, 16  ;;  %s13230_s10 = scalar_lea.vmem %s13668_s22, 32 }
  0x40   : > { %p13224_p0 = scmp.ne.s32.totalorder %s13668_s22, %s13223_s18  ;;  %p13231_p7 = scmp.lt.s32.totalorder %s13668_s22, %s13668_s22 }
  0x41   : > { %p13232_p9 = scmp.lt.s32.totalorder %s13230_s10, %s13223_s18 }
  0x42   : > { %p13226_p2 = pnand %p13224_p0, %p13680_p8 }
  0x43   : > { %p13233_p4 = por %p13232_p9, %p13231_p7 }
  0x44   : > { %p13227_p5 = pneg %p13226_p2 }
  0x46   : > { %p13234_p10 = pnand %p13233_p4, %p13227_p5 }
  0x48   : > { %13237 = shalt.err (!%p13234_p10)
}
  0x49   : > { %12757 = dma.hbm_to_vmem [thread:$0]  (!%p13664_p6), %s16973_s3, 16, %s13668_s22, [#allocation12]  }
  0x4a   : > { %s13238_s28 = scalar_lea.hbm %s16831_s5, 16 }
  0x4b   : > { %p13239_p11 = scmp.ne.s32.totalorder %s16831_s5, %s13238_s28  ;;  %p13245_p0 = scmp.lt.u32.totalorder %s13238_s28, %s16831_s5 }
  0x4d   : > { %p13241_p12 = pnand %p13239_p11, %p13680_p8 }
  0x4f   : > { %p13242_p13 = pneg %p13241_p12 }
  0x51   : > { %p13247_p2 = pnand %p13245_p0, %p13242_p13 }
  0x53   : > { %13250 = shalt.err (!%p13247_p2)
}
  0x54   : > { %s13251_s22 = scalar_lea.vmem %s13670_s25, 16  ;;  %s13258_s21 = scalar_lea.vmem %s13670_s25, 32 }
  0x55   : > { %p13252_p5 = scmp.ne.s32.totalorder %s13670_s25, %s13251_s22  ;;  %p13259_p4 = scmp.lt.s32.totalorder %s13670_s25, %s13670_s25 }
  0x56   : > { %p13260_p10 = scmp.lt.s32.totalorder %s13258_s21, %s13251_s22 }
  0x57   : > { %p13254_p7 = pnand %p13252_p5, %p13680_p8 }
  0x58   : > { %p13261_p11 = por %p13260_p10, %p13259_p4 }
  0x59   : > { %p13255_p9 = pneg %p13254_p7 }
  0x5b   : > { %p13262_p12 = pnand %p13261_p11, %p13255_p9 }
  0x5d   : > { %13265 = shalt.err (!%p13262_p12)
}
  0x5e   : > { %12763 = dma.hbm_to_vmem [thread:$0]  (!%p13664_p6), %s16831_s5, 16, %s13670_s25, [#allocation15]  }
  0x5f   : > { %s13557_s20 = smov [#allocation17]   ;;  %s13558_s26 = smov [#allocation10]  }
  0x60   : > { %s364_s24 = sshll.u32 %s13557_s20, 4  ;;  %s302_s27 = sshll.u32 %s13558_s26, 4  ;;  %s365_s24 = int_to_ptr.vmem [resolvable:$true] %s364_s24  ;;  %s303_s27 = int_to_ptr.vmem [resolvable:$true] %s302_s27 }
  0x61   : > { %s13266_s30 = scalar_lea.hbm %s16833_s7, 16 }
  0x62   : > { %p13267_p13 = scmp.ne.s32.totalorder %s16833_s7, %s13266_s30  ;;  %p13273_p5 = scmp.lt.u32.totalorder %s13266_s30, %s16833_s7 }
  0x64   : > { %p13269_p0 = pnand %p13267_p13, %p13680_p8 }
  0x66   : > { %p13270_p2 = pneg %p13269_p0 }
  0x68   : > { %p13275_p7 = pnand %p13273_p5, %p13270_p2 }
  0x6a   : > { %13278 = shalt.err (!%p13275_p7)
}
  0x6b   : > { %s13279_s25 = scalar_lea.vmem %s365_s24, 16  ;;  %s13286_s18 = scalar_lea.vmem %s365_s24, 32 }
  0x6c   : > { %p13280_p9 = scmp.ne.s32.totalorder %s365_s24, %s13279_s25  ;;  %p13287_p11 = scmp.lt.s32.totalorder %s365_s24, %s365_s24 }
  0x6d   : > { %p13288_p12 = scmp.lt.s32.totalorder %s13286_s18, %s13279_s25 }
  0x6e   : > { %p13282_p4 = pnand %p13280_p9, %p13680_p8 }
  0x6f   : > { %p13289_p1 = por %p13288_p12, %p13287_p11 }
  0x70   : > { %p13283_p10 = pneg %p13282_p4 }
  0x72   : > { %p13290_p3 = pnand %p13289_p1, %p13283_p10 }
  0x74   : > { %13293 = shalt.err (!%p13290_p3)
}
  0x75   : > { %12769 = dma.hbm_to_vmem [thread:$0]  (!%p13664_p6), %s16833_s7, 16, %s365_s24, [#allocation18]  }
  0x76   : > { %s13294_s29 = scalar_lea.hbm %s16828_s2, 9216 }
  0x77   : > { %p13295_p13 = scmp.ne.s32.totalorder %s16828_s2, %s13294_s29  ;;  %p13301_p3 = scmp.lt.u32.totalorder %s13294_s29, %s16828_s2 }
  0x79   : > { %p13297_p0 = pnand %p13295_p13, %p13680_p8 }
  0x7b   : > { %p13298_p1 = pneg %p13297_p0 }
  0x7d   : > { %p13303_p2 = pnand %p13301_p3, %p13298_p1 }
  0x7f   : > { %13306 = shalt.err (!%p13303_p2)
}
  0x80   : > { %s13307_s21 = scalar_lea.vmem %s303_s27, 9216  ;;  %p13315_p4 = scmp.lt.s32.totalorder %s303_s27, %s303_s27 }
  0x81   : > { %p13308_p5 = scmp.ne.s32.totalorder %s303_s27, %s13307_s21  ;;  %p13316_p10 = scmp.lt.s32.totalorder %s13307_s21, %s13307_s21 }
  0x83   : > { %p13310_p7 = pnand %p13308_p5, %p13680_p8  ;;  %p13317_p11 = por %p13316_p10, %p13315_p4 }
  0x85   : > { %p13311_p9 = pneg %p13310_p7 }
  0x87   : > { %p13318_p12 = pnand %p13317_p11, %p13311_p9 }
  0x89   : > { %13321 = shalt.err (!%p13318_p12)
}
  0x8a   : > { %s16841_s24 = smov 64   ;;  %s16842_s25 = smov 4  }
  0x8b   : > { %12754 = dma.hbm_to_vmem [thread:$0]  (!%p13664_p6), %s16828_s2, 9216, %s303_s27, [#allocation9], %s16841_s24, %s16841_s24, %s16842_s25  }
  0x8c   : > { %s13561_s20 = smov [#allocation13]   ;;  %s13562_s28 = smov [#allocation16]  }
  0x8d   : > { %s326_s26 = sshll.u32 %s13561_s20, 4  ;;  %s350_s29 = sshll.u32 %s13562_s28, 4  ;;  %s327_s26 = int_to_ptr.vmem [resolvable:$true] %s326_s26  ;;  %s351_s29 = int_to_ptr.vmem [resolvable:$true] %s350_s29 }
  0x8e   : > { %s13322_s17 = scalar_lea.hbm %s16830_s4, 9216 }
  0x8f   : > { %p13323_p13 = scmp.ne.s32.totalorder %s16830_s4, %s13322_s17  ;;  %p13329_p3 = scmp.lt.u32.totalorder %s13322_s17, %s16830_s4 }
  0x91   : > { %p13325_p0 = pnand %p13323_p13, %p13680_p8 }
  0x93   : > { %p13326_p1 = pneg %p13325_p0 }
  0x95   : > { %p13331_p2 = pnand %p13329_p3, %p13326_p1 }
  0x97   : > { %13334 = shalt.err (!%p13331_p2)
}
  0x98   : > { %s13335_s27 = scalar_lea.vmem %s327_s26, 9216  ;;  %p13343_p4 = scmp.lt.s32.totalorder %s327_s26, %s327_s26 }
  0x99   : > { %p13336_p5 = scmp.ne.s32.totalorder %s327_s26, %s13335_s27  ;;  %p13344_p10 = scmp.lt.s32.totalorder %s13335_s27, %s13335_s27 }
  0x9b   : > { %p13338_p7 = pnand %p13336_p5, %p13680_p8  ;;  %p13345_p11 = por %p13344_p10, %p13343_p4 }
  0x9d   : > { %p13339_p9 = pneg %p13338_p7 }
  0x9f   : > { %p13346_p12 = pnand %p13345_p11, %p13339_p9 }
  0xa1   : > { %13349 = shalt.err (!%p13346_p12)
}
  0xa2   : > { %12760 = dma.hbm_to_vmem [thread:$0]  (!%p13664_p6), %s16830_s4, 9216, %s327_s26, [#allocation12], %s16841_s24, %s16841_s24, %s16842_s25  }
  0xa3   : > { %s13350_s20 = scalar_lea.hbm %s16832_s6, 9216 }
  0xa4   : > { %p13351_p13 = scmp.ne.s32.totalorder %s16832_s6, %s13350_s20  ;;  %p13357_p3 = scmp.lt.u32.totalorder %s13350_s20, %s16832_s6 }
  0xa6   : > { %p13353_p0 = pnand %p13351_p13, %p13680_p8 }
  0xa8   : > { %p13354_p1 = pneg %p13353_p0 }
  0xaa   : > { %p13359_p2 = pnand %p13357_p3, %p13354_p1 }
  0xac   : > { %13362 = shalt.err (!%p13359_p2)
}
  0xad   : > { %s13363_s22 = scalar_lea.vmem %s351_s29, 9216  ;;  %p13371_p4 = scmp.lt.s32.totalorder %s351_s29, %s351_s29 }
  0xae   : > { %p13364_p5 = scmp.ne.s32.totalorder %s351_s29, %s13363_s22  ;;  %p13372_p10 = scmp.lt.s32.totalorder %s13363_s22, %s13363_s22 }
  0xb0   : > { %p13366_p7 = pnand %p13364_p5, %p13680_p8  ;;  %p13373_p11 = por %p13372_p10, %p13371_p4 }
  0xb2   : > { %p13367_p9 = pneg %p13366_p7 }
  0xb4   : > { %p13374_p12 = pnand %p13373_p11, %p13367_p9 }
  0xb6   : > { %13377 = shalt.err (!%p13374_p12)
}
  0xb7   : > { %12766 = dma.hbm_to_vmem [thread:$0]  (!%p13664_p6), %s16832_s6, 9216, %s351_s29, [#allocation15], %s16841_s24, %s16841_s24, %s16842_s25  }
  0xb8   : > { %s13563_s27 = smov [#allocation19]   ;;  %s13564_s3 = smov [#allocation20]  }
  0xb9   : > { %s374_s1 = sshll.u32 %s13563_s27, 4  ;;  %s388_s18 = sshll.u32 %s13564_s3, 4  ;;  %s375_s1 = int_to_ptr.vmem [resolvable:$true] %s374_s1  ;;  %s389_s18 = int_to_ptr.vmem [resolvable:$true] %s388_s18 }
  0xba   : > { %s13378_s28 = scalar_lea.hbm %s16834_s8, 1024 }
  0xbb   : > { %p13379_p13 = scmp.ne.s32.totalorder %s16834_s8, %s13378_s28  ;;  %p13385_p3 = scmp.lt.u32.totalorder %s13378_s28, %s16834_s8 }
  0xbd   : > { %p13381_p0 = pnand %p13379_p13, %p13680_p8 }
  0xbf   : > { %p13382_p1 = pneg %p13381_p0 }
  0xc1   : > { %p13387_p2 = pnand %p13385_p3, %p13382_p1 }
  0xc3   : > { %13390 = shalt.err (!%p13387_p2)
}
  0xc4   : > { %s13391_s29 = scalar_lea.vmem %s375_s1, 1024  ;;  %p13399_p4 = scmp.lt.s32.totalorder %s375_s1, %s375_s1 }
  0xc5   : > { %p13392_p5 = scmp.ne.s32.totalorder %s375_s1, %s13391_s29  ;;  %p13400_p10 = scmp.lt.s32.totalorder %s13391_s29, %s13391_s29 }
  0xc7   : > { %p13394_p7 = pnand %p13392_p5, %p13680_p8  ;;  %p13401_p11 = por %p13400_p10, %p13399_p4 }
  0xc9   : > { %p13395_p9 = pneg %p13394_p7 }
  0xcb   : > { %p13402_p12 = pnand %p13401_p11, %p13395_p9 }
  0xcd   : > { %13405 = shalt.err (!%p13402_p12)
}
  0xce   : > { %12772 = dma.hbm_to_vmem [thread:$0]  (!%p13664_p6), %s16834_s8, 1024, %s375_s1, [#allocation18], %s16841_s24, %s16841_s24, %s16842_s25  }
  0xcf   : > { %s13406_s10 = scalar_lea.hbm %s16835_s9, 16 }
  0xd0   : > { %p13407_p13 = scmp.ne.s32.totalorder %s16835_s9, %s13406_s10  ;;  %p13413_p3 = scmp.lt.u32.totalorder %s13406_s10, %s16835_s9 }
  0xd2   : > { %p13409_p0 = pnand %p13407_p13, %p13680_p8 }
  0xd4   : > { %p13410_p1 = pneg %p13409_p0 }
  0xd6   : > { %p13415_p2 = pnand %p13413_p3, %p13410_p1 }
  0xd8   : > { %13418 = shalt.err (!%p13415_p2)
}
  0xd9   : > { %s13419_s17 = scalar_lea.vmem %s389_s18, 16  ;;  %s13426_s1 = scalar_lea.vmem %s389_s18, 32 }
  0xda   : > { %p13420_p5 = scmp.ne.s32.totalorder %s389_s18, %s13419_s17  ;;  %p13427_p4 = scmp.lt.s32.totalorder %s389_s18, %s389_s18 }
  0xdb   : > { %p13428_p10 = scmp.lt.s32.totalorder %s13426_s1, %s13419_s17 }
  0xdc   : > { %p13422_p7 = pnand %p13420_p5, %p13680_p8 }
  0xdd   : > { %p13429_p11 = por %p13428_p10, %p13427_p4 }
  0xde   : > { %p13423_p9 = pneg %p13422_p7 }
  0xe0   : > { %p13430_p12 = pnand %p13429_p11, %p13423_p9 }
  0xe2   : > { %13433 = shalt.err (!%p13430_p12)
}
  0xe3   : > { %12775 = dma.hbm_to_vmem [thread:$0]  (!%p13664_p6), %s16835_s9, 16, %s389_s18, [#allocation21]  }
  0xe4   : > { %s10716_s11 = sadd.s32 4294967294, %s13550_s16   ;;  %s13871_s23 = sadd.s32 1, %s13550_s16  }
  0xe5   : > { %s38_s26 = sadd.s32 1, %s13546_s15  ;;  %s35_s21 = ssub.s32 %s13550_s16, %s13871_s23 }
  0xe6   : > { %p45_p8 = scmp.ne.s32.totalorder %s13546_s15, %s13542_s14  ;;  %p36_p13 = scmp.eq.s32.totalorder %s35_s21, 0 }
  0xe7   : > { %p46_p0 = scmp.eq.s32.totalorder %s13550_s16, 0  ;;  %p51_p1 = scmp.ne.s32.totalorder %s13542_s14, %s13538_s13 }
  0xe8   : > { %p264_p3 = scmp.eq.s32.totalorder %s13648_s19, 1  ;;  %p16974_p5 = scmp.eq.s32.totalorder %s13648_s19, 0 }
  0xe9   : > { %s13883_s27 = scalar_select %p36_p13, %s13546_s15, %s38_s26  }
  0xea   : > { %p47_p2 = por %p46_p0, %p45_p8  ;;  %p13887_p7 = por %p16974_p5, %p51_p1 }
  0xeb   : > { %p13891_p6 = por %p264_p3, %p45_p8  ;;  %p270_p9 = scmp.eq.s32.totalorder %s10716_s11, 1 }
  0xec   : > { %p12793_p4 = scmp.lt.s32.totalorder %s13550_s16, 2  ;;  %s399_s10 = sand.u32 1, %s13546_s15  }
  0xed   : > { %s16976_s18 = scalar_select %p13891_p6, 1, 0 }
  0xee   : > { %p13897_p10 = por %p270_p9, %p51_p1  ;;  %s12704_s28 = smul.u32 192, %s399_s10 }
  0xef   : > { %p13901_p11 = pnand %p12793_p4, %p47_p2  ;;  %s12705_s12 = smul.u32 3072, %s13550_s16 }
  0xf0   : > { %s16977_s20 = scalar_select %p13897_p10, 1, 0 }
  0xf1   : > { %s13909_s22 = scalar_lea.hbm %s16826_s0, %s12705_s12  ;;  %s403_s29 = scalar_lea.vmem [#allocation5], %s12704_s28 }
  0xf2   : > { %s410_s11 = sshll.u32 %s403_s29, 4  ;;  %s13913_s26 = scalar_lea.sflag [#allocation6], %s399_s10  ;;  %s13911_s11 = int_to_ptr.vmem [resolvable:$true] %s410_s11 }
  0xf3   : > { %s13434_s21 = scalar_lea.hbm %s13909_s22, 3072  ;;  %p13436_p8 = pneg %p13901_p11 }
  0xf4   : > { %p13435_p12 = scmp.ne.s32.totalorder %s13909_s22, %s13434_s21  ;;  %s13439_s1 = scalar_lea.hbm %s16826_s0, 6144 }
  0xf5   : > { %p13440_p1 = scmp.lt.u32.totalorder %s13909_s22, %s16826_s0  ;;  %p13441_p3 = scmp.lt.u32.totalorder %s13439_s1, %s13434_s21 }
  0xf6   : > { %p13437_p13 = pnand %p13436_p8, %p13435_p12  ;;  %p13443_p5 = scmp.lt.u32.totalorder %s13434_s21, %s13909_s22 }
  0xf7   : > { %p13442_p2 = por %p13441_p3, %p13440_p1 }
  0xf8   : > { %p13438_p0 = pneg %p13437_p13 }
  0xf9   : > { %p13444_p9 = por %p13443_p5, %p13442_p2 }
  0xfb   : > { %p13445_p4 = pnand %p13444_p9, %p13438_p0 }
  0xfd   : > { %13448 = shalt.err (!%p13445_p4)
}
  0xfe   : > { %s13449_s10 = scalar_lea.vmem %s13911_s11, 3072  ;;  %s13565_s28 = smov [#allocation5]  }
  0xff   : > { %p13450_p12 = scmp.ne.s32.totalorder %s13911_s11, %s13449_s10  ;;  %s13454_s29 = sshll.u32 %s13565_s28, 4  ;;  %s13455_s29 = int_to_ptr.vmem [resolvable:$false] %s13454_s29 }
 0x100   : > { %s13456_s24 = scalar_lea.vmem %s13455_s29, 6144  ;;  %p13457_p6 = scmp.lt.s32.totalorder %s13911_s11, %s13455_s29 }
 0x101   : > { %p13452_p13 = pnand %p13450_p12, %p13436_p8  ;;  %p13458_p1 = scmp.lt.s32.totalorder %s13456_s24, %s13449_s10 }
 0x103   : > { %p13453_p10 = pneg %p13452_p13  ;;  %p13459_p3 = por %p13458_p1, %p13457_p6 }
 0x105   : > { %p13460_p2 = pnand %p13459_p3, %p13453_p10 }
 0x107   : > { %13463 = shalt.err (!%p13460_p2)
}
 0x108   : > { %s16979_s25 = smov 4   ;;  %s16980_s21 = smov 64  }
 0x109   : > { %12779 = dma.hbm_to_vmem [thread:$0]  (!%p13901_p11), %s13909_s22, 3072, %s13911_s11, %s13913_s26, %s16980_s21, %s16980_s21, %s16979_s25  }
 0x10a   : > { %s16981_s12 = sld [smem:[#allocation30_spill]] }
 0x110   : > { %p16982_p8 = scmp.ne.s32.totalorder %s16981_s12, 0 }
 0x112   : > { %422 = sbr.rel (%p16982_p8) target bundleno = 3001 (0xbb9), region = 60 }
 0x119   : > { %s13947_s17 = sand.u32 1, %s13542_s14  }
 0x11a   : > { %s12706_s1 = smul.u32 192, %s13947_s17  ;;  %s425_s10 = scalar_lea.sflag [#allocation6], %s13947_s17 }
 0x11c   : > { %s13953_s30 = scalar_lea.vmem [#allocation5], %s12706_s1 }
 0x11d   : > { %13509 = dma.done.wait (%p13887_p7), %s425_s10, 3072  }
 0x11e   : > { %13511 = vsyncadd (%p13887_p7), %s425_s10, 4294964224  ;;  %p16983_p6 = scmp.eq.s32.totalorder %s13648_s19, 0 }
 0x120   : > { %13513 = dma.done.wait (%p16983_p6), [#allocation9], 15360   ;;  %p16984_p10 = pmov %p16983_p6 }
 0x121   : > { %p16985_p11 = pmov %p16983_p6 }
 0x122   : > { %13515 = vsyncadd (%p16984_p10), [#allocation9], 4294951936 }
 0x123   : > { %13517 = dma.done.wait (%p16985_p11), [#allocation12], 9232   ;;  %p16986_p0 = pmov %p16983_p6 }
 0x125   : > { %13519 = vsyncadd (%p16986_p0), [#allocation12], 4294958064  ;;  %p16987_p5 = pmov %p16986_p0 }
 0x126   : > { %p16988_p9 = pmov %p16986_p0 }
 0x127   : > { %13521 = dma.done.wait (%p16987_p5), [#allocation15], 9232  }
 0x128   : > { %13523 = vsyncadd (%p16988_p9), [#allocation15], 4294958064  ;;  %p16989_p7 = pmov %p16986_p0 }
 0x129   : > { %p16990_p4 = pmov %p16986_p0 }
 0x12a   : > { %13525 = dma.done.wait (%p16989_p7), [#allocation18], 1040  }
 0x12b   : > { %13527 = vsyncadd (%p16990_p4), [#allocation18], 4294966256  ;;  %p16991_p12 = pmov %p16986_p0 }
 0x12c   : > { %p16992_p13 = pmov %p16986_p0 }
 0x12d   : > { %13529 = dma.done.wait (%p16991_p12), [#allocation21], 16  }
 0x12e   : > { %13531 = vsyncadd (%p16992_p13), [#allocation21], 4294967280  ;;  %v16845_v0 = vmov 0   ;;  %v13567_v1 = vmov 0.0   ;;  %v13568_v2 = vmov 0.0|0.0   ;;  %v12855_v3 = vld [vmem:[#allocation10] sm:$0xff]  }
 0x12f   : > { %2343 = vmatprep.subr.bf16.mxu0 %v16845_v0  ;;  %503 = vst [vmem:[#allocation2 + $0x8] sm:$0xff] %v13567_v1  ;;  %504 = vst [vmem:[#allocation2 + $0x10] sm:$0xff] %v13567_v1  ;;  %12853 = vset.pattern.permute.xlu0 %v16845_v0  ;;  %v12856_v4 = vld [vmem:[#allocation10 + $0x8] sm:$0xff]   ;;  %v12857_v5 = vld [vmem:[#allocation10 + $0x10] sm:$0xff]   ;;  %s16705_s3 = scalar_lea.vmem [#allocation22], %s12706_s1  ;;  %s12707_s22 = smul.u32 3072, %s13648_s19 }
 0x130   : > { %502 = vst [vmem:[#allocation2] sm:$0xff] %v13567_v1  ;;  %505 = vst [vmem:[#allocation2 + $0x18] sm:$0xff] %v13567_v1  ;;  %12854 = vset.pattern.permute.xlu1 %v16845_v0  ;;  %2375 = vmatprep.mubr.bf16.mxu0 %v13568_v2  ;;  %v12858_v6 = vld [vmem:[#allocation10 + $0x18] sm:$0xff]   ;;  %v12859_v7 = vld [vmem:[#allocation10 + $0x20] sm:$0xff]   ;;  %s10539_s11 = sshll.u32 %s16705_s3, 4  ;;  %s17444_s29 = sld [smem:[#allocation106_spill]]  ;;  %s16780_s11 = int_to_ptr.vmem [resolvable:$true] %s10539_s11 }
 0x131   : > { %506 = vst [vmem:[#allocation2 + $0x1a0] sm:$0xff] %v13567_v1  ;;  %507 = vst [vmem:[#allocation2 + $0x1a8] sm:$0xff] %v13567_v1  ;;  %2344 = vmatpush1.bf16.msra.mxu0 %v12855_v3  ;;  %v14003_v8 = vld [vmem:[%s13953_s30] sm:$0xff]   ;;  %v12860_v9 = vld [vmem:[#allocation10 + $0x28] sm:$0xff]   ;;  %s10526_s19 = scalar_lea.sflag [#allocation7], %s13947_s17  ;;  %s13464_s25 = scalar_lea.vmem %s16780_s11, 3072 }
 0x132   : > { %508 = vst [vmem:[#allocation2 + $0x1b0] sm:$0xff] %v13567_v1  ;;  %509 = vst [vmem:[#allocation2 + $0x1b8] sm:$0xff] %v13567_v1  ;;  %2345 = vmatprep.subr.bf16.mxu0 %v16845_v0  ;;  %v11068_v10 = vunpack.c.l.bf16 %v14003_v8  ;;  %v11069_v11 = vunpack.c.h.bf16 %v14003_v8  ;;  %v11282_v12 = vld [vmem:[%s13953_s30 + $0x8] sm:$0xff]   ;;  %v11283_v15 = vld [vmem:[%s13953_s30 + $0x10] sm:$0xff]   ;;  %p13465_p1 = scmp.ne.s32.totalorder %s16780_s11, %s13464_s25  ;;  %p17445_p3 = scmp.ne.s32.totalorder %s16976_s18, 0 }
 0x133   : > { %510 = vst [vmem:[#allocation3] sm:$0xff] %v13567_v1  ;;  %511 = vst [vmem:[#allocation3 + $0x8] sm:$0xff] %v13567_v1  ;;  %v11072_v13 = vunpack.c.l.bf16 %v11282_v12  ;;  %v11073_v14 = vunpack.c.h.bf16 %v11282_v12  ;;  %v11076_v16 = vunpack.c.l.bf16 %v11283_v15  ;;  %v11077_v17 = vunpack.c.h.bf16 %v11283_v15  ;;  %v11284_v18 = vld [vmem:[%s13953_s30 + $0x18] sm:$0xff]   ;;  %v12861_v19 = vld [vmem:[#allocation10 + $0x30] sm:$0xff]   ;;  %s13569_s21 = smov [#allocation22]  }
 0x134   : > { %512 = vst [vmem:[#allocation3 + $0x10] sm:$0xff] %v13567_v1  ;;  %513 = vst [vmem:[#allocation3 + $0x18] sm:$0xff] %v13567_v1  ;;  %v11080_v20 = vunpack.c.l.bf16 %v11284_v18  ;;  %v11081_v21 = vunpack.c.h.bf16 %v11284_v18  ;;  %v11285_v22 = vld [vmem:[%s13953_s30 + $0x20] sm:$0xff]   ;;  %v11286_v25 = vld [vmem:[%s13953_s30 + $0x28] sm:$0xff]   ;;  %p13466_p2 = pnand %p13465_p1, %p17445_p3  ;;  %s13468_s12 = sshll.u32 %s13569_s21, 4  ;;  %s13469_s12 = int_to_ptr.vmem [resolvable:$false] %s13468_s12 }
 0x135   : > { %514 = vst [vmem:[#allocation3 + $0x1a0] sm:$0xff] %v13567_v1  ;;  %515 = vst [vmem:[#allocation3 + $0x1a8] sm:$0xff] %v13567_v1  ;;  %2346 = vmatpush1.bf16.msra.mxu0 %v12856_v4  ;;  %v11084_v23 = vunpack.c.l.bf16 %v11285_v22  ;;  %v11085_v24 = vunpack.c.h.bf16 %v11285_v22  ;;  %v11088_v26 = vunpack.c.l.bf16 %v11286_v25  ;;  %v11089_v27 = vunpack.c.h.bf16 %v11286_v25  ;;  %v11287_v28 = vld [vmem:[%s13953_s30 + $0x30] sm:$0xff]   ;;  %v12862_v29 = vld [vmem:[#allocation10 + $0x38] sm:$0xff]   ;;  %s13470_s1 = scalar_lea.vmem %s13469_s12, 6144  ;;  %p13471_p6 = scmp.lt.s32.totalorder %s16780_s11, %s13469_s12 }
 0x136   : > { %516 = vst [vmem:[#allocation3 + $0x1b0] sm:$0xff] %v13567_v1  ;;  %517 = vst [vmem:[#allocation3 + $0x1b8] sm:$0xff] %v13567_v1  ;;  %2347 = vmatprep.subr.bf16.mxu0 %v16845_v0  ;;  %v11092_v30 = vunpack.c.l.bf16 %v11287_v28  ;;  %v11093_v31 = vunpack.c.h.bf16 %v11287_v28  ;;  %v11288_v32 = vld [vmem:[%s13953_s30 + $0x38] sm:$0xff]   ;;  %v11289_v33 = vld [vmem:[%s13953_s30 + $0x40] sm:$0xff]   ;;  %s16778_s24 = scalar_lea.hbm %s17444_s29, %s12707_s22  ;;  %p13467_p8 = pneg %p13466_p2 }
 0x137   : > { %614 = vst [vmem:[#allocation2 + $0x20] sm:$0xff] %v11068_v10  ;;  %615 = vst [vmem:[#allocation2 + $0x28] sm:$0xff] %v11069_v11  ;;  %v11096_v34 = vunpack.c.l.bf16 %v11288_v32  ;;  %v11097_v35 = vunpack.c.h.bf16 %v11288_v32  ;;  %v11100_v36 = vunpack.c.l.bf16 %v11289_v33  ;;  %v11101_v37 = vunpack.c.h.bf16 %v11289_v33  ;;  %v12863_v38 = vld [vmem:[#allocation10 + $0x40] sm:$0xff]   ;;  %v11290_v39 = vld [vmem:[%s13953_s30 + $0x48] sm:$0xff]   ;;  %p13472_p10 = scmp.lt.s32.totalorder %s13470_s1, %s13464_s25 }
 0x138   : > { %616 = vst [vmem:[#allocation2 + $0x30] sm:$0xff] %v11072_v13  ;;  %617 = vst [vmem:[#allocation2 + $0x38] sm:$0xff] %v11073_v14  ;;  %v11104_v40 = vunpack.c.l.bf16 %v11290_v39  ;;  %v11105_v41 = vunpack.c.h.bf16 %v11290_v39  ;;  %v12864_v42 = vld [vmem:[#allocation10 + $0x48] sm:$0xff]   ;;  %v11291_v43 = vld [vmem:[%s13953_s30 + $0x50] sm:$0xff]   ;;  %v811_v13 = vpack.c.bf16 %v11068_v10, %v13567_v1 }
 0x139   : > { %2348 = vmatpush1.bf16.msra.mxu0 %v12857_v5  ;;  %618 = vst [vmem:[#allocation2 + $0x40] sm:$0xff] %v11076_v16  ;;  %619 = vst [vmem:[#allocation2 + $0x48] sm:$0xff] %v11077_v17  ;;  %v11292_v44 = vld [vmem:[%s13953_s30 + $0x58] sm:$0xff]   ;;  %v11108_v45 = vunpack.c.l.bf16 %v11291_v43  ;;  %v11109_v46 = vunpack.c.h.bf16 %v11291_v43  ;;  %v12865_v49 = vld [vmem:[#allocation10 + $0x50] sm:$0xff]   ;;  %p13473_p11 = por %p13472_p10, %p13471_p6 }
 0x13a   : > { %2349 = vmatprep.subr.bf16.mxu0 %v16845_v0  ;;  %620 = vst [vmem:[#allocation2 + $0x50] sm:$0xff] %v11080_v20  ;;  %621 = vst [vmem:[#allocation2 + $0x58] sm:$0xff] %v11081_v21  ;;  %v11112_v47 = vunpack.c.l.bf16 %v11292_v44  ;;  %v11113_v48 = vunpack.c.h.bf16 %v11292_v44  ;;  %v11293_v50 = vld [vmem:[%s13953_s30 + $0x60] sm:$0xff]   ;;  %v11294_v53 = vld [vmem:[%s13953_s30 + $0x68] sm:$0xff]  }
 0x13b   : > { %622 = vst [vmem:[#allocation2 + $0x60] sm:$0xff] %v11084_v23  ;;  %623 = vst [vmem:[#allocation2 + $0x68] sm:$0xff] %v11085_v24  ;;  %v11116_v51 = vunpack.c.l.bf16 %v11293_v50  ;;  %v11117_v52 = vunpack.c.h.bf16 %v11293_v50  ;;  %v12866_v54 = vld [vmem:[#allocation10 + $0x58] sm:$0xff]   ;;  %v11120_v55 = vunpack.c.l.bf16 %v11294_v53  ;;  %v11295_v56 = vld [vmem:[%s13953_s30 + $0x70] sm:$0xff]   ;;  %v11121_v57 = vunpack.c.h.bf16 %v11294_v53  ;;  %p13474_p0 = pnand %p13473_p11, %p13467_p8 }
 0x13c   : > { %624 = vst [vmem:[#allocation2 + $0x70] sm:$0xff] %v11088_v26  ;;  %625 = vst [vmem:[#allocation2 + $0x78] sm:$0xff] %v11089_v27  ;;  %v11124_v58 = vunpack.c.l.bf16 %v11295_v56  ;;  %v12867_v59 = vld [vmem:[#allocation10 + $0x60] sm:$0xff]   ;;  %v12868_v60 = vld [vmem:[#allocation10 + $0x68] sm:$0xff]   ;;  %v11125_v62 = vunpack.c.h.bf16 %v11295_v56 }
 0x13d   : > { %2350 = vmatpush1.bf16.msra.mxu0 %v12858_v6  ;;  %626 = vst [vmem:[#allocation2 + $0x80] sm:$0xff] %v11092_v30  ;;  %627 = vst [vmem:[#allocation2 + $0x88] sm:$0xff] %v11093_v31  ;;  %v11296_v61 = vld [vmem:[%s13953_s30 + $0x78] sm:$0xff]   ;;  %v12869_v2 = vld [vmem:[#allocation10 + $0x70] sm:$0xff]  }
 0x13e   : > { %2351 = vmatprep.subr.bf16.mxu0 %v16845_v0  ;;  %628 = vst [vmem:[#allocation2 + $0x90] sm:$0xff] %v11096_v34  ;;  %629 = vst [vmem:[#allocation2 + $0x98] sm:$0xff] %v11097_v35  ;;  %v11128_v63 = vunpack.c.l.bf16 %v11296_v61  ;;  %v12870_v3 = vld [vmem:[#allocation10 + $0x78] sm:$0xff]   ;;  %v664_v4 = vld [vmem:[#allocation2 + $0x7] sm:$0xff] }
 0x13f   : > { %630 = vst [vmem:[#allocation2 + $0xa0] sm:$0xff] %v11100_v36  ;;  %631 = vst [vmem:[#allocation2 + $0xa8] sm:$0xff] %v11101_v37  ;;  %v665_v5 = vld [vmem:[#allocation2 + $0xf] sm:$0xff]  ;;  %v11297_v6 = vld [vmem:[%s13953_s30 + $0x80] sm:$0xff]  }
 0x140   : > { %632 = vst [vmem:[#allocation2 + $0xb0] sm:$0xff] %v11104_v40  ;;  %633 = vst [vmem:[#allocation2 + $0xb8] sm:$0xff] %v11105_v41  ;;  %v11132_v11 = vunpack.c.l.bf16 %v11297_v6  ;;  %v12871_v12 = vld [vmem:[#allocation10 + $0x80] sm:$0xff]   ;;  %v666_v14 = vld [vmem:[#allocation2 + $0x17] sm:$0xff] }
 0x141   : > { %2352 = vmatpush1.bf16.msra.mxu0 %v12859_v7  ;;  %634 = vst [vmem:[#allocation2 + $0xc0] sm:$0xff] %v11108_v45  ;;  %635 = vst [vmem:[#allocation2 + $0xc8] sm:$0xff] %v11109_v46  ;;  %v712_v7 = vpack.c.bf16 %v665_v5, %v664_v4  ;;  %v667_v15 = vld [vmem:[#allocation2 + $0x1f] sm:$0xff]  ;;  %v12872_v16 = vld [vmem:[#allocation10 + $0x88] sm:$0xff]  }
 0x142   : > { %2353 = vmatprep.subr.bf16.mxu0 %v16845_v0  ;;  %636 = vst [vmem:[#allocation2 + $0xd0] sm:$0xff] %v11112_v47  ;;  %637 = vst [vmem:[#allocation2 + $0xd8] sm:$0xff] %v11113_v48  ;;  %v11298_v17 = vld [vmem:[%s13953_s30 + $0x88] sm:$0xff]   ;;  %v713_v18 = vpack.c.bf16 %v667_v15, %v666_v14  ;;  %v12875_v8 = vld [vmem:[#allocation10 + $0x90] sm:$0xff]  }
 0x143   : > { %638 = vst [vmem:[#allocation2 + $0xe0] sm:$0xff] %v11116_v51  ;;  %639 = vst [vmem:[#allocation2 + $0xe8] sm:$0xff] %v11117_v52  ;;  %v11136_v20 = vunpack.c.l.bf16 %v11298_v17  ;;  %v12873_v1 = vld [vmem:[%s13953_s30 + $0x4] ss:$4 sps:$4 sm:$0xff]   ;;  %v12877_v21 = vld [vmem:[#allocation10 + $0x98] sm:$0xff]   ;;  %v11137_v25 = vunpack.c.h.bf16 %v11298_v17 }
 0x144   : > { %640 = vst [vmem:[#allocation2 + $0xf0] sm:$0xff] %v11120_v55  ;;  %641 = vst [vmem:[#allocation2 + $0xf8] sm:$0xff] %v11121_v57  ;;  %v668_v10 = vld [vmem:[#allocation2 + $0x27] sm:$0xff]  ;;  %v669_v22 = vld [vmem:[#allocation2 + $0x2f] sm:$0xff] }
 0x145   : > { %2354 = vmatpush1.bf16.msra.mxu0 %v12860_v9  ;;  %642 = vst [vmem:[#allocation2 + $0x100] sm:$0xff] %v11124_v58  ;;  %643 = vst [vmem:[#allocation2 + $0x108] sm:$0xff] %v11125_v62  ;;  %v11129_v9 = vunpack.c.h.bf16 %v11296_v61  ;;  %v11299_v23 = vld [vmem:[%s13953_s30 + $0x90] sm:$0xff]   ;;  %v714_v24 = vpack.c.bf16 %v669_v22, %v668_v10  ;;  %v12880_v28 = vld [vmem:[#allocation10 + $0xa0] sm:$0xff]  }
 0x146   : > { %2355 = vmatprep.subr.bf16.mxu0 %v16845_v0  ;;  %644 = vst [vmem:[#allocation2 + $0x110] sm:$0xff] %v11128_v63  ;;  %646 = vst [vmem:[#allocation2 + $0x120] sm:$0xff] %v11132_v11  ;;  %v11140_v26 = vunpack.c.l.bf16 %v11299_v23  ;;  %v12874_v27 = vld [vmem:[%s13953_s30 + $0xc] ss:$4 sps:$4 sm:$0xff]   ;;  %v14048_v30 = vld [vmem:[#allocation2 + $0x37] sm:$0xff]  ;;  %v11141_v34 = vunpack.c.h.bf16 %v11299_v23 }
 0x147   : > { %645 = vst [vmem:[#allocation2 + $0x118] sm:$0xff] %v11129_v9  ;;  %648 = vst [vmem:[#allocation2 + $0x130] sm:$0xff] %v11136_v20  ;;  %v14050_v31 = vld [vmem:[#allocation2 + $0x3f] sm:$0xff]  ;;  %v12876_v36 = vld [vmem:[%s13953_s30 + $0x14] ss:$4 sps:$4 sm:$0xff]  }
 0x148   : > { %649 = vst [vmem:[#allocation2 + $0x138] sm:$0xff] %v11137_v25  ;;  %650 = vst [vmem:[#allocation2 + $0x140] sm:$0xff] %v11140_v26  ;;  %v11300_v32 = vld [vmem:[%s13953_s30 + $0x98] sm:$0xff]   ;;  %v715_v33 = vpack.c.bf16 %v14050_v31, %v14048_v30  ;;  %v12885_v37 = vld [vmem:[#allocation10 + $0xb0] sm:$0xff]  }
 0x149   : > { %2356 = vmatpush1.bf16.msra.mxu0 %v12861_v19  ;;  %v11133_v19 = vunpack.c.h.bf16 %v11297_v6  ;;  %v11144_v35 = vunpack.c.l.bf16 %v11300_v32  ;;  %651 = vst [vmem:[#allocation2 + $0x148] sm:$0xff] %v11141_v34  ;;  %v14060_v39 = vld [vmem:[#allocation2 + $0x4f] sm:$0xff]  ;;  %v12887_v40 = vld [vmem:[#allocation10 + $0xb8] sm:$0xff]   ;;  %v11301_v41 = vld [vmem:[%s13953_s30 + $0xa0] sm:$0xff]   ;;  %v11145_v43 = vunpack.c.h.bf16 %v11300_v32 }
 0x14a   : > { %2357 = vmatprep.subr.bf16.mxu0 %v16845_v0  ;;  %v11148_v44 = vunpack.c.l.bf16 %v11301_v41  ;;  %v12878_v45 = vld [vmem:[%s13953_s30 + $0x1c] ss:$4 sps:$4 sm:$0xff]   ;;  %v11302_v50 = vld [vmem:[%s13953_s30 + $0xa8] sm:$0xff]   ;;  %v11149_v52 = vunpack.c.h.bf16 %v11301_v41  ;;  %v12895_v55 = vld [vmem:[#allocation10 + $0xd0] sm:$0xff]  }
 0x14b   : > { %647 = vst [vmem:[#allocation2 + $0x128] sm:$0xff] %v11133_v19  ;;  %652 = vst [vmem:[#allocation2 + $0x150] sm:$0xff] %v11144_v35  ;;  %v12890_v46 = vld [vmem:[#allocation10 + $0xc0] sm:$0xff]   ;;  %v14068_v47 = vld [vmem:[#allocation2 + $0x57] sm:$0xff]  ;;  %v11152_v53 = vunpack.c.l.bf16 %v11302_v50  ;;  %v11153_v61 = vunpack.c.h.bf16 %v11302_v50 }
 0x14c   : > { %653 = vst [vmem:[#allocation2 + $0x158] sm:$0xff] %v11145_v43  ;;  %654 = vst [vmem:[#allocation2 + $0x160] sm:$0xff] %v11148_v44  ;;  %v14070_v48 = vld [vmem:[#allocation2 + $0x5f] sm:$0xff]  ;;  %v14078_v56 = vld [vmem:[#allocation2 + $0x67] sm:$0xff] }
 0x14d   : > { %2358 = vmatpush1.bf16.msra.mxu0 %v12862_v29  ;;  %v12882_v29 = vld [vmem:[#allocation10 + $0xa8] sm:$0xff]   ;;  %v717_v51 = vpack.c.bf16 %v14070_v48, %v14068_v47  ;;  %655 = vst [vmem:[#allocation2 + $0x168] sm:$0xff] %v11149_v52  ;;  %656 = vst [vmem:[#allocation2 + $0x170] sm:$0xff] %v11152_v53  ;;  %v12897_v58 = vld [vmem:[#allocation10 + $0xd8] sm:$0xff]  }
 0x14e   : > { %2359 = vmatprep.subr.bf16.mxu0 %v16845_v0  ;;  %v14080_v57 = vld [vmem:[#allocation2 + $0x6f] sm:$0xff]  ;;  %657 = vst [vmem:[#allocation2 + $0x178] sm:$0xff] %v11153_v61  ;;  %v14093_v4 = vld [vmem:[#allocation2 + $0x7f] sm:$0xff]  ;;  %v14100_v11 = vld [vmem:[#allocation2 + $0x87] sm:$0xff] }
 0x14f   : > { %v12881_v63 = vld [vmem:[%s13953_s30 + $0x2c] ss:$4 sps:$4 sm:$0xff]   ;;  %v12884_v14 = vld [vmem:[%s13953_s30 + $0x3c] ss:$4 sps:$4 sm:$0xff]   ;;  %v12889_v23 = vld [vmem:[%s13953_s30 + $0x54] ss:$4 sps:$4 sm:$0xff]  }
 0x150   : > { %v12902_v5 = vld [vmem:[#allocation10 + $0xe8] sm:$0xff]   ;;  %v12905_v9 = vld [vmem:[#allocation10 + $0xf0] sm:$0xff]   ;;  %v14111_v17 = vld [vmem:[#allocation2 + $0x9f] sm:$0xff] }
 0x151   : > { %2360 = vmatpush1.bf16.msra.mxu0 %v12863_v38  ;;  %v14058_v38 = vld [vmem:[#allocation2 + $0x47] sm:$0xff]  ;;  %v14125_v22 = vld [vmem:[#allocation2 + $0xbf] sm:$0xff]  ;;  %v14132_v26 = vld [vmem:[#allocation2 + $0xcf] sm:$0xff] }
 0x152   : > { %2361 = vmatprep.subr.bf16.mxu0 %v16845_v0  ;;  %v14116_v20 = vld [vmem:[#allocation2 + $0xa7] sm:$0xff]  ;;  %v14139_v32 = vld [vmem:[#allocation2 + $0xdf] sm:$0xff]  ;;  %v14151_v41 = vld [vmem:[#allocation2 + $0xf7] sm:$0xff] }
 0x153   : > { %v14130_v25 = vld [vmem:[#allocation2 + $0xc7] sm:$0xff]  ;;  %v12896_v43 = vld [vmem:[%s13953_s30 + $0x74] ss:$4 sps:$4 sm:$0xff]   ;;  %v14167_v52 = vld [vmem:[#allocation2 + $0x11f] sm:$0xff] }
 0x154   : > { %v14144_v35 = vld [vmem:[#allocation2 + $0xe7] sm:$0xff] }
 0x155   : > { %2362 = vmatpush1.bf16.msra.mxu0 %v12864_v42  ;;  %v716_v42 = vpack.c.bf16 %v14060_v39, %v14058_v38  ;;  %v12899_v53 = vld [vmem:[%s13953_s30 + $0x84] ss:$4 sps:$4 sm:$0xff]   ;;  %v12901_v61 = vld [vmem:[%s13953_s30 + $0x8c] ss:$4 sps:$4 sm:$0xff]  }
 0x156   : > { %2363 = vmatprep.subr.bf16.mxu0 %v16845_v0 }
 0x159   : > { %2364 = vmatpush1.bf16.msra.mxu0 %v12865_v49  ;;  %v12892_v49 = vld [vmem:[#allocation10 + $0xc8] sm:$0xff]  }
 0x15a   : > { %2365 = vmatprep.subr.bf16.mxu0 %v16845_v0 }
 0x15d   : > { %2366 = vmatpush1.bf16.msra.mxu0 %v12866_v54  ;;  %v12879_v54 = vld [vmem:[%s13953_s30 + $0x24] ss:$4 sps:$4 sm:$0xff]  }
 0x15e   : > { %2367 = vmatprep.subr.bf16.mxu0 %v16845_v0 }
 0x161   : > { %2368 = vmatpush1.bf16.msra.mxu0 %v12867_v59  ;;  %v14084_v59 = vld [vmem:[%s13953_s30 + $0xb0] sm:$0xff]  }
 0x162   : > { %2369 = vmatprep.subr.bf16.mxu0 %v16845_v0  ;;  %v11156_v62 = vunpack.c.l.bf16 %v14084_v59 }
 0x164   : > { %658 = vst [vmem:[#allocation2 + $0x180] sm:$0xff] %v11156_v62  ;;  %v14179_v62 = vld [vmem:[#allocation2 + $0x137] sm:$0xff] }
 0x165   : > { %2370 = vmatpush1.bf16.msra.mxu0 %v12868_v60  ;;  %v718_v60 = vpack.c.bf16 %v14080_v57, %v14078_v56 }
 0x166   : > { %2371 = vmatprep.subr.bf16.mxu0 %v16845_v0 }
 0x169   : > { %2372 = vmatpush1.bf16.msra.mxu0 %v12869_v2  ;;  %v12900_v2 = vld [vmem:[#allocation10 + $0xe0] sm:$0xff]  }
 0x16a   : > { %2373 = vmatprep.subr.bf16.mxu0 %v16845_v0 }
 0x16d   : > { %2374 = vmatpush1.bf16.msra.mxu0 %v12870_v3  ;;  %v14091_v3 = vld [vmem:[#allocation2 + $0x77] sm:$0xff] }
 0x16e   : > { %2568 = vmatprep.subr.bf16.mxu0 %v16845_v0  ;;  %v719_v6 = vpack.c.bf16 %v14093_v4, %v14091_v3 }
 0x170   : > { %2376 = vmatmul.mubr.bf16.vlgmr.msra.gmra.mrb[0].mxu0 %v712_v7  ;;  %v12883_v7 = vld [vmem:[%s13953_s30 + $0x34] ss:$4 sps:$4 sm:$0xff]  }
 0x171   : > { %2569 = vmatpush1.bf16.msra.mxu0 %v12871_v12  ;;  %2383 = vmatprep.mubr.bf16.mxu0 %v811_v13  ;;  %v14102_v12 = vld [vmem:[#allocation2 + $0x8f] sm:$0xff]  ;;  %v12907_v13 = vld [vmem:[#allocation10 + $0xf8] sm:$0xff]  }
 0x172   : > { %2570 = vmatprep.subr.bf16.mxu0 %v16845_v0  ;;  %v720_v15 = vpack.c.bf16 %v14102_v12, %v14100_v11 }
 0x175   : > { %2571 = vmatpush1.bf16.msra.mxu0 %v12872_v16  ;;  %v14109_v16 = vld [vmem:[#allocation2 + $0x97] sm:$0xff] }
 0x176   : > { %2572 = vmatprep.subr.bf16.mxu0 %v16845_v0  ;;  %v721_v19 = vpack.c.bf16 %v14111_v17, %v14109_v16 }
 0x178   : > { %2384 = vmatmul.mubr.bf16.gmra.mrb[4].mxu0 %v713_v18  ;;  %v12886_v18 = vld [vmem:[%s13953_s30 + $0x44] ss:$4 sps:$4 sm:$0xff]  }
 0x179   : > { %2391 = vmatprep.mubr.bf16.mxu0 %v12873_v1  ;;  %2573 = vmatpush1.bf16.msra.mxu0 %v12875_v8  ;;  %v14118_v1 = vld [vmem:[#allocation2 + $0xaf] sm:$0xff] }
 0x17a   : > { %2574 = vmatprep.subr.bf16.mxu0 %v16845_v0  ;;  %v12888_v8 = vld [vmem:[%s13953_s30 + $0x4c] ss:$4 sps:$4 sm:$0xff]   ;;  %v722_v10 = vpack.c.bf16 %v14118_v1, %v14116_v20 }
 0x17d   : > { %2575 = vmatpush1.bf16.msra.mxu0 %v12877_v21  ;;  %v14123_v21 = vld [vmem:[#allocation2 + $0xb7] sm:$0xff] }
 0x17e   : > { %2576 = vmatprep.subr.bf16.mxu0 %v16845_v0 }
 0x180   : > { %2392 = vmatmul.mubr.bf16.gmra.mrb[8].mxu0 %v714_v24  ;;  %v723_v24 = vpack.c.bf16 %v14125_v22, %v14123_v21 }
 0x181   : > { %2399 = vmatprep.mubr.bf16.mxu0 %v12874_v27  ;;  %2577 = vmatpush1.bf16.msra.mxu0 %v12880_v28  ;;  %v12891_v27 = vld [vmem:[%s13953_s30 + $0x5c] ss:$4 sps:$4 sm:$0xff]   ;;  %v724_v28 = vpack.c.bf16 %v14132_v26, %v14130_v25 }
 0x182   : > { %2578 = vmatprep.subr.bf16.mxu0 %v16845_v0 }
 0x185   : > { %2579 = vmatpush1.bf16.msra.mxu0 %v12882_v29  ;;  %v14137_v29 = vld [vmem:[#allocation2 + $0xd7] sm:$0xff] }
 0x186   : > { %2580 = vmatprep.subr.bf16.mxu0 %v16845_v0  ;;  %v725_v34 = vpack.c.bf16 %v14139_v32, %v14137_v29 }
 0x188   : > { %2400 = vmatmul.mubr.bf16.gmra.mrb[12].mxu0 %v715_v33  ;;  %v12893_v33 = vld [vmem:[%s13953_s30 + $0x64] ss:$4 sps:$4 sm:$0xff]  }
 0x189   : > { %2407 = vmatprep.mubr.bf16.mxu0 %v12876_v36  ;;  %2581 = vmatpush1.bf16.msra.mxu0 %v12885_v37  ;;  %v14146_v36 = vld [vmem:[#allocation2 + $0xef] sm:$0xff] }
 0x18a   : > { %2582 = vmatprep.subr.bf16.mxu0 %v16845_v0  ;;  %v12894_v37 = vld [vmem:[%s13953_s30 + $0x6c] ss:$4 sps:$4 sm:$0xff]  }
 0x18d   : > { %2583 = vmatpush1.bf16.msra.mxu0 %v12887_v40  ;;  %v726_v40 = vpack.c.bf16 %v14146_v36, %v14144_v35 }
 0x18e   : > { %2584 = vmatprep.subr.bf16.mxu0 %v16845_v0 }
 0x190   : > { %2408 = vmatmul.mubr.bf16.gmra.mrb[16].mxu0 %v716_v42  ;;  %v14153_v42 = vld [vmem:[#allocation2 + $0xff] sm:$0xff] }
 0x191   : > { %2415 = vmatprep.mubr.bf16.mxu0 %v12878_v45  ;;  %2585 = vmatpush1.bf16.msra.mxu0 %v12890_v46  ;;  %v727_v44 = vpack.c.bf16 %v14153_v42, %v14151_v41  ;;  %v14158_v45 = vld [vmem:[#allocation2 + $0x107] sm:$0xff]  ;;  %v14160_v46 = vld [vmem:[#allocation2 + $0x10f] sm:$0xff] }
 0x192   : > { %2586 = vmatprep.subr.bf16.mxu0 %v16845_v0  ;;  %v728_v50 = vpack.c.bf16 %v14160_v46, %v14158_v45 }
 0x195   : > { %2587 = vmatpush1.bf16.msra.mxu0 %v12892_v49  ;;  %v12898_v49 = vld [vmem:[%s13953_s30 + $0x7c] ss:$4 sps:$4 sm:$0xff]  }
 0x196   : > { %2588 = vmatprep.subr.bf16.mxu0 %v16845_v0 }
 0x198   : > { %2416 = vmatmul.mubr.bf16.gmra.mrb[20].mxu0 %v717_v51  ;;  %v14165_v51 = vld [vmem:[#allocation2 + $0x117] sm:$0xff] }
 0x199   : > { %2423 = vmatprep.mubr.bf16.mxu0 %v12879_v54  ;;  %2589 = vmatpush1.bf16.msra.mxu0 %v12895_v55  ;;  %v729_v54 = vpack.c.bf16 %v14167_v52, %v14165_v51  ;;  %v14172_v55 = vld [vmem:[#allocation2 + $0x127] sm:$0xff] }
 0x19a   : > { %2590 = vmatprep.subr.bf16.mxu0 %v16845_v0 }
 0x19d   : > { %2591 = vmatpush1.bf16.msra.mxu0 %v12897_v58  ;;  %v14174_v58 = vld [vmem:[#allocation2 + $0x12f] sm:$0xff] }
 0x19e   : > { %2592 = vmatprep.subr.bf16.mxu0 %v16845_v0 }
 0x1a0   : > { %2424 = vmatmul.mubr.bf16.gmra.mrb[24].mxu0 %v718_v60  ;;  %v730_v60 = vpack.c.bf16 %v14174_v58, %v14172_v55 }
 0x1a1   : > { %2431 = vmatprep.mubr.bf16.mxu0 %v12881_v63  ;;  %2593 = vmatpush1.bf16.msra.mxu0 %v12900_v2  ;;  %v14181_v63 = vld [vmem:[#allocation2 + $0x13f] sm:$0xff] }
 0x1a2   : > { %2594 = vmatprep.subr.bf16.mxu0 %v16845_v0  ;;  %v731_v2 = vpack.c.bf16 %v14181_v63, %v14179_v62 }
 0x1a5   : > { %2595 = vmatpush1.bf16.msra.mxu0 %v12902_v5  ;;  %v12903_v5 = vld [vmem:[%s13953_s30 + $0x94] ss:$4 sps:$4 sm:$0xff]  }
 0x1a6   : > { %2596 = vmatprep.subr.bf16.mxu0 %v16845_v0 }
 0x1a8   : > { %2432 = vmatmul.mubr.bf16.gmra.mrb[28].mxu0 %v719_v6  ;;  %v14186_v6 = vld [vmem:[#allocation2 + $0x147] sm:$0xff] }
 0x1a9   : > { %2439 = vmatprep.mubr.bf16.mxu0 %v12883_v7  ;;  %2597 = vmatpush1.bf16.msra.mxu0 %v12905_v9  ;;  %v14188_v7 = vld [vmem:[#allocation2 + $0x14f] sm:$0xff] }
 0x1aa   : > { %2598 = vmatprep.subr.bf16.mxu0 %v16845_v0  ;;  %v732_v9 = vpack.c.bf16 %v14188_v7, %v14186_v6 }
 0x1ad   : > { %2599 = vmatpush1.bf16.msra.mxu0 %v12907_v13  ;;  %v12904_v13 = vld [vmem:[%s13953_s30 + $0x9c] ss:$4 sps:$4 sm:$0xff]  }
 0x1ae   : > { %2793 = vmatprep.subr.bf16.mxu0 %v16845_v0 }
 0x1b0   : > { %2440 = vmatmul.mubr.bf16.gmra.mrb[32].mxu0 %v720_v15  ;;  %v14195_v15 = vld [vmem:[#allocation2 + $0x15f] sm:$0xff] }
 0x1b1   : > { %2447 = vmatprep.mubr.bf16.mxu0 %v12884_v14  ;;  %v14193_v14 = vld [vmem:[#allocation2 + $0x157] sm:$0xff] }
 0x1b8   : > { %2448 = vmatmul.mubr.bf16.gmra.mrb[36].mxu0 %v721_v19  ;;  %v12906_v19 = vld [vmem:[%s13953_s30 + $0xa4] ss:$4 sps:$4 sm:$0xff]  }
 0x1b9   : > { %2455 = vmatprep.mubr.bf16.mxu0 %v12886_v18  ;;  %v733_v18 = vpack.c.bf16 %v14195_v15, %v14193_v14 }
 0x1c0   : > { %2456 = vmatmul.mubr.bf16.gmra.mrb[40].mxu0 %v722_v10  ;;  %v14202_v10 = vld [vmem:[#allocation2 + $0x16f] sm:$0xff] }
 0x1c1   : > { %2463 = vmatprep.mubr.bf16.mxu0 %v12888_v8  ;;  %v14200_v8 = vld [vmem:[#allocation2 + $0x167] sm:$0xff] }
 0x1c8   : > { %2464 = vmatmul.mubr.bf16.gmra.mrb[44].mxu0 %v723_v24  ;;  %v12908_v24 = vld [vmem:[%s13953_s30 + $0xac] ss:$4 sps:$4 sm:$0xff]  }
 0x1c9   : > { %2471 = vmatprep.mubr.bf16.mxu0 %v12889_v23  ;;  %v734_v23 = vpack.c.bf16 %v14202_v10, %v14200_v8 }
 0x1d0   : > { %2472 = vmatmul.mubr.bf16.gmra.mrb[48].mxu0 %v724_v28  ;;  %v14209_v28 = vld [vmem:[#allocation2 + $0x17f] sm:$0xff] }
 0x1d1   : > { %2479 = vmatprep.mubr.bf16.mxu0 %v12891_v27  ;;  %v14207_v27 = vld [vmem:[#allocation2 + $0x177] sm:$0xff] }
 0x1d8   : > { %2480 = vmatmul.mubr.bf16.gmra.mrb[52].mxu0 %v725_v34  ;;  %v13102_v34 = vld [vmem:[#allocation2 + $0x1f] sm:$0xff] }
 0x1d9   : > { %2487 = vmatprep.mubr.bf16.mxu0 %v12893_v33  ;;  %v735_v33 = vpack.c.bf16 %v14209_v28, %v14207_v27 }
 0x1e0   : > { %2488 = vmatmul.mubr.bf16.gmra.mrb[56].mxu0 %v726_v40 }
 0x1e1   : > { %2495 = vmatprep.mubr.bf16.mxu0 %v12894_v37  ;;  %v13103_v37 = vld [vmem:[#allocation2 + $0x27] sm:$0xff] }
 0x1e2   : > { %v1006_v40 = vpack.c.bf16 %v13103_v37, %v13102_v34  ;;  %v12914_v34 = vld [vmem:[#allocation10 + $0x128] sm:$0xff]  }
 0x1e8   : > { %2496 = vmatmul.mubr.bf16.gmra.mrb[60].mxu0 %v727_v44  ;;  %v861_v44 = vld [vmem:[#allocation2 + $0x11] sm:$0xff] }
 0x1e9   : > { %2503 = vmatprep.mubr.bf16.mxu0 %v12896_v43  ;;  %v860_v43 = vld [vmem:[#allocation2 + $0x9] sm:$0xff] }
 0x1f0   : > { %2504 = vmatmul.mubr.bf16.gmra.mrb[64].mxu0 %v728_v50  ;;  %v12909_v50 = vld [vmem:[#allocation10 + $0x100] sm:$0xff]  }
 0x1f1   : > { %2511 = vmatprep.mubr.bf16.mxu0 %v12898_v49  ;;  %v908_v49 = vpack.c.bf16 %v861_v44, %v860_v43  ;;  %v14243_v43 = vld [vmem:[#allocation2 + $0x51] sm:$0xff] }
 0x1f2   : > { %v12916_v44 = vld [vmem:[#allocation10 + $0x138] sm:$0xff]  }
 0x1f8   : > { %2512 = vmatmul.mubr.bf16.gmra.mrb[68].mxu0 %v729_v54 }
 0x1f9   : > { %2519 = vmatprep.mubr.bf16.mxu0 %v12899_v53  ;;  %v13104_v53 = vld [vmem:[#allocation2 + $0x2f] sm:$0xff] }
 0x1fa   : > { %v1007_v54 = vpack.c.bf16 %v14048_v30, %v13104_v53  ;;  %v14221_v30 = vld [vmem:[#allocation2 + $0x29] sm:$0xff]  ;;  %v14253_v53 = vld [vmem:[#allocation2 + $0x61] sm:$0xff] }
 0x200   : > { %2520 = vmatmul.mubr.bf16.gmra.mrb[72].mxu0 %v730_v60  ;;  %v862_v60 = vld [vmem:[#allocation2 + $0x19] sm:$0xff] }
 0x201   : > { %2527 = vmatprep.mubr.bf16.mxu0 %v12901_v61  ;;  %v14214_v61 = vld [vmem:[#allocation2 + $0x21] sm:$0xff] }
 0x208   : > { %2528 = vmatmul.mubr.bf16.gmra.mrb[76].mxu0 %v731_v2  ;;  %v12910_v2 = vld [vmem:[#allocation10 + $0x108] sm:$0xff]  }
 0x209   : > { %2535 = vmatprep.mubr.bf16.mxu0 %v12903_v5  ;;  %v909_v5 = vpack.c.bf16 %v14214_v61, %v862_v60  ;;  %v11157_v60 = vunpack.c.h.bf16 %v14084_v59  ;;  %v11304_v59 = vld [vmem:[%s13953_s30 + $0xb8] sm:$0xff]  }
 0x20b   : > { %659 = vst [vmem:[#allocation2 + $0x188] sm:$0xff] %v11157_v60  ;;  %v1016_v60 = vpack.c.bf16 %v14130_v25, %v14125_v22  ;;  %v1018_v25 = vpack.c.bf16 %v14144_v35, %v14139_v32  ;;  %v1020_v35 = vpack.c.bf16 %v14158_v45, %v14153_v42  ;;  %v1022_v45 = vpack.c.bf16 %v14172_v55, %v14167_v52 }
 0x20c   : > { %v1024_v55 = vpack.c.bf16 %v14186_v6, %v14181_v63  ;;  %v1026_v6 = vpack.c.bf16 %v14200_v8, %v14195_v15 }
 0x210   : > { %2536 = vmatmul.mubr.bf16.gmra.mrb[80].mxu0 %v732_v9  ;;  %v1008_v9 = vpack.c.bf16 %v14058_v38, %v14050_v31  ;;  %v12913_v31 = vld [vmem:[#allocation10 + $0x120] sm:$0xff]  }
 0x211   : > { %2543 = vmatprep.mubr.bf16.mxu0 %v12904_v13  ;;  %v12911_v13 = vld [vmem:[#allocation10 + $0x110] sm:$0xff]   ;;  %v14231_v38 = vld [vmem:[#allocation2 + $0x39] sm:$0xff] }
 0x218   : > { %2544 = vmatmul.mubr.bf16.gmra.mrb[84].mxu0 %v733_v18  ;;  %v14223_v18 = vld [vmem:[#allocation2 + $0x31] sm:$0xff] }
 0x219   : > { %2551 = vmatprep.mubr.bf16.mxu0 %v12906_v19  ;;  %v12912_v19 = vld [vmem:[#allocation10 + $0x118] sm:$0xff]  }
 0x220   : > { %2552 = vmatmul.mubr.bf16.gmra.mrb[88].mxu0 %v734_v23  ;;  %v910_v23 = vpack.c.bf16 %v14223_v18, %v14221_v30 }
 0x221   : > { %2559 = vmatprep.mubr.bf16.mxu0 %v12908_v24  ;;  %v1009_v24 = vpack.c.bf16 %v14068_v47, %v14060_v39  ;;  %v1010_v39 = vpack.c.bf16 %v14078_v56, %v14070_v48  ;;  %v12915_v47 = vld [vmem:[#allocation10 + $0x130] sm:$0xff]   ;;  %v1011_v48 = vpack.c.bf16 %v14091_v3, %v14080_v57  ;;  %v12917_v56 = vld [vmem:[#allocation10 + $0x140] sm:$0xff]   ;;  %v1012_v3 = vpack.c.bf16 %v14100_v11, %v14093_v4 }
 0x222   : > { %v1013_v11 = vpack.c.bf16 %v14109_v16, %v14102_v12  ;;  %v1014_v12 = vpack.c.bf16 %v14116_v20, %v14111_v17  ;;  %v12923_v16 = vld [vmem:[#allocation10 + $0x170] sm:$0xff]   ;;  %v1015_v17 = vpack.c.bf16 %v14123_v21, %v14118_v1  ;;  %v14293_v20 = vld [vmem:[#allocation2 + $0x99] sm:$0xff] }
 0x223   : > { %v14303_v1 = vld [vmem:[#allocation2 + $0xb1] sm:$0xff] }
 0x228   : > { %2560 = vmatmul.mubr.bf16.gmra.mrb[92].mxu0 %v735_v33  ;;  %v14233_v33 = vld [vmem:[#allocation2 + $0x41] sm:$0xff] }
 0x229   : > { %2600 = vmatprep.mubr.bf16.mxu0 %v1006_v40  ;;  %v911_v37 = vpack.c.bf16 %v14233_v33, %v14231_v38  ;;  %v14241_v40 = vld [vmem:[#allocation2 + $0x49] sm:$0xff] }
 0x230   : > { %2601 = vmatmul.mubr.bf16.vlgmr.msra.gmra.mrb[0].mxu0 %v908_v49  ;;  %v912_v49 = vpack.c.bf16 %v14243_v43, %v14241_v40 }
 0x231   : > { %2794 = vmatpush1.bf16.msra.mxu0 %v12909_v50  ;;  %2608 = vmatprep.mubr.bf16.mxu0 %v1007_v54  ;;  %v14251_v50 = vld [vmem:[#allocation2 + $0x59] sm:$0xff]  ;;  %v12918_v54 = vld [vmem:[#allocation10 + $0x148] sm:$0xff]  }
 0x232   : > { %2795 = vmatprep.subr.bf16.mxu0 %v16845_v0  ;;  %v913_v57 = vpack.c.bf16 %v14253_v53, %v14251_v50 }
 0x235   : > { %2796 = vmatpush1.bf16.msra.mxu0 %v12910_v2  ;;  %v12919_v2 = vld [vmem:[#allocation10 + $0x150] sm:$0xff]  }
 0x236   : > { %2797 = vmatprep.subr.bf16.mxu0 %v16845_v0 }
 0x238   : > { %2609 = vmatmul.mubr.bf16.gmra.mrb[4].mxu0 %v909_v5  ;;  %v14262_v5 = vld [vmem:[#allocation2 + $0x69] sm:$0xff] }
 0x239   : > { %2616 = vmatprep.mubr.bf16.mxu0 %v1008_v9  ;;  %2798 = vmatpush1.bf16.msra.mxu0 %v12911_v13  ;;  %v14264_v9 = vld [vmem:[#allocation2 + $0x71] sm:$0xff] }
 0x23a   : > { %2799 = vmatprep.subr.bf16.mxu0 %v16845_v0  ;;  %v12920_v13 = vld [vmem:[#allocation10 + $0x158] sm:$0xff]   ;;  %v914_v4 = vpack.c.bf16 %v14264_v9, %v14262_v5 }
 0x23d   : > { %2800 = vmatpush1.bf16.msra.mxu0 %v12912_v19  ;;  %v11160_v19 = vunpack.c.l.bf16 %v11304_v59 }
 0x23e   : > { %2801 = vmatprep.subr.bf16.mxu0 %v16845_v0 }
 0x23f   : > { %660 = vst [vmem:[#allocation2 + $0x190] sm:$0xff] %v11160_v19  ;;  %v14319_v19 = vld [vmem:[#allocation2 + $0xd1] sm:$0xff] }
 0x240   : > { %2617 = vmatmul.mubr.bf16.gmra.mrb[8].mxu0 %v910_v23  ;;  %v11161_v23 = vunpack.c.h.bf16 %v11304_v59  ;;  %v14317_v59 = vld [vmem:[#allocation2 + $0xc9] sm:$0xff] }
 0x241   : > { %2624 = vmatprep.mubr.bf16.mxu0 %v1009_v24  ;;  %2802 = vmatpush1.bf16.msra.mxu0 %v12913_v31  ;;  %v12921_v24 = vld [vmem:[#allocation10 + $0x160] sm:$0xff]  }
 0x242   : > { %2803 = vmatprep.subr.bf16.mxu0 %v16845_v0  ;;  %661 = vst [vmem:[#allocation2 + $0x198] sm:$0xff] %v11161_v23  ;;  %v14273_v31 = vld [vmem:[#allocation2 + $0x79] sm:$0xff] }
 0x243   : > { %v14325_v23 = vld [vmem:[#allocation2 + $0xd9] sm:$0xff] }
 0x245   : > { %2804 = vmatpush1.bf16.msra.mxu0 %v12914_v34  ;;  %v14275_v34 = vld [vmem:[#allocation2 + $0x81] sm:$0xff] }
 0x246   : > { %2805 = vmatprep.subr.bf16.mxu0 %v16845_v0 }
 0x248   : > { %2625 = vmatmul.mubr.bf16.gmra.mrb[12].mxu0 %v911_v37  ;;  %v12922_v37 = vld [vmem:[#allocation10 + $0x168] sm:$0xff]  }
 0x249   : > { %2632 = vmatprep.mubr.bf16.mxu0 %v1010_v39  ;;  %2806 = vmatpush1.bf16.msra.mxu0 %v12915_v47  ;;  %v915_v39 = vpack.c.bf16 %v14275_v34, %v14273_v31  ;;  %v14283_v47 = vld [vmem:[#allocation2 + $0x89] sm:$0xff] }
 0x24a   : > { %2807 = vmatprep.subr.bf16.mxu0 %v16845_v0 }
 0x24d   : > { %2808 = vmatpush1.bf16.msra.mxu0 %v12916_v44  ;;  %v14285_v44 = vld [vmem:[#allocation2 + $0x91] sm:$0xff] }
 0x24e   : > { %2809 = vmatprep.subr.bf16.mxu0 %v16845_v0 }
 0x250   : > { %2633 = vmatmul.mubr.bf16.gmra.mrb[16].mxu0 %v912_v49  ;;  %v12924_v49 = vld [vmem:[#allocation10 + $0x178] sm:$0xff]  }
 0x251   : > { %2640 = vmatprep.mubr.bf16.mxu0 %v1011_v48  ;;  %2810 = vmatpush1.bf16.msra.mxu0 %v12917_v56  ;;  %v916_v48 = vpack.c.bf16 %v14285_v44, %v14283_v47  ;;  %v14295_v56 = vld [vmem:[#allocation2 + $0xa1] sm:$0xff] }
 0x252   : > { %2811 = vmatprep.subr.bf16.mxu0 %v16845_v0 }
 0x255   : > { %2812 = vmatpush1.bf16.msra.mxu0 %v12918_v54  ;;  %v917_v54 = vpack.c.bf16 %v14295_v56, %v14293_v20 }
 0x256   : > { %2813 = vmatprep.subr.bf16.mxu0 %v16845_v0 }
 0x258   : > { %2641 = vmatmul.mubr.bf16.gmra.mrb[20].mxu0 %v913_v57  ;;  %v14301_v57 = vld [vmem:[#allocation2 + $0xa9] sm:$0xff] }
 0x259   : > { %2648 = vmatprep.mubr.bf16.mxu0 %v1012_v3  ;;  %2814 = vmatpush1.bf16.msra.mxu0 %v12919_v2  ;;  %v918_v21 = vpack.c.bf16 %v14303_v1, %v14301_v57  ;;  %v1017_v3 = vpack.c.bf16 %v14137_v29, %v14132_v26  ;;  %v14309_v2 = vld [vmem:[#allocation2 + $0xb9] sm:$0xff]  ;;  %v920_v26 = vpack.c.bf16 %v14319_v19, %v14317_v59 }
 0x25a   : > { %2815 = vmatprep.subr.bf16.mxu0 %v16845_v0  ;;  %v1019_v29 = vpack.c.bf16 %v14151_v41, %v14146_v36  ;;  %v1021_v41 = vpack.c.bf16 %v14165_v51, %v14160_v46  ;;  %v1023_v51 = vpack.c.bf16 %v14179_v62, %v14174_v58  ;;  %v1025_v62 = vpack.c.bf16 %v14193_v14, %v14188_v7 }
 0x25b   : > { %v1027_v14 = vpack.c.bf16 %v14207_v27, %v14202_v10  ;;  %v1005_v10 = vld [vmem:[#allocation2 + $0x197] sm:$0xff] }
 0x25d   : > { %2816 = vmatpush1.bf16.msra.mxu0 %v12920_v13  ;;  %v14311_v13 = vld [vmem:[#allocation2 + $0xc1] sm:$0xff] }
 0x25e   : > { %2817 = vmatprep.subr.bf16.mxu0 %v16845_v0  ;;  %v919_v22 = vpack.c.bf16 %v14311_v13, %v14309_v2 }
 0x260   : > { %2649 = vmatmul.mubr.bf16.gmra.mrb[24].mxu0 %v914_v4  ;;  %v14327_v4 = vld [vmem:[#allocation2 + $0xe1] sm:$0xff] }
 0x261   : > { %2656 = vmatprep.mubr.bf16.mxu0 %v1013_v11  ;;  %2818 = vmatpush1.bf16.msra.mxu0 %v12921_v24  ;;  %v921_v32 = vpack.c.bf16 %v14327_v4, %v14325_v23  ;;  %v14333_v11 = vld [vmem:[#allocation2 + $0xe9] sm:$0xff]  ;;  %v14335_v24 = vld [vmem:[#allocation2 + $0xf1] sm:$0xff] }
 0x262   : > { %2819 = vmatprep.subr.bf16.mxu0 %v16845_v0  ;;  %v922_v36 = vpack.c.bf16 %v14335_v24, %v14333_v11 }
 0x265   : > { %2820 = vmatpush1.bf16.msra.mxu0 %v12922_v37  ;;  %v14341_v37 = vld [vmem:[#allocation2 + $0xf9] sm:$0xff] }
 0x266   : > { %2821 = vmatprep.subr.bf16.mxu0 %v16845_v0 }
 0x268   : > { %2657 = vmatmul.mubr.bf16.gmra.mrb[28].mxu0 %v915_v39  ;;  %v14343_v39 = vld [vmem:[#allocation2 + $0x101] sm:$0xff] }
 0x269   : > { %2664 = vmatprep.mubr.bf16.mxu0 %v1014_v12  ;;  %2822 = vmatpush1.bf16.msra.mxu0 %v12923_v16  ;;  %v923_v42 = vpack.c.bf16 %v14343_v39, %v14341_v37  ;;  %v14349_v12 = vld [vmem:[#allocation2 + $0x109] sm:$0xff]  ;;  %v14351_v16 = vld [vmem:[#allocation2 + $0x111] sm:$0xff] }
 0x26a   : > { %2823 = vmatprep.subr.bf16.mxu0 %v16845_v0  ;;  %v924_v46 = vpack.c.bf16 %v14351_v16, %v14349_v12 }
 0x26d   : > { %2824 = vmatpush1.bf16.msra.mxu0 %v12924_v49  ;;  %v14357_v49 = vld [vmem:[#allocation2 + $0x119] sm:$0xff] }
 0x26e   : > { %3018 = vmatprep.subr.bf16.mxu0 %v16845_v0 }
 0x270   : > { %2665 = vmatmul.mubr.bf16.gmra.mrb[32].mxu0 %v916_v48  ;;  %v14359_v48 = vld [vmem:[#allocation2 + $0x121] sm:$0xff] }
 0x271   : > { %2672 = vmatprep.mubr.bf16.mxu0 %v1015_v17  ;;  %v925_v52 = vpack.c.bf16 %v14359_v48, %v14357_v49  ;;  %v14365_v17 = vld [vmem:[#allocation2 + $0x129] sm:$0xff] }
 0x278   : > { %2673 = vmatmul.mubr.bf16.gmra.mrb[36].mxu0 %v917_v54  ;;  %v14367_v54 = vld [vmem:[#allocation2 + $0x131] sm:$0xff] }
 0x279   : > { %2680 = vmatprep.mubr.bf16.mxu0 %v1016_v60  ;;  %v926_v58 = vpack.c.bf16 %v14367_v54, %v14365_v17  ;;  %v14373_v60 = vld [vmem:[#allocation2 + $0x139] sm:$0xff] }
 0x280   : > { %2681 = vmatmul.mubr.bf16.gmra.mrb[40].mxu0 %v918_v21  ;;  %v14375_v21 = vld [vmem:[#allocation2 + $0x141] sm:$0xff] }
 0x281   : > { %2688 = vmatprep.mubr.bf16.mxu0 %v1017_v3  ;;  %v927_v63 = vpack.c.bf16 %v14375_v21, %v14373_v60  ;;  %v14381_v3 = vld [vmem:[#allocation2 + $0x149] sm:$0xff] }
 0x288   : > { %2689 = vmatmul.mubr.bf16.gmra.mrb[44].mxu0 %v919_v22  ;;  %v14383_v22 = vld [vmem:[#allocation2 + $0x151] sm:$0xff] }
 0x289   : > { %2696 = vmatprep.mubr.bf16.mxu0 %v1018_v25  ;;  %v928_v7 = vpack.c.bf16 %v14383_v22, %v14381_v3  ;;  %v14389_v25 = vld [vmem:[#allocation2 + $0x159] sm:$0xff] }
 0x290   : > { %2697 = vmatmul.mubr.bf16.gmra.mrb[48].mxu0 %v920_v26  ;;  %v14391_v26 = vld [vmem:[#allocation2 + $0x161] sm:$0xff] }
 0x291   : > { %2704 = vmatprep.mubr.bf16.mxu0 %v1019_v29  ;;  %v1003_v29 = vld [vmem:[#allocation2 + $0x187] sm:$0xff]  ;;  %v929_v15 = vpack.c.bf16 %v14391_v26, %v14389_v25 }
 0x292   : > { %v1028_v8 = vpack.c.bf16 %v1003_v29, %v14209_v28  ;;  %v12928_v29 = vld [vmem:[#allocation10 + $0x198] sm:$0xff]  }
 0x298   : > { %2705 = vmatmul.mubr.bf16.gmra.mrb[52].mxu0 %v921_v32  ;;  %v14396_v32 = vld [vmem:[#allocation2 + $0x169] sm:$0xff] }
 0x299   : > { %2712 = vmatprep.mubr.bf16.mxu0 %v1020_v35  ;;  %v14398_v35 = vld [vmem:[#allocation2 + $0x171] sm:$0xff] }
 0x29a   : > { %v930_v27 = vpack.c.bf16 %v14398_v35, %v14396_v32 }
 0x2a0   : > { %2713 = vmatmul.mubr.bf16.gmra.mrb[56].mxu0 %v922_v36  ;;  %v1004_v36 = vld [vmem:[#allocation2 + $0x18f] sm:$0xff] }
 0x2a1   : > { %2720 = vmatprep.mubr.bf16.mxu0 %v1021_v41  ;;  %v1029_v41 = vpack.c.bf16 %v1005_v10, %v1004_v36  ;;  %v14431_v36 = vld [vmem:[#allocation2 + $0x58] sm:$0xff]  ;;  %v12930_v10 = vld [vmem:[#allocation10 + $0x1a8] sm:$0xff]  }
 0x2a8   : > { %2721 = vmatmul.mubr.bf16.gmra.mrb[60].mxu0 %v923_v42  ;;  %v14402_v42 = vld [vmem:[#allocation2 + $0x179] sm:$0xff] }
 0x2a9   : > { %2728 = vmatprep.mubr.bf16.mxu0 %v1022_v45  ;;  %v14404_v45 = vld [vmem:[#allocation2 + $0x181] sm:$0xff] }
 0x2aa   : > { %v931_v28 = vpack.c.bf16 %v14404_v45, %v14402_v42 }
 0x2b0   : > { %2729 = vmatmul.mubr.bf16.gmra.mrb[64].mxu0 %v924_v46  ;;  %v1202_v46 = vpack.c.bf16 %v14221_v30, %v14214_v61  ;;  %v1204_v30 = vpack.c.bf16 %v14241_v40, %v14233_v33  ;;  %v12929_v33 = vld [vmem:[#allocation10 + $0x1a0] sm:$0xff]   ;;  %v14429_v40 = vld [vmem:[#allocation2 + $0x50] sm:$0xff] }
 0x2b1   : > { %2736 = vmatprep.mubr.bf16.mxu0 %v1023_v51  ;;  %v1056_v51 = vld [vmem:[#allocation2 + $0x20] sm:$0xff] }
 0x2b8   : > { %2737 = vmatmul.mubr.bf16.gmra.mrb[68].mxu0 %v925_v52  ;;  %v1057_v52 = vld [vmem:[#allocation2 + $0x28] sm:$0xff] }
 0x2b9   : > { %2744 = vmatprep.mubr.bf16.mxu0 %v1024_v55  ;;  %v1104_v55 = vpack.c.bf16 %v1057_v52, %v1056_v51  ;;  %v12939_v52 = vld [vmem:[#allocation10 + $0x200] sm:$0xff]  }
 0x2ba   : > { %11456 = vmatprep.subr.bf16.mxu1 %v12939_v52 }
 0x2bb   : > { %11457 = vmatpush3.bf16.msra.mxu1 %v12939_v52  ;;  %v14491_v52 = vld [vmem:[#allocation8 + $0xb8] sm:$0xff] }
 0x2c0   : > { %2745 = vmatmul.mubr.bf16.gmra.mrb[72].mxu0 %v926_v58  ;;  %v12925_v58 = vld [vmem:[#allocation10 + $0x180] sm:$0xff]  }
 0x2c1   : > { %2752 = vmatprep.mubr.bf16.mxu0 %v1025_v62  ;;  %v1203_v62 = vpack.c.bf16 %v14231_v38, %v14223_v18  ;;  %v14419_v18 = vld [vmem:[#allocation2 + $0x40] sm:$0xff]  ;;  %v14421_v38 = vld [vmem:[#allocation2 + $0x48] sm:$0xff] }
 0x2c8   : > { %2753 = vmatmul.mubr.bf16.gmra.mrb[76].mxu0 %v927_v63  ;;  %v1058_v63 = vld [vmem:[#allocation2 + $0x30] sm:$0xff] }
 0x2c9   : > { %2760 = vmatprep.mubr.bf16.mxu0 %v1026_v6  ;;  %v14412_v6 = vld [vmem:[#allocation2 + $0x38] sm:$0xff] }
 0x2ca   : > { %v1105_v61 = vpack.c.bf16 %v14412_v6, %v1058_v63  ;;  %v12934_v63 = vld [vmem:[#allocation10 + $0x1c8] sm:$0xff]  }
 0x2d0   : > { %2761 = vmatmul.mubr.bf16.gmra.mrb[80].mxu0 %v928_v7  ;;  %v12926_v7 = vld [vmem:[#allocation10 + $0x188] sm:$0xff]  }
 0x2d1   : > { %2768 = vmatprep.mubr.bf16.mxu0 %v1027_v14  ;;  %v12927_v14 = vld [vmem:[#allocation10 + $0x190] sm:$0xff]  }
 0x2d8   : > { %2769 = vmatmul.mubr.bf16.gmra.mrb[84].mxu0 %v929_v15  ;;  %v1106_v15 = vpack.c.bf16 %v14421_v38, %v14419_v18 }
 0x2d9   : > { %2776 = vmatprep.mubr.bf16.mxu0 %v1028_v8  ;;  %v1205_v8 = vpack.c.bf16 %v14251_v50, %v14243_v43  ;;  %v1206_v43 = vpack.c.bf16 %v14262_v5, %v14253_v53  ;;  %v12931_v50 = vld [vmem:[#allocation10 + $0x1b0] sm:$0xff]   ;;  %v1207_v53 = vpack.c.bf16 %v14273_v31, %v14264_v9  ;;  %v12933_v5 = vld [vmem:[#allocation10 + $0x1c0] sm:$0xff]   ;;  %v1208_v31 = vpack.c.bf16 %v14283_v47, %v14275_v34 }
 0x2da   : > { %v14472_v47 = vld [vmem:[#allocation8 + $0xa0] sm:$0xff] }
 0x2e0   : > { %2777 = vmatmul.mubr.bf16.gmra.mrb[88].mxu0 %v930_v27  ;;  %v1107_v27 = vpack.c.bf16 %v14431_v36, %v14429_v40 }
 0x2e1   : > { %2784 = vmatprep.mubr.bf16.mxu0 %v1029_v41  ;;  %v14439_v41 = vld [vmem:[#allocation2 + $0x60] sm:$0xff] }
 0x2e8   : > { %2785 = vmatmul.mubr.bf16.gmra.mrb[92].mxu0 %v931_v28  ;;  %v14441_v28 = vld [vmem:[#allocation2 + $0x68] sm:$0xff] }
 0x2e9   : > { %2825 = vmatprep.mubr.bf16.mxu0 %v1202_v46  ;;  %v12932_v46 = vld [vmem:[#allocation10 + $0x1b8] sm:$0xff]   ;;  %v1108_v51 = vpack.c.bf16 %v14441_v28, %v14439_v41 }
 0x2f0   : > { %2826 = vmatmul.mubr.bf16.vlgmr.msra.gmra.mrb[0].mxu0 %v1104_v55  ;;  %v12940_v55 = vld [vmem:[#allocation10 + $0x208] sm:$0xff]  }
 0x2f1   : > { %3019 = vmatpush1.bf16.msra.mxu0 %v12925_v58  ;;  %2833 = vmatprep.mubr.bf16.mxu0 %v1203_v62  ;;  %v14449_v58 = vld [vmem:[#allocation2 + $0x70] sm:$0xff]  ;;  %v14451_v62 = vld [vmem:[#allocation2 + $0x78] sm:$0xff] }
 0x2f2   : > { %3020 = vmatprep.subr.bf16.mxu0 %v16845_v0  ;;  %16993 = vst [vmem:[#allocation31_spill] sm:$0xff] %v14451_v62  ;;  %v1109_v9 = vpack.c.bf16 %v14451_v62, %v14449_v58  ;;  %11458 = vmatprep.subr.bf16.mxu1 %v12940_v55 }
 0x2f3   : > { %11459 = vmatpush3.bf16.msra.mxu1 %v12940_v55  ;;  %v14493_v55 = vld [vmem:[#allocation8 + $0xb0] sm:$0xff] }
 0x2f5   : > { %3021 = vmatpush1.bf16.msra.mxu0 %v12926_v7  ;;  %v12935_v7 = vld [vmem:[#allocation10 + $0x1d0] sm:$0xff]  }
 0x2f6   : > { %3022 = vmatprep.subr.bf16.mxu0 %v16845_v0 }
 0x2f8   : > { %2834 = vmatmul.mubr.bf16.gmra.mrb[4].mxu0 %v1105_v61  ;;  %v12942_v61 = vld [vmem:[#allocation10 + $0x210] sm:$0xff]  }
 0x2f9   : > { %2841 = vmatprep.mubr.bf16.mxu0 %v1204_v30  ;;  %3023 = vmatpush1.bf16.msra.mxu0 %v12927_v14  ;;  %v14459_v30 = vld [vmem:[#allocation2 + $0x80] sm:$0xff]  ;;  %v14461_v14 = vld [vmem:[#allocation8 + $0x98] sm:$0xff] }
 0x2fa   : > { %3024 = vmatprep.subr.bf16.mxu0 %v16845_v0  ;;  %16994 = vst [vmem:[#allocation32_spill] sm:$0xff] %v14459_v30  ;;  %11460 = vmatprep.subr.bf16.mxu1 %v12942_v61 }
 0x2fb   : > { %3661 = vperm.xlu0 %12853, %v14461_v14   ;;  %11461 = vmatpush3.bf16.msra.mxu1 %v12942_v61  ;;  %v14502_v61 = vld [vmem:[#allocation8 + $0xc8] sm:$0xff] }
 0x2fd   : > { %3025 = vmatpush1.bf16.msra.mxu0 %v12928_v29  ;;  %v12943_v29 = vld [vmem:[#allocation10 + $0x218] sm:$0xff]  }
 0x2fe   : > { %3026 = vmatprep.subr.bf16.mxu0 %v16845_v0  ;;  %11462 = vmatprep.subr.bf16.mxu1 %v12943_v29 }
 0x2ff   : > { %3666 = vperm.xlu0 %12853, %v14472_v47   ;;  %11463 = vmatpush3.bf16.msra.mxu1 %v12943_v29  ;;  %v14504_v29 = vld [vmem:[#allocation8 + $0xc0] sm:$0xff] }
 0x300   : > { %2842 = vmatmul.mubr.bf16.gmra.mrb[8].mxu0 %v1106_v15  ;;  %v14463_v15 = vld [vmem:[#allocation2 + $0x88] sm:$0xff] }
 0x301   : > { %2849 = vmatprep.mubr.bf16.mxu0 %v1205_v8  ;;  %3027 = vmatpush1.bf16.msra.mxu0 %v12929_v33  ;;  %16995 = vst [vmem:[#allocation33_spill] sm:$0xff] %v14463_v15  ;;  %v12936_v8 = vld [vmem:[#allocation10 + $0x1d8] sm:$0xff]   ;;  %v14465_v33 = vld [vmem:[#allocation8 + $0xa8] sm:$0xff]  ;;  %v1110_v34 = vpack.c.bf16 %v14463_v15, %v14459_v30 }
 0x302   : > { %3028 = vmatprep.subr.bf16.mxu0 %v16845_v0  ;;  %3671 = vperm.xlu1 %12854, %v14465_v33   ;;  %v1458_v15 = vld [vmem:[#allocation2 + $0x89] sm:$0xff]  ;;  %v1459_v30 = vld [vmem:[#allocation2 + $0x91] sm:$0xff] }
 0x303   : > { %v1501_v62 = vpack.c.bf16 %v1459_v30, %v1458_v15  ;;  %v14615_v30 = vld [vmem:[#allocation8 + $0x38] sm:$0xff]  ;;  %v1216_v15 = vpack.c.bf16 %v14349_v12, %v14343_v39  ;;  %v14635_v12 = vld [vmem:[#allocation8 + $0x48] sm:$0xff] }
 0x305   : > { %3029 = vmatpush1.bf16.msra.mxu0 %v12930_v10  ;;  %v1209_v10 = vpack.c.bf16 %v14293_v20, %v14285_v44  ;;  %v12938_v44 = vld [vmem:[#allocation10 + $0x1e8] sm:$0xff]  }
 0x306   : > { %3030 = vmatprep.subr.bf16.mxu0 %v16845_v0  ;;  %v12946_v20 = vld [vmem:[#allocation10 + $0x228] sm:$0xff]  }
 0x308   : > { %2850 = vmatmul.mubr.bf16.gmra.mrb[12].mxu0 %v1107_v27  ;;  %v12937_v27 = vld [vmem:[#allocation10 + $0x1e0] sm:$0xff]  }
 0x309   : > { %2857 = vmatprep.mubr.bf16.mxu0 %v1206_v43  ;;  %3031 = vmatpush1.bf16.msra.mxu0 %v12931_v50  ;;  %v12944_v43 = vld [vmem:[#allocation10 + $0x220] sm:$0xff]   ;;  %v14478_v50 = vld [vmem:[#allocation2 + $0x90] sm:$0xff] }
 0x30a   : > { %3032 = vmatprep.subr.bf16.mxu0 %v16845_v0  ;;  %16996 = vst [vmem:[#allocation34_spill] sm:$0xff] %v14478_v50  ;;  %11464 = vmatprep.subr.bf16.mxu1 %v12944_v43 }
 0x30b   : > { %11465 = vmatpush3.bf16.msra.mxu1 %v12944_v43  ;;  %v1211_v43 = vpack.c.bf16 %v14309_v2, %v14303_v1  ;;  %v14524_v1 = vld [vmem:[#allocation2 + $0xb0] sm:$0xff]  ;;  %v14526_v2 = vld [vmem:[#allocation2 + $0xb8] sm:$0xff] }
 0x30c   : > { %11466 = vmatprep.subr.bf16.mxu1 %v12946_v20  ;;  %17000 = vst [vmem:[#allocation38_spill] sm:$0xff] %v14524_v1  ;;  %17001 = vst [vmem:[#allocation39_spill] sm:$0xff] %v14526_v2 }
 0x30d   : > { %3033 = vmatpush1.bf16.msra.mxu0 %v12932_v46  ;;  %v14480_v46 = vld [vmem:[#allocation8 + $0x90] sm:$0xff] }
 0x30e   : > { %3034 = vmatprep.subr.bf16.mxu0 %v16845_v0  ;;  %3656 = vperm.xlu0 %12853, %v14480_v46  }
 0x30f   : > { %11467 = vmatpush3.bf16.msra.mxu1 %v12946_v20  ;;  %v1449_v20 = vld [vmem:[#allocation2 + $0x41] sm:$0xff] }
 0x310   : > { %2858 = vmatmul.mubr.bf16.gmra.mrb[16].mxu0 %v1108_v51  ;;  %v14482_v51 = vld [vmem:[#allocation8 + $0x88] sm:$0xff] }
 0x311   : > { %2865 = vmatprep.mubr.bf16.mxu0 %v1207_v53  ;;  %3035 = vmatpush1.bf16.msra.mxu0 %v12933_v5  ;;  %v14484_v53 = vld [vmem:[#allocation2 + $0x98] sm:$0xff] }
 0x312   : > { %3036 = vmatprep.subr.bf16.mxu0 %v16845_v0  ;;  %16997 = vst [vmem:[#allocation35_spill] sm:$0xff] %v14484_v53  ;;  %3651 = vperm.xlu1 %12854, %v14482_v51   ;;  %v1111_v5 = vpack.c.bf16 %v14484_v53, %v14478_v50  ;;  %v14567_v50 = vld [vmem:[#allocation2 + $0xd8] sm:$0xff] }
 0x313   : > { %3681 = vperm.xlu0 %12853, %v14491_v52   ;;  %17005 = vst [vmem:[#allocation43_spill] sm:$0xff] %v14567_v50 }
 0x315   : > { %3037 = vmatpush1.bf16.msra.mxu0 %v12934_v63  ;;  %v1210_v63 = vpack.c.bf16 %v14301_v57, %v14295_v56  ;;  %v14506_v56 = vld [vmem:[#allocation2 + $0xa8] sm:$0xff]  ;;  %v12945_v57 = vld [vmem:[#allocation10 + $0x1f8] sm:$0xff]  }
 0x316   : > { %3038 = vmatprep.subr.bf16.mxu0 %v16845_v0  ;;  %3676 = vperm.xlu1 %12854, %v14493_v55   ;;  %16999 = vst [vmem:[#allocation37_spill] sm:$0xff] %v14506_v56 }
 0x317   : > { %3691 = vperm.xlu0 %12853, %v14502_v61  }
 0x318   : > { %2866 = vmatmul.mubr.bf16.gmra.mrb[20].mxu0 %v1109_v9  ;;  %v12941_v9 = vld [vmem:[#allocation10 + $0x1f0] sm:$0xff]  }
 0x319   : > { %2873 = vmatprep.mubr.bf16.mxu0 %v1208_v31  ;;  %3039 = vmatpush1.bf16.msra.mxu0 %v12935_v7  ;;  %v12948_v31 = vld [vmem:[#allocation10 + $0x230] sm:$0xff]   ;;  %v14500_v7 = vld [vmem:[#allocation2 + $0xa0] sm:$0xff] }
 0x31a   : > { %3040 = vmatprep.subr.bf16.mxu0 %v16845_v0  ;;  %16998 = vst [vmem:[#allocation36_spill] sm:$0xff] %v14500_v7  ;;  %11468 = vmatprep.subr.bf16.mxu1 %v12948_v31 }
 0x31b   : > { %3686 = vperm.xlu1 %12854, %v14504_v29   ;;  %11469 = vmatpush3.bf16.msra.mxu1 %v12948_v31 }
 0x31d   : > { %3041 = vmatpush1.bf16.msra.mxu0 %v12936_v8  ;;  %v12949_v8 = vld [vmem:[#allocation10 + $0x238] sm:$0xff]  }
 0x31e   : > { %3042 = vmatprep.subr.bf16.mxu0 %v16845_v0  ;;  %11470 = vmatprep.subr.bf16.mxu1 %v12949_v8 }
 0x31f   : > { %11471 = vmatpush3.bf16.msra.mxu1 %v12949_v8  ;;  %v14535_v8 = vld [vmem:[#allocation8 + $0xf8] sm:$0xff] }
 0x320   : > { %2874 = vmatmul.mubr.bf16.gmra.mrb[24].mxu0 %v1110_v34  ;;  %v1112_v34 = vpack.c.bf16 %v14506_v56, %v14500_v7  ;;  %v14522_v56 = vld [vmem:[#allocation8 + $0xe8] sm:$0xff]  ;;  %11712 = vmatprep.subr.bf16.mxu1 %v16845_v0  ;;  %v1455_v7 = vld [vmem:[#allocation2 + $0x71] sm:$0xff] }
 0x321   : > { %2881 = vmatprep.mubr.bf16.mxu0 %v1209_v10  ;;  %3043 = vmatpush1.bf16.msra.mxu0 %v12937_v27  ;;  %v14513_v10 = vld [vmem:[#allocation8 + $0xd8] sm:$0xff]  ;;  %v14515_v27 = vld [vmem:[#allocation8 + $0xd0] sm:$0xff] }
 0x322   : > { %3044 = vmatprep.subr.bf16.mxu0 %v16845_v0  ;;  %3701 = vperm.xlu0 %12853, %v14513_v10  }
 0x323   : > { %3696 = vperm.xlu1 %12854, %v14515_v27  }
 0x325   : > { %3045 = vmatpush1.bf16.msra.mxu0 %v12938_v44  ;;  %v1448_v44 = vld [vmem:[#allocation2 + $0x39] sm:$0xff] }
 0x326   : > { %3046 = vmatprep.subr.bf16.mxu0 %v16845_v0  ;;  %3711 = vperm.xlu0 %12853, %v14522_v56  }
 0x328   : > { %2882 = vmatmul.mubr.bf16.gmra.mrb[28].mxu0 %v1111_v5  ;;  %v1496_v5 = vpack.c.bf16 %v1449_v20, %v1448_v44  ;;  %v1113_v44 = vpack.c.bf16 %v14526_v2, %v14524_v1  ;;  %v14543_v20 = vld [vmem:[#allocation8 + $0x100] sm:$0xff]  ;;  %v1454_v1 = vld [vmem:[#allocation2 + $0x69] sm:$0xff] }
 0x329   : > { %2889 = vmatprep.mubr.bf16.mxu0 %v1210_v63  ;;  %3047 = vmatpush1.bf16.msra.mxu0 %v12941_v9  ;;  %v1450_v63 = vld [vmem:[#allocation2 + $0x49] sm:$0xff]  ;;  %v1451_v9 = vld [vmem:[#allocation2 + $0x51] sm:$0xff]  ;;  %v1499_v53 = vpack.c.bf16 %v1455_v7, %v1454_v1  ;;  %v1214_v7 = vpack.c.bf16 %v14333_v11, %v14327_v4 }
 0x32a   : > { %3048 = vmatprep.subr.bf16.mxu0 %v16845_v0  ;;  %v1497_v31 = vpack.c.bf16 %v1451_v9, %v1450_v63  ;;  %11472 = vmatprep.mubr.bf16.mxu1 %v1496_v5  ;;  %v14545_v5 = vld [vmem:[#allocation2 + $0xc0] sm:$0xff]  ;;  %v14547_v63 = vld [vmem:[#allocation2 + $0xc8] sm:$0xff]  ;;  %v14579_v1 = vld [vmem:[#allocation8 + $0x118] sm:$0xff] }
 0x32b   : > { %3721 = vperm.xlu0 %12853, %v14535_v8   ;;  %17002 = vst [vmem:[#allocation40_spill] sm:$0xff] %v14545_v5  ;;  %17003 = vst [vmem:[#allocation41_spill] sm:$0xff] %v14547_v63  ;;  %v14549_v9 = vld [vmem:[#allocation8] sm:$0xff]  ;;  %v14595_v11 = vld [vmem:[#allocation8 + $0x28] sm:$0xff] }
 0x32c   : > { %11473 = vmatmul.mubr.bf16.vlgmr.msra.gmra.mrb[0].mxu1 %v1497_v31  ;;  %v1213_v31 = vpack.c.bf16 %v14325_v23, %v14319_v19  ;;  %v14569_v19 = vld [vmem:[#allocation8 + $0x10] sm:$0xff]  ;;  %v14575_v23 = vld [vmem:[#allocation8 + $0x18] sm:$0xff]  ;;  %17006 = vst [vmem:[#allocation44_spill] sm:$0xff] %v14579_v1 }
 0x32d   : > { %3049 = vmatpush1.bf16.msra.mxu0 %v12945_v57  ;;  %v14528_v57 = vld [vmem:[#allocation8 + $0xe0] sm:$0xff] }
 0x32e   : > { %5572 = vmatprep.subr.bf16.mxu0 %v16845_v0  ;;  %3706 = vperm.xlu1 %12854, %v14528_v57   ;;  %v1453_v0 = vld [vmem:[#allocation2 + $0x61] sm:$0xff] }
 0x32f   : > { %3726 = vperm.xlu0 %12853, %v14543_v20  }
 0x330   : > { %2890 = vmatmul.mubr.bf16.gmra.mrb[32].mxu0 %v1112_v34  ;;  %v1212_v34 = vpack.c.bf16 %v14317_v59, %v14311_v13  ;;  %v1114_v13 = vpack.c.bf16 %v14547_v63, %v14545_v5  ;;  %v14555_v59 = vld [vmem:[#allocation8 + $0x8] sm:$0xff]  ;;  %v14563_v63 = vld [vmem:[#allocation8 + $0x110] sm:$0xff] }
 0x331   : > { %2897 = vmatprep.mubr.bf16.mxu0 %v1211_v43  ;;  %v14539_v43 = vld [vmem:[#allocation8 + $0xf0] sm:$0xff] }
 0x332   : > { %3716 = vperm.xlu1 %12854, %v14539_v43   ;;  %v14565_v5 = vld [vmem:[#allocation2 + $0xd0] sm:$0xff] }
 0x333   : > { %3571 = vperm.xlu0 %12853, %v14555_v59   ;;  %17004 = vst [vmem:[#allocation42_spill] sm:$0xff] %v14565_v5 }
 0x336   : > { %3566 = vperm.xlu1 %12854, %v14549_v9  }
 0x337   : > { %3736 = vperm.xlu0 %12853, %v14563_v63  }
 0x338   : > { %2898 = vmatmul.mubr.bf16.gmra.mrb[36].mxu0 %v1113_v44  ;;  %v14559_v44 = vld [vmem:[#allocation8 + $0x108] sm:$0xff] }
 0x339   : > { %2905 = vmatprep.mubr.bf16.mxu0 %v1212_v34  ;;  %v1452_v34 = vld [vmem:[#allocation2 + $0x59] sm:$0xff] }
 0x33a   : > { %v1498_v2 = vpack.c.bf16 %v1453_v0, %v1452_v34  ;;  %3731 = vperm.xlu1 %12854, %v14559_v44   ;;  %v1115_v0 = vpack.c.bf16 %v14567_v50, %v14565_v5  ;;  %v1215_v34 = vpack.c.bf16 %v14341_v37, %v14335_v24  ;;  %v1457_v50 = vld [vmem:[#allocation2 + $0x81] sm:$0xff]  ;;  %v14609_v24 = vld [vmem:[#allocation8 + $0x30] sm:$0xff] }
 0x33b   : > { %3581 = vperm.xlu0 %12853, %v14575_v23  }
 0x33c   : > { %11476 = vmatprep.mubr.bf16.mxu1 %v1498_v2  ;;  %v14585_v2 = vld [vmem:[#allocation2 + $0xe0] sm:$0xff] }
 0x33d   : > { %11477 = vmatmul.mubr.bf16.gmra.mrb[4].mxu1 %v1499_v53  ;;  %v14583_v53 = vld [vmem:[#allocation8 + $0x120] sm:$0xff]  ;;  %17007 = vst [vmem:[#allocation45_spill] sm:$0xff] %v14585_v2 }
 0x33e   : > { %3576 = vperm.xlu1 %12854, %v14569_v19  }
 0x33f   : > { %3746 = vperm.xlu0 %12853, %v14583_v53  }
 0x340   : > { %2906 = vmatmul.mubr.bf16.gmra.mrb[40].mxu0 %v1114_v13  ;;  %v14587_v13 = vld [vmem:[#allocation2 + $0xe8] sm:$0xff] }
 0x341   : > { %2913 = vmatprep.mubr.bf16.mxu0 %v1213_v31  ;;  %17008 = vst [vmem:[#allocation46_spill] sm:$0xff] %v14587_v13  ;;  %v14589_v31 = vld [vmem:[#allocation8 + $0x20] sm:$0xff]  ;;  %v1116_v4 = vpack.c.bf16 %v14587_v13, %v14585_v2  ;;  %v14603_v13 = vld [vmem:[#allocation8 + $0x130] sm:$0xff] }
 0x342   : > { %3741 = vperm.xlu1 %12854, %v14579_v1   ;;  %17010 = vst [vmem:[#allocation48_spill] sm:$0xff] %v14603_v13  ;;  %v14605_v2 = vld [vmem:[#allocation2 + $0xf0] sm:$0xff]  ;;  %v14607_v1 = vld [vmem:[#allocation2 + $0xf8] sm:$0xff] }
 0x343   : > { %3591 = vperm.xlu0 %12853, %v14595_v11   ;;  %17011 = vst [vmem:[#allocation49_spill] sm:$0xff] %v14605_v2  ;;  %17012 = vst [vmem:[#allocation50_spill] sm:$0xff] %v14607_v1  ;;  %v1117_v37 = vpack.c.bf16 %v14607_v1, %v14605_v2  ;;  %v1461_v1 = vld [vmem:[#allocation2 + $0xa1] sm:$0xff] }
 0x346   : > { %3586 = vperm.xlu1 %12854, %v14589_v31  }
 0x347   : > { %3756 = vperm.xlu0 %12853, %v14603_v13   ;;  %v14647_v13 = vld [vmem:[#allocation2 + $0x118] sm:$0xff] }
 0x348   : > { %2914 = vmatmul.mubr.bf16.gmra.mrb[44].mxu0 %v1115_v0  ;;  %v14599_v0 = vld [vmem:[#allocation8 + $0x128] sm:$0xff]  ;;  %17020 = vst [vmem:[#allocation58_spill] sm:$0xff] %v14647_v13 }
 0x349   : > { %2921 = vmatprep.mubr.bf16.mxu0 %v1214_v7  ;;  %17009 = vst [vmem:[#allocation47_spill] sm:$0xff] %v14599_v0  ;;  %v1456_v7 = vld [vmem:[#allocation2 + $0x79] sm:$0xff] }
 0x34a   : > { %v1500_v5 = vpack.c.bf16 %v1457_v50, %v1456_v7  ;;  %3751 = vperm.xlu1 %12854, %v14599_v0   ;;  %v14619_v50 = vld [vmem:[#allocation8 + $0x138] sm:$0xff]  ;;  %v1217_v7 = vpack.c.bf16 %v14357_v49, %v14351_v16  ;;  %v14649_v16 = vld [vmem:[#allocation8 + $0x50] sm:$0xff] }
 0x34b   : > { %17013 = vst [vmem:[#allocation51_spill] sm:$0xff] %v14619_v50  ;;  %3601 = vperm.xlu0 %12853, %v14615_v30   ;;  %v1463_v0 = vld [vmem:[#allocation2 + $0xb1] sm:$0xff] }
 0x34c   : > { %11480 = vmatprep.mubr.bf16.mxu1 %v1500_v5  ;;  %v14625_v5 = vld [vmem:[#allocation2 + $0x100] sm:$0xff] }
 0x34d   : > { %11481 = vmatmul.mubr.bf16.gmra.mrb[8].mxu1 %v1501_v62  ;;  %v14623_v62 = vld [vmem:[#allocation8 + $0x140] sm:$0xff]  ;;  %17015 = vst [vmem:[#allocation53_spill] sm:$0xff] %v14625_v5 }
 0x34e   : > { %3596 = vperm.xlu1 %12854, %v14609_v24   ;;  %17014 = vst [vmem:[#allocation52_spill] sm:$0xff] %v14623_v62 }
 0x34f   : > { %3766 = vperm.xlu0 %12853, %v14623_v62  }
 0x350   : > { %2922 = vmatmul.mubr.bf16.gmra.mrb[48].mxu0 %v1116_v4  ;;  %v14627_v4 = vld [vmem:[#allocation2 + $0x108] sm:$0xff] }
 0x351   : > { %2929 = vmatprep.mubr.bf16.mxu0 %v1215_v34  ;;  %17016 = vst [vmem:[#allocation54_spill] sm:$0xff] %v14627_v4  ;;  %v14629_v34 = vld [vmem:[#allocation8 + $0x40] sm:$0xff]  ;;  %v1118_v39 = vpack.c.bf16 %v14627_v4, %v14625_v5  ;;  %v14643_v4 = vld [vmem:[#allocation8 + $0x150] sm:$0xff] }
 0x352   : > { %3761 = vperm.xlu1 %12854, %v14619_v50   ;;  %v1462_v50 = vld [vmem:[#allocation2 + $0xa9] sm:$0xff]  ;;  %17018 = vst [vmem:[#allocation56_spill] sm:$0xff] %v14643_v4 }
 0x353   : > { %3611 = vperm.xlu0 %12853, %v14635_v12   ;;  %v1503_v62 = vpack.c.bf16 %v1463_v0, %v1462_v50  ;;  %v14645_v5 = vld [vmem:[#allocation2 + $0x110] sm:$0xff]  ;;  %v1218_v0 = vpack.c.bf16 %v14365_v17, %v14359_v48  ;;  %v14659_v50 = vld [vmem:[#allocation8 + $0x158] sm:$0xff]  ;;  %v14675_v17 = vld [vmem:[#allocation8 + $0x68] sm:$0xff] }
 0x354   : > { %17019 = vst [vmem:[#allocation57_spill] sm:$0xff] %v14645_v5  ;;  %v1119_v49 = vpack.c.bf16 %v14647_v13, %v14645_v5  ;;  %17021 = vst [vmem:[#allocation59_spill] sm:$0xff] %v14659_v50  ;;  %v1465_v13 = vld [vmem:[#allocation2 + $0xc1] sm:$0xff] }
 0x356   : > { %3606 = vperm.xlu1 %12854, %v14629_v34  }
 0x357   : > { %3776 = vperm.xlu0 %12853, %v14643_v4   ;;  %v14687_v4 = vld [vmem:[#allocation2 + $0x138] sm:$0xff] }
 0x358   : > { %2930 = vmatmul.mubr.bf16.gmra.mrb[52].mxu0 %v1117_v37  ;;  %v14639_v37 = vld [vmem:[#allocation8 + $0x148] sm:$0xff]  ;;  %17027 = vst [vmem:[#allocation65_spill] sm:$0xff] %v14687_v4 }
 0x359   : > { %2937 = vmatprep.mubr.bf16.mxu0 %v1216_v15  ;;  %17017 = vst [vmem:[#allocation55_spill] sm:$0xff] %v14639_v37  ;;  %v1460_v15 = vld [vmem:[#allocation2 + $0x99] sm:$0xff] }
 0x35a   : > { %v1502_v2 = vpack.c.bf16 %v1461_v1, %v1460_v15  ;;  %3771 = vperm.xlu1 %12854, %v14639_v37   ;;  %v14655_v1 = vld [vmem:[#allocation8 + $0x58] sm:$0xff]  ;;  %v1219_v15 = vpack.c.bf16 %v14373_v60, %v14367_v54  ;;  %v14689_v54 = vld [vmem:[#allocation8 + $0x70] sm:$0xff] }
 0x35b   : > { %3621 = vperm.xlu0 %12853, %v14655_v1   ;;  %v1467_v37 = vld [vmem:[#allocation2 + $0xd1] sm:$0xff] }
 0x35c   : > { %11484 = vmatprep.mubr.bf16.mxu1 %v1502_v2  ;;  %v14663_v2 = vld [vmem:[#allocation8 + $0x160] sm:$0xff] }
 0x35d   : > { %11485 = vmatmul.mubr.bf16.gmra.mrb[12].mxu1 %v1503_v62  ;;  %17022 = vst [vmem:[#allocation60_spill] sm:$0xff] %v14663_v2  ;;  %v14665_v62 = vld [vmem:[#allocation2 + $0x120] sm:$0xff] }
 0x35e   : > { %3616 = vperm.xlu1 %12854, %v14649_v16   ;;  %17023 = vst [vmem:[#allocation61_spill] sm:$0xff] %v14665_v62 }
 0x35f   : > { %3786 = vperm.xlu0 %12853, %v14663_v2  }
 0x360   : > { %2938 = vmatmul.mubr.bf16.gmra.mrb[56].mxu0 %v1118_v39  ;;  %v14667_v39 = vld [vmem:[#allocation2 + $0x128] sm:$0xff] }
 0x361   : > { %2945 = vmatprep.mubr.bf16.mxu0 %v1217_v7  ;;  %17024 = vst [vmem:[#allocation62_spill] sm:$0xff] %v14667_v39  ;;  %v14669_v7 = vld [vmem:[#allocation8 + $0x60] sm:$0xff]  ;;  %v1120_v48 = vpack.c.bf16 %v14667_v39, %v14665_v62  ;;  %v14683_v39 = vld [vmem:[#allocation8 + $0x170] sm:$0xff] }
 0x362   : > { %3781 = vperm.xlu1 %12854, %v14659_v50   ;;  %v1466_v50 = vld [vmem:[#allocation2 + $0xc9] sm:$0xff] }
 0x363   : > { %3631 = vperm.xlu0 %12853, %v14675_v17   ;;  %v1505_v2 = vpack.c.bf16 %v1467_v37, %v1466_v50  ;;  %v14685_v62 = vld [vmem:[#allocation2 + $0x130] sm:$0xff]  ;;  %v1220_v37 = vpack.c.bf16 %v14381_v3, %v14375_v21  ;;  %v14699_v50 = vld [vmem:[#allocation8 + $0x178] sm:$0xff] }
 0x364   : > { %17026 = vst [vmem:[#allocation64_spill] sm:$0xff] %v14685_v62  ;;  %v1121_v60 = vpack.c.bf16 %v14687_v4, %v14685_v62  ;;  %v1470_v62 = vld [vmem:[#allocation2 + $0xe9] sm:$0xff] }
 0x366   : > { %3626 = vperm.xlu1 %12854, %v14669_v7  }
 0x367   : > { %3796 = vperm.xlu0 %12853, %v14683_v39  }
 0x368   : > { %2946 = vmatmul.mubr.bf16.gmra.mrb[60].mxu0 %v1119_v49  ;;  %v14679_v49 = vld [vmem:[#allocation8 + $0x168] sm:$0xff] }
 0x369   : > { %2953 = vmatprep.mubr.bf16.mxu0 %v1218_v0  ;;  %17025 = vst [vmem:[#allocation63_spill] sm:$0xff] %v14679_v49  ;;  %v1464_v0 = vld [vmem:[#allocation2 + $0xb9] sm:$0xff] }
 0x36a   : > { %v1504_v5 = vpack.c.bf16 %v1465_v13, %v1464_v0  ;;  %3791 = vperm.xlu1 %12854, %v14679_v49   ;;  %v14695_v13 = vld [vmem:[#allocation8 + $0x78] sm:$0xff]  ;;  %v14707_v0 = vld [vmem:[#allocation8 + $0x80] sm:$0xff] }
 0x36b   : > { %3641 = vperm.xlu0 %12853, %v14695_v13   ;;  %v1471_v49 = vld [vmem:[#allocation2 + $0xf1] sm:$0xff] }
 0x36c   : > { %11488 = vmatprep.mubr.bf16.mxu1 %v1504_v5  ;;  %v14704_v5 = vld [vmem:[#allocation2 + $0x148] sm:$0xff]  ;;  %v1507_v21 = vpack.c.bf16 %v1471_v49, %v1470_v62  ;;  %v14719_v62 = vld [vmem:[#allocation2 + $0x158] sm:$0xff] }
 0x36d   : > { %11489 = vmatmul.mubr.bf16.gmra.mrb[16].mxu1 %v1505_v2  ;;  %v1468_v2 = vld [vmem:[#allocation2 + $0xd9] sm:$0xff]  ;;  %v1474_v49 = vld [vmem:[#allocation2 + $0x109] sm:$0xff] }
 0x36e   : > { %3636 = vperm.xlu1 %12854, %v14689_v54  }
 0x36f   : > { %6795 = vperm.xlu0 %12853, %v14549_v9  }
 0x370   : > { %2954 = vmatmul.mubr.bf16.gmra.mrb[64].mxu0 %v1120_v48  ;;  %v14701_v48 = vld [vmem:[#allocation2 + $0x140] sm:$0xff] }
 0x371   : > { %2961 = vmatprep.mubr.bf16.mxu0 %v1219_v15  ;;  %v1469_v15 = vld [vmem:[#allocation2 + $0xe1] sm:$0xff]  ;;  %v1122_v3 = vpack.c.bf16 %v14704_v5, %v14701_v48 }
 0x372   : > { %3801 = vperm.xlu1 %12854, %v14699_v50   ;;  %v1506_v4 = vpack.c.bf16 %v1469_v15, %v1468_v2  ;;  %v1475_v2 = vld [vmem:[#allocation2 + $0x111] sm:$0xff] }
 0x373   : > { %6805 = vperm.xlu0 %12853, %v14569_v19   ;;  %v1473_v19 = vld [vmem:[#allocation2 + $0x101] sm:$0xff]  ;;  %v1509_v15 = vpack.c.bf16 %v1475_v2, %v1474_v49  ;;  %v1486_v49 = vld [vmem:[#allocation2 + $0x169] sm:$0xff]  ;;  %v1487_v2 = vld [vmem:[#allocation2 + $0x171] sm:$0xff] }
 0x374   : > { %11492 = vmatprep.mubr.bf16.mxu1 %v1506_v4  ;;  %v14731_v4 = vld [vmem:[#allocation2 + $0x168] sm:$0xff] }
 0x375   : > { %11493 = vmatmul.mubr.bf16.gmra.mrb[20].mxu1 %v1507_v21  ;;  %v1478_v21 = vld [vmem:[#allocation2 + $0x129] sm:$0xff] }
 0x376   : > { %3646 = vperm.xlu1 %12854, %v14707_v0  }
 0x377   : > { %6815 = vperm.xlu0 %12853, %v14589_v31  }
 0x378   : > { %2962 = vmatmul.mubr.bf16.gmra.mrb[68].mxu0 %v1121_v60  ;;  %v1221_v60 = vpack.c.bf16 %v14389_v25, %v14383_v22  ;;  %v1222_v22 = vpack.c.bf16 %v14396_v32, %v14391_v26  ;;  %v14728_v25 = vld [vmem:[#allocation2 + $0x160] sm:$0xff]  ;;  %v1223_v32 = vpack.c.bf16 %v14402_v42, %v14398_v35 }
 0x379   : > { %2969 = vmatprep.mubr.bf16.mxu0 %v1220_v37  ;;  %v14717_v37 = vld [vmem:[#allocation2 + $0x150] sm:$0xff]  ;;  %v1124_v26 = vpack.c.bf16 %v14731_v4, %v14728_v25  ;;  %v1476_v42 = vld [vmem:[#allocation2 + $0x119] sm:$0xff] }
 0x37a   : > { %6800 = vperm.xlu1 %12854, %v14555_v59   ;;  %v1123_v9 = vpack.c.bf16 %v14719_v62, %v14717_v37  ;;  %v1472_v59 = vld [vmem:[#allocation2 + $0xf9] sm:$0xff] }
 0x37b   : > { %6825 = vperm.xlu0 %12853, %v14609_v24   ;;  %v1508_v31 = vpack.c.bf16 %v1473_v19, %v1472_v59  ;;  %v14743_v24 = vld [vmem:[#allocation2 + $0x189] sm:$0xff]  ;;  %v1253_v59 = vld [vmem:[#allocation2 + $0x3f] sm:$0xff] }
 0x37c   : > { %v1224_v35 = vpack.c.bf16 %v14743_v24, %v14404_v45  ;;  %v13105_v45 = vld [vmem:[#allocation2 + $0x188] sm:$0xff] }
 0x37d   : > { %11496 = vmatprep.mubr.bf16.mxu1 %v1508_v31  ;;  %v1482_v19 = vld [vmem:[#allocation2 + $0x149] sm:$0xff]  ;;  %v1483_v31 = vld [vmem:[#allocation2 + $0x151] sm:$0xff] }
 0x37e   : > { %6810 = vperm.xlu1 %12854, %v14575_v23   ;;  %11497 = vmatmul.mubr.bf16.gmra.mrb[24].mxu1 %v1509_v15  ;;  %v14741_v23 = vld [vmem:[#allocation2 + $0x170] sm:$0xff]  ;;  %v17029_v15 = vld [vmem:[#allocation31_spill] sm:$0xff] }
 0x37f   : > { %6835 = vperm.xlu0 %12853, %v14629_v34  }
 0x380   : > { %2970 = vmatmul.mubr.bf16.gmra.mrb[72].mxu0 %v1122_v3  ;;  %v14754_v3 = vld [vmem:[#allocation2 + $0x191] sm:$0xff] }
 0x381   : > { %2977 = vmatprep.mubr.bf16.mxu0 %v1221_v60 }
 0x382   : > { %6820 = vperm.xlu1 %12854, %v14595_v11   ;;  %v1099_v11 = vld [vmem:[#allocation2 + $0x178] sm:$0xff] }
 0x383   : > { %6845 = vperm.xlu0 %12853, %v14649_v16   ;;  %v1125_v34 = vpack.c.bf16 %v1099_v11, %v14741_v23  ;;  %v1489_v11 = vld [vmem:[#allocation2 + $0x181] sm:$0xff] }
 0x386   : > { %6830 = vperm.xlu1 %12854, %v14615_v30   ;;  %v1477_v30 = vld [vmem:[#allocation2 + $0x121] sm:$0xff] }
 0x387   : > { %6855 = vperm.xlu0 %12853, %v14669_v7   ;;  %v1510_v16 = vpack.c.bf16 %v1477_v30, %v1476_v42  ;;  %v1479_v7 = vld [vmem:[#allocation2 + $0x131] sm:$0xff] }
 0x388   : > { %2978 = vmatmul.mubr.bf16.gmra.mrb[76].mxu0 %v1123_v9  ;;  %v1511_v60 = vpack.c.bf16 %v1479_v7, %v1478_v21  ;;  %v12947_v9 = vld [vmem:[%s13953_s30 + $0xb8] sm:$0xff]  ;;  %v17033_v42 = vld [vmem:[#allocation52_spill] sm:$0xff]  ;;  %v17036_v7 = vld [vmem:[#allocation34_spill] sm:$0xff] }
 0x389   : > { %2985 = vmatprep.mubr.bf16.mxu0 %v1222_v22  ;;  %11500 = vmatprep.mubr.bf16.mxu1 %v1510_v16  ;;  %v1480_v22 = vld [vmem:[#allocation2 + $0x139] sm:$0xff]  ;;  %v17034_v16 = vld [vmem:[#allocation51_spill] sm:$0xff] }
 0x38a   : > { %6840 = vperm.xlu1 %12854, %v14635_v12   ;;  %v14752_v12 = vld [vmem:[#allocation2 + $0x180] sm:$0xff]  ;;  %11501 = vmatmul.mubr.bf16.gmra.mrb[28].mxu1 %v1511_v60  ;;  %v17035_v21 = vld [vmem:[#allocation33_spill] sm:$0xff]  ;;  %v17037_v60 = vmov 0  }
 0x38b   : > { %6865 = vperm.xlu0 %12853, %v14689_v54   ;;  %v1126_v54 = vpack.c.bf16 %v13105_v45, %v14752_v12  ;;  %v17038_v45 = vld [vmem:[#allocation56_spill] sm:$0xff] }
 0x38e   : > { %6850 = vperm.xlu1 %12854, %v14655_v1   ;;  %v1201_v1 = vld [vmem:[#allocation2 + $0x199] sm:$0xff] }
 0x38f   : > { %6875 = vperm.xlu0 %12853, %v14707_v0   ;;  %v1398_v0 = vpack.c.bf16 %v14419_v18, %v14412_v6  ;;  %v1399_v6 = vpack.c.bf16 %v14429_v40, %v14421_v38  ;;  %v1254_v18 = vld [vmem:[#allocation2 + $0x47] sm:$0xff]  ;;  %v1256_v38 = vld [vmem:[#allocation2 + $0x57] sm:$0xff] }
 0x390   : > { %2986 = vmatmul.mubr.bf16.gmra.mrb[80].mxu0 %v1124_v26  ;;  %v1484_v40 = vld [vmem:[#allocation2 + $0x159] sm:$0xff]  ;;  %v17030_v26 = vld [vmem:[#allocation32_spill] sm:$0xff] }
 0x391   : > { %2993 = vmatprep.mubr.bf16.mxu0 %v1223_v32  ;;  %v17031_v32 = vld [vmem:[#allocation48_spill] sm:$0xff] }
 0x392   : > { %6860 = vperm.xlu1 %12854, %v14675_v17   ;;  %v1225_v17 = vpack.c.bf16 %v1201_v1, %v14754_v3  ;;  %v1403_v1 = vpack.c.bf16 %v17036_v7, %v17035_v21  ;;  %v1272_v21 = vld [vmem:[#allocation2 + $0xd7] sm:$0xff]  ;;  %v1273_v7 = vld [vmem:[#allocation2 + $0xdf] sm:$0xff] }
 0x393   : > { %6885 = vperm.xlu0 %12853, %v14480_v46   ;;  %v1481_v46 = vld [vmem:[#allocation2 + $0x141] sm:$0xff] }
 0x396   : > { %6870 = vperm.xlu1 %12854, %v14695_v13   ;;  %v1252_v13 = vld [vmem:[#allocation2 + $0x37] sm:$0xff] }
 0x397   : > { %6895 = vperm.xlu0 %12853, %v14472_v47   ;;  %v1513_v47 = vpack.c.bf16 %v1483_v31, %v1482_v19  ;;  %v1264_v19 = vld [vmem:[#allocation2 + $0x97] sm:$0xff]  ;;  %v17044_v31 = vld [vmem:[#allocation63_spill] sm:$0xff] }
 0x398   : > { %2994 = vmatmul.mubr.bf16.gmra.mrb[84].mxu0 %v1125_v34  ;;  %v1261_v34 = vld [vmem:[#allocation2 + $0x7f] sm:$0xff] }
 0x399   : > { %3001 = vmatprep.mubr.bf16.mxu0 %v1224_v35 }
 0x39a   : > { %6880 = vperm.xlu1 %12854, %v14482_v51   ;;  %v1512_v51 = vpack.c.bf16 %v1481_v46, %v1480_v22  ;;  %v12952_v22 = vld [vmem:[#allocation13 + $0x10] sm:$0xff]   ;;  %v17042_v46 = vld [vmem:[#allocation35_spill] sm:$0xff] }
 0x39b   : > { %6905 = vperm.xlu0 %12853, %v14493_v55  }
 0x39c   : > { %11504 = vmatprep.mubr.bf16.mxu1 %v1512_v51 }
 0x39d   : > { %11505 = vmatmul.mubr.bf16.gmra.mrb[32].mxu1 %v1513_v47  ;;  %v12953_v47 = vld [vmem:[#allocation13 + $0x18] sm:$0xff]  }
 0x39e   : > { %6890 = vperm.xlu1 %12854, %v14461_v14   ;;  %v1300_v14 = vpack.c.bf16 %v1253_v59, %v1252_v13  ;;  %v17041_v13 = vld [vmem:[#allocation59_spill] sm:$0xff]  ;;  %v17043_v59 = vld [vmem:[#allocation36_spill] sm:$0xff] }
 0x39f   : > { %6915 = vperm.xlu0 %12853, %v14504_v29   ;;  %v1485_v29 = vld [vmem:[#allocation2 + $0x161] sm:$0xff]  ;;  %v1404_v51 = vpack.c.bf16 %v17043_v59, %v17042_v46  ;;  %v17056_v59 = vld [vmem:[#allocation53_spill] sm:$0xff] }
 0x3a0   : > { %3002 = vmatmul.mubr.bf16.gmra.mrb[88].mxu0 %v1126_v54  ;;  %v17039_v54 = vld [vmem:[#allocation55_spill] sm:$0xff]  ;;  %v17055_v46 = vld [vmem:[#allocation50_spill] sm:$0xff] }
 0x3a1   : > { %3009 = vmatprep.mubr.bf16.mxu0 %v1225_v17  ;;  %v12951_v17 = vld [vmem:[#allocation13 + $0x8] sm:$0xff]  }
 0x3a2   : > { %6900 = vperm.xlu1 %12854, %v14465_v33   ;;  %v1255_v33 = vld [vmem:[#allocation2 + $0x4f] sm:$0xff] }
 0x3a3   : > { %6925 = vperm.xlu0 %12853, %v14515_v27   ;;  %v1301_v55 = vpack.c.bf16 %v1255_v33, %v1254_v18  ;;  %v1514_v27 = vpack.c.bf16 %v1485_v29, %v1484_v40  ;;  %v1265_v18 = vld [vmem:[#allocation2 + $0x9f] sm:$0xff] }
 0x3a4   : > { %v1306_v40 = vpack.c.bf16 %v1265_v18, %v1264_v19  ;;  %v17045_v29 = vld [vmem:[#allocation37_spill] sm:$0xff] }
 0x3a5   : > { %11508 = vmatprep.mubr.bf16.mxu1 %v1514_v27  ;;  %v1277_v18 = vld [vmem:[#allocation2 + $0xff] sm:$0xff] }
 0x3a6   : > { %6910 = vperm.xlu1 %12854, %v14491_v52   ;;  %v1400_v52 = vpack.c.bf16 %v14439_v41, %v14431_v36  ;;  %v1401_v36 = vpack.c.bf16 %v14449_v58, %v14441_v28  ;;  %v1258_v41 = vld [vmem:[#allocation2 + $0x67] sm:$0xff] }
 0x3a7   : > { %6935 = vperm.xlu0 %12853, %v14528_v57   ;;  %v1515_v57 = vpack.c.bf16 %v1487_v2, %v1486_v49  ;;  %v17032_v28 = vld [vmem:[#allocation47_spill] sm:$0xff] }
 0x3a8   : > { %3010 = vmatmul.mubr.bf16.gmra.mrb[92].mxu0 %v12947_v9  ;;  %v12950_v58 = vld [vmem:[#allocation13] sm:$0xff]   ;;  %v17040_v9 = vld [vmem:[#allocation60_spill] sm:$0xff] }
 0x3a9   : > { %3050 = vmatprep.mubr.bf16.mxu0 %v1398_v0  ;;  %11509 = vmatmul.mubr.bf16.gmra.mrb[36].mxu1 %v1515_v57  ;;  %v12955_v49 = vld [vmem:[#allocation13 + $0x28] sm:$0xff]  }
 0x3aa   : > { %6920 = vperm.xlu1 %12854, %v14502_v61   ;;  %v1257_v61 = vld [vmem:[#allocation2 + $0x5f] sm:$0xff]  ;;  %v1266_v2 = vld [vmem:[#allocation2 + $0xa7] sm:$0xff]  ;;  %v1267_v57 = vld [vmem:[#allocation2 + $0xaf] sm:$0xff] }
 0x3ab   : > { %6945 = vperm.xlu0 %12853, %v14539_v43  }
 0x3ae   : > { %6930 = vperm.xlu1 %12854, %v14513_v10   ;;  %v1302_v10 = vpack.c.bf16 %v1257_v61, %v1256_v38  ;;  %v17046_v61 = vld [vmem:[#allocation38_spill] sm:$0xff] }
 0x3af   : > { %6955 = vperm.xlu0 %12853, %v14543_v20   ;;  %v17028_v20 = vld [vmem:[#allocation44_spill] sm:$0xff]  ;;  %v1405_v27 = vpack.c.bf16 %v17046_v61, %v17045_v29  ;;  %v1278_v29 = vld [vmem:[#allocation2 + $0x107] sm:$0xff] }
 0x3b0   : > { %3051 = vmatmul.mubr.bf16.vlgmr.msra.gmra.mrb[0].mxu0 %v1300_v14  ;;  %v1492_v14 = vld [vmem:[#allocation2 + $0x199] sm:$0xff]  ;;  %v1279_v61 = vld [vmem:[#allocation2 + $0x10f] sm:$0xff] }
 0x3b1   : > { %3058 = vmatprep.mubr.bf16.mxu0 %v1399_v6  ;;  %5573 = vmatpush1.bf16.msra.mxu0 %v12950_v58  ;;  %v1493_v6 = vld [vmem:[#allocation2 + $0x1a1] sm:$0xff] }
 0x3b2   : > { %6940 = vperm.xlu1 %12854, %v14522_v56   ;;  %v1259_v56 = vld [vmem:[#allocation2 + $0x6f] sm:$0xff]  ;;  %5574 = vmatprep.subr.bf16.mxu0 %v17037_v60  ;;  %v1518_v33 = vpack.c.bf16 %v1493_v6, %v1492_v14  ;;  %v12966_v14 = vld [vmem:[#allocation13 + $0x78] sm:$0xff]  }
 0x3b3   : > { %6965 = vperm.xlu0 %12853, %v14563_v63   ;;  %v1303_v43 = vpack.c.bf16 %v1259_v56, %v1258_v41  ;;  %v1488_v63 = vld [vmem:[#allocation2 + $0x179] sm:$0xff]  ;;  %v17047_v41 = vld [vmem:[#allocation39_spill] sm:$0xff] }
 0x3b4   : > { %v1516_v35 = vpack.c.bf16 %v1489_v11, %v1488_v63  ;;  %v12959_v63 = vld [vmem:[#allocation13 + $0x48] sm:$0xff]   ;;  %v1276_v6 = vld [vmem:[#allocation2 + $0xf7] sm:$0xff] }
 0x3b5   : > { %5575 = vmatpush1.bf16.msra.mxu0 %v12951_v17  ;;  %v1270_v11 = vld [vmem:[#allocation2 + $0xc7] sm:$0xff]  ;;  %v17054_v17 = vld [vmem:[#allocation49_spill] sm:$0xff] }
 0x3b6   : > { %6950 = vperm.xlu1 %12854, %v14535_v8   ;;  %v1402_v8 = vpack.c.bf16 %v17030_v26, %v17029_v15  ;;  %11512 = vmatprep.mubr.bf16.mxu1 %v1516_v35  ;;  %v1269_v15 = vld [vmem:[#allocation2 + $0xbf] sm:$0xff] }
 0x3b7   : > { %6975 = vperm.xlu0 %12853, %v14583_v53   ;;  %v1517_v53 = vpack.c.bf16 %v14754_v3, %v14743_v24  ;;  %v1262_v24 = vld [vmem:[#allocation2 + $0x87] sm:$0xff]  ;;  %v1263_v3 = vld [vmem:[#allocation2 + $0x8f] sm:$0xff]  ;;  %5576 = vmatprep.subr.bf16.mxu0 %v17037_v60 }
 0x3b8   : > { %3059 = vmatmul.mubr.bf16.gmra.mrb[4].mxu0 %v1301_v55  ;;  %v1305_v0 = vpack.c.bf16 %v1263_v3, %v1262_v24  ;;  %v1494_v55 = vld [vmem:[#allocation2 + $0x1a9] sm:$0xff] }
 0x3b9   : > { %3066 = vmatprep.mubr.bf16.mxu0 %v1400_v52  ;;  %11513 = vmatmul.mubr.bf16.gmra.mrb[40].mxu1 %v1517_v53  ;;  %v1495_v52 = vld [vmem:[#allocation2 + $0x1b1] sm:$0xff]  ;;  %v12958_v26 = vld [vmem:[#allocation13 + $0x40] sm:$0xff]  }
 0x3ba   : > { %6960 = vperm.xlu1 %12854, %v14559_v44   ;;  %v1260_v44 = vld [vmem:[#allocation2 + $0x77] sm:$0xff]  ;;  %5577 = vmatpush1.bf16.msra.mxu0 %v12952_v22  ;;  %v1519_v38 = vpack.c.bf16 %v1495_v52, %v1494_v55  ;;  %v17051_v53 = vld [vmem:[#allocation43_spill] sm:$0xff]  ;;  %v1312_v55 = vpack.c.bf16 %v1277_v18, %v1276_v6  ;;  %v17057_v52 = vld [vmem:[#allocation54_spill] sm:$0xff]  ;;  %v1417_v18 = vpack.c.bf16 %v14741_v23, %v14731_v4 }
 0x3bb   : > { %6985 = vperm.xlu0 %12853, %v17031_v32   ;;  %v1304_v30 = vpack.c.bf16 %v1261_v34, %v1260_v44  ;;  %5578 = vmatprep.subr.bf16.mxu0 %v17037_v60  ;;  %v17049_v32 = vld [vmem:[#allocation41_spill] sm:$0xff]  ;;  %v1271_v44 = vld [vmem:[#allocation2 + $0xcf] sm:$0xff] }
 0x3bc   : > { %11516 = vmatprep.mubr.bf16.mxu1 %v1518_v33  ;;  %v12960_v34 = vld [vmem:[#allocation13 + $0x50] sm:$0xff]   ;;  %v1309_v35 = vpack.c.bf16 %v1271_v44, %v1270_v11  ;;  %v12963_v3 = vld [vmem:[#allocation13 + $0x68] sm:$0xff]   ;;  %v14870_v44 = vld [vmem:[#allocation13 + $0x98] sm:$0xff]  }
 0x3bd   : > { %v12964_v22 = vld [vmem:[#allocation13 + $0x70] sm:$0xff]  }
 0x3be   : > { %6970 = vperm.xlu1 %12854, %v17028_v20   ;;  %5579 = vmatpush1.bf16.msra.mxu0 %v12953_v47  ;;  %v1268_v20 = vld [vmem:[#allocation2 + $0xb7] sm:$0xff] }
 0x3bf   : > { %6995 = vperm.xlu0 %12853, %v17033_v42   ;;  %5580 = vmatprep.subr.bf16.mxu0 %v17037_v60  ;;  %v17052_v42 = vld [vmem:[#allocation45_spill] sm:$0xff] }
 0x3c0   : > { %3067 = vmatmul.mubr.bf16.gmra.mrb[8].mxu0 %v1302_v10  ;;  %v1307_v10 = vpack.c.bf16 %v1267_v57, %v1266_v2  ;;  %v17060_v2 = vld [vmem:[#allocation61_spill] sm:$0xff] }
 0x3c1   : > { %3074 = vmatprep.mubr.bf16.mxu0 %v1401_v36  ;;  %11517 = vmatmul.mubr.bf16.gmra.mrb[44].mxu1 %v1519_v38  ;;  %v12956_v36 = vld [vmem:[#allocation13 + $0x30] sm:$0xff]  }
 0x3c2   : > { %6980 = vperm.xlu1 %12854, %v17032_v28   ;;  %v17050_v28 = vld [vmem:[#allocation42_spill] sm:$0xff]  ;;  %v17058_v38 = vld [vmem:[#allocation57_spill] sm:$0xff] }
 0x3c3   : > { %7005 = vperm.xlu0 %12853, %v17038_v45   ;;  %v1407_v58 = vpack.c.bf16 %v17050_v28, %v17049_v32  ;;  %v1310_v45 = vpack.c.bf16 %v1273_v7, %v1272_v21  ;;  %v17062_v32 = vld [vmem:[#allocation64_spill] sm:$0xff] }
 0x3c4   : > { %v1284_v7 = vld [vmem:[#allocation2 + $0x137] sm:$0xff] }
 0x3c6   : > { %6990 = vperm.xlu1 %12854, %v17034_v16   ;;  %v12961_v16 = vld [vmem:[#allocation13 + $0x58] sm:$0xff]  }
 0x3c7   : > { %7015 = vperm.xlu0 %12853, %v17040_v9   ;;  %v1274_v9 = vld [vmem:[#allocation2 + $0xe7] sm:$0xff] }
 0x3c8   : > { %3075 = vmatmul.mubr.bf16.gmra.mrb[12].mxu0 %v1303_v43  ;;  %v12957_v43 = vld [vmem:[#allocation13 + $0x38] sm:$0xff]  }
 0x3c9   : > { %3082 = vmatprep.mubr.bf16.mxu0 %v1402_v8  ;;  %v1308_v8 = vpack.c.bf16 %v1269_v15, %v1268_v20  ;;  %v1281_v20 = vld [vmem:[#allocation2 + $0x11f] sm:$0xff] }
 0x3ca   : > { %7000 = vperm.xlu1 %12854, %v17039_v54   ;;  %v17053_v54 = vld [vmem:[#allocation46_spill] sm:$0xff] }
 0x3cb   : > { %7025 = vperm.xlu0 %12853, %v14683_v39   ;;  %v12954_v39 = vld [vmem:[#allocation13 + $0x20] sm:$0xff]   ;;  %v1409_v24 = vpack.c.bf16 %v17054_v17, %v17053_v54  ;;  %v14890_v54 = vld [vmem:[#allocation13 + $0xa8] sm:$0xff]  }
 0x3cc   : > { %5581 = vmatpush1.bf16.msra.mxu0 %v12954_v39  ;;  %v14846_v39 = vld [vmem:[#allocation13 + $0x80] sm:$0xff]  }
 0x3cd   : > { %5582 = vmatprep.subr.bf16.mxu0 %v17037_v60  ;;  %11728 = vmatpush1.bf16.msra.mxu1 %v14846_v39  ;;  %v1286_v17 = vld [vmem:[#allocation2 + $0x147] sm:$0xff] }
 0x3ce   : > { %7010 = vperm.xlu1 %12854, %v17041_v13   ;;  %11713 = vmatprep.subr.bf16.mxu1 %v17037_v60 }
 0x3d0   : > { %3083 = vmatmul.mubr.bf16.gmra.mrb[16].mxu0 %v1304_v30  ;;  %v1408_v30 = vpack.c.bf16 %v17052_v42, %v17051_v53  ;;  %v14877_v42 = vld [vmem:[#allocation13 + $0xa0] sm:$0xff]  }
 0x3d1   : > { %3090 = vmatprep.mubr.bf16.mxu0 %v1403_v1  ;;  %5583 = vmatpush1.bf16.msra.mxu0 %v12955_v49  ;;  %v12962_v1 = vld [vmem:[#allocation13 + $0x60] sm:$0xff]  }
 0x3d2   : > { %7020 = vperm.xlu1 %12854, %v17044_v31   ;;  %5584 = vmatprep.subr.bf16.mxu0 %v17037_v60  ;;  %v17059_v49 = vld [vmem:[#allocation58_spill] sm:$0xff] }
 0x3d3   : > { %v1412_v57 = vpack.c.bf16 %v17060_v2, %v17059_v49 }
 0x3d5   : > { %5585 = vmatpush1.bf16.msra.mxu0 %v12956_v36  ;;  %v14854_v36 = vld [vmem:[#allocation13 + $0x88] sm:$0xff]  }
 0x3d6   : > { %7030 = vperm.xlu1 %12854, %v14699_v50   ;;  %v17048_v50 = vld [vmem:[#allocation40_spill] sm:$0xff]  ;;  %5586 = vmatprep.subr.bf16.mxu0 %v17037_v60 }
 0x3d7   : > { %v1406_v56 = vpack.c.bf16 %v17048_v50, %v17047_v41  ;;  %11729 = vmatpush1.bf16.msra.mxu1 %v14854_v36 }
 0x3d8   : > { %3091 = vmatmul.mubr.bf16.gmra.mrb[20].mxu0 %v1305_v0  ;;  %v1275_v0 = vld [vmem:[#allocation2 + $0xef] sm:$0xff]  ;;  %11714 = vmatprep.subr.bf16.mxu1 %v17037_v60 }
 0x3d9   : > { %3098 = vmatprep.mubr.bf16.mxu0 %v1404_v51  ;;  %5587 = vmatpush1.bf16.msra.mxu0 %v12957_v43  ;;  %v1311_v13 = vpack.c.bf16 %v1275_v0, %v1274_v9  ;;  %v1410_v51 = vpack.c.bf16 %v17056_v59, %v17055_v46  ;;  %v1280_v43 = vld [vmem:[#allocation2 + $0x117] sm:$0xff]  ;;  %v1416_v0 = vpack.c.bf16 %v14728_v25, %v14719_v62  ;;  %v1289_v62 = vld [vmem:[#allocation2 + $0x15f] sm:$0xff]  ;;  %v14914_v25 = vpop.permute.xlu1 %3671 }
 0x3da   : > { %5588 = vmatprep.subr.bf16.mxu0 %v17037_v60  ;;  %v1314_v15 = vpack.c.bf16 %v1281_v20, %v1280_v43  ;;  %v14909_v59 = vld [vmem:[#allocation13 + $0xb8] sm:$0xff]  }
 0x3dd   : > { %5589 = vmatpush1.bf16.msra.mxu0 %v12958_v26  ;;  %v14864_v26 = vld [vmem:[#allocation13 + $0x90] sm:$0xff]  }
 0x3de   : > { %5590 = vmatprep.subr.bf16.mxu0 %v17037_v60  ;;  %11730 = vmatpush1.bf16.msra.mxu1 %v14864_v26 }
 0x3df   : > { %11715 = vmatprep.subr.bf16.mxu1 %v17037_v60 }
 0x3e0   : > { %3099 = vmatmul.mubr.bf16.gmra.mrb[24].mxu0 %v1306_v40  ;;  %v1411_v40 = vpack.c.bf16 %v17058_v38, %v17057_v52  ;;  %v14922_v52 = vld [vmem:[#allocation13 + $0xc0] sm:$0xff]   ;;  %v14924_v38 = vpop.permute.xlu1 %3651 }
 0x3e1   : > { %3106 = vmatprep.mubr.bf16.mxu0 %v1405_v27  ;;  %5591 = vmatpush1.bf16.msra.mxu0 %v12959_v63  ;;  %v1313_v27 = vpack.c.bf16 %v1279_v61, %v1278_v29  ;;  %v1283_v63 = vld [vmem:[#allocation2 + $0x12f] sm:$0xff]  ;;  %v1390_v61 = vld [vmem:[#allocation2 + $0x178] sm:$0xff] }
 0x3e2   : > { %5592 = vmatprep.subr.bf16.mxu0 %v17037_v60  ;;  %11731 = vmatpush1.bf16.msra.mxu1 %v14870_v44  ;;  %v1291_v29 = vld [vmem:[#allocation2 + $0x16f] sm:$0xff]  ;;  %v1418_v23 = vpack.c.bf16 %v14752_v12, %v1390_v61  ;;  %v14973_v61 = vld [vmem:[#allocation13 + $0xe0] sm:$0xff]  }
 0x3e3   : > { %11716 = vmatprep.subr.bf16.mxu1 %v17037_v60 }
 0x3e4   : > { %v14933_v2 = vpop.permute.xlu1 %3676 }
 0x3e5   : > { %5593 = vmatpush1.bf16.msra.mxu0 %v12960_v34  ;;  %v17063_v34 = vld [vmem:[#allocation65_spill] sm:$0xff] }
 0x3e6   : > { %5594 = vmatprep.subr.bf16.mxu0 %v17037_v60  ;;  %11732 = vmatpush1.bf16.msra.mxu1 %v14877_v42 }
 0x3e7   : > { %11717 = vmatprep.subr.bf16.mxu1 %v17037_v60 }
 0x3e8   : > { %3107 = vmatmul.mubr.bf16.gmra.mrb[28].mxu0 %v1307_v10 }
 0x3e9   : > { %3114 = vmatprep.mubr.bf16.mxu0 %v1406_v56  ;;  %5595 = vmatpush1.bf16.msra.mxu0 %v12961_v16 }
 0x3ea   : > { %5596 = vmatprep.subr.bf16.mxu0 %v17037_v60  ;;  %11733 = vmatpush1.bf16.msra.mxu1 %v14890_v54 }
 0x3eb   : > { %11718 = vmatprep.subr.bf16.mxu1 %v17037_v60 }
 0x3ed   : > { %5597 = vmatpush1.bf16.msra.mxu0 %v12962_v1  ;;  %v1285_v1 = vld [vmem:[#allocation2 + $0x13f] sm:$0xff] }
 0x3ee   : > { %5598 = vmatprep.subr.bf16.mxu0 %v17037_v60 }
 0x3f0   : > { %3115 = vmatmul.mubr.bf16.gmra.mrb[32].mxu0 %v1308_v8  ;;  %v17061_v8 = vld [vmem:[#allocation62_spill] sm:$0xff] }
 0x3f1   : > { %3122 = vmatprep.mubr.bf16.mxu0 %v1407_v58  ;;  %5599 = vmatpush1.bf16.msra.mxu0 %v12963_v3  ;;  %v1413_v28 = vpack.c.bf16 %v17062_v32, %v17061_v8  ;;  %v1282_v58 = vld [vmem:[#allocation2 + $0x127] sm:$0xff]  ;;  %v14894_v3 = vpop.permute.xlu0 %3661  ;;  %v1292_v8 = vld [vmem:[#allocation2 + $0x177] sm:$0xff]  ;;  %v1293_v32 = vld [vmem:[#allocation2 + $0x17f] sm:$0xff] }
 0x3f2   : > { %5600 = vmatprep.subr.bf16.mxu0 %v17037_v60  ;;  %v1315_v11 = vpack.c.bf16 %v1283_v63, %v1282_v58  ;;  %v1393_v58 = vld [vmem:[#allocation2 + $0x190] sm:$0xff]  ;;  %v14947_v63 = vpop.permute.xlu1 %3686 }
 0x3f3   : > { %17065 = vst [vmem:[#allocation31_spill] sm:$0xff] %v14947_v63 }
 0x3f5   : > { %5601 = vmatpush1.bf16.msra.mxu0 %v12964_v22  ;;  %v14900_v22 = vld [vmem:[#allocation13 + $0xb0] sm:$0xff]   ;;  %v14906_v46 = vpop.permute.xlu0 %3666 }
 0x3f6   : > { %5602 = vmatprep.subr.bf16.mxu0 %v17037_v60  ;;  %11734 = vmatpush1.bf16.msra.mxu1 %v14900_v22 }
 0x3f7   : > { %11719 = vmatprep.subr.bf16.mxu1 %v17037_v60 }
 0x3f8   : > { %3123 = vmatmul.mubr.bf16.gmra.mrb[36].mxu0 %v1309_v35  ;;  %v1414_v35 = vpack.c.bf16 %v14701_v48, %v17063_v34  ;;  %v1316_v48 = vpack.c.bf16 %v1285_v1, %v1284_v7  ;;  %v14949_v34 = vld [vmem:[#allocation13 + $0xd0] sm:$0xff]   ;;  %v1294_v1 = vld [vmem:[#allocation2 + $0x187] sm:$0xff] }
 0x3f9   : > { %3130 = vmatprep.mubr.bf16.mxu0 %v1408_v30  ;;  %5603 = vmatpush1.bf16.msra.mxu0 %v12966_v14  ;;  %v1288_v14 = vld [vmem:[#allocation2 + $0x157] sm:$0xff] }
 0x3fa   : > { %5797 = vmatprep.subr.bf16.mxu0 %v17037_v60  ;;  %v1318_v6 = vpack.c.bf16 %v1289_v62, %v1288_v14  ;;  %11735 = vmatpush1.bf16.msra.mxu1 %v14909_v59  ;;  %v14963_v62 = vld [vmem:[#allocation13 + $0xd8] sm:$0xff]  }
 0x3fb   : > { %11720 = vmatprep.subr.bf16.mxu1 %v17037_v60 }
 0x3fe   : > { %11736 = vmatpush1.bf16.msra.mxu1 %v14922_v52 }
 0x3ff   : > { %v14834_v19 = vpop.f32.mrb[0].mxu1  ;;  %11721 = vmatprep.subr.bf16.mxu1 %v17037_v60 }
 0x400   : > { %3131 = vmatmul.mubr.bf16.gmra.mrb[40].mxu0 %v1310_v45  ;;  %v14836_v31 = vpop.f32.mrb[1].mxu1  ;;  %v1415_v45 = vpack.c.bf16 %v14717_v37, %v14704_v5 }
 0x401   : > { %3138 = vmatprep.mubr.bf16.mxu0 %v1409_v24  ;;  %v14839_v47 = vpop.f32.mrb[2].mxu1  ;;  %v1287_v24 = vld [vmem:[#allocation2 + $0x14f] sm:$0xff] }
 0x402   : > { %v14841_v33 = vpop.f32.mrb[3].mxu1  ;;  %v1317_v9 = vpack.c.bf16 %v1287_v24, %v1286_v17  ;;  %v14957_v17 = vpop.permute.xlu1 %3696  ;;  %v1394_v24 = vld [vmem:[#allocation2 + $0x198] sm:$0xff] }
 0x403   : > { %17067 = vst [vmem:[#allocation48_spill] sm:$0xff] %v14957_v17 }
 0x408   : > { %3139 = vmatmul.mubr.bf16.gmra.mrb[44].mxu0 %v1311_v13 }
 0x409   : > { %3146 = vmatprep.mubr.bf16.mxu0 %v1410_v51 }
 0x410   : > { %3147 = vmatmul.mubr.bf16.gmra.mrb[48].mxu0 %v1312_v55  ;;  %v14852_v10 = vpop.f32.mrb[4].mxu1  ;;  %v14920_v55 = vpop.permute.xlu0 %3656 }
 0x411   : > { %3154 = vmatprep.mubr.bf16.mxu0 %v1411_v40  ;;  %v14856_v41 = vpop.f32.mrb[5].mxu1  ;;  %v1290_v40 = vld [vmem:[#allocation2 + $0x167] sm:$0xff] }
 0x412   : > { %v14858_v50 = vpop.f32.mrb[6].mxu1  ;;  %v1319_v4 = vpack.c.bf16 %v1291_v29, %v1290_v40 }
 0x413   : > { %v14861_v56 = vpop.f32.mrb[7].mxu1 }
 0x418   : > { %3155 = vmatmul.mubr.bf16.gmra.mrb[52].mxu0 %v1313_v27  ;;  %v14928_v27 = vpop.permute.xlu0 %3681 }
 0x419   : > { %3162 = vmatprep.mubr.bf16.mxu0 %v1412_v57  ;;  %v14935_v57 = vld [vmem:[#allocation13 + $0xc8] sm:$0xff]  }
 0x41a   : > { %11737 = vmatpush1.bf16.msra.mxu1 %v14935_v57 }
 0x41b   : > { %11722 = vmatprep.subr.bf16.mxu1 %v17037_v60 }
 0x41c   : > { %v14945_v12 = vpop.permute.xlu0 %3691 }
 0x41d   : > { %17064 = vst [vmem:[#allocation44_spill] sm:$0xff] %v14945_v12 }
 0x41e   : > { %11738 = vmatpush1.bf16.msra.mxu1 %v14949_v34 }
 0x41f   : > { %11723 = vmatprep.subr.bf16.mxu1 %v17037_v60 }
 0x420   : > { %3163 = vmatmul.mubr.bf16.gmra.mrb[56].mxu0 %v1314_v15  ;;  %v14874_v53 = vpop.f32.mrb[8].mxu1  ;;  %v14953_v7 = vpop.permute.xlu0 %3701 }
 0x421   : > { %3170 = vmatprep.mubr.bf16.mxu0 %v1413_v28  ;;  %v14879_v30 = vpop.f32.mrb[9].mxu1  ;;  %v1392_v28 = vld [vmem:[#allocation2 + $0x188] sm:$0xff]  ;;  %17066 = vst [vmem:[#allocation32_spill] sm:$0xff] %v14953_v7 }
 0x422   : > { %v14882_v16 = vpop.f32.mrb[10].mxu1  ;;  %11739 = vmatpush1.bf16.msra.mxu1 %v14963_v62  ;;  %v3903_v7 = vld [vmem:[#allocation3 + $0xf] sm:$0xff] }
 0x423   : > { %v14884_v21 = vpop.f32.mrb[11].mxu1  ;;  %11724 = vmatprep.subr.bf16.mxu1 %v17037_v60 }
 0x424   : > { %v14970_v29 = vpop.permute.xlu0 %3711 }
 0x425   : > { %17068 = vst [vmem:[#allocation47_spill] sm:$0xff] %v14970_v29 }
 0x426   : > { %11740 = vmatpush1.bf16.msra.mxu1 %v14973_v61 }
 0x427   : > { %11725 = vmatprep.subr.bf16.mxu1 %v17037_v60 }
 0x428   : > { %3171 = vmatmul.mubr.bf16.gmra.mrb[60].mxu0 %v1315_v11  ;;  %v1320_v11 = vpack.c.bf16 %v1293_v32, %v1292_v8  ;;  %v1297_v8 = vld [vmem:[#allocation2 + $0x19f] sm:$0xff]  ;;  %v14980_v32 = vpop.permute.xlu0 %3721 }
 0x429   : > { %3178 = vmatprep.mubr.bf16.mxu0 %v1414_v35  ;;  %v1419_v35 = vpack.c.bf16 %v1393_v58, %v1392_v28  ;;  %17070 = vst [vmem:[#allocation51_spill] sm:$0xff] %v14980_v32  ;;  %v14982_v58 = vld [vmem:[#allocation13 + $0xe8] sm:$0xff]  }
 0x42a   : > { %11741 = vmatpush1.bf16.msra.mxu1 %v14982_v58 }
 0x42b   : > { %11726 = vmatprep.subr.bf16.mxu1 %v17037_v60 }
 0x430   : > { %3179 = vmatmul.mubr.bf16.gmra.mrb[64].mxu0 %v1316_v48  ;;  %v14898_v13 = vpop.f32.mrb[12].mxu1  ;;  %v1295_v48 = vld [vmem:[#allocation2 + $0x18f] sm:$0xff] }
 0x431   : > { %3186 = vmatprep.mubr.bf16.mxu0 %v1415_v45  ;;  %v14902_v5 = vpop.f32.mrb[13].mxu1  ;;  %v1321_v14 = vpack.c.bf16 %v1295_v48, %v1294_v1  ;;  %v14990_v1 = vld [vmem:[#allocation13 + $0xf0] sm:$0xff]   ;;  %v1298_v48 = vld [vmem:[#allocation2 + $0x1a7] sm:$0xff] }
 0x432   : > { %v14904_v37 = vpop.f32.mrb[14].mxu1  ;;  %11742 = vmatpush1.bf16.msra.mxu1 %v14990_v1 }
 0x433   : > { %v14911_v51 = vpop.f32.mrb[15].mxu1  ;;  %11727 = vmatprep.subr.bf16.mxu1 %v17037_v60 }
 0x438   : > { %3187 = vmatmul.mubr.bf16.gmra.mrb[68].mxu0 %v1317_v9 }
 0x439   : > { %3194 = vmatprep.mubr.bf16.mxu0 %v1416_v0 }
 0x440   : > { %3195 = vmatmul.mubr.bf16.gmra.mrb[72].mxu0 %v1318_v6  ;;  %v14931_v49 = vpop.f32.mrb[16].mxu1 }
 0x441   : > { %3202 = vmatprep.mubr.bf16.mxu0 %v1417_v18  ;;  %v14937_v43 = vpop.f32.mrb[17].mxu1  ;;  %v14967_v18 = vld [vmem:[#allocation2 + $0x8] sm:$0xff] }
 0x442   : > { %v14939_v20 = vpop.f32.mrb[18].mxu1  ;;  %v1420_v40 = vpack.c.bf16 %v14967_v18, %v1394_v24  ;;  %v1299_v24 = vld [vmem:[#allocation2 + $0x1af] sm:$0xff] }
 0x443   : > { %v14942_v15 = vpop.f32.mrb[19].mxu1 }
 0x448   : > { %3203 = vmatmul.mubr.bf16.gmra.mrb[76].mxu0 %v1319_v4  ;;  %v14955_v45 = vpop.f32.mrb[20].mxu1  ;;  %v14976_v4 = vpop.permute.xlu1 %3706 }
 0x449   : > { %3210 = vmatprep.mubr.bf16.mxu0 %v1418_v23  ;;  %v14959_v9 = vpop.f32.mrb[21].mxu1  ;;  %17069 = vst [vmem:[#allocation52_spill] sm:$0xff] %v14976_v4  ;;  %v1296_v23 = vld [vmem:[#allocation2 + $0x197] sm:$0xff] }
 0x44a   : > { %v14961_v0 = vpop.f32.mrb[22].mxu1  ;;  %v1322_v28 = vpack.c.bf16 %v1297_v8, %v1296_v23 }
 0x44b   : > { %v14965_v6 = vpop.f32.mrb[23].mxu1 }
 0x450   : > { %3211 = vmatmul.mubr.bf16.gmra.mrb[80].mxu0 %v1320_v11  ;;  %v1421_v11 = vpack.c.bf16 %v14967_v18, %v14967_v18 }
 0x451   : > { %3218 = vmatprep.mubr.bf16.mxu0 %v1419_v35  ;;  %v14986_v35 = vpop.permute.xlu1 %3716 }
 0x452   : > { %17071 = vst [vmem:[#allocation33_spill] sm:$0xff] %v14986_v35  ;;  %v1323_v35 = vpack.c.bf16 %v1299_v24, %v1298_v48 }
 0x455   : > { %v3567_v32 = vpop.permute.xlu1 %3566 }
 0x458   : > { %3219 = vmatmul.mubr.bf16.gmra.mrb[84].mxu0 %v1321_v14  ;;  %v14992_v14 = vpop.f32.mrb[24].mxu1 }
 0x459   : > { %3226 = vmatprep.mubr.bf16.mxu0 %v1420_v40  ;;  %17072 = vst [vmem:[#allocation34_spill] sm:$0xff] %v14992_v14  ;;  %v14994_v40 = vpop.permute.xlu0 %3726  ;;  %v14997_v23 = vpop.f32.mrb[25].mxu1 }
 0x45a   : > { %17073 = vst [vmem:[#allocation56_spill] sm:$0xff] %v14994_v40  ;;  %v15000_v8 = vpop.f32.mrb[26].mxu1  ;;  %v3902_v40 = vld [vmem:[#allocation3 + $0x7] sm:$0xff]  ;;  %v15008_v17 = vpop.permute.xlu1 %3731 }
 0x45b   : > { %17074 = vst [vmem:[#allocation55_spill] sm:$0xff] %v15000_v8  ;;  %v15004_v29 = vpop.f32.mrb[27].mxu1  ;;  %17075 = vst [vmem:[#allocation60_spill] sm:$0xff] %v15008_v17  ;;  %v3950_v14 = vpack.c.bf16 %v3903_v7, %v3902_v40 }
 0x45d   : > { %v3572_v4 = vpop.permute.xlu0 %3571  ;;  %v15014_v48 = vpop.f32.mrb[28].mxu1 }
 0x45e   : > { %v15012_v8 = vpop.permute.xlu1 %3576  ;;  %17077 = vst [vmem:[#allocation35_spill] sm:$0xff] %v15014_v48  ;;  %v15017_v24 = vpop.f32.mrb[29].mxu1 }
 0x45f   : > { %17078 = vst [vmem:[#allocation36_spill] sm:$0xff] %v15017_v24 }
 0x460   : > { %3227 = vmatmul.mubr.bf16.gmra.mrb[88].mxu0 %v1322_v28  ;;  %v15002_v28 = vld [vmem:[#allocation13 + $0xf8] sm:$0xff]  }
 0x461   : > { %3234 = vmatprep.mubr.bf16.mxu0 %v1421_v11  ;;  %11743 = vmatpush1.bf16.msra.mxu1 %v15002_v28  ;;  %v15010_v12 = vpop.permute.xlu0 %3736 }
 0x462   : > { %6022 = vmatprep.subr.bf16.mxu1 %v17037_v60  ;;  %17076 = vst [vmem:[#allocation59_spill] sm:$0xff] %v15010_v12  ;;  %v15027_v7 = vpop.permute.xlu1 %3741  ;;  %v15040_v12 = vld [vmem:[#allocation11] ss:$0 sm:$0xff] }
 0x463   : > { %17081 = vst [vmem:[#allocation38_spill] sm:$0xff] %v15027_v7 }
 0x468   : > { %3235 = vmatmul.mubr.bf16.gmra.mrb[92].mxu0 %v1323_v35  ;;  %v15020_v35 = vpop.f32.mrb[30].mxu1 }
 0x469   : > { %5604 = vmatprep.mubr.bf16.mxu0 %v1421_v11  ;;  %17079 = vst [vmem:[#allocation63_spill] sm:$0xff] %v15020_v35  ;;  %v15022_v11 = vpop.permute.xlu0 %3581  ;;  %v15024_v63 = vpop.f32.mrb[31].mxu1 }
 0x46a   : > { %17080 = vst [vmem:[#allocation37_spill] sm:$0xff] %v15024_v63 }
 0x470   : > { %5605 = vmatmul.mubr.bf16.vlgmr.msra.gmra.mrb[96].mxu0 %v3950_v14  ;;  %v15031_v14 = vpop.permute.xlu0 %3746  ;;  %v15045_v7 = vpop.f32.mrb[32].mxu1 }
 0x471   : > { %5798 = vmatpush1.bf16.msra.mxu0 %v14846_v39  ;;  %17082 = vst [vmem:[#allocation39_spill] sm:$0xff] %v15031_v14  ;;  %v15034_v39 = vpop.permute.xlu1 %3586  ;;  %17084 = vst [vmem:[#allocation41_spill] sm:$0xff] %v15045_v7  ;;  %v15048_v14 = vpop.f32.mrb[33].mxu1 }
 0x472   : > { %5799 = vmatprep.subr.bf16.mxu0 %v17037_v60  ;;  %17085 = vst [vmem:[#allocation42_spill] sm:$0xff] %v15048_v14  ;;  %v15051_v35 = vpop.f32.mrb[34].mxu1 }
 0x473   : > { %17086 = vst [vmem:[#allocation43_spill] sm:$0xff] %v15051_v35  ;;  %v15053_v63 = vpop.f32.mrb[35].mxu1 }
 0x474   : > { %v15038_v40 = vpop.permute.xlu0 %3591  ;;  %17087 = vst [vmem:[#allocation45_spill] sm:$0xff] %v15053_v63 }
 0x475   : > { %5800 = vmatpush1.bf16.msra.mxu0 %v14854_v36  ;;  %v15043_v36 = vpop.permute.xlu1 %3751 }
 0x476   : > { %5801 = vmatprep.subr.bf16.mxu0 %v17037_v60  ;;  %17083 = vst [vmem:[#allocation40_spill] sm:$0xff] %v15043_v36 }
 0x479   : > { %5802 = vmatpush1.bf16.msra.mxu0 %v14864_v26 }
 0x47a   : > { %5803 = vmatprep.subr.bf16.mxu0 %v17037_v60 }
 0x47d   : > { %5804 = vmatpush1.bf16.msra.mxu0 %v14870_v44 }
 0x47e   : > { %5805 = vmatprep.subr.bf16.mxu0 %v17037_v60 }
 0x481   : > { %5806 = vmatpush1.bf16.msra.mxu0 %v14877_v42  ;;  %v15056_v42 = vpop.permute.xlu0 %3756 }
 0x482   : > { %5807 = vmatprep.subr.bf16.mxu0 %v17037_v60  ;;  %17088 = vst [vmem:[#allocation46_spill] sm:$0xff] %v15056_v42 }
 0x483   : > { %v3052_v26 = vpop.f32.mrb[0].mxu0 }
 0x484   : > { %v3054_v17 = vpop.f32.mrb[1].mxu0  ;;  %v11744_v44 = vadd.f32 %v15040_v12, %v3052_v26  ;;  %v15063_v26 = vpop.permute.xlu1 %3596 }
 0x485   : > { %v3055_v48 = vpop.f32.mrb[2].mxu0  ;;  %5808 = vmatpush1.bf16.msra.mxu0 %v14890_v54  ;;  %v15066_v42 = vpop.permute.xlu0 %3601 }
 0x486   : > { %v3278_v36 = vadd.f32 %v11744_v44, %v14836_v31  ;;  %v3057_v7 = vpop.f32.mrb[3].mxu0  ;;  %v11745_v24 = vadd.f32 %v15040_v12, %v3055_v48  ;;  %5809 = vmatprep.subr.bf16.mxu0 %v17037_v60 }
 0x488   : > { %v3468_v14 = vmax.f32 %v3278_v36, 0.0  ;;  %v3281_v17 = vadd.f32 %v11745_v24, %v14841_v33  ;;  %v15074_v24 = vpop.permute.xlu1 %3761 }
 0x489   : > { %5810 = vmatpush1.bf16.msra.mxu0 %v14900_v22 }
 0x48a   : > { %v3804_v35 = vmul.f32 %v3567_v32, %v3468_v14  ;;  %v3469_v63 = vmax.f32 %v3281_v17, 0.0  ;;  %5811 = vmatprep.subr.bf16.mxu0 %v17037_v60  ;;  %v3904_v14 = vld [vmem:[#allocation3 + $0x17] sm:$0xff] }
 0x48b   : > { %v3060_v54 = vpop.f32.mrb[4].mxu0 }
 0x48c   : > { %3853 = vst [vmem:[#allocation3 + $0x20] sm:$0xff] %v3804_v35  ;;  %v3805_v31 = vmul.f32 %v3572_v4, %v3469_v63  ;;  %v11746_v48 = vadd.f32 %v15040_v12, %v3060_v54  ;;  %v3062_v7 = vpop.f32.mrb[5].mxu0  ;;  %v4048_v36 = vpack.c.bf16 %v3804_v35, %v14967_v18  ;;  %v15078_v18 = vpop.permute.xlu0 %3766 }
 0x48d   : > { %v3063_v44 = vpop.f32.mrb[6].mxu0  ;;  %5812 = vmatpush1.bf16.msra.mxu0 %v14909_v59 }
 0x48e   : > { %3854 = vst [vmem:[#allocation3 + $0x28] sm:$0xff] %v3805_v31  ;;  %v3286_v33 = vadd.f32 %v11746_v48, %v14834_v19  ;;  %v11747_v22 = vadd.f32 %v15040_v12, %v3063_v44  ;;  %v3065_v32 = vpop.f32.mrb[7].mxu0  ;;  %5612 = vmatprep.mubr.bf16.mxu0 %v4048_v36  ;;  %5813 = vmatprep.subr.bf16.mxu0 %v17037_v60  ;;  %v15081_v19 = vpop.f32.mrb[36].mxu1 }
 0x48f   : > { %v15084_v48 = vpop.f32.mrb[37].mxu1  ;;  %v15093_v32 = vpop.permute.xlu1 %3606 }
 0x490   : > { %v3470_v63 = vmax.f32 %v3286_v33, 0.0  ;;  %v3289_v4 = vadd.f32 %v11747_v22, %v14839_v47  ;;  %v15088_v33 = vpop.f32.mrb[38].mxu1 }
 0x491   : > { %5814 = vmatpush1.bf16.msra.mxu0 %v14922_v52  ;;  %v15090_v22 = vpop.f32.mrb[39].mxu1 }
 0x492   : > { %v3806_v59 = vmul.f32 %v15012_v8, %v3470_v63  ;;  %v3471_v35 = vmax.f32 %v3289_v4, 0.0  ;;  %5815 = vmatprep.subr.bf16.mxu0 %v17037_v60 }
 0x493   : > { %v3068_v17 = vpop.f32.mrb[8].mxu0  ;;  %v3905_v54 = vld [vmem:[#allocation3 + $0x1f] sm:$0xff] }
 0x494   : > { %3855 = vst [vmem:[#allocation3 + $0x30] sm:$0xff] %v3806_v59  ;;  %v3807_v7 = vmul.f32 %v15022_v11, %v3471_v35  ;;  %v3070_v47 = vpop.f32.mrb[9].mxu0  ;;  %v11748_v36 = vadd.f32 %v15040_v12, %v3068_v17  ;;  %v3951_v52 = vpack.c.bf16 %v3905_v54, %v3904_v14  ;;  %v4049_v44 = vpack.c.bf16 %v3806_v59, %v3805_v31  ;;  %v3612_v35 = vpop.permute.xlu0 %3611 }
 0x495   : > { %v3071_v8 = vpop.f32.mrb[10].mxu0  ;;  %5816 = vmatpush1.bf16.msra.mxu0 %v14935_v57  ;;  %v15102_v47 = vpop.permute.xlu1 %3771 }
 0x496   : > { %3856 = vst [vmem:[#allocation3 + $0x38] sm:$0xff] %v3807_v7  ;;  %v3294_v63 = vadd.f32 %v11748_v36, %v14856_v41  ;;  %v3073_v4 = vpop.f32.mrb[11].mxu0  ;;  %v11749_v11 = vadd.f32 %v15040_v12, %v3071_v8  ;;  %5613 = vmatmul.mubr.bf16.gmra.mrb[100].mxu0 %v3951_v52  ;;  %5817 = vmatprep.subr.bf16.mxu0 %v17037_v60  ;;  %v3906_v41 = vld [vmem:[#allocation3 + $0x27] sm:$0xff] }
 0x497   : > { %5620 = vmatprep.mubr.bf16.mxu0 %v4049_v44 }
 0x498   : > { %v3472_v31 = vmax.f32 %v3294_v63, 0.0  ;;  %v3297_v14 = vadd.f32 %v11749_v11, %v14861_v56 }
 0x499   : > { %5818 = vmatpush1.bf16.msra.mxu0 %v14949_v34 }
 0x49a   : > { %v3808_v59 = vmul.f32 %v15034_v39, %v3472_v31  ;;  %v3473_v57 = vmax.f32 %v3297_v14, 0.0  ;;  %5819 = vmatprep.subr.bf16.mxu0 %v17037_v60  ;;  %v15111_v31 = vpop.permute.xlu0 %3776 }
 0x49b   : > { %v3076_v17 = vpop.f32.mrb[12].mxu0  ;;  %v3907_v54 = vld [vmem:[#allocation3 + $0x2f] sm:$0xff] }
 0x49c   : > { %3857 = vst [vmem:[#allocation3 + $0x40] sm:$0xff] %v3808_v59  ;;  %v3809_v36 = vmul.f32 %v15038_v40, %v3473_v57  ;;  %v11750_v52 = vadd.f32 %v15040_v12, %v3076_v17  ;;  %v3078_v44 = vpop.f32.mrb[13].mxu0  ;;  %v3952_v56 = vpack.c.bf16 %v3907_v54, %v3906_v41  ;;  %v4050_v8 = vpack.c.bf16 %v3808_v59, %v3807_v7  ;;  %v3617_v7 = vpop.permute.xlu1 %3616 }
 0x49d   : > { %v3079_v34 = vpop.f32.mrb[14].mxu0  ;;  %5820 = vmatpush1.bf16.msra.mxu0 %v14963_v62  ;;  %v15115_v59 = vpop.f32.mrb[40].mxu1  ;;  %v3908_v57 = vld [vmem:[#allocation3 + $0x37] sm:$0xff] }
 0x49e   : > { %3858 = vst [vmem:[#allocation3 + $0x48] sm:$0xff] %v3809_v36  ;;  %v3302_v39 = vadd.f32 %v11750_v52, %v14852_v10  ;;  %v11751_v63 = vadd.f32 %v15040_v12, %v3079_v34  ;;  %v3081_v4 = vpop.f32.mrb[15].mxu0  ;;  %5621 = vmatmul.mubr.bf16.gmra.mrb[104].mxu0 %v3952_v56  ;;  %5821 = vmatprep.subr.bf16.mxu0 %v17037_v60  ;;  %v15118_v41 = vpop.f32.mrb[41].mxu1 }
 0x49f   : > { %5628 = vmatprep.mubr.bf16.mxu0 %v4050_v8  ;;  %v15122_v56 = vpop.f32.mrb[42].mxu1  ;;  %v3622_v4 = vpop.permute.xlu0 %3621 }
 0x4a0   : > { %v3474_v11 = vmax.f32 %v3302_v39, 0.0  ;;  %v3305_v40 = vadd.f32 %v11751_v63, %v14858_v50  ;;  %v15124_v8 = vpop.f32.mrb[43].mxu1 }
 0x4a1   : > { %5822 = vmatpush1.bf16.msra.mxu0 %v14973_v61 }
 0x4a2   : > { %v3810_v62 = vmul.f32 %v15063_v26, %v3474_v11  ;;  %v3475_v14 = vmax.f32 %v3305_v40, 0.0  ;;  %5823 = vmatprep.subr.bf16.mxu0 %v17037_v60 }
 0x4a3   : > { %v3084_v10 = vpop.f32.mrb[16].mxu0  ;;  %v3909_v17 = vld [vmem:[#allocation3 + $0x3f] sm:$0xff] }
 0x4a4   : > { %3859 = vst [vmem:[#allocation3 + $0x50] sm:$0xff] %v3810_v62  ;;  %v3811_v50 = vmul.f32 %v15066_v42, %v3475_v14  ;;  %v3086_v54 = vpop.f32.mrb[17].mxu0  ;;  %v11752_v52 = vadd.f32 %v15040_v12, %v3084_v10  ;;  %v3953_v61 = vpack.c.bf16 %v3909_v17, %v3908_v57  ;;  %v4051_v44 = vpack.c.bf16 %v3810_v62, %v3809_v36 }
 0x4a5   : > { %v3087_v26 = vpop.f32.mrb[18].mxu0  ;;  %5824 = vmatpush1.bf16.msra.mxu0 %v14982_v58  ;;  %v15134_v58 = vpop.permute.xlu1 %3781  ;;  %v3910_v62 = vld [vmem:[#allocation3 + $0x47] sm:$0xff] }
 0x4a6   : > { %3860 = vst [vmem:[#allocation3 + $0x58] sm:$0xff] %v3811_v50  ;;  %v3310_v34 = vadd.f32 %v11752_v52, %v14879_v30  ;;  %v3089_v39 = vpop.f32.mrb[19].mxu0  ;;  %v11753_v63 = vadd.f32 %v15040_v12, %v3087_v26  ;;  %5629 = vmatmul.mubr.bf16.gmra.mrb[108].mxu0 %v3953_v61  ;;  %5825 = vmatprep.subr.bf16.mxu0 %v17037_v60  ;;  %v15137_v52 = vld [vmem:[#allocation3 + $0x48] sm:$0xff] }
 0x4a7   : > { %5636 = vmatprep.mubr.bf16.mxu0 %v4051_v44 }
 0x4a8   : > { %v3476_v42 = vmax.f32 %v3310_v34, 0.0  ;;  %v3313_v36 = vadd.f32 %v11753_v63, %v14884_v21  ;;  %v15146_v34 = vpop.permute.xlu0 %3786 }
 0x4a9   : > { %5826 = vmatpush1.bf16.msra.mxu0 %v14990_v1  ;;  %v3627_v63 = vpop.permute.xlu1 %3626 }
 0x4aa   : > { %v3812_v11 = vmul.f32 %v15093_v32, %v3476_v42  ;;  %v3477_v40 = vmax.f32 %v3313_v36, 0.0  ;;  %5827 = vmatprep.subr.bf16.mxu0 %v17037_v60 }
 0x4ab   : > { %v3092_v30 = vpop.f32.mrb[20].mxu0  ;;  %v3911_v14 = vld [vmem:[#allocation3 + $0x4f] sm:$0xff] }
 0x4ac   : > { %3861 = vst [vmem:[#allocation3 + $0x60] sm:$0xff] %v3812_v11  ;;  %v3813_v10 = vmul.f32 %v3612_v35, %v3477_v40  ;;  %v11754_v57 = vadd.f32 %v15040_v12, %v3092_v30  ;;  %v3094_v17 = vpop.f32.mrb[21].mxu0  ;;  %v3954_v54 = vpack.c.bf16 %v3911_v14, %v3910_v62  ;;  %v4052_v21 = vpack.c.bf16 %v3812_v11, %v3811_v50  ;;  %v15139_v1 = vld [vmem:[#allocation3 + $0x50] sm:$0xff] }
 0x4ad   : > { %v3095_v32 = vpop.f32.mrb[22].mxu0  ;;  %5828 = vmatpush1.bf16.msra.mxu0 %v15002_v28  ;;  %v15149_v28 = vpop.f32.mrb[44].mxu1  ;;  %v3912_v40 = vld [vmem:[#allocation3 + $0x57] sm:$0xff] }
 0x4ae   : > { %3862 = vst [vmem:[#allocation3 + $0x68] sm:$0xff] %v3813_v10  ;;  %v3318_v44 = vadd.f32 %v11754_v57, %v14874_v53  ;;  %v11755_v35 = vadd.f32 %v15040_v12, %v3095_v32  ;;  %v3097_v26 = vpop.f32.mrb[23].mxu0  ;;  %5637 = vmatmul.mubr.bf16.gmra.mrb[112].mxu0 %v3954_v54  ;;  %v15151_v62 = vpop.f32.mrb[45].mxu1 }
 0x4af   : > { %5644 = vmatprep.mubr.bf16.mxu0 %v4052_v21  ;;  %v15154_v21 = vpop.f32.mrb[46].mxu1  ;;  %v3632_v26 = vpop.permute.xlu0 %3631 }
 0x4b0   : > { %v3478_v50 = vmax.f32 %v3318_v44, 0.0  ;;  %v3321_v39 = vadd.f32 %v11755_v35, %v14882_v16  ;;  %v15156_v16 = vld [vmem:[#allocation3 + $0x58] sm:$0xff]  ;;  %v15160_v44 = vpop.f32.mrb[47].mxu1 }
 0x4b1   : > { %17089 = vst [vmem:[#allocation49_spill] sm:$0xff] %v15156_v16 }
 0x4b2   : > { %v3814_v42 = vmul.f32 %v3617_v7, %v3478_v50  ;;  %v3479_v36 = vmax.f32 %v3321_v39, 0.0 }
 0x4b3   : > { %v3100_v11 = vpop.f32.mrb[24].mxu0  ;;  %v3913_v30 = vld [vmem:[#allocation3 + $0x5f] sm:$0xff]  ;;  %v15169_v35 = vpop.permute.xlu0 %3796 }
 0x4b4   : > { %3863 = vst [vmem:[#allocation3 + $0x70] sm:$0xff] %v3814_v42  ;;  %v3815_v53 = vmul.f32 %v3622_v4, %v3479_v36  ;;  %v3102_v14 = vpop.f32.mrb[25].mxu0  ;;  %v11756_v57 = vadd.f32 %v15040_v12, %v3100_v11  ;;  %v3955_v17 = vpack.c.bf16 %v3913_v30, %v3912_v40  ;;  %v4053_v54 = vpack.c.bf16 %v3814_v42, %v3813_v10  ;;  %v15158_v7 = vld [vmem:[#allocation3 + $0x60] sm:$0xff]  ;;  %v15166_v10 = vpop.permute.xlu1 %3791 }
 0x4b5   : > { %17090 = vst [vmem:[#allocation50_spill] sm:$0xff] %v15158_v7  ;;  %v3103_v32 = vpop.f32.mrb[26].mxu0  ;;  %v3914_v14 = vld [vmem:[#allocation3 + $0x67] sm:$0xff] }
 0x4b6   : > { %3864 = vst [vmem:[#allocation3 + $0x78] sm:$0xff] %v3815_v53  ;;  %v3326_v4 = vadd.f32 %v11756_v57, %v14902_v5  ;;  %v3105_v50 = vpop.f32.mrb[27].mxu0  ;;  %v11757_v39 = vadd.f32 %v15040_v12, %v3103_v32  ;;  %5645 = vmatmul.mubr.bf16.gmra.mrb[116].mxu0 %v3955_v17 }
 0x4b7   : > { %5652 = vmatprep.mubr.bf16.mxu0 %v4053_v54  ;;  %v15172_v50 = vld [vmem:[#allocation3 + $0x68] sm:$0xff] }
 0x4b8   : > { %v3480_v42 = vmax.f32 %v3326_v4, 0.0  ;;  %v3329_v36 = vadd.f32 %v11757_v39, %v14911_v51  ;;  %17091 = vst [vmem:[#allocation53_spill] sm:$0xff] %v15172_v50  ;;  %v3637_v4 = vpop.permute.xlu1 %3636 }
 0x4ba   : > { %v3816_v11 = vmul.f32 %v3627_v63, %v3480_v42  ;;  %v3481_v40 = vmax.f32 %v3329_v36, 0.0 }
 0x4bb   : > { %v3108_v30 = vpop.f32.mrb[28].mxu0  ;;  %v3915_v61 = vld [vmem:[#allocation3 + $0x6f] sm:$0xff] }
 0x4bc   : > { %3865 = vst [vmem:[#allocation3 + $0x80] sm:$0xff] %v3816_v11  ;;  %v3817_v16 = vmul.f32 %v3632_v26, %v3481_v40  ;;  %v11758_v5 = vadd.f32 %v15040_v12, %v3108_v30  ;;  %v3110_v57 = vpop.f32.mrb[29].mxu0  ;;  %v3956_v32 = vpack.c.bf16 %v3915_v61, %v3914_v14  ;;  %v4054_v17 = vpack.c.bf16 %v3816_v11, %v3815_v53  ;;  %v15174_v54 = vld [vmem:[#allocation3 + $0x70] sm:$0xff]  ;;  %v3642_v53 = vpop.permute.xlu0 %3641 }
 0x4bd   : > { %v3111_v51 = vpop.f32.mrb[30].mxu0  ;;  %v15181_v30 = vpop.permute.xlu1 %3801  ;;  %v3916_v57 = vld [vmem:[#allocation3 + $0x77] sm:$0xff] }
 0x4be   : > { %3866 = vst [vmem:[#allocation3 + $0x88] sm:$0xff] %v3817_v16  ;;  %v3334_v39 = vadd.f32 %v11758_v5, %v14898_v13  ;;  %v11759_v42 = vadd.f32 %v15040_v12, %v3111_v51  ;;  %v3113_v26 = vpop.f32.mrb[31].mxu0  ;;  %5653 = vmatmul.mubr.bf16.gmra.mrb[120].mxu0 %v3956_v32  ;;  %v15184_v32 = vld [vmem:[#allocation3 + $0x78] sm:$0xff] }
 0x4bf   : > { %5660 = vmatprep.mubr.bf16.mxu0 %v4054_v17 }
 0x4c0   : > { %v3482_v36 = vmax.f32 %v3334_v39, 0.0  ;;  %v3337_v61 = vadd.f32 %v11759_v42, %v14904_v37 }
 0x4c2   : > { %v3818_v11 = vmul.f32 %v3637_v4, %v3482_v36  ;;  %v3483_v40 = vmax.f32 %v3337_v61, 0.0 }
 0x4c3   : > { %v3116_v14 = vpop.f32.mrb[32].mxu0  ;;  %v3917_v7 = vld [vmem:[#allocation3 + $0x7f] sm:$0xff] }
 0x4c4   : > { %3867 = vst [vmem:[#allocation3 + $0x90] sm:$0xff] %v3818_v11  ;;  %v3819_v63 = vmul.f32 %v3642_v53, %v3483_v40  ;;  %v3118_v50 = vpop.f32.mrb[33].mxu0  ;;  %v11760_v13 = vadd.f32 %v15040_v12, %v3116_v14  ;;  %v3957_v5 = vpack.c.bf16 %v3917_v7, %v3916_v57  ;;  %v4055_v51 = vpack.c.bf16 %v3818_v11, %v3817_v16  ;;  %v15186_v17 = vld [vmem:[#allocation3 + $0x80] sm:$0xff]  ;;  %v3647_v16 = vpop.permute.xlu1 %3646 }
 0x4c5   : > { %v3119_v37 = vpop.f32.mrb[34].mxu0  ;;  %v3918_v11 = vld [vmem:[#allocation3 + $0x87] sm:$0xff] }
 0x4c6   : > { %3868 = vst [vmem:[#allocation3 + $0x98] sm:$0xff] %v3819_v63  ;;  %v3342_v39 = vadd.f32 %v11760_v13, %v14937_v43  ;;  %v3121_v42 = vpop.f32.mrb[35].mxu0  ;;  %v11761_v26 = vadd.f32 %v15040_v12, %v3119_v37  ;;  %5661 = vmatmul.mubr.bf16.gmra.mrb[124].mxu0 %v3957_v5  ;;  %v15195_v37 = vld [vmem:[#allocation3 + $0x88] sm:$0xff] }
 0x4c7   : > { %5668 = vmatprep.mubr.bf16.mxu0 %v4055_v51 }
 0x4c8   : > { %v3484_v50 = vmax.f32 %v3342_v39, 0.0  ;;  %v3345_v7 = vadd.f32 %v11761_v26, %v14942_v15  ;;  %v17109_v15 = vld [vmem:[#allocation63_spill] sm:$0xff] }
 0x4ca   : > { %v3820_v36 = vmul.f32 %v3647_v16, %v3484_v50  ;;  %v3485_v61 = vmax.f32 %v3345_v7, 0.0 }
 0x4cb   : > { %v3124_v53 = vpop.f32.mrb[36].mxu0  ;;  %v3919_v40 = vld [vmem:[#allocation3 + $0x8f] sm:$0xff] }
 0x4cc   : > { %3869 = vst [vmem:[#allocation3 + $0xa0] sm:$0xff] %v3820_v36  ;;  %v3821_v14 = vmul.f32 %v14924_v38, %v3485_v61  ;;  %v11762_v57 = vadd.f32 %v15040_v12, %v3124_v53  ;;  %v3126_v43 = vpop.f32.mrb[37].mxu0  ;;  %v3958_v13 = vpack.c.bf16 %v3919_v40, %v3918_v11  ;;  %v4056_v42 = vpack.c.bf16 %v3820_v36, %v3819_v63  ;;  %v15197_v5 = vld [vmem:[#allocation3 + $0x90] sm:$0xff] }
 0x4cd   : > { %v3127_v51 = vpop.f32.mrb[38].mxu0  ;;  %v3920_v61 = vld [vmem:[#allocation3 + $0x97] sm:$0xff] }
 0x4ce   : > { %3870 = vst [vmem:[#allocation3 + $0xa8] sm:$0xff] %v3821_v14  ;;  %v3350_v39 = vadd.f32 %v11762_v57, %v14931_v49  ;;  %v11763_v26 = vadd.f32 %v15040_v12, %v3127_v51  ;;  %v3129_v50 = vpop.f32.mrb[39].mxu0  ;;  %5669 = vmatmul.mubr.bf16.gmra.mrb[128].mxu0 %v3958_v13  ;;  %v15207_v51 = vld [vmem:[#allocation3 + $0x98] sm:$0xff] }
 0x4cf   : > { %5676 = vmatprep.mubr.bf16.mxu0 %v4056_v42 }
 0x4d0   : > { %v3486_v38 = vmax.f32 %v3350_v39, 0.0  ;;  %v3353_v7 = vadd.f32 %v11763_v26, %v14939_v20 }
 0x4d2   : > { %v3822_v63 = vmul.f32 %v14920_v55, %v3486_v38  ;;  %v3487_v16 = vmax.f32 %v3353_v7, 0.0 }
 0x4d3   : > { %v3132_v36 = vpop.f32.mrb[40].mxu0  ;;  %v3921_v53 = vld [vmem:[#allocation3 + $0x9f] sm:$0xff] }
 0x4d4   : > { %3871 = vst [vmem:[#allocation3 + $0xb0] sm:$0xff] %v3822_v63  ;;  %v3823_v11 = vmul.f32 %v14894_v3, %v3487_v16  ;;  %v11764_v40 = vadd.f32 %v15040_v12, %v3132_v36  ;;  %v3134_v49 = vpop.f32.mrb[41].mxu0  ;;  %v3959_v57 = vpack.c.bf16 %v3921_v53, %v3920_v61  ;;  %v4057_v43 = vpack.c.bf16 %v3822_v63, %v3821_v14  ;;  %v15209_v13 = vld [vmem:[#allocation3 + $0xa0] sm:$0xff] }
 0x4d5   : > { %v3135_v42 = vpop.f32.mrb[42].mxu0  ;;  %v3922_v63 = vld [vmem:[#allocation3 + $0xa7] sm:$0xff] }
 0x4d6   : > { %3872 = vst [vmem:[#allocation3 + $0xb8] sm:$0xff] %v3823_v11  ;;  %v3358_v20 = vadd.f32 %v11764_v40, %v14959_v9  ;;  %v11765_v39 = vadd.f32 %v15040_v12, %v3135_v42  ;;  %v3137_v26 = vpop.f32.mrb[43].mxu0  ;;  %5677 = vmatmul.mubr.bf16.gmra.mrb[132].mxu0 %v3959_v57  ;;  %v15219_v49 = vld [vmem:[#allocation3 + $0xa8] sm:$0xff] }
 0x4d7   : > { %5684 = vmatprep.mubr.bf16.mxu0 %v4057_v43 }
 0x4d8   : > { %v3488_v3 = vmax.f32 %v3358_v20, 0.0  ;;  %v3361_v50 = vadd.f32 %v11765_v39, %v14965_v6 }
 0x4da   : > { %v3824_v14 = vmul.f32 %v14906_v46, %v3488_v3  ;;  %v3489_v38 = vmax.f32 %v3361_v50, 0.0 }
 0x4db   : > { %v3140_v7 = vpop.f32.mrb[44].mxu0  ;;  %v3923_v16 = vld [vmem:[#allocation3 + $0xaf] sm:$0xff] }
 0x4dc   : > { %3873 = vst [vmem:[#allocation3 + $0xc0] sm:$0xff] %v3824_v14  ;;  %v3825_v36 = vmul.f32 %v14914_v25, %v3489_v38  ;;  %v11766_v61 = vadd.f32 %v15040_v12, %v3140_v7  ;;  %v3142_v9 = vpop.f32.mrb[45].mxu0  ;;  %v3960_v53 = vpack.c.bf16 %v3923_v16, %v3922_v63  ;;  %v4058_v40 = vpack.c.bf16 %v3824_v14, %v3823_v11  ;;  %v15221_v57 = vld [vmem:[#allocation3 + $0xb0] sm:$0xff] }
 0x4dd   : > { %v3143_v43 = vpop.f32.mrb[46].mxu0  ;;  %v3924_v50 = vld [vmem:[#allocation3 + $0xb7] sm:$0xff] }
 0x4de   : > { %3874 = vst [vmem:[#allocation3 + $0xc8] sm:$0xff] %v3825_v36  ;;  %v3366_v6 = vadd.f32 %v11766_v61, %v14955_v45  ;;  %v11767_v42 = vadd.f32 %v15040_v12, %v3143_v43  ;;  %v3145_v20 = vpop.f32.mrb[47].mxu0  ;;  %5685 = vmatmul.mubr.bf16.gmra.mrb[136].mxu0 %v3960_v53  ;;  %v4117_v16 = vld [vmem:[#allocation3 + $0xb1] sm:$0xff] }
 0x4df   : > { %5692 = vmatprep.mubr.bf16.mxu0 %v4058_v40  ;;  %v15231_v9 = vld [vmem:[#allocation3 + $0xb8] sm:$0xff]  ;;  %v4116_v20 = vld [vmem:[#allocation3 + $0xa9] sm:$0xff] }
 0x4e0   : > { %v3490_v25 = vmax.f32 %v3366_v6, 0.0  ;;  %v3369_v39 = vadd.f32 %v11767_v42, %v14961_v0 }
 0x4e2   : > { %v3826_v11 = vmul.f32 %v14933_v2, %v3490_v25  ;;  %v3491_v26 = vmax.f32 %v3369_v39, 0.0  ;;  %v12982_v25 = vld [vmem:[#allocation13 + $0x100] sm:$0xff]  }
 0x4e3   : > { %v3148_v3 = vpop.f32.mrb[48].mxu0  ;;  %v3925_v14 = vld [vmem:[#allocation3 + $0xbf] sm:$0xff] }
 0x4e4   : > { %3875 = vst [vmem:[#allocation3 + $0xd0] sm:$0xff] %v3826_v11  ;;  %v3827_v38 = vmul.f32 %v14928_v27, %v3491_v26  ;;  %v11768_v7 = vadd.f32 %v15040_v12, %v3148_v3  ;;  %v3150_v45 = vpop.f32.mrb[49].mxu0  ;;  %v3961_v63 = vpack.c.bf16 %v3925_v14, %v3924_v50  ;;  %v4059_v61 = vpack.c.bf16 %v3826_v11, %v3825_v36  ;;  %v15233_v53 = vld [vmem:[#allocation3 + $0xc0] sm:$0xff]  ;;  %v17092_v26 = vld [vmem:[#allocation31_spill] sm:$0xff] }
 0x4e5   : > { %v3151_v0 = vpop.f32.mrb[50].mxu0  ;;  %v4214_v40 = vld [vmem:[#allocation3 + $0xc7] sm:$0xff]  ;;  %v4154_v36 = vpack.c.bf16 %v4117_v16, %v4116_v20 }
 0x4e6   : > { %3876 = vst [vmem:[#allocation3 + $0xd8] sm:$0xff] %v3827_v38  ;;  %v3374_v43 = vadd.f32 %v11768_v7, %v14997_v23  ;;  %v11769_v27 = vadd.f32 %v15040_v12, %v3151_v0  ;;  %v3153_v6 = vpop.f32.mrb[51].mxu0  ;;  %5693 = vmatmul.mubr.bf16.gmra.mrb[140].mxu0 %v3961_v63  ;;  %v4251_v42 = vpack.c.bf16 %v4214_v40, %v3925_v14  ;;  %v12983_v45 = vld [vmem:[#allocation13 + $0x108] sm:$0xff]  }
 0x4e7   : > { %5700 = vmatprep.mubr.bf16.mxu0 %v4059_v61  ;;  %v17093_v14 = vld [vmem:[#allocation44_spill] sm:$0xff] }
 0x4e8   : > { %v3492_v39 = vmax.f32 %v3374_v43, 0.0  ;;  %v3377_v11 = vadd.f32 %v11769_v27, %v15004_v29  ;;  %5909 = vmatprep.mubr.bf16.mxu1 %v4251_v42  ;;  %v4119_v43 = vld [vmem:[#allocation3 + $0xc1] sm:$0xff] }
 0x4e9   : > { %5910 = vmatmul.mubr.bf16.vlgmr.msra.gmra.mrb[48].mxu1 %v4154_v36  ;;  %v15244_v27 = vld [vmem:[#allocation3 + $0xc8] sm:$0xff]  ;;  %v17096_v36 = vld [vmem:[#allocation34_spill] sm:$0xff] }
 0x4ea   : > { %v3828_v3 = vmul.f32 %v17092_v26, %v3492_v39  ;;  %v3493_v50 = vmax.f32 %v3377_v11, 0.0  ;;  %6023 = vmatpush1.bf16.msra.mxu1 %v12982_v25  ;;  %17094 = vst [vmem:[#allocation54_spill] sm:$0xff] %v15244_v27  ;;  %v17098_v25 = vld [vmem:[#allocation48_spill] sm:$0xff] }
 0x4eb   : > { %v3156_v23 = vpop.f32.mrb[52].mxu0  ;;  %v3927_v7 = vld [vmem:[#allocation3 + $0xcf] sm:$0xff]  ;;  %6024 = vmatprep.subr.bf16.mxu1 %v17037_v60 }
 0x4ec   : > { %3877 = vst [vmem:[#allocation3 + $0xe0] sm:$0xff] %v3828_v3  ;;  %v3829_v63 = vmul.f32 %v17093_v14, %v3493_v50  ;;  %v11770_v16 = vadd.f32 %v15040_v12, %v3156_v23  ;;  %v3158_v61 = vpop.f32.mrb[53].mxu0  ;;  %v3962_v0 = vpack.c.bf16 %v3927_v7, %v4214_v40  ;;  %v4060_v29 = vpack.c.bf16 %v3828_v3, %v3827_v38  ;;  %v15246_v6 = vld [vmem:[#allocation3 + $0xd0] sm:$0xff]  ;;  %v4118_v40 = vld [vmem:[#allocation3 + $0xb9] sm:$0xff]  ;;  %v17097_v14 = vld [vmem:[#allocation55_spill] sm:$0xff] }
 0x4ed   : > { %17095 = vst [vmem:[#allocation57_spill] sm:$0xff] %v15246_v6  ;;  %v3159_v42 = vpop.f32.mrb[54].mxu0  ;;  %v4216_v20 = vld [vmem:[#allocation3 + $0xd7] sm:$0xff]  ;;  %v4155_v3 = vpack.c.bf16 %v4119_v43, %v4118_v40 }
 0x4ee   : > { %3878 = vst [vmem:[#allocation3 + $0xe8] sm:$0xff] %v3829_v63  ;;  %v3382_v39 = vadd.f32 %v11770_v16, %v17096_v36  ;;  %v11771_v11 = vadd.f32 %v15040_v12, %v3159_v42  ;;  %v3161_v26 = vpop.f32.mrb[55].mxu0  ;;  %5701 = vmatmul.mubr.bf16.gmra.mrb[144].mxu0 %v3962_v0  ;;  %v4252_v50 = vpack.c.bf16 %v4216_v20, %v3927_v7  ;;  %v12984_v38 = vld [vmem:[#allocation13 + $0x110] sm:$0xff]   ;;  %v12985_v42 = vld [vmem:[#allocation13 + $0x118] sm:$0xff]  }
 0x4ef   : > { %6025 = vmatpush1.bf16.msra.mxu1 %v12983_v45  ;;  %5708 = vmatprep.mubr.bf16.mxu0 %v4060_v29  ;;  %v17099_v45 = vld [vmem:[#allocation32_spill] sm:$0xff] }
 0x4f0   : > { %6026 = vmatprep.subr.bf16.mxu1 %v17037_v60  ;;  %v3494_v23 = vmax.f32 %v3382_v39, 0.0  ;;  %v3385_v61 = vadd.f32 %v11771_v11, %v17097_v14  ;;  %5917 = vmatprep.mubr.bf16.mxu1 %v4252_v50  ;;  %v4121_v26 = vld [vmem:[#allocation3 + $0xd1] sm:$0xff] }
 0x4f1   : > { %5918 = vmatmul.mubr.bf16.gmra.mrb[52].mxu1 %v4155_v3  ;;  %v15258_v50 = vld [vmem:[#allocation3 + $0xd8] sm:$0xff]  ;;  %v17104_v3 = vld [vmem:[#allocation52_spill] sm:$0xff] }
 0x4f2   : > { %v3830_v2 = vmul.f32 %v17098_v25, %v3494_v23  ;;  %v3495_v16 = vmax.f32 %v3385_v61, 0.0  ;;  %17100 = vst [vmem:[#allocation58_spill] sm:$0xff] %v15258_v50  ;;  %v17102_v23 = vld [vmem:[#allocation36_spill] sm:$0xff] }
 0x4f3   : > { %6027 = vmatpush1.bf16.msra.mxu1 %v12984_v38  ;;  %v3164_v36 = vpop.f32.mrb[56].mxu0  ;;  %v3929_v0 = vld [vmem:[#allocation3 + $0xdf] sm:$0xff] }
 0x4f4   : > { %6028 = vmatprep.subr.bf16.mxu1 %v17037_v60  ;;  %3879 = vst [vmem:[#allocation3 + $0xf0] sm:$0xff] %v3830_v2  ;;  %v3831_v7 = vmul.f32 %v17099_v45, %v3495_v16  ;;  %v11772_v43 = vadd.f32 %v15040_v12, %v3164_v36  ;;  %v3166_v29 = vpop.f32.mrb[57].mxu0  ;;  %v3963_v39 = vpack.c.bf16 %v3929_v0, %v4216_v20  ;;  %v15260_v40 = vld [vmem:[#allocation3 + $0xe0] sm:$0xff]  ;;  %v4120_v20 = vld [vmem:[#allocation3 + $0xc9] sm:$0xff] }
 0x4f5   : > { %v4061_v11 = vpack.c.bf16 %v3830_v2, %v3829_v63  ;;  %17101 = vst [vmem:[#allocation61_spill] sm:$0xff] %v15260_v40  ;;  %v3167_v25 = vpop.f32.mrb[58].mxu0  ;;  %v4218_v38 = vld [vmem:[#allocation3 + $0xe7] sm:$0xff]  ;;  %v4156_v63 = vpack.c.bf16 %v4121_v26, %v4120_v20  ;;  %v17103_v29 = vld [vmem:[#allocation37_spill] sm:$0xff] }
 0x4f6   : > { %3880 = vst [vmem:[#allocation3 + $0xf8] sm:$0xff] %v3831_v7  ;;  %v3390_v14 = vadd.f32 %v11772_v43, %v17102_v23  ;;  %v11773_v61 = vadd.f32 %v15040_v12, %v3167_v25  ;;  %v3169_v16 = vpop.f32.mrb[59].mxu0  ;;  %5709 = vmatmul.mubr.bf16.gmra.mrb[148].mxu0 %v3963_v39  ;;  %v4253_v36 = vpack.c.bf16 %v4218_v38, %v3929_v0  ;;  %v12986_v2 = vld [vmem:[#allocation13 + $0x120] sm:$0xff]   ;;  %v12987_v0 = vld [vmem:[#allocation13 + $0x128] sm:$0xff]  }
 0x4f7   : > { %6029 = vmatpush1.bf16.msra.mxu1 %v12985_v42  ;;  %5716 = vmatprep.mubr.bf16.mxu0 %v4061_v11  ;;  %v17105_v42 = vld [vmem:[#allocation47_spill] sm:$0xff] }
 0x4f8   : > { %6030 = vmatprep.subr.bf16.mxu1 %v17037_v60  ;;  %v3496_v45 = vmax.f32 %v3390_v14, 0.0  ;;  %v3393_v46 = vadd.f32 %v11773_v61, %v17103_v29  ;;  %5925 = vmatprep.mubr.bf16.mxu1 %v4253_v36  ;;  %v4123_v16 = vld [vmem:[#allocation3 + $0xe1] sm:$0xff] }
 0x4f9   : > { %5926 = vmatmul.mubr.bf16.gmra.mrb[56].mxu1 %v4156_v63  ;;  %v15272_v36 = vld [vmem:[#allocation3 + $0xe8] sm:$0xff] }
 0x4fa   : > { %v3832_v55 = vmul.f32 %v17104_v3, %v3496_v45  ;;  %v3497_v43 = vmax.f32 %v3393_v46, 0.0  ;;  %17106 = vst [vmem:[#allocation62_spill] sm:$0xff] %v15272_v36  ;;  %v17108_v45 = vld [vmem:[#allocation35_spill] sm:$0xff]  ;;  %v17115_v36 = vld [vmem:[#allocation45_spill] sm:$0xff] }
 0x4fb   : > { %6031 = vmatpush1.bf16.msra.mxu1 %v12986_v2  ;;  %v3172_v25 = vpop.f32.mrb[60].mxu0  ;;  %v3931_v23 = vld [vmem:[#allocation3 + $0xef] sm:$0xff]  ;;  %v15276_v2 = vld [vmem:[#allocation13 + $0x200] sm:$0xff]  }
 0x4fc   : > { %6032 = vmatprep.subr.bf16.mxu1 %v17037_v60  ;;  %3881 = vst [vmem:[#allocation3 + $0x100] sm:$0xff] %v3832_v55  ;;  %v3833_v39 = vmul.f32 %v17105_v42, %v3497_v43  ;;  %v11774_v26 = vadd.f32 %v15040_v12, %v3172_v25  ;;  %v3174_v11 = vpop.f32.mrb[61].mxu0  ;;  %v3964_v14 = vpack.c.bf16 %v3931_v23, %v4218_v38  ;;  %v15274_v20 = vld [vmem:[#allocation3 + $0xf0] sm:$0xff] }
 0x4fd   : > { %v4062_v61 = vpack.c.bf16 %v3832_v55, %v3831_v7  ;;  %17107 = vst [vmem:[#allocation64_spill] sm:$0xff] %v15274_v20  ;;  %v3175_v46 = vpop.f32.mrb[62].mxu0  ;;  %v4220_v3 = vld [vmem:[#allocation3 + $0xf7] sm:$0xff]  ;;  %11520 = vmatprep.subr.bf16.mxu0 %v15276_v2 }
 0x4fe   : > { %3882 = vst [vmem:[#allocation3 + $0x108] sm:$0xff] %v3833_v39  ;;  %v3398_v29 = vadd.f32 %v11774_v26, %v17108_v45  ;;  %v11775_v43 = vadd.f32 %v15040_v12, %v3175_v46  ;;  %v3177_v25 = vpop.f32.mrb[63].mxu0  ;;  %5717 = vmatmul.mubr.bf16.gmra.mrb[152].mxu0 %v3964_v14  ;;  %v4254_v38 = vpack.c.bf16 %v4220_v3, %v3931_v23  ;;  %v4122_v55 = vld [vmem:[#allocation3 + $0xd9] sm:$0xff] }
 0x4ff   : > { %v4157_v7 = vpack.c.bf16 %v4123_v16, %v4122_v55  ;;  %5724 = vmatprep.mubr.bf16.mxu0 %v4062_v61  ;;  %6033 = vmatpush1.bf16.msra.mxu1 %v12987_v0  ;;  %v12988_v42 = vld [vmem:[#allocation13 + $0x130] sm:$0xff]   ;;  %v12989_v23 = vld [vmem:[#allocation13 + $0x138] sm:$0xff]   ;;  %v17111_v16 = vld [vmem:[#allocation51_spill] sm:$0xff] }
 0x500   : > { %v3498_v11 = vmax.f32 %v3398_v29, 0.0  ;;  %v3401_v4 = vadd.f32 %v11775_v43, %v17109_v15  ;;  %5933 = vmatprep.mubr.bf16.mxu1 %v4254_v38  ;;  %6034 = vmatprep.subr.bf16.mxu1 %v17037_v60  ;;  %v17110_v26 = vld [vmem:[#allocation33_spill] sm:$0xff] }
 0x501   : > { %5934 = vmatmul.mubr.bf16.gmra.mrb[60].mxu1 %v4157_v7  ;;  %v4125_v43 = vld [vmem:[#allocation3 + $0xf1] sm:$0xff] }
 0x502   : > { %v3834_v45 = vmul.f32 %v17110_v26, %v3498_v11  ;;  %v3499_v46 = vmax.f32 %v3401_v4, 0.0  ;;  %v15289_v55 = vld [vmem:[#allocation3 + $0xf8] sm:$0xff]  ;;  %v17114_v26 = vld [vmem:[#allocation42_spill] sm:$0xff] }
 0x503   : > { %v3180_v25 = vpop.f32.mrb[64].mxu0  ;;  %v3933_v14 = vld [vmem:[#allocation3 + $0xff] sm:$0xff]  ;;  %6035 = vmatpush1.bf16.msra.mxu1 %v12988_v42  ;;  %17112 = vst [vmem:[#allocation65_spill] sm:$0xff] %v15289_v55  ;;  %v17116_v42 = vld [vmem:[#allocation56_spill] sm:$0xff] }
 0x504   : > { %3883 = vst [vmem:[#allocation3 + $0x110] sm:$0xff] %v3834_v45  ;;  %v3835_v0 = vmul.f32 %v17111_v16, %v3499_v46  ;;  %v11776_v61 = vadd.f32 %v15040_v12, %v3180_v25  ;;  %v3182_v29 = vpop.f32.mrb[65].mxu0  ;;  %v3965_v15 = vpack.c.bf16 %v3933_v14, %v4220_v3  ;;  %v4063_v38 = vpack.c.bf16 %v3834_v45, %v3833_v39  ;;  %v15291_v7 = vld [vmem:[#allocation3 + $0x100] sm:$0xff]  ;;  %v4124_v39 = vld [vmem:[#allocation3 + $0xe9] sm:$0xff] }
 0x505   : > { %6036 = vmatprep.subr.bf16.mxu1 %v17037_v60  ;;  %17113 = vst [vmem:[#allocation31_spill] sm:$0xff] %v15291_v7  ;;  %v3183_v4 = vpop.f32.mrb[66].mxu0  ;;  %v4222_v11 = vld [vmem:[#allocation3 + $0x107] sm:$0xff]  ;;  %v4158_v45 = vpack.c.bf16 %v4125_v43, %v4124_v39  ;;  %v17119_v39 = vld [vmem:[#allocation41_spill] sm:$0xff] }
 0x506   : > { %3884 = vst [vmem:[#allocation3 + $0x118] sm:$0xff] %v3835_v0  ;;  %v3406_v46 = vadd.f32 %v11776_v61, %v17114_v26  ;;  %v11777_v25 = vadd.f32 %v15040_v12, %v3183_v4  ;;  %v3185_v16 = vpop.f32.mrb[67].mxu0  ;;  %5725 = vmatmul.mubr.bf16.gmra.mrb[156].mxu0 %v3965_v15  ;;  %v4255_v3 = vpack.c.bf16 %v4222_v11, %v3933_v14  ;;  %v12990_v29 = vld [vmem:[#allocation13 + $0x140] sm:$0xff]   ;;  %v12991_v15 = vld [vmem:[#allocation13 + $0x148] sm:$0xff]  }
 0x507   : > { %5732 = vmatprep.mubr.bf16.mxu0 %v4063_v38  ;;  %6037 = vmatpush1.bf16.msra.mxu1 %v12989_v23  ;;  %v17117_v14 = vld [vmem:[#allocation60_spill] sm:$0xff]  ;;  %v4127_v16 = vld [vmem:[#allocation3 + $0x101] sm:$0xff] }
 0x508   : > { %v3500_v63 = vmax.f32 %v3406_v46, 0.0  ;;  %v3409_v20 = vadd.f32 %v11777_v25, %v17115_v36  ;;  %5941 = vmatprep.mubr.bf16.mxu1 %v4255_v3  ;;  %6038 = vmatprep.subr.bf16.mxu1 %v17037_v60  ;;  %v15303_v25 = vld [vmem:[#allocation3 + $0x108] sm:$0xff] }
 0x509   : > { %5942 = vmatmul.mubr.bf16.gmra.mrb[64].mxu1 %v4158_v45 }
 0x50a   : > { %v3836_v55 = vmul.f32 %v17116_v42, %v3500_v63  ;;  %v3501_v61 = vmax.f32 %v3409_v20, 0.0  ;;  %v17121_v42 = vld [vmem:[#allocation59_spill] sm:$0xff] }
 0x50b   : > { %v3188_v26 = vpop.f32.mrb[68].mxu0  ;;  %v3935_v4 = vld [vmem:[#allocation3 + $0x10f] sm:$0xff]  ;;  %6039 = vmatpush1.bf16.msra.mxu1 %v12990_v29 }
 0x50c   : > { %3885 = vst [vmem:[#allocation3 + $0x120] sm:$0xff] %v3836_v55  ;;  %v3837_v43 = vmul.f32 %v17117_v14, %v3501_v61  ;;  %v11778_v23 = vadd.f32 %v15040_v12, %v3188_v26  ;;  %v3190_v38 = vpop.f32.mrb[69].mxu0  ;;  %v3966_v46 = vpack.c.bf16 %v3935_v4, %v4222_v11  ;;  %v4064_v36 = vpack.c.bf16 %v3836_v55, %v3835_v0  ;;  %v15305_v3 = vld [vmem:[#allocation3 + $0x110] sm:$0xff]  ;;  %v4126_v0 = vld [vmem:[#allocation3 + $0xf9] sm:$0xff] }
 0x50d   : > { %6040 = vmatprep.subr.bf16.mxu1 %v17037_v60  ;;  %17118 = vst [vmem:[#allocation44_spill] sm:$0xff] %v15305_v3  ;;  %v3191_v20 = vpop.f32.mrb[70].mxu0  ;;  %v4224_v63 = vld [vmem:[#allocation3 + $0x117] sm:$0xff]  ;;  %v4159_v55 = vpack.c.bf16 %v4127_v16, %v4126_v0  ;;  %v17120_v38 = vld [vmem:[#allocation43_spill] sm:$0xff] }
 0x50e   : > { %3886 = vst [vmem:[#allocation3 + $0x128] sm:$0xff] %v3837_v43  ;;  %v3414_v45 = vadd.f32 %v11778_v23, %v17119_v39  ;;  %v11779_v29 = vadd.f32 %v15040_v12, %v3191_v20  ;;  %v3193_v61 = vpop.f32.mrb[71].mxu0  ;;  %5733 = vmatmul.mubr.bf16.gmra.mrb[160].mxu0 %v3966_v46  ;;  %v4256_v11 = vpack.c.bf16 %v4224_v63, %v3935_v4  ;;  %v12992_v26 = vld [vmem:[#allocation13 + $0x150] sm:$0xff]   ;;  %v12993_v46 = vld [vmem:[#allocation13 + $0x158] sm:$0xff]  }
 0x50f   : > { %5740 = vmatprep.mubr.bf16.mxu0 %v4064_v36  ;;  %6041 = vmatpush1.bf16.msra.mxu1 %v12991_v15  ;;  %v17122_v4 = vld [vmem:[#allocation38_spill] sm:$0xff] }
 0x510   : > { %v3502_v14 = vmax.f32 %v3414_v45, 0.0  ;;  %v3417_v7 = vadd.f32 %v11779_v29, %v17120_v38  ;;  %5949 = vmatprep.mubr.bf16.mxu1 %v4256_v11  ;;  %6042 = vmatprep.subr.bf16.mxu1 %v17037_v60  ;;  %v15315_v36 = vld [vmem:[#allocation11] ss:$0 sm:$0xff]  ;;  %v4129_v29 = vld [vmem:[#allocation3 + $0x111] sm:$0xff] }
 0x511   : > { %5950 = vmatmul.mubr.bf16.gmra.mrb[68].mxu1 %v4159_v55  ;;  %v15319_v11 = vld [vmem:[#allocation3 + $0x118] sm:$0xff] }
 0x512   : > { %v3838_v3 = vmul.f32 %v17121_v42, %v3502_v14  ;;  %v3503_v23 = vmax.f32 %v3417_v7, 0.0 }
 0x513   : > { %v3196_v39 = vpop.f32.mrb[72].mxu0  ;;  %v3937_v12 = vld [vmem:[#allocation3 + $0x11f] sm:$0xff]  ;;  %6043 = vmatpush1.bf16.msra.mxu1 %v12992_v26 }
 0x514   : > { %3887 = vst [vmem:[#allocation3 + $0x130] sm:$0xff] %v3838_v3  ;;  %v3839_v16 = vmul.f32 %v17122_v4, %v3503_v23  ;;  %v11780_v15 = vadd.f32 %v15315_v36, %v3196_v39  ;;  %v3198_v20 = vpop.f32.mrb[73].mxu0  ;;  %v3967_v45 = vpack.c.bf16 %v3937_v12, %v4224_v63  ;;  %v4065_v61 = vpack.c.bf16 %v3838_v3, %v3837_v43  ;;  %v15321_v7 = vld [vmem:[#allocation3 + $0x120] sm:$0xff]  ;;  %v4128_v43 = vld [vmem:[#allocation3 + $0x109] sm:$0xff] }
 0x515   : > { %6044 = vmatprep.subr.bf16.mxu1 %v17037_v60  ;;  %v3199_v42 = vpop.f32.mrb[74].mxu0  ;;  %v4226_v0 = vld [vmem:[#allocation3 + $0x127] sm:$0xff]  ;;  %v4160_v3 = vpack.c.bf16 %v4129_v29, %v4128_v43 }
 0x516   : > { %3888 = vst [vmem:[#allocation3 + $0x138] sm:$0xff] %v3839_v16  ;;  %v3422_v26 = vadd.f32 %v11780_v15, %v15084_v48  ;;  %v11781_v14 = vadd.f32 %v15315_v36, %v3199_v42  ;;  %v3201_v38 = vpop.f32.mrb[75].mxu0  ;;  %5741 = vmatmul.mubr.bf16.gmra.mrb[164].mxu0 %v3967_v45  ;;  %v4257_v63 = vpack.c.bf16 %v4226_v0, %v3937_v12  ;;  %v12994_v23 = vld [vmem:[#allocation13 + $0x160] sm:$0xff]   ;;  %v12995_v45 = vld [vmem:[#allocation13 + $0x168] sm:$0xff]  }
 0x517   : > { %5748 = vmatprep.mubr.bf16.mxu0 %v4065_v61  ;;  %6045 = vmatpush1.bf16.msra.mxu1 %v12993_v46  ;;  %v17123_v20 = vld [vmem:[#allocation39_spill] sm:$0xff]  ;;  %v17124_v12 = vld [vmem:[#allocation40_spill] sm:$0xff] }
 0x518   : > { %v3504_v39 = vmax.f32 %v3422_v26, 0.0  ;;  %v3425_v4 = vadd.f32 %v11781_v14, %v15090_v22  ;;  %5957 = vmatprep.mubr.bf16.mxu1 %v4257_v63  ;;  %6046 = vmatprep.subr.bf16.mxu1 %v17037_v60  ;;  %v4131_v38 = vld [vmem:[#allocation3 + $0x121] sm:$0xff] }
 0x519   : > { %5958 = vmatmul.mubr.bf16.gmra.mrb[72].mxu1 %v4160_v3  ;;  %v15333_v14 = vld [vmem:[#allocation3 + $0x128] sm:$0xff] }
 0x51a   : > { %v3840_v55 = vmul.f32 %v17123_v20, %v3504_v39  ;;  %v3505_v48 = vmax.f32 %v3425_v4, 0.0 }
 0x51b   : > { %v3204_v15 = vpop.f32.mrb[76].mxu0  ;;  %v3939_v42 = vld [vmem:[#allocation3 + $0x12f] sm:$0xff]  ;;  %6047 = vmatpush1.bf16.msra.mxu1 %v12994_v23 }
 0x51c   : > { %3889 = vst [vmem:[#allocation3 + $0x140] sm:$0xff] %v3840_v55  ;;  %v3841_v29 = vmul.f32 %v17124_v12, %v3505_v48  ;;  %v11782_v46 = vadd.f32 %v15315_v36, %v3204_v15  ;;  %v3206_v61 = vpop.f32.mrb[77].mxu0  ;;  %v3968_v26 = vpack.c.bf16 %v3939_v42, %v4226_v0  ;;  %v4066_v22 = vpack.c.bf16 %v3840_v55, %v3839_v16  ;;  %v15335_v63 = vld [vmem:[#allocation3 + $0x130] sm:$0xff]  ;;  %v4130_v16 = vld [vmem:[#allocation3 + $0x119] sm:$0xff] }
 0x51d   : > { %6048 = vmatprep.subr.bf16.mxu1 %v17037_v60  ;;  %v3207_v43 = vpop.f32.mrb[78].mxu0  ;;  %v4228_v3 = vld [vmem:[#allocation3 + $0x137] sm:$0xff]  ;;  %v4161_v55 = vpack.c.bf16 %v4131_v38, %v4130_v16  ;;  %v17125_v61 = vld [vmem:[#allocation46_spill] sm:$0xff] }
 0x51e   : > { %3890 = vst [vmem:[#allocation3 + $0x148] sm:$0xff] %v3841_v29  ;;  %v3430_v39 = vadd.f32 %v11782_v46, %v15081_v19  ;;  %v11783_v4 = vadd.f32 %v15315_v36, %v3207_v43  ;;  %v3209_v20 = vpop.f32.mrb[79].mxu0  ;;  %5749 = vmatmul.mubr.bf16.gmra.mrb[168].mxu0 %v3968_v26  ;;  %v4258_v0 = vpack.c.bf16 %v4228_v3, %v3939_v42  ;;  %v12996_v48 = vld [vmem:[#allocation13 + $0x170] sm:$0xff]   ;;  %v12997_v26 = vld [vmem:[#allocation13 + $0x178] sm:$0xff]  }
 0x51f   : > { %5756 = vmatprep.mubr.bf16.mxu0 %v4066_v22  ;;  %6049 = vmatpush1.bf16.msra.mxu1 %v12995_v45 }
 0x520   : > { %v3506_v15 = vmax.f32 %v3430_v39, 0.0  ;;  %v3433_v12 = vadd.f32 %v11783_v4, %v15088_v33  ;;  %5965 = vmatprep.mubr.bf16.mxu1 %v4258_v0  ;;  %6050 = vmatprep.subr.bf16.mxu1 %v17037_v60  ;;  %v4133_v39 = vld [vmem:[#allocation3 + $0x131] sm:$0xff] }
 0x521   : > { %5966 = vmatmul.mubr.bf16.gmra.mrb[76].mxu1 %v4161_v55  ;;  %v15347_v4 = vld [vmem:[#allocation3 + $0x138] sm:$0xff] }
 0x522   : > { %v3842_v23 = vmul.f32 %v17125_v61, %v3506_v15  ;;  %v3507_v19 = vmax.f32 %v3433_v12, 0.0  ;;  %v4405_v55 = vld [vmem:[#allocation3 + $0xb9] sm:$0xff] }
 0x523   : > { %v3212_v46 = vpop.f32.mrb[80].mxu0  ;;  %v3941_v43 = vld [vmem:[#allocation3 + $0x13f] sm:$0xff]  ;;  %6051 = vmatpush1.bf16.msra.mxu1 %v12996_v48 }
 0x524   : > { %3891 = vst [vmem:[#allocation3 + $0x150] sm:$0xff] %v3842_v23  ;;  %v3843_v42 = vmul.f32 %v15074_v24, %v3507_v19  ;;  %v11784_v45 = vadd.f32 %v15315_v36, %v3212_v46  ;;  %v3214_v38 = vpop.f32.mrb[81].mxu0  ;;  %v3969_v22 = vpack.c.bf16 %v3941_v43, %v4228_v3  ;;  %v4067_v33 = vpack.c.bf16 %v3842_v23, %v3841_v29  ;;  %v15349_v20 = vld [vmem:[#allocation3 + $0x140] sm:$0xff]  ;;  %v4132_v29 = vld [vmem:[#allocation3 + $0x129] sm:$0xff] }
 0x525   : > { %6052 = vmatprep.subr.bf16.mxu1 %v17037_v60  ;;  %v3215_v0 = vpop.f32.mrb[82].mxu0  ;;  %v4230_v16 = vld [vmem:[#allocation3 + $0x147] sm:$0xff]  ;;  %v4162_v23 = vpack.c.bf16 %v4133_v39, %v4132_v29 }
 0x526   : > { %3892 = vst [vmem:[#allocation3 + $0x158] sm:$0xff] %v3843_v42  ;;  %v3438_v24 = vadd.f32 %v11784_v45, %v15118_v41  ;;  %v11785_v48 = vadd.f32 %v15315_v36, %v3215_v0  ;;  %v3217_v15 = vpop.f32.mrb[83].mxu0  ;;  %5757 = vmatmul.mubr.bf16.gmra.mrb[172].mxu0 %v3969_v22  ;;  %v4259_v3 = vpack.c.bf16 %v4230_v16, %v3941_v43  ;;  %v15360_v0 = vld [vmem:[#allocation3 + $0x148] sm:$0xff] }
 0x527   : > { %5764 = vmatprep.mubr.bf16.mxu0 %v4067_v33  ;;  %6053 = vmatpush1.bf16.msra.mxu1 %v12997_v26  ;;  %v4135_v26 = vld [vmem:[#allocation3 + $0x141] sm:$0xff] }
 0x528   : > { %v3508_v12 = vmax.f32 %v3438_v24, 0.0  ;;  %v3441_v61 = vadd.f32 %v11785_v48, %v15124_v8  ;;  %5973 = vmatprep.mubr.bf16.mxu1 %v4259_v3  ;;  %6247 = vmatprep.subr.bf16.mxu1 %v17037_v60 }
 0x529   : > { %5974 = vmatmul.mubr.bf16.gmra.mrb[80].mxu1 %v4162_v23 }
 0x52a   : > { %v3844_v19 = vmul.f32 %v15078_v18, %v3508_v12  ;;  %v3509_v46 = vmax.f32 %v3441_v61, 0.0  ;;  %v4402_v18 = vld [vmem:[#allocation3 + $0xa1] sm:$0xff] }
 0x52b   : > { %v3220_v41 = vpop.f32.mrb[84].mxu0  ;;  %v3943_v45 = vld [vmem:[#allocation3 + $0x14f] sm:$0xff] }
 0x52c   : > { %3893 = vst [vmem:[#allocation3 + $0x160] sm:$0xff] %v3844_v19  ;;  %v3845_v38 = vmul.f32 %v15102_v47, %v3509_v46  ;;  %v11786_v43 = vadd.f32 %v15315_v36, %v3220_v41  ;;  %v3222_v22 = vpop.f32.mrb[85].mxu0  ;;  %v3970_v39 = vpack.c.bf16 %v3943_v45, %v4230_v16  ;;  %v4068_v33 = vpack.c.bf16 %v3844_v19, %v3843_v42  ;;  %v15362_v8 = vld [vmem:[#allocation3 + $0x150] sm:$0xff]  ;;  %v4134_v16 = vld [vmem:[#allocation3 + $0x139] sm:$0xff] }
 0x52d   : > { %v3223_v24 = vpop.f32.mrb[86].mxu0  ;;  %v4232_v48 = vld [vmem:[#allocation3 + $0x157] sm:$0xff]  ;;  %v4163_v23 = vpack.c.bf16 %v4135_v26, %v4134_v16  ;;  %v4136_v16 = vld [vmem:[#allocation3 + $0x149] sm:$0xff] }
 0x52e   : > { %3894 = vst [vmem:[#allocation3 + $0x168] sm:$0xff] %v3845_v38  ;;  %v3446_v15 = vadd.f32 %v11786_v43, %v15115_v59  ;;  %v11787_v47 = vadd.f32 %v15315_v36, %v3223_v24  ;;  %v3225_v3 = vpop.f32.mrb[87].mxu0  ;;  %5765 = vmatmul.mubr.bf16.gmra.mrb[176].mxu0 %v3970_v39  ;;  %v4260_v29 = vpack.c.bf16 %v4232_v48, %v3943_v45  ;;  %v4137_v26 = vld [vmem:[#allocation3 + $0x151] sm:$0xff] }
 0x52f   : > { %5772 = vmatprep.mubr.bf16.mxu0 %v4068_v33  ;;  %v15374_v24 = vld [vmem:[#allocation3 + $0x158] sm:$0xff] }
 0x530   : > { %v3510_v42 = vmax.f32 %v3446_v15, 0.0  ;;  %v3449_v12 = vadd.f32 %v11787_v47, %v15122_v56  ;;  %5981 = vmatprep.mubr.bf16.mxu1 %v4260_v29 }
 0x531   : > { %5982 = vmatmul.mubr.bf16.gmra.mrb[84].mxu1 %v4163_v23  ;;  %v4164_v23 = vpack.c.bf16 %v4137_v26, %v4136_v16 }
 0x532   : > { %v3846_v61 = vmul.f32 %v15111_v31, %v3510_v42  ;;  %v3511_v19 = vmax.f32 %v3449_v12, 0.0  ;;  %v15462_v31 = vld [vmem:[#allocation3 + $0xaf] sm:$0xff] }
 0x533   : > { %v3228_v46 = vpop.f32.mrb[88].mxu0  ;;  %v3945_v41 = vld [vmem:[#allocation3 + $0x15f] sm:$0xff] }
 0x534   : > { %v15370_v22 = vld [vmem:[#allocation3 + $0x160] sm:$0xff]  ;;  %3895 = vst [vmem:[#allocation3 + $0x170] sm:$0xff] %v3846_v61  ;;  %v3847_v59 = vmul.f32 %v15134_v58, %v3511_v19  ;;  %v11788_v45 = vadd.f32 %v15315_v36, %v3228_v46  ;;  %v3230_v43 = vpop.f32.mrb[89].mxu0  ;;  %v3971_v39 = vpack.c.bf16 %v3945_v41, %v4232_v48  ;;  %v4069_v33 = vpack.c.bf16 %v3846_v61, %v3845_v38 }
 0x535   : > { %v3231_v56 = vpop.f32.mrb[90].mxu0  ;;  %v4234_v15 = vld [vmem:[#allocation3 + $0x167] sm:$0xff] }
 0x536   : > { %3896 = vst [vmem:[#allocation3 + $0x178] sm:$0xff] %v3847_v59  ;;  %v3454_v47 = vadd.f32 %v11788_v45, %v15151_v62  ;;  %v11789_v3 = vadd.f32 %v15315_v36, %v3231_v56  ;;  %v3233_v29 = vpop.f32.mrb[91].mxu0  ;;  %5773 = vmatmul.mubr.bf16.gmra.mrb[180].mxu0 %v3971_v39  ;;  %v4261_v58 = vpack.c.bf16 %v4234_v15, %v3945_v41  ;;  %v4139_v39 = vld [vmem:[#allocation3 + $0x161] sm:$0xff] }
 0x537   : > { %5780 = vmatprep.mubr.bf16.mxu0 %v4069_v33  ;;  %v15386_v33 = vld [vmem:[#allocation3 + $0x168] sm:$0xff] }
 0x538   : > { %v3512_v48 = vmax.f32 %v3454_v47, 0.0  ;;  %v3457_v38 = vadd.f32 %v11789_v3, %v15160_v44  ;;  %5989 = vmatprep.mubr.bf16.mxu1 %v4261_v58  ;;  %v15392_v58 = vld [vmem:[#allocation3 + $0x159] sm:$0xff] }
 0x539   : > { %5990 = vmatmul.mubr.bf16.gmra.mrb[88].mxu1 %v4164_v23 }
 0x53a   : > { %v3848_v42 = vmul.f32 %v15146_v34, %v3512_v48  ;;  %v3513_v12 = vmax.f32 %v3457_v38, 0.0  ;;  %v4194_v48 = vld [vmem:[#allocation3 + $0x27] sm:$0xff] }
 0x53b   : > { %v3236_v61 = vpop.f32.mrb[92].mxu0  ;;  %v3947_v19 = vld [vmem:[#allocation3 + $0x16f] sm:$0xff] }
 0x53c   : > { %v15382_v46 = vld [vmem:[#allocation3 + $0x170] sm:$0xff]  ;;  %3897 = vst [vmem:[#allocation3 + $0x180] sm:$0xff] %v3848_v42  ;;  %v3849_v62 = vmul.f32 %v15166_v10, %v3513_v12  ;;  %v11790_v41 = vadd.f32 %v15315_v36, %v3236_v61  ;;  %v3238_v45 = vpop.f32.mrb[93].mxu0  ;;  %v3972_v43 = vpack.c.bf16 %v3947_v19, %v4234_v15  ;;  %v4070_v26 = vpack.c.bf16 %v3848_v42, %v3847_v59 }
 0x53d   : > { %v3239_v44 = vpop.f32.mrb[94].mxu0  ;;  %v4236_v56 = vld [vmem:[#allocation3 + $0x177] sm:$0xff]  ;;  %v15395_v15 = vpack.c.bf16 %v4139_v39, %v15392_v58 }
 0x53e   : > { %3898 = vst [vmem:[#allocation3 + $0x188] sm:$0xff] %v3849_v62  ;;  %v3462_v47 = vadd.f32 %v11790_v41, %v15149_v28  ;;  %v11791_v3 = vadd.f32 %v15315_v36, %v3239_v44  ;;  %v3241_v29 = vpop.f32.mrb[95].mxu0  ;;  %5781 = vmatmul.mubr.bf16.gmra.mrb[184].mxu0 %v3972_v43  ;;  %v4262_v10 = vpack.c.bf16 %v4236_v56, %v3947_v19  ;;  %v15400_v38 = vld [vmem:[#allocation3 + $0x178] sm:$0xff]  ;;  %v15407_v43 = vld [vmem:[#allocation3 + $0x169] sm:$0xff] }
 0x53f   : > { %5788 = vmatprep.mubr.bf16.mxu0 %v4070_v26  ;;  %v4193_v19 = vld [vmem:[#allocation3 + $0x1f] sm:$0xff]  ;;  %v4141_v62 = vld [vmem:[#allocation3 + $0x171] sm:$0xff]  ;;  %v4096_v26 = vld [vmem:[#allocation3 + $0x9] sm:$0xff] }
 0x540   : > { %v3514_v59 = vmax.f32 %v3462_v47, 0.0  ;;  %v3465_v16 = vadd.f32 %v11791_v3, %v15154_v21  ;;  %5997 = vmatprep.mubr.bf16.mxu1 %v4262_v10  ;;  %v4241_v41 = vpack.c.bf16 %v4194_v48, %v4193_v19  ;;  %v15410_v39 = vpack.c.bf16 %v4141_v62, %v15407_v43  ;;  %v4097_v44 = vld [vmem:[#allocation3 + $0x11] sm:$0xff]  ;;  %v4386_v62 = vld [vmem:[#allocation3 + $0x21] sm:$0xff] }
 0x541   : > { %5998 = vmatmul.mubr.bf16.gmra.mrb[92].mxu1 %v15395_v15  ;;  %v4195_v29 = vld [vmem:[#allocation3 + $0x2f] sm:$0xff] }
 0x542   : > { %v3850_v23 = vmul.f32 %v15169_v35, %v3514_v59  ;;  %v3515_v28 = vmax.f32 %v3465_v16, 0.0  ;;  %v13003_v59 = vld [vmem:[#allocation13 + $0x208] sm:$0xff]  }
 0x543   : > { %v3949_v36 = vld [vmem:[#allocation3 + $0x17f] sm:$0xff] }
 0x544   : > { %v15402_v42 = vld [vmem:[#allocation3 + $0x180] sm:$0xff]  ;;  %3899 = vst [vmem:[#allocation3 + $0x190] sm:$0xff] %v3850_v23  ;;  %v3851_v12 = vmul.f32 %v15181_v30, %v3515_v28  ;;  %v3973_v61 = vpack.c.bf16 %v3949_v36, %v4236_v56  ;;  %v4144_v30 = vpack.c.bf16 %v4097_v44, %v4096_v26  ;;  %v4196_v56 = vld [vmem:[#allocation3 + $0x37] sm:$0xff] }
 0x545   : > { %v4238_v45 = vld [vmem:[#allocation3 + $0x187] sm:$0xff]  ;;  %v4242_v23 = vpack.c.bf16 %v4196_v56, %v4195_v29  ;;  %v4098_v26 = vld [vmem:[#allocation3 + $0x19] sm:$0xff] }
 0x546   : > { %3900 = vst [vmem:[#allocation3 + $0x198] sm:$0xff] %v3851_v12  ;;  %5789 = vmatmul.mubr.bf16.gmra.mrb[188].mxu0 %v3973_v61  ;;  %v4263_v35 = vpack.c.bf16 %v4238_v45, %v3949_v36  ;;  %v15413_v47 = vld [vmem:[#allocation3 + $0x188] sm:$0xff]  ;;  %v15419_v61 = vld [vmem:[#allocation3 + $0x179] sm:$0xff]  ;;  %v4145_v44 = vpack.c.bf16 %v4386_v62, %v4098_v26 }
 0x547   : > { %5829 = vmatprep.mubr.bf16.mxu0 %v4241_v41  ;;  %v4143_v10 = vld [vmem:[#allocation3 + $0x181] sm:$0xff]  ;;  %v4387_v36 = vld [vmem:[#allocation3 + $0x29] sm:$0xff]  ;;  %v13004_v45 = vld [vmem:[#allocation13 + $0x210] sm:$0xff]  }
 0x548   : > { %6005 = vmatprep.mubr.bf16.mxu1 %v4263_v35  ;;  %v15422_v19 = vpack.c.bf16 %v4143_v10, %v15419_v61  ;;  %v4434_v41 = vpack.c.bf16 %v4387_v36, %v4386_v62  ;;  %v4198_v35 = vld [vmem:[#allocation3 + $0x47] sm:$0xff]  ;;  %v13006_v29 = vld [vmem:[#allocation13 + $0x218] sm:$0xff]   ;;  %v4199_v26 = vld [vmem:[#allocation3 + $0x4f] sm:$0xff] }
 0x549   : > { %6006 = vmatmul.mubr.bf16.gmra.mrb[96].mxu1 %v15410_v39  ;;  %v4290_v56 = vld [vmem:[#allocation3 + $0x28] sm:$0xff] }
 0x54a   : > { %v12999_v62 = vld [vmem:[#allocation13 + $0x188] sm:$0xff]  }
 0x54b   : > { %v15415_v3 = vld [vmem:[#allocation3 + $0x190] sm:$0xff] }
 0x54c   : > { %v4239_v28 = vld [vmem:[#allocation3 + $0x18f] sm:$0xff] }
 0x54d   : > { %v4240_v48 = vld [vmem:[#allocation3 + $0x197] sm:$0xff] }
 0x54e   : > { %5830 = vmatmul.mubr.bf16.vlgmr.msra.gmra.mrb[96].mxu0 %v4144_v30  ;;  %v4264_v12 = vpack.c.bf16 %v4240_v48, %v4239_v28  ;;  %v4197_v30 = vld [vmem:[#allocation3 + $0x3f] sm:$0xff] }
 0x54f   : > { %5837 = vmatprep.mubr.bf16.mxu0 %v4242_v23  ;;  %11521 = vmatpush3.bf16.msra.mxu0 %v15276_v2  ;;  %v4243_v10 = vpack.c.bf16 %v4198_v35, %v4197_v30  ;;  %v4389_v23 = vld [vmem:[#allocation3 + $0x39] sm:$0xff]  ;;  %v12998_v2 = vld [vmem:[#allocation13 + $0x180] sm:$0xff]  }
 0x550   : > { %6013 = vmatprep.mubr.bf16.mxu1 %v4264_v12  ;;  %11522 = vmatprep.subr.bf16.mxu0 %v13003_v59  ;;  %v4289_v28 = vld [vmem:[#allocation3 + $0x20] sm:$0xff]  ;;  %v4388_v12 = vld [vmem:[#allocation3 + $0x31] sm:$0xff] }
 0x551   : > { %6014 = vmatmul.mubr.bf16.gmra.mrb[100].mxu1 %v15422_v19  ;;  %v4337_v48 = vpack.c.bf16 %v4290_v56, %v4289_v28  ;;  %v4435_v16 = vpack.c.bf16 %v4389_v23, %v4388_v12  ;;  %v4146_v35 = vpack.c.bf16 %v4388_v12, %v4387_v36  ;;  %v13008_v56 = vld [vmem:[#allocation13 + $0x228] sm:$0xff]   ;;  %v13000_v28 = vld [vmem:[#allocation13 + $0x190] sm:$0xff]   ;;  %v13001_v12 = vld [vmem:[#allocation13 + $0x198] sm:$0xff]  }
 0x552   : > { %6054 = vmatprep.mubr.bf16.mxu1 %v4434_v41  ;;  %v13007_v41 = vld [vmem:[#allocation13 + $0x220] sm:$0xff]   ;;  %v13010_v36 = vld [vmem:[#allocation13 + $0x230] sm:$0xff]  }
 0x553   : > { %11523 = vmatpush3.bf16.msra.mxu0 %v13003_v59  ;;  %v4200_v59 = vld [vmem:[#allocation3 + $0x57] sm:$0xff] }
 0x554   : > { %11524 = vmatprep.subr.bf16.mxu0 %v13004_v45  ;;  %v4244_v30 = vpack.c.bf16 %v4200_v59, %v4199_v26  ;;  %v4393_v26 = vld [vmem:[#allocation3 + $0x59] sm:$0xff] }
 0x556   : > { %5838 = vmatmul.mubr.bf16.gmra.mrb[100].mxu0 %v4145_v44  ;;  %v4292_v44 = vld [vmem:[#allocation3 + $0x38] sm:$0xff] }
 0x557   : > { %5845 = vmatprep.mubr.bf16.mxu0 %v4243_v10  ;;  %11525 = vmatpush3.bf16.msra.mxu0 %v13004_v45  ;;  %v4391_v10 = vld [vmem:[#allocation3 + $0x49] sm:$0xff] }
 0x558   : > { %11526 = vmatprep.subr.bf16.mxu0 %v13006_v29  ;;  %v4291_v45 = vld [vmem:[#allocation3 + $0x30] sm:$0xff] }
 0x559   : > { %6055 = vmatmul.mubr.bf16.vlgmr.msra.gmra.mrb[104].mxu1 %v4337_v48  ;;  %v4338_v48 = vpack.c.bf16 %v4292_v44, %v4291_v45  ;;  %v13011_v44 = vld [vmem:[#allocation13 + $0x238] sm:$0xff]   ;;  %v13108_v45 = vld [vmem:[#allocation3 + $0x48] sm:$0xff] }
 0x55a   : > { %6062 = vmatprep.mubr.bf16.mxu1 %v4435_v16  ;;  %6248 = vmatpush1.bf16.msra.mxu1 %v12998_v2  ;;  %v4390_v16 = vld [vmem:[#allocation3 + $0x41] sm:$0xff] }
 0x55b   : > { %6249 = vmatprep.subr.bf16.mxu1 %v17037_v60  ;;  %11527 = vmatpush3.bf16.msra.mxu0 %v13006_v29  ;;  %v4436_v2 = vpack.c.bf16 %v4391_v10, %v4390_v16  ;;  %v4202_v29 = vld [vmem:[#allocation3 + $0x67] sm:$0xff]  ;;  %v15429_v59 = vpack.c.bf16 %v4390_v16, %v4389_v23 }
 0x55c   : > { %11528 = vmatprep.subr.bf16.mxu0 %v13007_v41  ;;  %v13009_v16 = vld [vmem:[#allocation13 + $0x1a8] sm:$0xff]  }
 0x55e   : > { %5846 = vmatmul.mubr.bf16.gmra.mrb[104].mxu0 %v4146_v35  ;;  %6250 = vmatpush1.bf16.msra.mxu1 %v12999_v62  ;;  %v4201_v62 = vld [vmem:[#allocation3 + $0x5f] sm:$0xff] }
 0x55f   : > { %5853 = vmatprep.mubr.bf16.mxu0 %v4244_v30  ;;  %6251 = vmatprep.subr.bf16.mxu1 %v17037_v60  ;;  %v4245_v35 = vpack.c.bf16 %v4202_v29, %v4201_v62  ;;  %v13005_v30 = vld [vmem:[#allocation13 + $0x1a0] sm:$0xff]   ;;  %v4203_v29 = vld [vmem:[#allocation3 + $0x6f] sm:$0xff] }
 0x560   : > { %11529 = vmatpush3.bf16.msra.mxu0 %v13007_v41  ;;  %v15432_v41 = vld [vmem:[#allocation3 + $0x40] sm:$0xff]  ;;  %v4395_v62 = vld [vmem:[#allocation3 + $0x69] sm:$0xff] }
 0x561   : > { %6063 = vmatmul.mubr.bf16.gmra.mrb[108].mxu1 %v4338_v48  ;;  %11530 = vmatprep.subr.bf16.mxu0 %v13008_v56  ;;  %v4392_v48 = vld [vmem:[#allocation3 + $0x51] sm:$0xff] }
 0x562   : > { %6070 = vmatprep.mubr.bf16.mxu1 %v4436_v2  ;;  %6252 = vmatpush1.bf16.msra.mxu1 %v13000_v28  ;;  %v4339_v28 = vpack.c.bf16 %v13108_v45, %v15432_v41  ;;  %v4437_v23 = vpack.c.bf16 %v4393_v26, %v4392_v48  ;;  %v15437_v2 = vpack.c.bf16 %v4392_v48, %v4391_v10  ;;  %v13110_v45 = vld [vmem:[#allocation3 + $0x58] sm:$0xff]  ;;  %v4206_v10 = vld [vmem:[#allocation3 + $0x87] sm:$0xff] }
 0x563   : > { %6253 = vmatprep.subr.bf16.mxu1 %v17037_v60  ;;  %v13013_v48 = vld [vmem:[#allocation13 + $0x1b8] sm:$0xff]  }
 0x564   : > { %11531 = vmatpush3.bf16.msra.mxu0 %v13008_v56  ;;  %v4204_v56 = vld [vmem:[#allocation3 + $0x77] sm:$0xff] }
 0x565   : > { %11532 = vmatprep.subr.bf16.mxu0 %v13010_v36 }
 0x566   : > { %5854 = vmatmul.mubr.bf16.gmra.mrb[108].mxu0 %v15429_v59  ;;  %6254 = vmatpush1.bf16.msra.mxu1 %v13001_v12  ;;  %v4246_v12 = vpack.c.bf16 %v4204_v56, %v4203_v29  ;;  %v4205_v56 = vld [vmem:[#allocation3 + $0x7f] sm:$0xff] }
 0x567   : > { %5861 = vmatprep.mubr.bf16.mxu0 %v4245_v35  ;;  %6255 = vmatprep.subr.bf16.mxu1 %v17037_v60  ;;  %v13012_v35 = vld [vmem:[#allocation13 + $0x1b0] sm:$0xff]  }
 0x568   : > { %11533 = vmatpush3.bf16.msra.mxu0 %v13010_v36  ;;  %v13109_v36 = vld [vmem:[#allocation3 + $0x50] sm:$0xff]  ;;  %v4397_v29 = vld [vmem:[#allocation3 + $0x79] sm:$0xff] }
 0x569   : > { %6071 = vmatmul.mubr.bf16.gmra.mrb[112].mxu1 %v4339_v28  ;;  %11534 = vmatprep.subr.bf16.mxu0 %v13011_v44  ;;  %v4340_v28 = vpack.c.bf16 %v13110_v45, %v13109_v36  ;;  %v13111_v36 = vld [vmem:[#allocation3 + $0x60] sm:$0xff]  ;;  %v13112_v45 = vld [vmem:[#allocation3 + $0x68] sm:$0xff] }
 0x56a   : > { %6078 = vmatprep.mubr.bf16.mxu1 %v4437_v23  ;;  %6256 = vmatpush1.bf16.msra.mxu1 %v13005_v30  ;;  %v4394_v23 = vld [vmem:[#allocation3 + $0x61] sm:$0xff]  ;;  %v4341_v21 = vpack.c.bf16 %v13112_v45, %v13111_v36  ;;  %v13113_v36 = vld [vmem:[#allocation3 + $0x70] sm:$0xff]  ;;  %v13114_v45 = vld [vmem:[#allocation3 + $0x78] sm:$0xff] }
 0x56b   : > { %6257 = vmatprep.subr.bf16.mxu1 %v17037_v60  ;;  %v4438_v30 = vpack.c.bf16 %v4395_v62, %v4394_v23  ;;  %v4342_v34 = vpack.c.bf16 %v13114_v45, %v13113_v36  ;;  %v13115_v36 = vld [vmem:[#allocation3 + $0x80] sm:$0xff] }
 0x56c   : > { %11535 = vmatpush3.bf16.msra.mxu0 %v13011_v44  ;;  %v15442_v44 = vpack.c.bf16 %v4394_v23, %v4393_v26  ;;  %v13015_v26 = vld [vmem:[#allocation13 + $0x1c8] sm:$0xff]  }
 0x56e   : > { %5862 = vmatmul.mubr.bf16.gmra.mrb[112].mxu0 %v15437_v2  ;;  %6258 = vmatpush1.bf16.msra.mxu1 %v13009_v16  ;;  %v4247_v16 = vpack.c.bf16 %v4206_v10, %v4205_v56  ;;  %v4207_v10 = vld [vmem:[#allocation3 + $0x8f] sm:$0xff] }
 0x56f   : > { %5869 = vmatprep.mubr.bf16.mxu0 %v4246_v12  ;;  %6259 = vmatprep.subr.bf16.mxu1 %v17037_v60  ;;  %v13014_v12 = vld [vmem:[#allocation13 + $0x1c0] sm:$0xff]  }
 0x570   : > { %v4399_v56 = vld [vmem:[#allocation3 + $0x89] sm:$0xff] }
 0x571   : > { %6079 = vmatmul.mubr.bf16.gmra.mrb[116].mxu1 %v4340_v28  ;;  %v4396_v28 = vld [vmem:[#allocation3 + $0x71] sm:$0xff] }
 0x572   : > { %6086 = vmatprep.mubr.bf16.mxu1 %v4438_v30  ;;  %6260 = vmatpush1.bf16.msra.mxu1 %v13012_v35  ;;  %v4439_v35 = vpack.c.bf16 %v4397_v29, %v4396_v28  ;;  %v4208_v30 = vld [vmem:[#allocation3 + $0x97] sm:$0xff]  ;;  %v15447_v23 = vpack.c.bf16 %v4396_v28, %v4395_v62 }
 0x573   : > { %6261 = vmatprep.subr.bf16.mxu1 %v17037_v60  ;;  %v13017_v62 = vld [vmem:[#allocation13 + $0x1d8] sm:$0xff]  }
 0x576   : > { %5870 = vmatmul.mubr.bf16.gmra.mrb[116].mxu0 %v15442_v44  ;;  %6262 = vmatpush1.bf16.msra.mxu1 %v13013_v48  ;;  %v4248_v48 = vpack.c.bf16 %v4208_v30, %v4207_v10  ;;  %v15454_v30 = vld [vmem:[#allocation3 + $0x9f] sm:$0xff] }
 0x577   : > { %5877 = vmatprep.mubr.bf16.mxu0 %v4247_v16  ;;  %6263 = vmatprep.subr.bf16.mxu1 %v17037_v60  ;;  %v13016_v16 = vld [vmem:[#allocation13 + $0x1d0] sm:$0xff]  }
 0x578   : > { %v4401_v10 = vld [vmem:[#allocation3 + $0x99] sm:$0xff] }
 0x579   : > { %6087 = vmatmul.mubr.bf16.gmra.mrb[120].mxu1 %v4341_v21  ;;  %v4398_v21 = vld [vmem:[#allocation3 + $0x81] sm:$0xff] }
 0x57a   : > { %6094 = vmatprep.mubr.bf16.mxu1 %v4439_v35  ;;  %6264 = vmatpush1.bf16.msra.mxu1 %v13014_v12  ;;  %v4440_v12 = vpack.c.bf16 %v4399_v56, %v4398_v21  ;;  %v4210_v35 = vld [vmem:[#allocation3 + $0xa7] sm:$0xff]  ;;  %v15452_v28 = vpack.c.bf16 %v4398_v21, %v4397_v29  ;;  %v15459_v29 = vld [vmem:[#allocation3 + $0xb7] sm:$0xff] }
 0x57b   : > { %6265 = vmatprep.subr.bf16.mxu1 %v17037_v60  ;;  %v13019_v21 = vld [vmem:[#allocation13 + $0x1e8] sm:$0xff]  }
 0x57e   : > { %5878 = vmatmul.mubr.bf16.gmra.mrb[120].mxu0 %v15447_v23  ;;  %6266 = vmatpush1.bf16.msra.mxu1 %v13015_v26  ;;  %v4249_v26 = vpack.c.bf16 %v4210_v35, %v15454_v30 }
 0x57f   : > { %5885 = vmatprep.mubr.bf16.mxu0 %v4248_v48  ;;  %6267 = vmatprep.subr.bf16.mxu1 %v17037_v60  ;;  %v13018_v48 = vld [vmem:[#allocation13 + $0x1e0] sm:$0xff]  }
 0x581   : > { %6095 = vmatmul.mubr.bf16.gmra.mrb[124].mxu1 %v4342_v34  ;;  %v13116_v34 = vld [vmem:[#allocation3 + $0x88] sm:$0xff] }
 0x582   : > { %6102 = vmatprep.mubr.bf16.mxu1 %v4440_v12  ;;  %6268 = vmatpush1.bf16.msra.mxu1 %v13016_v16  ;;  %v4343_v45 = vpack.c.bf16 %v13116_v34, %v13115_v36  ;;  %v4400_v12 = vld [vmem:[#allocation3 + $0x91] sm:$0xff] }
 0x583   : > { %6269 = vmatprep.subr.bf16.mxu1 %v17037_v60  ;;  %v4441_v16 = vpack.c.bf16 %v4401_v10, %v4400_v12  ;;  %v4152_v35 = vpack.c.bf16 %v4400_v12, %v4399_v56  ;;  %v13020_v36 = vld [vmem:[#allocation13 + $0x1f0] sm:$0xff]   ;;  %v13021_v56 = vld [vmem:[#allocation13 + $0x1f8] sm:$0xff]   ;;  %v4153_v12 = vpack.c.bf16 %v4402_v18, %v4401_v10 }
 0x584   : > { %v13117_v34 = vld [vmem:[#allocation3 + $0x90] sm:$0xff]  ;;  %v13122_v10 = vld [vmem:[#allocation3 + $0xb8] sm:$0xff] }
 0x586   : > { %5886 = vmatmul.mubr.bf16.gmra.mrb[124].mxu0 %v15452_v28  ;;  %6270 = vmatpush1.bf16.msra.mxu1 %v13017_v62  ;;  %v4250_v62 = vpack.c.bf16 %v15459_v29, %v15462_v31 }
 0x587   : > { %5893 = vmatprep.mubr.bf16.mxu0 %v4249_v26  ;;  %6271 = vmatprep.subr.bf16.mxu1 %v17037_v60  ;;  %v15466_v26 = vld [vmem:[#allocation3 + $0xa9] sm:$0xff] }
 0x589   : > { %6103 = vmatmul.mubr.bf16.gmra.mrb[128].mxu1 %v4343_v45  ;;  %v13118_v45 = vld [vmem:[#allocation3 + $0x98] sm:$0xff] }
 0x58a   : > { %6110 = vmatprep.mubr.bf16.mxu1 %v4441_v16  ;;  %6272 = vmatpush1.bf16.msra.mxu1 %v13018_v48  ;;  %v4344_v16 = vpack.c.bf16 %v13118_v45, %v13117_v34  ;;  %v4442_v48 = vpack.c.bf16 %v15466_v26, %v4402_v18  ;;  %v4404_v45 = vld [vmem:[#allocation3 + $0xb1] sm:$0xff] }
 0x58b   : > { %6273 = vmatprep.subr.bf16.mxu1 %v17037_v60  ;;  %v4443_v50 = vpack.c.bf16 %v4405_v55, %v4404_v45  ;;  %v13121_v18 = vld [vmem:[#allocation3 + $0xb0] sm:$0xff] }
 0x58e   : > { %5894 = vmatmul.mubr.bf16.gmra.mrb[128].mxu0 %v4152_v35  ;;  %6274 = vmatpush1.bf16.msra.mxu1 %v13019_v21  ;;  %v13119_v21 = vld [vmem:[#allocation3 + $0xa0] sm:$0xff] }
 0x58f   : > { %5901 = vmatprep.mubr.bf16.mxu0 %v4250_v62  ;;  %6275 = vmatprep.subr.bf16.mxu1 %v17037_v60  ;;  %v13120_v62 = vld [vmem:[#allocation3 + $0xa8] sm:$0xff] }
 0x590   : > { %v4345_v34 = vpack.c.bf16 %v13120_v62, %v13119_v21  ;;  %v13123_v21 = vld [vmem:[#allocation3 + $0xc0] sm:$0xff]  ;;  %v13124_v62 = vld [vmem:[#allocation3 + $0xc8] sm:$0xff] }
 0x591   : > { %6111 = vmatmul.mubr.bf16.gmra.mrb[132].mxu1 %v4344_v16  ;;  %v4407_v16 = vld [vmem:[#allocation3 + $0xc9] sm:$0xff] }
 0x592   : > { %6118 = vmatprep.mubr.bf16.mxu1 %v4442_v48  ;;  %6276 = vmatpush1.bf16.msra.mxu1 %v13020_v36  ;;  %v4346_v36 = vpack.c.bf16 %v13122_v10, %v13121_v18  ;;  %v4406_v48 = vld [vmem:[#allocation3 + $0xc1] sm:$0xff]  ;;  %v13126_v18 = vld [vmem:[#allocation3 + $0xd8] sm:$0xff] }
 0x593   : > { %6277 = vmatprep.subr.bf16.mxu1 %v17037_v60 }
 0x596   : > { %5902 = vmatmul.mubr.bf16.gmra.mrb[132].mxu0 %v4153_v12  ;;  %6278 = vmatpush1.bf16.msra.mxu1 %v13021_v56  ;;  %v4444_v56 = vpack.c.bf16 %v4407_v16, %v4406_v48 }
 0x597   : > { %11536 = vmatprep.mubr.bf16.mxu0 %v15429_v59  ;;  %8792 = vmatprep.subr.bf16.mxu1 %v17037_v60  ;;  %v4409_v59 = vld [vmem:[#allocation3 + $0xd9] sm:$0xff] }
 0x599   : > { %6119 = vmatmul.mubr.bf16.gmra.mrb[136].mxu1 %v4345_v34  ;;  %v4408_v34 = vld [vmem:[#allocation3 + $0xd1] sm:$0xff] }
 0x59a   : > { %6126 = vmatprep.mubr.bf16.mxu1 %v4443_v50  ;;  %v4347_v50 = vpack.c.bf16 %v13124_v62, %v13123_v21  ;;  %v4445_v40 = vpack.c.bf16 %v4409_v59, %v4408_v34  ;;  %v4732_v62 = vpack.c.bf16 %v4404_v45, %v15466_v26  ;;  %v4415_v26 = vld [vmem:[#allocation3 + $0x109] sm:$0xff]  ;;  %v13130_v45 = vld [vmem:[#allocation3 + $0xf8] sm:$0xff] }
 0x59e   : > { %11537 = vmatmul.mubr.bf16.vlgmr.msra.gmra.mrb[192].mxu0 %v15437_v2  ;;  %v4411_v2 = vld [vmem:[#allocation3 + $0xe9] sm:$0xff] }
 0x59f   : > { %11540 = vmatprep.mubr.bf16.mxu0 %v15442_v44  ;;  %v13125_v44 = vld [vmem:[#allocation3 + $0xd0] sm:$0xff] }
 0x5a0   : > { %v4348_v10 = vpack.c.bf16 %v13126_v18, %v13125_v44  ;;  %v4412_v44 = vld [vmem:[#allocation3 + $0xf1] sm:$0xff] }
 0x5a1   : > { %6127 = vmatmul.mubr.bf16.gmra.mrb[140].mxu1 %v4346_v36  ;;  %v4410_v36 = vld [vmem:[#allocation3 + $0xe1] sm:$0xff] }
 0x5a2   : > { %6134 = vmatprep.mubr.bf16.mxu1 %v4444_v56  ;;  %v4446_v56 = vpack.c.bf16 %v4411_v2, %v4410_v36 }
 0x5a6   : > { %11541 = vmatmul.mubr.bf16.gmra.mrb[196].mxu0 %v15447_v23 }
 0x5a7   : > { %11544 = vmatprep.mubr.bf16.mxu0 %v15452_v28 }
 0x5a9   : > { %6135 = vmatmul.mubr.bf16.gmra.mrb[48].mxu1 %v4347_v50  ;;  %v4733_v50 = vpack.c.bf16 %v4406_v48, %v4405_v55  ;;  %v13129_v55 = vld [vmem:[#allocation3 + $0xf0] sm:$0xff] }
 0x5aa   : > { %6142 = vmatprep.mubr.bf16.mxu1 %v4445_v40  ;;  %v4413_v40 = vld [vmem:[#allocation3 + $0xf9] sm:$0xff]  ;;  %v4350_v48 = vpack.c.bf16 %v13130_v45, %v13129_v55  ;;  %v4706_v45 = vld [vmem:[#allocation3 + $0x121] sm:$0xff] }
 0x5ab   : > { %v4447_v18 = vpack.c.bf16 %v4413_v40, %v4412_v44 }
 0x5ae   : > { %11545 = vmatmul.mubr.bf16.gmra.mrb[200].mxu0 %v4152_v35  ;;  %v13127_v35 = vld [vmem:[#allocation3 + $0xe0] sm:$0xff] }
 0x5af   : > { %11548 = vmatprep.mubr.bf16.mxu0 %v4153_v12  ;;  %v13128_v12 = vld [vmem:[#allocation3 + $0xe8] sm:$0xff] }
 0x5b0   : > { %v4349_v6 = vpack.c.bf16 %v13128_v12, %v13127_v35 }
 0x5b1   : > { %6143 = vmatmul.mubr.bf16.gmra.mrb[52].mxu1 %v4348_v10  ;;  %v15477_v27 = vpop.f32.mrb[136].mxu0 }
 0x5b2   : > { %17126 = vst [vmem:[#allocation34_spill] sm:$0xff] %v15477_v27  ;;  %6150 = vmatprep.mubr.bf16.mxu1 %v4446_v56  ;;  %v5688_v23 = vpop.f32.mrb[137].mxu0  ;;  %v4735_v27 = vpack.c.bf16 %v4410_v36, %v4409_v59  ;;  %v13131_v59 = vld [vmem:[#allocation3 + $0x100] sm:$0xff] }
 0x5b3   : > { %v15479_v28 = vpop.f32.mrb[138].mxu0 }
 0x5b4   : > { %17127 = vst [vmem:[#allocation55_spill] sm:$0xff] %v15479_v28  ;;  %v5691_v21 = vpop.f32.mrb[139].mxu0 }
 0x5b5   : > { %v4734_v21 = vpack.c.bf16 %v4408_v34, %v4407_v16  ;;  %v4417_v16 = vld [vmem:[#allocation3 + $0x119] sm:$0xff]  ;;  %v4416_v34 = vld [vmem:[#allocation3 + $0x111] sm:$0xff] }
 0x5b6   : > { %11549 = vmatmul.mubr.bf16.gmra.mrb[204].mxu0 %v4732_v62  ;;  %v4414_v62 = vld [vmem:[#allocation3 + $0x101] sm:$0xff]  ;;  %v4449_v36 = vpack.c.bf16 %v4417_v16, %v4416_v34 }
 0x5b7   : > { %11552 = vmatprep.mubr.bf16.mxu0 %v4733_v50  ;;  %v4448_v50 = vpack.c.bf16 %v4415_v26, %v4414_v62 }
 0x5b9   : > { %6151 = vmatmul.mubr.bf16.gmra.mrb[56].mxu1 %v4349_v6  ;;  %v15482_v10 = vpop.f32.mrb[140].mxu0 }
 0x5ba   : > { %17128 = vst [vmem:[#allocation48_spill] sm:$0xff] %v15482_v10  ;;  %6158 = vmatprep.mubr.bf16.mxu1 %v4447_v18  ;;  %v5696_v56 = vpop.f32.mrb[141].mxu0 }
 0x5bb   : > { %v15484_v23 = vpop.f32.mrb[142].mxu0  ;;  %v4736_v56 = vpack.c.bf16 %v4412_v44, %v4411_v2  ;;  %v4739_v2 = vpack.c.bf16 %v4706_v45, %v4417_v16  ;;  %v13132_v44 = vld [vmem:[#allocation3 + $0x110] sm:$0xff] }
 0x5bc   : > { %17129 = vst [vmem:[#allocation32_spill] sm:$0xff] %v15484_v23  ;;  %v5699_v28 = vpop.f32.mrb[143].mxu0  ;;  %v4518_v23 = vld [vmem:[#allocation3 + $0x14f] sm:$0xff] }
 0x5bd   : > { %v4737_v28 = vpack.c.bf16 %v4414_v62, %v4413_v40  ;;  %v4419_v40 = vld [vmem:[#allocation3 + $0x129] sm:$0xff]  ;;  %v4352_v62 = vpack.c.bf16 %v15319_v11, %v13132_v44 }
 0x5be   : > { %11553 = vmatmul.mubr.bf16.gmra.mrb[208].mxu0 %v4734_v21 }
 0x5bf   : > { %11556 = vmatprep.mubr.bf16.mxu0 %v4735_v27  ;;  %v4351_v27 = vpack.c.bf16 %v15303_v25, %v13131_v59 }
 0x5c1   : > { %6159 = vmatmul.mubr.bf16.gmra.mrb[60].mxu1 %v4350_v48  ;;  %v15486_v35 = vpop.f32.mrb[144].mxu0 }
 0x5c2   : > { %17130 = vst [vmem:[#allocation36_spill] sm:$0xff] %v15486_v35  ;;  %6166 = vmatprep.mubr.bf16.mxu1 %v4448_v50  ;;  %v5704_v6 = vpop.f32.mrb[145].mxu0 }
 0x5c3   : > { %v15488_v12 = vpop.f32.mrb[146].mxu0  ;;  %v4738_v6 = vpack.c.bf16 %v4416_v34, %v4415_v26  ;;  %v4709_v26 = vld [vmem:[#allocation3 + $0x139] sm:$0xff]  ;;  %v4353_v34 = vpack.c.bf16 %v15333_v14, %v15321_v7 }
 0x5c4   : > { %17131 = vst [vmem:[#allocation37_spill] sm:$0xff] %v15488_v12  ;;  %v5707_v18 = vpop.f32.mrb[147].mxu0 }
 0x5c5   : > { %v4450_v18 = vpack.c.bf16 %v4419_v40, %v4706_v45 }
 0x5c6   : > { %11557 = vmatmul.mubr.bf16.gmra.mrb[212].mxu0 %v4736_v56 }
 0x5c7   : > { %11560 = vmatprep.mubr.bf16.mxu0 %v4737_v28  ;;  %v4708_v28 = vld [vmem:[#allocation3 + $0x131] sm:$0xff] }
 0x5c9   : > { %6167 = vmatmul.mubr.bf16.gmra.mrb[64].mxu1 %v4351_v27  ;;  %v15491_v21 = vpop.f32.mrb[148].mxu0  ;;  %v4710_v27 = vld [vmem:[#allocation3 + $0x141] sm:$0xff] }
 0x5ca   : > { %17132 = vst [vmem:[#allocation52_spill] sm:$0xff] %v15491_v21  ;;  %6174 = vmatprep.mubr.bf16.mxu1 %v4449_v36  ;;  %v5712_v55 = vpop.f32.mrb[149].mxu0  ;;  %v4741_v16 = vpack.c.bf16 %v4710_v27, %v4709_v26  ;;  %v13047_v21 = vld [vmem:[#allocation16 + $0x230] sm:$0xff]  }
 0x5cb   : > { %v15493_v48 = vpop.f32.mrb[150].mxu0 }
 0x5cc   : > { %17133 = vst [vmem:[#allocation47_spill] sm:$0xff] %v15493_v48  ;;  %v5715_v50 = vpop.f32.mrb[151].mxu0 }
 0x5cd   : > { %v4740_v50 = vpack.c.bf16 %v4708_v28, %v4419_v40  ;;  %v4354_v40 = vpack.c.bf16 %v15347_v4, %v15335_v63 }
 0x5ce   : > { %11561 = vmatmul.mubr.bf16.gmra.mrb[216].mxu0 %v4738_v6  ;;  %v4451_v6 = vpack.c.bf16 %v4709_v26, %v4708_v28 }
 0x5cf   : > { %11564 = vmatprep.mubr.bf16.mxu0 %v4739_v2  ;;  %v4712_v2 = vld [vmem:[#allocation3 + $0x151] sm:$0xff] }
 0x5d1   : > { %6175 = vmatmul.mubr.bf16.gmra.mrb[68].mxu1 %v4352_v62  ;;  %v15496_v56 = vpop.f32.mrb[152].mxu0 }
 0x5d2   : > { %17134 = vst [vmem:[#allocation35_spill] sm:$0xff] %v15496_v56  ;;  %6182 = vmatprep.mubr.bf16.mxu1 %v4450_v18  ;;  %v5720_v59 = vpop.f32.mrb[153].mxu0  ;;  %v4711_v18 = vld [vmem:[#allocation3 + $0x149] sm:$0xff] }
 0x5d3   : > { %v15498_v36 = vpop.f32.mrb[154].mxu0  ;;  %v13044_v56 = vld [vmem:[#allocation16 + $0x220] sm:$0xff]  }
 0x5d4   : > { %17135 = vst [vmem:[#allocation63_spill] sm:$0xff] %v15498_v36  ;;  %v5723_v55 = vpop.f32.mrb[155].mxu0 }
 0x5d5   : > { %v4742_v55 = vpack.c.bf16 %v4712_v2, %v4711_v18 }
 0x5d6   : > { %11565 = vmatmul.mubr.bf16.gmra.mrb[220].mxu0 %v4740_v50  ;;  %v4452_v50 = vpack.c.bf16 %v4711_v18, %v4710_v27  ;;  %v4720_v27 = vld [vmem:[#allocation3 + $0x191] sm:$0xff] }
 0x5d7   : > { %11568 = vmatprep.mubr.bf16.mxu0 %v4741_v16 }
 0x5d9   : > { %6183 = vmatmul.mubr.bf16.gmra.mrb[72].mxu1 %v4353_v34  ;;  %v15502_v45 = vpop.f32.mrb[156].mxu0 }
 0x5da   : > { %17136 = vst [vmem:[#allocation33_spill] sm:$0xff] %v15502_v45  ;;  %6190 = vmatprep.mubr.bf16.mxu1 %v4451_v6  ;;  %v5728_v44 = vpop.f32.mrb[157].mxu0  ;;  %v4355_v6 = vpack.c.bf16 %v15360_v0, %v15349_v20  ;;  %v4509_v45 = vld [vmem:[#allocation3 + $0x107] sm:$0xff] }
 0x5db   : > { %v15504_v62 = vpop.f32.mrb[158].mxu0 }
 0x5dc   : > { %17137 = vst [vmem:[#allocation51_spill] sm:$0xff] %v15504_v62  ;;  %v5731_v59 = vpop.f32.mrb[159].mxu0  ;;  %v13040_v62 = vld [vmem:[#allocation16 + $0x208] sm:$0xff]  }
 0x5dd   : > { %v4721_v59 = vld [vmem:[#allocation3 + $0x199] sm:$0xff] }
 0x5de   : > { %11569 = vmatmul.mubr.bf16.gmra.mrb[224].mxu0 %v4742_v55  ;;  %v4722_v55 = vld [vmem:[#allocation3 + $0x1a1] sm:$0xff] }
 0x5df   : > { %11572 = vmatprep.mubr.bf16.mxu0 %v15395_v15  ;;  %v4453_v15 = vpack.c.bf16 %v15392_v58, %v4712_v2  ;;  %v4426_v58 = vld [vmem:[#allocation3 + $0x161] sm:$0xff] }
 0x5e0   : > { %v4454_v2 = vpack.c.bf16 %v15407_v43, %v4426_v58  ;;  %v4358_v58 = vpack.c.bf16 %v15400_v38, %v15382_v46 }
 0x5e1   : > { %6191 = vmatmul.mubr.bf16.gmra.mrb[76].mxu1 %v4354_v40  ;;  %v15509_v28 = vpop.f32.mrb[160].mxu0 }
 0x5e2   : > { %17138 = vst [vmem:[#allocation42_spill] sm:$0xff] %v15509_v28  ;;  %6198 = vmatprep.mubr.bf16.mxu1 %v4452_v50  ;;  %v5736_v26 = vpop.f32.mrb[161].mxu0  ;;  %v4719_v50 = vld [vmem:[#allocation3 + $0x189] sm:$0xff] }
 0x5e3   : > { %v15511_v16 = vpop.f32.mrb[162].mxu0 }
 0x5e4   : > { %17139 = vst [vmem:[#allocation45_spill] sm:$0xff] %v15511_v16  ;;  %v5739_v34 = vpop.f32.mrb[163].mxu0  ;;  %v17175_v16 = vld [vmem:[#allocation65_spill] sm:$0xff] }
 0x5e5   : > { %v4747_v34 = vpack.c.bf16 %v4722_v55, %v4721_v59  ;;  %v4428_v55 = vld [vmem:[#allocation3 + $0x171] sm:$0xff] }
 0x5e6   : > { %11573 = vmatmul.mubr.bf16.gmra.mrb[228].mxu0 %v15410_v39  ;;  %v4746_v39 = vpack.c.bf16 %v4720_v27, %v4719_v50 }
 0x5e7   : > { %11576 = vmatprep.mubr.bf16.mxu0 %v15422_v19  ;;  %v4356_v19 = vpack.c.bf16 %v15374_v24, %v15362_v8 }
 0x5e9   : > { %6199 = vmatmul.mubr.bf16.gmra.mrb[80].mxu1 %v4355_v6  ;;  %v15518_v44 = vpop.f32.mrb[164].mxu0 }
 0x5ea   : > { %17140 = vst [vmem:[#allocation56_spill] sm:$0xff] %v15518_v44  ;;  %6206 = vmatprep.mubr.bf16.mxu1 %v4453_v15  ;;  %v5744_v18 = vpop.f32.mrb[165].mxu0 }
 0x5eb   : > { %v15520_v40 = vpop.f32.mrb[166].mxu0 }
 0x5ec   : > { %17141 = vst [vmem:[#allocation60_spill] sm:$0xff] %v15520_v40  ;;  %v5747_v26 = vpop.f32.mrb[167].mxu0 }
 0x5ed   : > { %v4357_v26 = vpack.c.bf16 %v15386_v33, %v15370_v22 }
 0x5ee   : > { %11577 = vmatmul.mubr.bf16.gmra.mrb[232].mxu0 %v4746_v39  ;;  %v4455_v39 = vpack.c.bf16 %v15419_v61, %v4428_v55 }
 0x5ef   : > { %11580 = vmatprep.mubr.bf16.mxu0 %v4747_v34 }
 0x5f1   : > { %6207 = vmatmul.mubr.bf16.gmra.mrb[84].mxu1 %v4356_v19  ;;  %v15525_v6 = vpop.f32.mrb[168].mxu0 }
 0x5f2   : > { %17142 = vst [vmem:[#allocation41_spill] sm:$0xff] %v15525_v6  ;;  %6214 = vmatprep.mubr.bf16.mxu1 %v4454_v2  ;;  %v5752_v15 = vpop.f32.mrb[169].mxu0  ;;  %v4430_v2 = vld [vmem:[#allocation3 + $0x181] sm:$0xff] }
 0x5f3   : > { %v15527_v18 = vpop.f32.mrb[170].mxu0  ;;  %v4456_v15 = vpack.c.bf16 %v4719_v50, %v4430_v2  ;;  %v4580_v2 = vld [vmem:[#allocation3 + $0x38] sm:$0xff] }
 0x5f4   : > { %17143 = vst [vmem:[#allocation43_spill] sm:$0xff] %v15527_v18  ;;  %v5755_v40 = vpop.f32.mrb[171].mxu0 }
 0x5f9   : > { %6215 = vmatmul.mubr.bf16.gmra.mrb[88].mxu1 %v4357_v26  ;;  %v15532_v34 = vpop.f32.mrb[172].mxu0  ;;  %v4359_v26 = vpack.c.bf16 %v15413_v47, %v15402_v42 }
 0x5fa   : > { %17144 = vst [vmem:[#allocation59_spill] sm:$0xff] %v15532_v34  ;;  %6222 = vmatprep.mubr.bf16.mxu1 %v4455_v39  ;;  %v5760_v44 = vpop.f32.mrb[173].mxu0 }
 0x5fb   : > { %v15534_v43 = vpop.f32.mrb[174].mxu0  ;;  %v4457_v44 = vpack.c.bf16 %v4721_v59, %v4720_v27 }
 0x5fc   : > { %17145 = vst [vmem:[#allocation38_spill] sm:$0xff] %v15534_v43  ;;  %v5763_v19 = vpop.f32.mrb[175].mxu0  ;;  %v17172_v43 = vld [vmem:[#allocation62_spill] sm:$0xff] }
 0x601   : > { %6223 = vmatmul.mubr.bf16.gmra.mrb[92].mxu1 %v4358_v58  ;;  %v15538_v40 = vpop.f32.mrb[176].mxu0  ;;  %v15548_v58 = vld [vmem:[#allocation3 + $0x198] sm:$0xff] }
 0x602   : > { %17146 = vst [vmem:[#allocation39_spill] sm:$0xff] %v15538_v40  ;;  %6230 = vmatprep.mubr.bf16.mxu1 %v4456_v15  ;;  %v5768_v18 = vpop.f32.mrb[177].mxu0  ;;  %v4628_v15 = vpack.c.bf16 %v15432_v41, %v4580_v2 }
 0x603   : > { %v15540_v6 = vpop.f32.mrb[178].mxu0  ;;  %v4360_v18 = vpack.c.bf16 %v15548_v58, %v15415_v3 }
 0x604   : > { %17147 = vst [vmem:[#allocation40_spill] sm:$0xff] %v15540_v6  ;;  %v5771_v61 = vpop.f32.mrb[179].mxu0  ;;  %v17153_v6 = vpack.c.bf16 %v15139_v1, %v15137_v52  ;;  %v17155_v52 = vld [vmem:[#allocation50_spill] sm:$0xff]  ;;  %v17156_v1 = vld [vmem:[#allocation49_spill] sm:$0xff] }
 0x609   : > { %6231 = vmatmul.mubr.bf16.gmra.mrb[96].mxu1 %v4359_v26  ;;  %v15544_v55 = vpop.f32.mrb[180].mxu0 }
 0x60a   : > { %17148 = vst [vmem:[#allocation46_spill] sm:$0xff] %v15544_v55  ;;  %6238 = vmatprep.mubr.bf16.mxu1 %v4457_v44  ;;  %v5776_v39 = vpop.f32.mrb[181].mxu0  ;;  %v4484_v44 = vld [vmem:[#allocation3 + $0x3f] sm:$0xff] }
 0x60b   : > { %v15546_v19 = vpop.f32.mrb[182].mxu0  ;;  %v4483_v39 = vld [vmem:[#allocation3 + $0x37] sm:$0xff] }
 0x60c   : > { %17149 = vst [vmem:[#allocation66_spill] sm:$0xff] %v15546_v19  ;;  %v5779_v50 = vpop.f32.mrb[183].mxu0  ;;  %v13022_v19 = vld [vmem:[#allocation16] sm:$0xff]  }
 0x60d   : > { %v4531_v50 = vpack.c.bf16 %v4484_v44, %v4483_v39 }
 0x611   : > { %6239 = vmatmul.mubr.bf16.gmra.mrb[100].mxu1 %v4360_v18  ;;  %v15553_v61 = vpop.f32.mrb[184].mxu0  ;;  %v13023_v18 = vld [vmem:[#allocation16 + $0x8] sm:$0xff]  }
 0x612   : > { %17150 = vst [vmem:[#allocation67_spill] sm:$0xff] %v15553_v61  ;;  %6279 = vmatprep.mubr.bf16.mxu1 %v4628_v15  ;;  %v5784_v27 = vpop.f32.mrb[185].mxu0 }
 0x613   : > { %v15555_v59 = vpop.f32.mrb[186].mxu0  ;;  %v4486_v27 = vld [vmem:[#allocation3 + $0x4f] sm:$0xff] }
 0x614   : > { %17151 = vst [vmem:[#allocation68_spill] sm:$0xff] %v15555_v59  ;;  %v5787_v26 = vpop.f32.mrb[187].mxu0  ;;  %v13024_v59 = vld [vmem:[#allocation16 + $0x10] sm:$0xff]  }
 0x615   : > { %v4485_v26 = vld [vmem:[#allocation3 + $0x47] sm:$0xff] }
 0x616   : > { %v4532_v44 = vpack.c.bf16 %v4486_v27, %v4485_v26  ;;  %v13026_v27 = vld [vmem:[#allocation16 + $0x20] sm:$0xff]  }
 0x619   : > { %6280 = vmatmul.mubr.bf16.vlgmr.msra.gmra.mrb[104].mxu1 %v4531_v50  ;;  %v15557_v55 = vpop.f32.mrb[188].mxu0  ;;  %v13025_v50 = vld [vmem:[#allocation16 + $0x18] sm:$0xff]  }
 0x61a   : > { %17152 = vst [vmem:[#allocation69_spill] sm:$0xff] %v15557_v55  ;;  %6287 = vmatprep.mubr.bf16.mxu1 %v17153_v6  ;;  %v5792_v41 = vpop.f32.mrb[189].mxu0  ;;  %8793 = vmatpush1.bf16.msra.mxu1 %v13022_v19  ;;  %v17157_v6 = vpack.c.bf16 %v17155_v52, %v17156_v1  ;;  %v17158_v52 = vld [vmem:[#allocation53_spill] sm:$0xff]  ;;  %v4489_v55 = vld [vmem:[#allocation3 + $0x67] sm:$0xff] }
 0x61b   : > { %v15562_v2 = vpop.f32.mrb[190].mxu0  ;;  %8794 = vmatprep.subr.bf16.mxu1 %v17037_v60  ;;  %v17159_v1 = vpack.c.bf16 %v15174_v54, %v17158_v52  ;;  %v17160_v54 = vpack.c.bf16 %v15186_v17, %v15184_v32  ;;  %v13029_v52 = vld [vmem:[#allocation16 + $0x38] sm:$0xff]   ;;  %v17161_v32 = vpack.c.bf16 %v15197_v5, %v15195_v37  ;;  %v17162_v37 = vpack.c.bf16 %v15209_v13, %v15207_v51  ;;  %v13034_v13 = vld [vmem:[#allocation16 + $0x60] sm:$0xff]  }
 0x61c   : > { %17154 = vst [vmem:[#allocation70_spill] sm:$0xff] %v15562_v2  ;;  %v5795_v15 = vpop.f32.mrb[191].mxu0  ;;  %v4487_v2 = vld [vmem:[#allocation3 + $0x57] sm:$0xff] }
 0x61e   : > { %8795 = vmatpush1.bf16.msra.mxu1 %v13023_v18  ;;  %v4488_v18 = vld [vmem:[#allocation3 + $0x5f] sm:$0xff] }
 0x61f   : > { %8796 = vmatprep.subr.bf16.mxu1 %v17037_v60  ;;  %v4533_v26 = vpack.c.bf16 %v4488_v18, %v4487_v2  ;;  %v13028_v2 = vld [vmem:[#allocation16 + $0x30] sm:$0xff]  }
 0x621   : > { %6288 = vmatmul.mubr.bf16.gmra.mrb[108].mxu1 %v4532_v44  ;;  %v15566_v39 = vpop.f32.mrb[96].mxu0 }
 0x622   : > { %6295 = vmatprep.mubr.bf16.mxu1 %v17157_v6  ;;  %v5833_v19 = vpop.f32.mrb[97].mxu0  ;;  %8797 = vmatpush1.bf16.msra.mxu1 %v13024_v59  ;;  %v13027_v6 = vld [vmem:[#allocation16 + $0x28] sm:$0xff]  }
 0x623   : > { %v15571_v41 = vpop.f32.mrb[98].mxu0  ;;  %8798 = vmatprep.subr.bf16.mxu1 %v17037_v60 }
 0x624   : > { %v5836_v15 = vpop.f32.mrb[99].mxu0 }
 0x626   : > { %8799 = vmatpush1.bf16.msra.mxu1 %v13025_v50  ;;  %v4490_v50 = vld [vmem:[#allocation3 + $0x6f] sm:$0xff] }
 0x627   : > { %8800 = vmatprep.subr.bf16.mxu1 %v17037_v60  ;;  %v4534_v18 = vpack.c.bf16 %v4490_v50, %v4489_v55  ;;  %v13030_v55 = vld [vmem:[#allocation16 + $0x40] sm:$0xff]  }
 0x629   : > { %6296 = vmatmul.mubr.bf16.gmra.mrb[112].mxu1 %v4533_v26  ;;  %v15575_v44 = vpop.f32.mrb[100].mxu0 }
 0x62a   : > { %6303 = vmatprep.mubr.bf16.mxu1 %v17159_v1  ;;  %v5841_v59 = vpop.f32.mrb[101].mxu0  ;;  %8801 = vmatpush1.bf16.msra.mxu1 %v13026_v27 }
 0x62b   : > { %v15580_v19 = vpop.f32.mrb[102].mxu0  ;;  %8802 = vmatprep.subr.bf16.mxu1 %v17037_v60 }
 0x62c   : > { %v5844_v15 = vpop.f32.mrb[103].mxu0 }
 0x62d   : > { %v4491_v15 = vld [vmem:[#allocation3 + $0x77] sm:$0xff] }
 0x62e   : > { %8803 = vmatpush1.bf16.msra.mxu1 %v13027_v6  ;;  %v4492_v6 = vld [vmem:[#allocation3 + $0x7f] sm:$0xff] }
 0x62f   : > { %8804 = vmatprep.subr.bf16.mxu1 %v17037_v60  ;;  %v4535_v50 = vpack.c.bf16 %v4492_v6, %v4491_v15  ;;  %v13032_v6 = vld [vmem:[#allocation16 + $0x50] sm:$0xff]  }
 0x631   : > { %6304 = vmatmul.mubr.bf16.gmra.mrb[116].mxu1 %v4534_v18  ;;  %v15584_v26 = vpop.f32.mrb[104].mxu0 }
 0x632   : > { %6311 = vmatprep.mubr.bf16.mxu1 %v17160_v54  ;;  %v5849_v27 = vpop.f32.mrb[105].mxu0  ;;  %8805 = vmatpush1.bf16.msra.mxu1 %v13028_v2  ;;  %v13031_v2 = vld [vmem:[#allocation16 + $0x48] sm:$0xff]  }
 0x633   : > { %v15589_v1 = vpop.f32.mrb[106].mxu0  ;;  %8806 = vmatprep.subr.bf16.mxu1 %v17037_v60 }
 0x634   : > { %v5852_v59 = vpop.f32.mrb[107].mxu0 }
 0x635   : > { %v4493_v59 = vld [vmem:[#allocation3 + $0x87] sm:$0xff] }
 0x636   : > { %8807 = vmatpush1.bf16.msra.mxu1 %v13029_v52  ;;  %v4494_v52 = vld [vmem:[#allocation3 + $0x8f] sm:$0xff] }
 0x637   : > { %8808 = vmatprep.subr.bf16.mxu1 %v17037_v60  ;;  %v4536_v15 = vpack.c.bf16 %v4494_v52, %v4493_v59  ;;  %v4495_v59 = vld [vmem:[#allocation3 + $0x97] sm:$0xff] }
 0x639   : > { %6312 = vmatmul.mubr.bf16.gmra.mrb[120].mxu1 %v4535_v50  ;;  %v15593_v18 = vpop.f32.mrb[108].mxu0 }
 0x63a   : > { %6319 = vmatprep.mubr.bf16.mxu1 %v17161_v32  ;;  %v5857_v17 = vpop.f32.mrb[109].mxu0  ;;  %8809 = vmatpush1.bf16.msra.mxu1 %v13030_v55  ;;  %v13033_v55 = vld [vmem:[#allocation16 + $0x58] sm:$0xff]  }
 0x63b   : > { %v15598_v54 = vpop.f32.mrb[110].mxu0  ;;  %8810 = vmatprep.subr.bf16.mxu1 %v17037_v60 }
 0x63c   : > { %v5860_v27 = vpop.f32.mrb[111].mxu0 }
 0x63d   : > { %v4724_v27 = vld [vmem:[#allocation3 + $0x1b1] sm:$0xff] }
 0x63e   : > { %8811 = vmatpush1.bf16.msra.mxu1 %v13031_v2  ;;  %v4723_v2 = vld [vmem:[#allocation3 + $0x1a9] sm:$0xff] }
 0x63f   : > { %8812 = vmatprep.subr.bf16.mxu1 %v17037_v60  ;;  %v4748_v52 = vpack.c.bf16 %v4724_v27, %v4723_v2  ;;  %v13035_v27 = vld [vmem:[#allocation16 + $0x68] sm:$0xff]  }
 0x641   : > { %6320 = vmatmul.mubr.bf16.gmra.mrb[124].mxu1 %v4536_v15  ;;  %v15602_v50 = vpop.f32.mrb[112].mxu0  ;;  %v4537_v15 = vpack.c.bf16 %v15454_v30, %v4495_v59  ;;  %11581 = vmatmul.mubr.bf16.gmra.mrb[236].mxu0 %v4748_v52  ;;  %v17164_v52 = vpack.c.bf16 %v15233_v53, %v15231_v9  ;;  %v13036_v59 = vld [vmem:[#allocation16 + $0x70] sm:$0xff]   ;;  %v17166_v9 = vld [vmem:[#allocation54_spill] sm:$0xff] }
 0x642   : > { %6327 = vmatprep.mubr.bf16.mxu1 %v17162_v37  ;;  %v5865_v5 = vpop.f32.mrb[113].mxu0  ;;  %8813 = vmatpush1.bf16.msra.mxu1 %v13032_v6  ;;  %v17163_v6 = vpack.c.bf16 %v15221_v57, %v15219_v49 }
 0x643   : > { %v15607_v32 = vpop.f32.mrb[114].mxu0  ;;  %8814 = vmatprep.subr.bf16.mxu1 %v17037_v60 }
 0x644   : > { %v5868_v17 = vpop.f32.mrb[115].mxu0 }
 0x646   : > { %8815 = vmatpush1.bf16.msra.mxu1 %v13033_v55  ;;  %v4497_v55 = vld [vmem:[#allocation3 + $0xa7] sm:$0xff] }
 0x647   : > { %8816 = vmatprep.subr.bf16.mxu1 %v17037_v60  ;;  %v4538_v30 = vpack.c.bf16 %v15462_v31, %v4497_v55 }
 0x649   : > { %6328 = vmatmul.mubr.bf16.gmra.mrb[128].mxu1 %v4537_v15  ;;  %v15612_v51 = vpop.f32.mrb[116].mxu0 }
 0x64a   : > { %6335 = vmatprep.mubr.bf16.mxu1 %v17163_v6  ;;  %v5873_v37 = vpop.f32.mrb[117].mxu0  ;;  %8817 = vmatpush1.bf16.msra.mxu1 %v13034_v13  ;;  %v4500_v13 = vld [vmem:[#allocation3 + $0xbf] sm:$0xff] }
 0x64b   : > { %v15617_v5 = vpop.f32.mrb[118].mxu0  ;;  %8818 = vmatprep.subr.bf16.mxu1 %v17037_v60  ;;  %v4539_v6 = vpack.c.bf16 %v4500_v13, %v15459_v29  ;;  %v17165_v37 = vld [vmem:[#allocation57_spill] sm:$0xff] }
 0x64c   : > { %v5876_v17 = vpop.f32.mrb[119].mxu0  ;;  %v17167_v53 = vpack.c.bf16 %v17165_v37, %v17166_v9  ;;  %v17168_v29 = vld [vmem:[#allocation61_spill] sm:$0xff] }
 0x64d   : > { %v4504_v37 = vld [vmem:[#allocation3 + $0xdf] sm:$0xff]  ;;  %v4503_v9 = vld [vmem:[#allocation3 + $0xd7] sm:$0xff] }
 0x64e   : > { %8819 = vmatpush1.bf16.msra.mxu1 %v13035_v27  ;;  %v4502_v27 = vld [vmem:[#allocation3 + $0xcf] sm:$0xff] }
 0x64f   : > { %8820 = vmatprep.subr.bf16.mxu1 %v17037_v60 }
 0x651   : > { %6336 = vmatmul.mubr.bf16.gmra.mrb[132].mxu1 %v4538_v30  ;;  %v15621_v2 = vpop.f32.mrb[120].mxu0 }
 0x652   : > { %6343 = vmatprep.mubr.bf16.mxu1 %v17164_v52  ;;  %v5881_v49 = vpop.f32.mrb[121].mxu0  ;;  %8821 = vmatpush1.bf16.msra.mxu1 %v13036_v59  ;;  %v4501_v52 = vld [vmem:[#allocation3 + $0xc7] sm:$0xff] }
 0x653   : > { %v15626_v57 = vpop.f32.mrb[122].mxu0  ;;  %8822 = vmatprep.subr.bf16.mxu1 %v17037_v60  ;;  %v4540_v49 = vpack.c.bf16 %v4502_v27, %v4501_v52  ;;  %v17169_v59 = vld [vmem:[#allocation58_spill] sm:$0xff] }
 0x654   : > { %v5884_v15 = vpop.f32.mrb[123].mxu0  ;;  %v17170_v13 = vpack.c.bf16 %v17168_v29, %v17169_v59  ;;  %v4506_v29 = vld [vmem:[#allocation3 + $0xef] sm:$0xff]  ;;  %v4505_v59 = vld [vmem:[#allocation3 + $0xe7] sm:$0xff] }
 0x659   : > { %6344 = vmatmul.mubr.bf16.gmra.mrb[136].mxu1 %v4539_v6  ;;  %v15631_v31 = vpop.f32.mrb[124].mxu0 }
 0x65a   : > { %6351 = vmatprep.mubr.bf16.mxu1 %v17167_v53  ;;  %v5889_v17 = vpop.f32.mrb[125].mxu0  ;;  %v4541_v53 = vpack.c.bf16 %v4504_v37, %v4503_v9 }
 0x65b   : > { %v15636_v55 = vpop.f32.mrb[126].mxu0 }
 0x65c   : > { %v5892_v30 = vpop.f32.mrb[127].mxu0 }
 0x65d   : > { %v17171_v30 = vld [vmem:[#allocation64_spill] sm:$0xff] }
 0x65e   : > { %v17173_v27 = vpack.c.bf16 %v17171_v30, %v17172_v43  ;;  %v13037_v43 = vld [vmem:[#allocation16 + $0x78] sm:$0xff]  }
 0x65f   : > { %8823 = vmatpush1.bf16.msra.mxu1 %v13037_v43  ;;  %v4510_v43 = vld [vmem:[#allocation3 + $0x10f] sm:$0xff] }
 0x660   : > { %9017 = vmatprep.subr.bf16.mxu1 %v17037_v60 }
 0x661   : > { %6352 = vmatmul.mubr.bf16.gmra.mrb[140].mxu1 %v4540_v49  ;;  %v15638_v15 = vpop.f32.mrb[128].mxu0 }
 0x662   : > { %6359 = vmatprep.mubr.bf16.mxu1 %v17170_v13  ;;  %v5897_v6 = vpop.f32.mrb[129].mxu0  ;;  %v4542_v13 = vpack.c.bf16 %v4506_v29, %v4505_v59  ;;  %v13039_v59 = vld [vmem:[#allocation16 + $0x200] sm:$0xff]  }
 0x663   : > { %v15643_v61 = vpop.f32.mrb[130].mxu0  ;;  %11584 = vmatprep.subr.bf16.mxu0 %v13039_v59 }
 0x664   : > { %v5900_v40 = vpop.f32.mrb[131].mxu0  ;;  %11585 = vmatpush3.bf16.msra.mxu0 %v13039_v59  ;;  %v4512_v59 = vld [vmem:[#allocation3 + $0x11f] sm:$0xff] }
 0x665   : > { %v17174_v40 = vld [vmem:[#allocation31_spill] sm:$0xff]  ;;  %11586 = vmatprep.subr.bf16.mxu0 %v13040_v62 }
 0x666   : > { %v17176_v37 = vpack.c.bf16 %v17174_v40, %v17175_v16 }
 0x668   : > { %11587 = vmatpush3.bf16.msra.mxu0 %v13040_v62 }
 0x669   : > { %6360 = vmatmul.mubr.bf16.gmra.mrb[48].mxu1 %v4541_v53  ;;  %v15645_v17 = vpop.f32.mrb[132].mxu0 }
 0x66a   : > { %6367 = vmatprep.mubr.bf16.mxu1 %v17173_v27  ;;  %v5905_v52 = vpop.f32.mrb[133].mxu0  ;;  %v4508_v27 = vld [vmem:[#allocation3 + $0xff] sm:$0xff] }
 0x66b   : > { %v15650_v49 = vpop.f32.mrb[134].mxu0 }
 0x66c   : > { %v5908_v34 = vpop.f32.mrb[135].mxu0 }
 0x66d   : > { %v4507_v34 = vld [vmem:[#allocation3 + $0xf7] sm:$0xff] }
 0x66e   : > { %v4543_v52 = vpack.c.bf16 %v4508_v27, %v4507_v34  ;;  %v4544_v27 = vpack.c.bf16 %v4510_v43, %v4509_v45  ;;  %v13043_v45 = vld [vmem:[#allocation16 + $0x218] sm:$0xff]  }
 0x66f   : > { %v4511_v43 = vld [vmem:[#allocation3 + $0x117] sm:$0xff] }
 0x670   : > { %v4545_v62 = vpack.c.bf16 %v4512_v59, %v4511_v43  ;;  %v13045_v59 = vld [vmem:[#allocation16 + $0x228] sm:$0xff]  }
 0x671   : > { %6368 = vmatmul.mubr.bf16.gmra.mrb[52].mxu1 %v4542_v13  ;;  %v15652_v6 = vpop.f32.mrb[192].mxu0  ;;  %v17177_v13 = vld [vmem:[#allocation44_spill] sm:$0xff]  ;;  %v4513_v43 = vld [vmem:[#allocation3 + $0x127] sm:$0xff] }
 0x672   : > { %6375 = vmatprep.mubr.bf16.mxu1 %v17176_v37  ;;  %v15657_v9 = vpop.f32.mrb[193].mxu0  ;;  %v17178_v16 = vpack.c.bf16 %v17177_v13, %v15303_v25  ;;  %v17179_v25 = vpack.c.bf16 %v15321_v7, %v15319_v11  ;;  %v17180_v11 = vpack.c.bf16 %v15335_v63, %v15333_v14  ;;  %v17181_v14 = vpack.c.bf16 %v15349_v20, %v15347_v4 }
 0x673   : > { %v15659_v53 = vpop.f32.mrb[194].mxu0  ;;  %v17183_v4 = vpack.c.bf16 %v15362_v8, %v15360_v0 }
 0x674   : > { %v15661_v30 = vpop.f32.mrb[195].mxu0 }
 0x679   : > { %6376 = vmatmul.mubr.bf16.gmra.mrb[56].mxu1 %v4543_v52  ;;  %v15664_v29 = vpop.f32.mrb[196].mxu0  ;;  %v13041_v52 = vld [vmem:[#allocation16 + $0x210] sm:$0xff]  }
 0x67a   : > { %6383 = vmatprep.mubr.bf16.mxu1 %v17178_v16  ;;  %v15669_v40 = vpop.f32.mrb[197].mxu0  ;;  %11588 = vmatprep.subr.bf16.mxu0 %v13041_v52 }
 0x67b   : > { %v15671_v37 = vpop.f32.mrb[198].mxu0  ;;  %11589 = vmatpush3.bf16.msra.mxu0 %v13041_v52  ;;  %v4514_v52 = vld [vmem:[#allocation3 + $0x12f] sm:$0xff] }
 0x67c   : > { %v15673_v28 = vpop.f32.mrb[199].mxu0  ;;  %11590 = vmatprep.subr.bf16.mxu0 %v13043_v45 }
 0x67f   : > { %11591 = vmatpush3.bf16.msra.mxu0 %v13043_v45  ;;  %v4546_v45 = vpack.c.bf16 %v4514_v52, %v4513_v43  ;;  %v13048_v52 = vld [vmem:[#allocation16 + $0x238] sm:$0xff]  }
 0x680   : > { %11592 = vmatprep.subr.bf16.mxu0 %v13044_v56  ;;  %v4515_v43 = vld [vmem:[#allocation3 + $0x137] sm:$0xff] }
 0x681   : > { %6384 = vmatmul.mubr.bf16.gmra.mrb[60].mxu1 %v4544_v27  ;;  %v15675_v34 = vpop.f32.mrb[200].mxu0 }
 0x682   : > { %6391 = vmatprep.mubr.bf16.mxu1 %v17179_v25  ;;  %v15680_v13 = vpop.f32.mrb[201].mxu0 }
 0x683   : > { %v15682_v16 = vpop.f32.mrb[202].mxu0  ;;  %11593 = vmatpush3.bf16.msra.mxu0 %v13044_v56  ;;  %v4516_v56 = vld [vmem:[#allocation3 + $0x13f] sm:$0xff] }
 0x684   : > { %v15684_v36 = vpop.f32.mrb[203].mxu0  ;;  %11594 = vmatprep.subr.bf16.mxu0 %v13045_v59 }
 0x687   : > { %11595 = vmatpush3.bf16.msra.mxu0 %v13045_v59  ;;  %v4547_v59 = vpack.c.bf16 %v4516_v56, %v4515_v43 }
 0x688   : > { %11596 = vmatprep.subr.bf16.mxu0 %v13047_v21 }
 0x689   : > { %6392 = vmatmul.mubr.bf16.gmra.mrb[64].mxu1 %v4545_v62  ;;  %v15686_v27 = vpop.f32.mrb[204].mxu0 }
 0x68a   : > { %6399 = vmatprep.mubr.bf16.mxu1 %v17180_v11  ;;  %v15691_v7 = vpop.f32.mrb[205].mxu0 }
 0x68b   : > { %v15693_v25 = vpop.f32.mrb[206].mxu0  ;;  %11597 = vmatpush3.bf16.msra.mxu0 %v13047_v21  ;;  %v4517_v21 = vld [vmem:[#allocation3 + $0x147] sm:$0xff] }
 0x68c   : > { %v15695_v48 = vpop.f32.mrb[207].mxu0  ;;  %11598 = vmatprep.subr.bf16.mxu0 %v13048_v52  ;;  %v4548_v10 = vpack.c.bf16 %v4518_v23, %v4517_v21  ;;  %v4522_v21 = vld [vmem:[#allocation3 + $0x16f] sm:$0xff] }
 0x68f   : > { %11599 = vmatpush3.bf16.msra.mxu0 %v13048_v52  ;;  %v17186_v52 = vpack.c.bf16 %v15370_v22, %v15374_v24 }
 0x691   : > { %6400 = vmatmul.mubr.bf16.gmra.mrb[68].mxu1 %v4546_v45  ;;  %v15697_v62 = vpop.f32.mrb[208].mxu0 }
 0x692   : > { %6407 = vmatprep.mubr.bf16.mxu1 %v17181_v14  ;;  %v15702_v63 = vpop.f32.mrb[209].mxu0 }
 0x693   : > { %v15704_v11 = vpop.f32.mrb[210].mxu0 }
 0x694   : > { %v15706_v12 = vpop.f32.mrb[211].mxu0 }
 0x699   : > { %6408 = vmatmul.mubr.bf16.gmra.mrb[72].mxu1 %v4547_v59  ;;  %v15708_v45 = vpop.f32.mrb[212].mxu0  ;;  %v4520_v59 = vld [vmem:[#allocation3 + $0x15f] sm:$0xff] }
 0x69a   : > { %17182 = vst [vmem:[#allocation50_spill] sm:$0xff] %v15708_v45  ;;  %6415 = vmatprep.mubr.bf16.mxu1 %v17183_v4  ;;  %v15713_v20 = vpop.f32.mrb[213].mxu0  ;;  %v4519_v4 = vld [vmem:[#allocation3 + $0x157] sm:$0xff] }
 0x69b   : > { %v15715_v14 = vpop.f32.mrb[214].mxu0 }
 0x69c   : > { %17184 = vst [vmem:[#allocation49_spill] sm:$0xff] %v15715_v14  ;;  %v15717_v35 = vpop.f32.mrb[215].mxu0  ;;  %v4549_v14 = vpack.c.bf16 %v4520_v59, %v4519_v4  ;;  %v4524_v4 = vld [vmem:[#allocation3 + $0x17f] sm:$0xff] }
 0x6a1   : > { %6416 = vmatmul.mubr.bf16.gmra.mrb[76].mxu1 %v4548_v10  ;;  %v15719_v56 = vpop.f32.mrb[216].mxu0  ;;  %v17189_v10 = vpack.c.bf16 %v15382_v46, %v15386_v33 }
 0x6a2   : > { %17185 = vst [vmem:[#allocation53_spill] sm:$0xff] %v15719_v56  ;;  %6423 = vmatprep.mubr.bf16.mxu1 %v17186_v52  ;;  %v15724_v43 = vpop.f32.mrb[217].mxu0  ;;  %v4521_v52 = vld [vmem:[#allocation3 + $0x167] sm:$0xff] }
 0x6a3   : > { %v15726_v0 = vpop.f32.mrb[218].mxu0 }
 0x6a4   : > { %17187 = vst [vmem:[#allocation57_spill] sm:$0xff] %v15726_v0  ;;  %v15728_v8 = vpop.f32.mrb[219].mxu0  ;;  %v4550_v0 = vpack.c.bf16 %v4522_v21, %v4521_v52  ;;  %v4526_v52 = vld [vmem:[#allocation3 + $0x18f] sm:$0xff] }
 0x6a9   : > { %6424 = vmatmul.mubr.bf16.gmra.mrb[80].mxu1 %v4549_v14  ;;  %v15730_v45 = vpop.f32.mrb[220].mxu0  ;;  %v17192_v14 = vpack.c.bf16 %v15402_v42, %v15400_v38 }
 0x6aa   : > { %17188 = vst [vmem:[#allocation54_spill] sm:$0xff] %v15730_v45  ;;  %6431 = vmatprep.mubr.bf16.mxu1 %v17189_v10  ;;  %v15735_v23 = vpop.f32.mrb[221].mxu0  ;;  %v4523_v10 = vld [vmem:[#allocation3 + $0x177] sm:$0xff] }
 0x6ab   : > { %v15737_v22 = vpop.f32.mrb[222].mxu0 }
 0x6ac   : > { %17190 = vst [vmem:[#allocation61_spill] sm:$0xff] %v15737_v22  ;;  %v15739_v24 = vpop.f32.mrb[223].mxu0  ;;  %v4551_v22 = vpack.c.bf16 %v4524_v4, %v4523_v10 }
 0x6b1   : > { %6432 = vmatmul.mubr.bf16.gmra.mrb[84].mxu1 %v4550_v0  ;;  %v15741_v56 = vpop.f32.mrb[224].mxu0  ;;  %v17196_v0 = vpack.c.bf16 %v15415_v3, %v15413_v47 }
 0x6b2   : > { %17191 = vst [vmem:[#allocation58_spill] sm:$0xff] %v15741_v56  ;;  %6439 = vmatprep.mubr.bf16.mxu1 %v17192_v14  ;;  %v15746_v59 = vpop.f32.mrb[225].mxu0  ;;  %v4525_v14 = vld [vmem:[#allocation3 + $0x187] sm:$0xff] }
 0x6b3   : > { %v15748_v46 = vpop.f32.mrb[226].mxu0  ;;  %v15763_v56 = vld [vmem:[#allocation2 + $0x8] sm:$0xff] }
 0x6b4   : > { %17193 = vst [vmem:[#allocation64_spill] sm:$0xff] %v15748_v46  ;;  %v15750_v33 = vpop.f32.mrb[227].mxu0  ;;  %v4552_v46 = vpack.c.bf16 %v4526_v52, %v4525_v14  ;;  %v4651_v52 = vpack.c.bf16 %v15763_v56, %v15763_v56 }
 0x6b5   : > { %17194 = vst [vmem:[#allocation62_spill] sm:$0xff] %v15750_v33  ;;  %v13053_v33 = vld [vmem:[#allocation16 + $0xb8] sm:$0xff]  }
 0x6b9   : > { %6440 = vmatmul.mubr.bf16.gmra.mrb[88].mxu1 %v4551_v22  ;;  %v15752_v45 = vpop.f32.mrb[228].mxu0  ;;  %v4650_v22 = vpack.c.bf16 %v15763_v56, %v15548_v58  ;;  %v4530_v58 = vld [vmem:[#allocation3 + $0x1af] sm:$0xff] }
 0x6ba   : > { %17195 = vst [vmem:[#allocation31_spill] sm:$0xff] %v15752_v45  ;;  %6447 = vmatprep.mubr.bf16.mxu1 %v17196_v0  ;;  %v15757_v21 = vpop.f32.mrb[229].mxu0  ;;  %v4527_v0 = vld [vmem:[#allocation3 + $0x197] sm:$0xff]  ;;  %v4529_v45 = vld [vmem:[#allocation3 + $0x1a7] sm:$0xff] }
 0x6bb   : > { %17197 = vst [vmem:[#allocation65_spill] sm:$0xff] %v15757_v21  ;;  %v15759_v38 = vpop.f32.mrb[230].mxu0  ;;  %v6796_v21 = vpop.permute.xlu0 %6795 }
 0x6bc   : > { %17198 = vst [vmem:[#allocation44_spill] sm:$0xff] %v15759_v38  ;;  %v15761_v42 = vpop.f32.mrb[231].mxu0  ;;  %v4528_v38 = vld [vmem:[#allocation3 + $0x19f] sm:$0xff] }
 0x6bd   : > { %17199 = vst [vmem:[#allocation71_spill] sm:$0xff] %v15761_v42  ;;  %v4553_v14 = vpack.c.bf16 %v4528_v38, %v4527_v0  ;;  %v13038_v42 = vld [vmem:[#allocation16 + $0x80] sm:$0xff]   ;;  %v13049_v38 = vld [vmem:[#allocation16 + $0x98] sm:$0xff]  }
 0x6be   : > { %v15781_v0 = vld [vmem:[#allocation14] ss:$0 sm:$0xff] }
 0x6c1   : > { %6448 = vmatmul.mubr.bf16.gmra.mrb[92].mxu1 %v4552_v46  ;;  %v15767_v4 = vpop.f32.mrb[232].mxu0  ;;  %v4554_v46 = vpack.c.bf16 %v4530_v58, %v4529_v45  ;;  %v13050_v45 = vld [vmem:[#allocation16 + $0xa0] sm:$0xff]   ;;  %v13052_v58 = vld [vmem:[#allocation16 + $0xb0] sm:$0xff]  }
 0x6c2   : > { %17200 = vst [vmem:[#allocation72_spill] sm:$0xff] %v15767_v4  ;;  %6455 = vmatprep.mubr.bf16.mxu1 %v4650_v22  ;;  %v15769_v47 = vpop.f32.mrb[233].mxu0  ;;  %v7129_v22 = vld [vmem:[#allocation2 + $0x7] sm:$0xff]  ;;  %v7130_v4 = vld [vmem:[#allocation2 + $0xf] sm:$0xff] }
 0x6c3   : > { %17201 = vst [vmem:[#allocation73_spill] sm:$0xff] %v15769_v47  ;;  %v15771_v3 = vpop.f32.mrb[234].mxu0  ;;  %v7177_v47 = vpack.c.bf16 %v7130_v4, %v7129_v22  ;;  %v13051_v4 = vld [vmem:[#allocation16 + $0xa8] sm:$0xff]  }
 0x6c4   : > { %17202 = vst [vmem:[#allocation74_spill] sm:$0xff] %v15771_v3  ;;  %v15773_v10 = vpop.f32.mrb[235].mxu0  ;;  %v13042_v3 = vld [vmem:[#allocation16 + $0x88] sm:$0xff]  }
 0x6c5   : > { %17203 = vst [vmem:[#allocation75_spill] sm:$0xff] %v15773_v10  ;;  %v13046_v10 = vld [vmem:[#allocation16 + $0x90] sm:$0xff]  }
 0x6c9   : > { %6456 = vmatmul.mubr.bf16.gmra.mrb[96].mxu1 %v4553_v14 }
 0x6ca   : > { %6463 = vmatprep.mubr.bf16.mxu1 %v4651_v52 }
 0x6d1   : > { %6464 = vmatmul.mubr.bf16.gmra.mrb[100].mxu1 %v4554_v46 }
 0x6d2   : > { %8824 = vmatprep.mubr.bf16.mxu1 %v4651_v52 }
 0x6d9   : > { %8825 = vmatmul.mubr.bf16.vlgmr.msra.gmra.mrb[144].mxu1 %v7177_v47 }
 0x6da   : > { %9018 = vmatpush1.bf16.msra.mxu1 %v13038_v42  ;;  %v11792_v42 = vadd.f32 %v15781_v0, %v15566_v39 }
 0x6db   : > { %9019 = vmatprep.subr.bf16.mxu1 %v17037_v60 }
 0x6de   : > { %9020 = vmatpush1.bf16.msra.mxu1 %v13042_v3  ;;  %v11794_v3 = vadd.f32 %v15781_v0, %v15571_v41  ;;  %v11796_v41 = vadd.f32 %v15781_v0, %v15575_v44 }
 0x6df   : > { %9021 = vmatprep.subr.bf16.mxu1 %v17037_v60 }
 0x6e2   : > { %9022 = vmatpush1.bf16.msra.mxu1 %v13046_v10 }
 0x6e3   : > { %9023 = vmatprep.subr.bf16.mxu1 %v17037_v60 }
 0x6e6   : > { %9024 = vmatpush1.bf16.msra.mxu1 %v13049_v38 }
 0x6e7   : > { %9025 = vmatprep.subr.bf16.mxu1 %v17037_v60 }
 0x6ea   : > { %9026 = vmatpush1.bf16.msra.mxu1 %v13050_v45 }
 0x6eb   : > { %9027 = vmatprep.subr.bf16.mxu1 %v17037_v60 }
 0x6ec   : > { %v6281_v47 = vpop.f32.mrb[104].mxu1 }
 0x6ed   : > { %v11793_v10 = vadd.f32 %v11792_v42, %v6281_v47  ;;  %v6283_v52 = vpop.f32.mrb[105].mxu1 }
 0x6ee   : > { %v6284_v14 = vpop.f32.mrb[106].mxu1  ;;  %9028 = vmatpush1.bf16.msra.mxu1 %v13051_v4  ;;  %v6801_v4 = vpop.permute.xlu1 %6800 }
 0x6ef   : > { %v6507_v46 = vadd.f32 %v11793_v10, %v15657_v9  ;;  %v11795_v22 = vadd.f32 %v11794_v3, %v6284_v14  ;;  %v6286_v38 = vpop.f32.mrb[107].mxu1  ;;  %9029 = vmatprep.subr.bf16.mxu1 %v17037_v60  ;;  %v11798_v9 = vadd.f32 %v15781_v0, %v15580_v19 }
 0x6f1   : > { %v6697_v45 = vmax.f32 %v6507_v46, 0.0  ;;  %v6510_v39 = vadd.f32 %v11795_v22, %v15661_v30  ;;  %v13054_v46 = vld [vmem:[#allocation16 + $0xc0] sm:$0xff]  }
 0x6f2   : > { %9030 = vmatpush1.bf16.msra.mxu1 %v13052_v58 }
 0x6f3   : > { %v7033_v42 = vmul.f32 %v6796_v21, %v6697_v45  ;;  %v6698_v47 = vmax.f32 %v6510_v39, 0.0  ;;  %9031 = vmatprep.subr.bf16.mxu1 %v17037_v60  ;;  %v6806_v45 = vpop.permute.xlu0 %6805  ;;  %v7131_v39 = vld [vmem:[#allocation2 + $0x17] sm:$0xff] }
 0x6f4   : > { %v6289_v52 = vpop.f32.mrb[108].mxu1 }
 0x6f5   : > { %7081 = vst [vmem:[#allocation2 + $0x20] sm:$0xff] %v7033_v42  ;;  %v7034_v3 = vmul.f32 %v6801_v4, %v6698_v47  ;;  %v11797_v10 = vadd.f32 %v11796_v41, %v6289_v52  ;;  %v6291_v14 = vpop.f32.mrb[109].mxu1  ;;  %v7274_v30 = vpack.c.bf16 %v7033_v42, %v15763_v56  ;;  %v13055_v41 = vld [vmem:[#allocation16 + $0xc8] sm:$0xff]   ;;  %v11800_v56 = vadd.f32 %v15781_v0, %v15584_v26 }
 0x6f6   : > { %v6292_v58 = vpop.f32.mrb[110].mxu1  ;;  %9032 = vmatpush1.bf16.msra.mxu1 %v13053_v33  ;;  %v11802_v47 = vadd.f32 %v15781_v0, %v15589_v1 }
 0x6f7   : > { %7082 = vst [vmem:[#allocation2 + $0x28] sm:$0xff] %v7034_v3  ;;  %v6515_v44 = vadd.f32 %v11797_v10, %v15652_v6  ;;  %v11799_v21 = vadd.f32 %v11798_v9, %v6292_v58  ;;  %v6294_v22 = vpop.f32.mrb[111].mxu1  ;;  %8832 = vmatprep.mubr.bf16.mxu1 %v7274_v30  ;;  %9033 = vmatprep.subr.bf16.mxu1 %v17037_v60  ;;  %v6811_v6 = vpop.permute.xlu1 %6810 }
 0x6f9   : > { %v6699_v38 = vmax.f32 %v6515_v44, 0.0  ;;  %v6518_v19 = vadd.f32 %v11799_v21, %v15659_v53 }
 0x6fa   : > { %9034 = vmatpush1.bf16.msra.mxu1 %v13054_v46  ;;  %v13056_v46 = vld [vmem:[#allocation16 + $0xd0] sm:$0xff]  }
 0x6fb   : > { %v7035_v33 = vmul.f32 %v6806_v45, %v6699_v38  ;;  %v6700_v42 = vmax.f32 %v6518_v19, 0.0  ;;  %9035 = vmatprep.subr.bf16.mxu1 %v17037_v60  ;;  %v6816_v38 = vpop.permute.xlu0 %6815 }
 0x6fc   : > { %v6297_v4 = vpop.f32.mrb[112].mxu1  ;;  %v7132_v52 = vld [vmem:[#allocation2 + $0x1f] sm:$0xff] }
 0x6fd   : > { %7083 = vst [vmem:[#allocation2 + $0x30] sm:$0xff] %v7035_v33  ;;  %v7036_v9 = vmul.f32 %v6811_v6, %v6700_v42  ;;  %v11801_v53 = vadd.f32 %v11800_v56, %v6297_v4  ;;  %v6299_v10 = vpop.f32.mrb[113].mxu1  ;;  %v7178_v14 = vpack.c.bf16 %v7132_v52, %v7131_v39  ;;  %v7275_v30 = vpack.c.bf16 %v7035_v33, %v7034_v3  ;;  %v6821_v39 = vpop.permute.xlu1 %6820 }
 0x6fe   : > { %v6300_v58 = vpop.f32.mrb[114].mxu1  ;;  %9036 = vmatpush1.bf16.msra.mxu1 %v13055_v41  ;;  %v11804_v3 = vadd.f32 %v15781_v0, %v15593_v18  ;;  %v7133_v56 = vld [vmem:[#allocation2 + $0x27] sm:$0xff]  ;;  %v13057_v18 = vld [vmem:[#allocation16 + $0xd8] sm:$0xff]  }
 0x6ff   : > { %7084 = vst [vmem:[#allocation2 + $0x38] sm:$0xff] %v7036_v9  ;;  %v6523_v26 = vadd.f32 %v11801_v53, %v15669_v40  ;;  %v11803_v44 = vadd.f32 %v11802_v47, %v6300_v58  ;;  %v6302_v21 = vpop.f32.mrb[115].mxu1  ;;  %8833 = vmatmul.mubr.bf16.gmra.mrb[148].mxu1 %v7178_v14  ;;  %9037 = vmatprep.subr.bf16.mxu1 %v17037_v60  ;;  %v15815_v53 = vld [vmem:[#allocation2 + $0x21] sm:$0xff] }
 0x700   : > { %8840 = vmatprep.mubr.bf16.mxu1 %v7275_v30  ;;  %v11806_v40 = vadd.f32 %v15781_v0, %v15598_v54  ;;  %17205 = vst [vmem:[#allocation77_spill] sm:$0xff] %v15815_v53  ;;  %v17301_v53 = vld [vmem:[#allocation69_spill] sm:$0xff] }
 0x701   : > { %v6701_v1 = vmax.f32 %v6523_v26, 0.0  ;;  %v6526_v22 = vadd.f32 %v11803_v44, %v15673_v28  ;;  %v11808_v44 = vadd.f32 %v15781_v0, %v15602_v50 }
 0x702   : > { %9038 = vmatpush1.bf16.msra.mxu1 %v13056_v46 }
 0x703   : > { %v7037_v19 = vmul.f32 %v6816_v38, %v6701_v1  ;;  %v6702_v45 = vmax.f32 %v6526_v22, 0.0  ;;  %9039 = vmatprep.subr.bf16.mxu1 %v17037_v60  ;;  %v6831_v22 = vpop.permute.xlu1 %6830 }
 0x704   : > { %v6305_v41 = vpop.f32.mrb[116].mxu1  ;;  %v7134_v33 = vld [vmem:[#allocation2 + $0x2f] sm:$0xff] }
 0x705   : > { %v15813_v42 = vld [vmem:[#allocation2 + $0x29] sm:$0xff]  ;;  %7085 = vst [vmem:[#allocation2 + $0x40] sm:$0xff] %v7037_v19  ;;  %v7038_v28 = vmul.f32 %v6821_v39, %v6702_v45  ;;  %v11805_v6 = vadd.f32 %v11804_v3, %v6305_v41  ;;  %v6307_v47 = vpop.f32.mrb[117].mxu1  ;;  %v7179_v4 = vpack.c.bf16 %v7134_v33, %v7133_v56  ;;  %v7276_v52 = vpack.c.bf16 %v7037_v19, %v7036_v9  ;;  %v6826_v9 = vpop.permute.xlu0 %6825 }
 0x706   : > { %17204 = vst [vmem:[#allocation76_spill] sm:$0xff] %v15813_v42  ;;  %v6308_v10 = vpop.f32.mrb[118].mxu1  ;;  %9040 = vmatpush1.bf16.msra.mxu1 %v13057_v18  ;;  %v7135_v3 = vld [vmem:[#allocation2 + $0x37] sm:$0xff] }
 0x707   : > { %7086 = vst [vmem:[#allocation2 + $0x48] sm:$0xff] %v7038_v28  ;;  %v6531_v54 = vadd.f32 %v11805_v6, %v15664_v29  ;;  %v11807_v30 = vadd.f32 %v11806_v40, %v6308_v10  ;;  %v6310_v58 = vpop.f32.mrb[119].mxu1  ;;  %8841 = vmatmul.mubr.bf16.gmra.mrb[152].mxu1 %v7179_v4  ;;  %9041 = vmatprep.subr.bf16.mxu1 %v17037_v60  ;;  %v15826_v45 = vld [vmem:[#allocation2 + $0x31] sm:$0xff]  ;;  %v7323_v42 = vld [vmem:[#allocation2 + $0x19] sm:$0xff] }
 0x708   : > { %8848 = vmatprep.mubr.bf16.mxu1 %v7276_v52  ;;  %v11810_v29 = vadd.f32 %v15781_v0, %v15607_v32  ;;  %17206 = vst [vmem:[#allocation78_spill] sm:$0xff] %v15826_v45  ;;  %v15830_v50 = vld [vmem:[#allocation2 + $0x38] sm:$0xff]  ;;  %v13058_v58 = vld [vmem:[#allocation16 + $0xe0] sm:$0xff]  }
 0x709   : > { %v6703_v46 = vmax.f32 %v6531_v54, 0.0  ;;  %v6534_v26 = vadd.f32 %v11807_v30, %v15671_v37  ;;  %17208 = vst [vmem:[#allocation80_spill] sm:$0xff] %v15830_v50  ;;  %v17267_v50 = vld [vmem:[#allocation56_spill] sm:$0xff] }
 0x70a   : > { %9042 = vmatpush1.bf16.msra.mxu1 %v13058_v58 }
 0x70b   : > { %v7039_v21 = vmul.f32 %v6826_v9, %v6703_v46  ;;  %v6704_v1 = vmax.f32 %v6534_v26, 0.0  ;;  %v6836_v9 = vpop.permute.xlu0 %6835  ;;  %9043 = vmatprep.subr.bf16.mxu1 %v17037_v60 }
 0x70c   : > { %v6313_v38 = vpop.f32.mrb[120].mxu1  ;;  %v7136_v19 = vld [vmem:[#allocation2 + $0x3f] sm:$0xff] }
 0x70d   : > { %7087 = vst [vmem:[#allocation2 + $0x50] sm:$0xff] %v7039_v21  ;;  %v7040_v39 = vmul.f32 %v6831_v22, %v6704_v1  ;;  %v11809_v37 = vadd.f32 %v11808_v44, %v6313_v38  ;;  %v6315_v40 = vpop.f32.mrb[121].mxu1  ;;  %v7180_v41 = vpack.c.bf16 %v7136_v19, %v7135_v3  ;;  %v7277_v56 = vpack.c.bf16 %v7039_v21, %v7038_v28  ;;  %v15828_v33 = vld [vmem:[#allocation2 + $0x39] sm:$0xff] }
 0x70e   : > { %17207 = vst [vmem:[#allocation79_spill] sm:$0xff] %v15828_v33  ;;  %v15832_v6 = vld [vmem:[#allocation2 + $0x40] sm:$0xff]  ;;  %v6316_v47 = vpop.f32.mrb[122].mxu1  ;;  %v11812_v44 = vadd.f32 %v15781_v0, %v15612_v51  ;;  %v11814_v22 = vadd.f32 %v15781_v0, %v15617_v5  ;;  %v15849_v51 = vld [vmem:[#allocation2 + $0x48] sm:$0xff] }
 0x70f   : > { %17209 = vst [vmem:[#allocation81_spill] sm:$0xff] %v15832_v6  ;;  %v7897_v4 = vld [vmem:[#allocation2 + $0x39] sm:$0xff]  ;;  %v7898_v32 = vld [vmem:[#allocation2 + $0x41] sm:$0xff]  ;;  %7088 = vst [vmem:[#allocation2 + $0x58] sm:$0xff] %v7040_v39  ;;  %v6539_v10 = vadd.f32 %v11809_v37, %v15680_v13  ;;  %v11811_v54 = vadd.f32 %v11810_v29, %v6316_v47  ;;  %v6318_v28 = vpop.f32.mrb[123].mxu1  ;;  %8849 = vmatmul.mubr.bf16.gmra.mrb[156].mxu1 %v7180_v41  ;;  %v6841_v13 = vpop.permute.xlu1 %6840 }
 0x710   : > { %v7945_v30 = vpack.c.bf16 %v7898_v32, %v7897_v4  ;;  %8856 = vmatprep.mubr.bf16.mxu1 %v7277_v56  ;;  %v7137_v38 = vld [vmem:[#allocation2 + $0x47] sm:$0xff]  ;;  %17212 = vst [vmem:[#allocation84_spill] sm:$0xff] %v15849_v51 }
 0x711   : > { %v6705_v46 = vmax.f32 %v6539_v10, 0.0  ;;  %v6542_v26 = vadd.f32 %v11811_v54, %v15684_v36  ;;  %v15845_v19 = vld [vmem:[#allocation2 + $0x41] sm:$0xff] }
 0x712   : > { %11600 = vmatprep.mubr.bf16.mxu0 %v7945_v30  ;;  %17210 = vst [vmem:[#allocation82_spill] sm:$0xff] %v15845_v19  ;;  %v17291_v19 = vld [vmem:[#allocation46_spill] sm:$0xff]  ;;  %v17297_v33 = vld [vmem:[#allocation67_spill] sm:$0xff] }
 0x713   : > { %v7041_v21 = vmul.f32 %v6836_v9, %v6705_v46  ;;  %v6706_v1 = vmax.f32 %v6542_v26, 0.0 }
 0x714   : > { %v6321_v29 = vpop.f32.mrb[124].mxu1  ;;  %v7138_v3 = vld [vmem:[#allocation2 + $0x4f] sm:$0xff] }
 0x715   : > { %7089 = vst [vmem:[#allocation2 + $0x60] sm:$0xff] %v7041_v21  ;;  %v7042_v36 = vmul.f32 %v6841_v13, %v6706_v1  ;;  %v11813_v37 = vadd.f32 %v11812_v44, %v6321_v29  ;;  %v6323_v40 = vpop.f32.mrb[125].mxu1  ;;  %v7181_v41 = vpack.c.bf16 %v7138_v3, %v7137_v38  ;;  %v7278_v56 = vpack.c.bf16 %v7041_v21, %v7040_v39  ;;  %v15847_v47 = vld [vmem:[#allocation2 + $0x49] sm:$0xff]  ;;  %v6846_v44 = vpop.permute.xlu0 %6845 }
 0x716   : > { %17211 = vst [vmem:[#allocation83_spill] sm:$0xff] %v15847_v47  ;;  %v15851_v4 = vld [vmem:[#allocation2 + $0x50] sm:$0xff]  ;;  %v6324_v32 = vpop.f32.mrb[126].mxu1  ;;  %v6851_v21 = vpop.permute.xlu1 %6850  ;;  %v11816_v1 = vadd.f32 %v15781_v0, %v15621_v2 }
 0x717   : > { %17213 = vst [vmem:[#allocation85_spill] sm:$0xff] %v15851_v4  ;;  %v7899_v10 = vld [vmem:[#allocation2 + $0x49] sm:$0xff]  ;;  %v7900_v5 = vld [vmem:[#allocation2 + $0x51] sm:$0xff]  ;;  %7090 = vst [vmem:[#allocation2 + $0x68] sm:$0xff] %v7042_v36  ;;  %v6547_v30 = vadd.f32 %v11813_v37, %v15675_v34  ;;  %v11815_v58 = vadd.f32 %v11814_v22, %v6324_v32  ;;  %v6326_v39 = vpop.f32.mrb[127].mxu1  ;;  %8857 = vmatmul.mubr.bf16.gmra.mrb[160].mxu1 %v7181_v41  ;;  %v11818_v34 = vadd.f32 %v15781_v0, %v15626_v57  ;;  %v15863_v37 = vpop.f32.mrb[236].mxu0 }
 0x718   : > { %v7946_v46 = vpack.c.bf16 %v7900_v5, %v7899_v10  ;;  %8864 = vmatprep.mubr.bf16.mxu1 %v7278_v56  ;;  %v7139_v38 = vld [vmem:[#allocation2 + $0x57] sm:$0xff]  ;;  %v13059_v5 = vld [vmem:[#allocation16 + $0xe8] sm:$0xff]  }
 0x719   : > { %v6707_v26 = vmax.f32 %v6547_v30, 0.0  ;;  %v6550_v9 = vadd.f32 %v11815_v58, %v15682_v16  ;;  %v15865_v40 = vld [vmem:[#allocation2 + $0x51] sm:$0xff]  ;;  %v15869_v30 = vpop.f32.mrb[237].mxu0  ;;  %9044 = vmatpush1.bf16.msra.mxu1 %v13059_v5 }
 0x71a   : > { %11601 = vmatmul.mubr.bf16.vlgmr.msra.gmra.mrb[240].mxu0 %v7946_v46  ;;  %17214 = vst [vmem:[#allocation86_spill] sm:$0xff] %v15865_v40  ;;  %v15867_v41 = vld [vmem:[#allocation2 + $0x58] sm:$0xff]  ;;  %9045 = vmatprep.subr.bf16.mxu1 %v17037_v60 }
 0x71b   : > { %v7043_v13 = vmul.f32 %v6846_v44, %v6707_v26  ;;  %v6708_v29 = vmax.f32 %v6550_v9, 0.0  ;;  %17215 = vst [vmem:[#allocation87_spill] sm:$0xff] %v15867_v41  ;;  %v15875_v9 = vpop.f32.mrb[238].mxu0 }
 0x71c   : > { %v6329_v22 = vpop.f32.mrb[128].mxu1  ;;  %v7140_v3 = vld [vmem:[#allocation2 + $0x5f] sm:$0xff] }
 0x71d   : > { %7091 = vst [vmem:[#allocation2 + $0x70] sm:$0xff] %v7043_v13  ;;  %v7044_v16 = vmul.f32 %v6851_v21, %v6708_v29  ;;  %v11817_v56 = vadd.f32 %v11816_v1, %v6329_v22  ;;  %v6331_v32 = vpop.f32.mrb[129].mxu1  ;;  %v7182_v10 = vpack.c.bf16 %v7140_v3, %v7139_v38  ;;  %v7279_v2 = vpack.c.bf16 %v7043_v13, %v7042_v36  ;;  %v15871_v58 = vld [vmem:[#allocation2 + $0x59] sm:$0xff]  ;;  %v15882_v38 = vpop.f32.mrb[239].mxu0 }
 0x71e   : > { %17216 = vst [vmem:[#allocation88_spill] sm:$0xff] %v15871_v58  ;;  %v15873_v57 = vld [vmem:[#allocation2 + $0x60] sm:$0xff]  ;;  %v6332_v39 = vpop.f32.mrb[130].mxu1  ;;  %v6856_v32 = vpop.permute.xlu0 %6855  ;;  %v11820_v21 = vadd.f32 %v15781_v0, %v15631_v31  ;;  %v15894_v31 = vld [vmem:[#allocation2 + $0x68] sm:$0xff] }
 0x71f   : > { %17217 = vst [vmem:[#allocation89_spill] sm:$0xff] %v15873_v57  ;;  %v7901_v46 = vld [vmem:[#allocation2 + $0x59] sm:$0xff]  ;;  %v7902_v26 = vld [vmem:[#allocation2 + $0x61] sm:$0xff]  ;;  %7092 = vst [vmem:[#allocation2 + $0x78] sm:$0xff] %v7044_v16  ;;  %v6555_v36 = vadd.f32 %v11817_v56, %v15691_v7  ;;  %v11819_v1 = vadd.f32 %v11818_v34, %v6332_v39  ;;  %v6334_v13 = vpop.f32.mrb[131].mxu1  ;;  %8865 = vmatmul.mubr.bf16.gmra.mrb[164].mxu1 %v7182_v10  ;;  %v6861_v34 = vpop.permute.xlu1 %6860  ;;  %v11822_v56 = vadd.f32 %v15781_v0, %v15636_v55 }
 0x720   : > { %v7947_v29 = vpack.c.bf16 %v7902_v26, %v7901_v46  ;;  %8872 = vmatprep.mubr.bf16.mxu1 %v7279_v2  ;;  %v7141_v39 = vld [vmem:[#allocation2 + $0x67] sm:$0xff]  ;;  %17220 = vst [vmem:[#allocation92_spill] sm:$0xff] %v15894_v31  ;;  %v16082_v57 = vld [vmem:[#allocation14] ss:$0 sm:$0xff] }
 0x721   : > { %v6709_v22 = vmax.f32 %v6555_v36, 0.0  ;;  %v6558_v3 = vadd.f32 %v11819_v1, %v15695_v48  ;;  %v15890_v5 = vld [vmem:[#allocation2 + $0x61] sm:$0xff] }
 0x722   : > { %11604 = vmatprep.mubr.bf16.mxu0 %v7947_v29  ;;  %17218 = vst [vmem:[#allocation90_spill] sm:$0xff] %v15890_v5  ;;  %v17252_v31 = vld [vmem:[#allocation35_spill] sm:$0xff] }
 0x723   : > { %v7045_v28 = vmul.f32 %v6856_v32, %v6709_v22  ;;  %v6710_v7 = vmax.f32 %v6558_v3, 0.0 }
 0x724   : > { %v6337_v10 = vpop.f32.mrb[132].mxu1  ;;  %v7142_v2 = vld [vmem:[#allocation2 + $0x6f] sm:$0xff] }
 0x725   : > { %7093 = vst [vmem:[#allocation2 + $0x80] sm:$0xff] %v7045_v28  ;;  %v7046_v48 = vmul.f32 %v6861_v34, %v6710_v7  ;;  %v11821_v46 = vadd.f32 %v11820_v21, %v6337_v10  ;;  %v6339_v26 = vpop.f32.mrb[133].mxu1  ;;  %v7183_v36 = vpack.c.bf16 %v7142_v2, %v7141_v39  ;;  %v7280_v1 = vpack.c.bf16 %v7045_v28, %v7044_v16  ;;  %v15892_v13 = vld [vmem:[#allocation2 + $0x69] sm:$0xff]  ;;  %v13060_v34 = vld [vmem:[#allocation16 + $0xf0] sm:$0xff]   ;;  %v6866_v2 = vpop.permute.xlu0 %6865 }
 0x726   : > { %17219 = vst [vmem:[#allocation91_spill] sm:$0xff] %v15892_v13  ;;  %v15896_v29 = vld [vmem:[#allocation2 + $0x70] sm:$0xff]  ;;  %v6340_v22 = vpop.f32.mrb[134].mxu1  ;;  %9046 = vmatpush1.bf16.msra.mxu1 %v13060_v34  ;;  %v11824_v26 = vadd.f32 %v15781_v0, %v15638_v15  ;;  %v15913_v15 = vld [vmem:[#allocation2 + $0x78] sm:$0xff]  ;;  %v17285_v13 = vld [vmem:[#allocation39_spill] sm:$0xff] }
 0x727   : > { %17221 = vst [vmem:[#allocation93_spill] sm:$0xff] %v15896_v29  ;;  %v7903_v3 = vld [vmem:[#allocation2 + $0x69] sm:$0xff]  ;;  %v7904_v55 = vld [vmem:[#allocation2 + $0x71] sm:$0xff]  ;;  %7094 = vst [vmem:[#allocation2 + $0x88] sm:$0xff] %v7046_v48  ;;  %v6563_v21 = vadd.f32 %v11821_v46, %v15686_v27  ;;  %v11823_v7 = vadd.f32 %v11822_v56, %v6340_v22  ;;  %v6342_v28 = vpop.f32.mrb[135].mxu1  ;;  %8873 = vmatmul.mubr.bf16.gmra.mrb[168].mxu1 %v7183_v36  ;;  %9047 = vmatprep.subr.bf16.mxu1 %v17037_v60  ;;  %v6871_v27 = vpop.permute.xlu1 %6870 }
 0x728   : > { %v7948_v16 = vpack.c.bf16 %v7904_v55, %v7903_v3  ;;  %8880 = vmatprep.mubr.bf16.mxu1 %v7280_v1  ;;  %v11826_v56 = vadd.f32 %v15781_v0, %v15643_v61  ;;  %v7143_v36 = vld [vmem:[#allocation2 + $0x77] sm:$0xff]  ;;  %17224 = vst [vmem:[#allocation96_spill] sm:$0xff] %v15913_v15 }
 0x729   : > { %v6711_v10 = vmax.f32 %v6563_v21, 0.0  ;;  %v6566_v39 = vadd.f32 %v11823_v7, %v15693_v25  ;;  %v15909_v22 = vld [vmem:[#allocation2 + $0x71] sm:$0xff] }
 0x72a   : > { %11605 = vmatmul.mubr.bf16.gmra.mrb[244].mxu0 %v7948_v16  ;;  %17222 = vst [vmem:[#allocation94_spill] sm:$0xff] %v15909_v22  ;;  %v17256_v29 = vld [vmem:[#allocation33_spill] sm:$0xff]  ;;  %v17279_v22 = vld [vmem:[#allocation59_spill] sm:$0xff] }
 0x72b   : > { %v7047_v18 = vmul.f32 %v6866_v2, %v6711_v10  ;;  %v6712_v32 = vmax.f32 %v6566_v39, 0.0 }
 0x72c   : > { %v6345_v46 = vpop.f32.mrb[136].mxu1  ;;  %v7144_v1 = vld [vmem:[#allocation2 + $0x7f] sm:$0xff] }
 0x72d   : > { %7095 = vst [vmem:[#allocation2 + $0x90] sm:$0xff] %v7047_v18  ;;  %v7048_v25 = vmul.f32 %v6871_v27, %v6712_v32  ;;  %v11825_v3 = vadd.f32 %v11824_v26, %v6345_v46  ;;  %v6347_v55 = vpop.f32.mrb[137].mxu1  ;;  %v7184_v21 = vpack.c.bf16 %v7144_v1, %v7143_v36  ;;  %v7281_v7 = vpack.c.bf16 %v7047_v18, %v7046_v48  ;;  %v15911_v28 = vld [vmem:[#allocation2 + $0x79] sm:$0xff]  ;;  %v6876_v1 = vpop.permute.xlu0 %6875 }
 0x72e   : > { %17223 = vst [vmem:[#allocation95_spill] sm:$0xff] %v15911_v28  ;;  %v15915_v16 = vld [vmem:[#allocation2 + $0x80] sm:$0xff]  ;;  %v6348_v34 = vpop.f32.mrb[138].mxu1  ;;  %v11828_v55 = vadd.f32 %v15781_v0, %v15645_v17  ;;  %v15932_v17 = vld [vmem:[#allocation2 + $0x88] sm:$0xff] }
 0x72f   : > { %17225 = vst [vmem:[#allocation97_spill] sm:$0xff] %v15915_v16  ;;  %v7905_v10 = vld [vmem:[#allocation2 + $0x79] sm:$0xff]  ;;  %v7906_v61 = vld [vmem:[#allocation2 + $0x81] sm:$0xff]  ;;  %7096 = vst [vmem:[#allocation2 + $0x98] sm:$0xff] %v7048_v25  ;;  %v6571_v32 = vadd.f32 %v11825_v3, %v15702_v63  ;;  %v11827_v26 = vadd.f32 %v11826_v56, %v6348_v34  ;;  %v6350_v18 = vpop.f32.mrb[139].mxu1  ;;  %8881 = vmatmul.mubr.bf16.gmra.mrb[172].mxu1 %v7184_v21  ;;  %v6881_v63 = vpop.permute.xlu1 %6880  ;;  %v11830_v56 = vadd.f32 %v15781_v0, %v15650_v49 }
 0x730   : > { %v7949_v48 = vpack.c.bf16 %v7906_v61, %v7905_v10  ;;  %v13061_v27 = vld [vmem:[#allocation16 + $0xf8] sm:$0xff]   ;;  %8888 = vmatprep.mubr.bf16.mxu1 %v7281_v7  ;;  %v7145_v21 = vld [vmem:[#allocation2 + $0x87] sm:$0xff]  ;;  %17228 = vst [vmem:[#allocation100_spill] sm:$0xff] %v15932_v17  ;;  %v17242_v17 = vld [vmem:[#allocation36_spill] sm:$0xff] }
 0x731   : > { %v6713_v46 = vmax.f32 %v6571_v32, 0.0  ;;  %v6574_v36 = vadd.f32 %v11827_v26, %v15706_v12  ;;  %9048 = vmatpush1.bf16.msra.mxu1 %v13061_v27  ;;  %v15928_v34 = vld [vmem:[#allocation2 + $0x81] sm:$0xff] }
 0x732   : > { %11608 = vmatprep.mubr.bf16.mxu0 %v7949_v48  ;;  %9242 = vmatprep.subr.bf16.mxu1 %v17037_v60  ;;  %17226 = vst [vmem:[#allocation98_spill] sm:$0xff] %v15928_v34 }
 0x733   : > { %v7049_v2 = vmul.f32 %v6876_v1, %v6713_v46  ;;  %v6714_v39 = vmax.f32 %v6574_v36, 0.0  ;;  %v6891_v54 = vpop.permute.xlu1 %6890  ;;  %v17231_v1 = vld [vmem:[#allocation55_spill] sm:$0xff] }
 0x734   : > { %v6353_v3 = vpop.f32.mrb[140].mxu1  ;;  %v7146_v7 = vld [vmem:[#allocation2 + $0x8f] sm:$0xff]  ;;  %v5690_v52 = vadd.f32 %v15781_v0, %v17231_v1 }
 0x735   : > { %7097 = vst [vmem:[#allocation2 + $0xa0] sm:$0xff] %v7049_v2  ;;  %v7050_v12 = vmul.f32 %v6881_v63, %v6714_v39  ;;  %v11829_v10 = vadd.f32 %v11828_v55, %v6353_v3  ;;  %v6355_v61 = vpop.f32.mrb[141].mxu1  ;;  %v7185_v32 = vpack.c.bf16 %v7146_v7, %v7145_v21  ;;  %v7282_v26 = vpack.c.bf16 %v7049_v2, %v7048_v25  ;;  %v15930_v18 = vld [vmem:[#allocation2 + $0x89] sm:$0xff]  ;;  %v6886_v21 = vpop.permute.xlu0 %6885  ;;  %v17230_v7 = vld [vmem:[#allocation34_spill] sm:$0xff] }
 0x736   : > { %17227 = vst [vmem:[#allocation99_spill] sm:$0xff] %v15930_v18  ;;  %v15934_v48 = vld [vmem:[#allocation2 + $0x90] sm:$0xff]  ;;  %v6356_v27 = vpop.f32.mrb[142].mxu1  ;;  %v5687_v61 = vadd.f32 %v15781_v0, %v17230_v7 }
 0x737   : > { %17229 = vst [vmem:[#allocation101_spill] sm:$0xff] %v15934_v48  ;;  %v7907_v46 = vld [vmem:[#allocation2 + $0x89] sm:$0xff]  ;;  %v7908_v49 = vld [vmem:[#allocation2 + $0x91] sm:$0xff]  ;;  %7098 = vst [vmem:[#allocation2 + $0xa8] sm:$0xff] %v7050_v12  ;;  %v6579_v39 = vadd.f32 %v11829_v10, %v15697_v62  ;;  %v11831_v55 = vadd.f32 %v11830_v56, %v6356_v27  ;;  %v6358_v25 = vpop.f32.mrb[143].mxu1  ;;  %8889 = vmatmul.mubr.bf16.gmra.mrb[176].mxu1 %v7185_v32 }
 0x738   : > { %v7950_v2 = vpack.c.bf16 %v7908_v49, %v7907_v46  ;;  %8896 = vmatprep.mubr.bf16.mxu1 %v7282_v26  ;;  %v7147_v56 = vld [vmem:[#allocation2 + $0x97] sm:$0xff] }
 0x739   : > { %v6715_v63 = vmax.f32 %v6579_v39, 0.0  ;;  %v6582_v3 = vadd.f32 %v11831_v55, %v15704_v11  ;;  %v15951_v39 = vld [vmem:[#allocation2 + $0x91] sm:$0xff] }
 0x73a   : > { %11609 = vmatmul.mubr.bf16.gmra.mrb[248].mxu0 %v7950_v2  ;;  %17233 = vst [vmem:[#allocation55_spill] sm:$0xff] %v15951_v39  ;;  %v15953_v55 = vld [vmem:[#allocation2 + $0x98] sm:$0xff]  ;;  %v17246_v48 = vld [vmem:[#allocation52_spill] sm:$0xff] }
 0x73b   : > { %v7051_v36 = vmul.f32 %v6886_v21, %v6715_v63  ;;  %v6716_v44 = vmax.f32 %v6582_v3, 0.0  ;;  %17234 = vst [vmem:[#allocation102_spill] sm:$0xff] %v15953_v55  ;;  %v17236_v21 = vld [vmem:[#allocation48_spill] sm:$0xff] }
 0x73c   : > { %v6361_v62 = vpop.f32.mrb[48].mxu1  ;;  %v15946_v10 = vld [vmem:[#allocation2 + $0x9f] sm:$0xff]  ;;  %v5695_v14 = vadd.f32 %v15781_v0, %v17236_v21 }
 0x73d   : > { %v15948_v32 = vld [vmem:[#allocation2 + $0x99] sm:$0xff]  ;;  %7099 = vst [vmem:[#allocation2 + $0xb0] sm:$0xff] %v7051_v36  ;;  %v7052_v26 = vmul.f32 %v6891_v54, %v6716_v44  ;;  %v11833_v11 = vadd.f32 %v6361_v62, %v5687_v61  ;;  %v6363_v27 = vpop.f32.mrb[49].mxu1  ;;  %v7186_v46 = vpack.c.bf16 %v15946_v10, %v7147_v56  ;;  %v7283_v49 = vpack.c.bf16 %v7051_v36, %v7050_v12 }
 0x73e   : > { %17232 = vst [vmem:[#allocation34_spill] sm:$0xff] %v15948_v32  ;;  %v15955_v25 = vld [vmem:[#allocation2 + $0xa0] sm:$0xff]  ;;  %v6364_v1 = vpop.f32.mrb[50].mxu1  ;;  %v6896_v27 = vpop.permute.xlu0 %6895  ;;  %v17273_v32 = vld [vmem:[#allocation41_spill] sm:$0xff] }
 0x73f   : > { %17235 = vst [vmem:[#allocation103_spill] sm:$0xff] %v15955_v25  ;;  %v7909_v2 = vld [vmem:[#allocation2 + $0x99] sm:$0xff]  ;;  %v7910_v63 = vld [vmem:[#allocation2 + $0xa1] sm:$0xff]  ;;  %7100 = vst [vmem:[#allocation2 + $0xb8] sm:$0xff] %v7052_v26  ;;  %v6587_v44 = vadd.f32 %v11833_v11, %v15713_v20  ;;  %v11835_v12 = vadd.f32 %v6364_v1, %v5690_v52  ;;  %v6366_v36 = vpop.f32.mrb[51].mxu1  ;;  %8897 = vmatmul.mubr.bf16.gmra.mrb[180].mxu1 %v7186_v46  ;;  %v6901_v25 = vpop.permute.xlu1 %6900 }
 0x740   : > { %v15957_v3 = vld [vmem:[#allocation2 + $0xa7] sm:$0xff]  ;;  %v7951_v7 = vpack.c.bf16 %v7910_v63, %v7909_v2  ;;  %8904 = vmatprep.mubr.bf16.mxu1 %v7283_v49  ;;  %v17237_v20 = vld [vmem:[#allocation32_spill] sm:$0xff] }
 0x741   : > { %v6717_v62 = vmax.f32 %v6587_v44, 0.0  ;;  %v6590_v56 = vadd.f32 %v11835_v12, %v15717_v35  ;;  %v5698_v52 = vadd.f32 %v15781_v0, %v17237_v20  ;;  %v15975_v44 = vld [vmem:[#allocation2 + $0xa8] sm:$0xff] }
 0x742   : > { %11612 = vmatprep.mubr.bf16.mxu0 %v7951_v7  ;;  %17238 = vst [vmem:[#allocation48_spill] sm:$0xff] %v15975_v44  ;;  %v6906_v61 = vpop.permute.xlu0 %6905 }
 0x743   : > { %v7053_v54 = vmul.f32 %v6896_v27, %v6717_v62  ;;  %v6718_v55 = vmax.f32 %v6590_v56, 0.0  ;;  %v5703_v56 = vadd.f32 %v15781_v0, %v17242_v17 }
 0x744   : > { %v6369_v11 = vpop.f32.mrb[52].mxu1  ;;  %v15971_v46 = vld [vmem:[#allocation2 + $0xaf] sm:$0xff] }
 0x745   : > { %7101 = vst [vmem:[#allocation2 + $0xc0] sm:$0xff] %v7053_v54  ;;  %v7054_v1 = vmul.f32 %v6901_v25, %v6718_v55  ;;  %v11837_v49 = vadd.f32 %v6369_v11, %v5695_v14  ;;  %v6371_v2 = vpop.f32.mrb[53].mxu1  ;;  %v7187_v35 = vpack.c.bf16 %v15971_v46, %v15957_v3  ;;  %v7284_v63 = vpack.c.bf16 %v7053_v54, %v7052_v26  ;;  %v15977_v21 = vld [vmem:[#allocation2 + $0xb0] sm:$0xff]  ;;  %v17240_v55 = vld [vmem:[#allocation50_spill] sm:$0xff]  ;;  %v17241_v11 = vld [vmem:[#allocation49_spill] sm:$0xff] }
 0x746   : > { %17239 = vst [vmem:[#allocation32_spill] sm:$0xff] %v15977_v21  ;;  %v6372_v12 = vpop.f32.mrb[54].mxu1  ;;  %v7911_v36 = vld [vmem:[#allocation2 + $0xa9] sm:$0xff]  ;;  %v7912_v7 = vld [vmem:[#allocation2 + $0xb1] sm:$0xff]  ;;  %v6916_v21 = vpop.permute.xlu0 %6915 }
 0x747   : > { %v15979_v62 = vld [vmem:[#allocation2 + $0xb7] sm:$0xff]  ;;  %7102 = vst [vmem:[#allocation2 + $0xc8] sm:$0xff] %v7054_v1  ;;  %v6595_v14 = vadd.f32 %v11837_v49, %v17240_v55  ;;  %v11839_v25 = vadd.f32 %v6372_v12, %v5698_v52  ;;  %v6374_v27 = vpop.f32.mrb[55].mxu1  ;;  %8905 = vmatmul.mubr.bf16.gmra.mrb[184].mxu1 %v7187_v35  ;;  %v15984_v20 = vpack.c.bf16 %v7912_v7, %v7911_v36  ;;  %v6911_v52 = vpop.permute.xlu1 %6910 }
 0x748   : > { %8912 = vmatprep.mubr.bf16.mxu1 %v7284_v63  ;;  %v17243_v12 = vld [vmem:[#allocation37_spill] sm:$0xff] }
 0x749   : > { %v6719_v54 = vmax.f32 %v6595_v14, 0.0  ;;  %v6598_v2 = vadd.f32 %v11839_v25, %v17241_v11  ;;  %11613 = vmatmul.mubr.bf16.gmra.mrb[252].mxu0 %v15984_v20  ;;  %v5706_v35 = vadd.f32 %v15781_v0, %v17243_v12  ;;  %v15998_v11 = vld [vmem:[#allocation2 + $0xb8] sm:$0xff]  ;;  %v5711_v12 = vadd.f32 %v15781_v0, %v17246_v48 }
 0x74a   : > { %17244 = vst [vmem:[#allocation50_spill] sm:$0xff] %v15998_v11  ;;  %v6926_v16 = vpop.permute.xlu0 %6925 }
 0x74b   : > { %v7055_v44 = vmul.f32 %v6906_v61, %v6719_v54  ;;  %v6720_v49 = vmax.f32 %v6598_v2, 0.0 }
 0x74c   : > { %v6377_v36 = vpop.f32.mrb[56].mxu1  ;;  %v15994_v7 = vld [vmem:[#allocation2 + $0xbf] sm:$0xff] }
 0x74d   : > { %7103 = vst [vmem:[#allocation2 + $0xd0] sm:$0xff] %v7055_v44  ;;  %v7056_v63 = vmul.f32 %v6911_v52, %v6720_v49  ;;  %v11841_v55 = vadd.f32 %v6377_v36, %v5703_v56  ;;  %v6379_v14 = vpop.f32.mrb[57].mxu1  ;;  %v7188_v25 = vpack.c.bf16 %v15994_v7, %v15979_v62  ;;  %v7285_v27 = vpack.c.bf16 %v7055_v44, %v7054_v1  ;;  %v16000_v17 = vld [vmem:[#allocation2 + $0xc0] sm:$0xff] }
 0x74e   : > { %17245 = vst [vmem:[#allocation49_spill] sm:$0xff] %v16000_v17  ;;  %v6380_v61 = vpop.f32.mrb[58].mxu1  ;;  %v7913_v54 = vld [vmem:[#allocation2 + $0xb9] sm:$0xff]  ;;  %v7914_v2 = vld [vmem:[#allocation2 + $0xc1] sm:$0xff] }
 0x74f   : > { %v16002_v26 = vld [vmem:[#allocation2 + $0xc7] sm:$0xff]  ;;  %7104 = vst [vmem:[#allocation2 + $0xd8] sm:$0xff] %v7056_v63  ;;  %v6603_v56 = vadd.f32 %v11841_v55, %v15724_v43  ;;  %v11843_v49 = vadd.f32 %v6380_v61, %v5706_v35  ;;  %v6382_v52 = vpop.f32.mrb[59].mxu1  ;;  %8913 = vmatmul.mubr.bf16.gmra.mrb[188].mxu1 %v7188_v25  ;;  %v16007_v36 = vpack.c.bf16 %v7914_v2, %v7913_v54  ;;  %v6921_v35 = vpop.permute.xlu1 %6920  ;;  %v17251_v17 = vld [vmem:[#allocation57_spill] sm:$0xff] }
 0x750   : > { %8920 = vmatprep.mubr.bf16.mxu1 %v7285_v27  ;;  %v17247_v55 = vld [vmem:[#allocation47_spill] sm:$0xff] }
 0x751   : > { %v6721_v44 = vmax.f32 %v6603_v56, 0.0  ;;  %v6606_v14 = vadd.f32 %v11843_v49, %v15728_v8  ;;  %11616 = vmatprep.mubr.bf16.mxu0 %v16007_v36  ;;  %v5714_v25 = vadd.f32 %v15781_v0, %v17247_v55  ;;  %v16021_v52 = vld [vmem:[#allocation2 + $0xc8] sm:$0xff]  ;;  %v5719_v55 = vadd.f32 %v15781_v0, %v17252_v31 }
 0x752   : > { %17248 = vst [vmem:[#allocation36_spill] sm:$0xff] %v16021_v52 }
 0x753   : > { %v7057_v11 = vmul.f32 %v6916_v21, %v6721_v44  ;;  %v6722_v43 = vmax.f32 %v6606_v14, 0.0 }
 0x754   : > { %v6385_v61 = vpop.f32.mrb[60].mxu1  ;;  %v16017_v54 = vld [vmem:[#allocation2 + $0xcf] sm:$0xff] }
 0x755   : > { %7105 = vst [vmem:[#allocation2 + $0xe0] sm:$0xff] %v7057_v11  ;;  %v7058_v27 = vmul.f32 %v6921_v35, %v6722_v43  ;;  %v11845_v2 = vadd.f32 %v6385_v61, %v5711_v12  ;;  %v6387_v56 = vpop.f32.mrb[61].mxu1  ;;  %v7189_v8 = vpack.c.bf16 %v16017_v54, %v16002_v26  ;;  %v7286_v49 = vpack.c.bf16 %v7057_v11, %v7056_v63  ;;  %v16023_v48 = vld [vmem:[#allocation2 + $0xd0] sm:$0xff]  ;;  %v17250_v43 = vld [vmem:[#allocation53_spill] sm:$0xff] }
 0x756   : > { %17249 = vst [vmem:[#allocation37_spill] sm:$0xff] %v16023_v48  ;;  %v6388_v21 = vpop.f32.mrb[62].mxu1  ;;  %v7915_v44 = vld [vmem:[#allocation2 + $0xc9] sm:$0xff]  ;;  %v7916_v14 = vld [vmem:[#allocation2 + $0xd1] sm:$0xff]  ;;  %v6936_v48 = vpop.permute.xlu0 %6935 }
 0x757   : > { %v16025_v1 = vld [vmem:[#allocation2 + $0xd7] sm:$0xff]  ;;  %7106 = vst [vmem:[#allocation2 + $0xe8] sm:$0xff] %v7058_v27  ;;  %v6611_v12 = vadd.f32 %v11845_v2, %v17250_v43  ;;  %v11847_v35 = vadd.f32 %v6388_v21, %v5714_v25  ;;  %v6390_v61 = vpop.f32.mrb[63].mxu1  ;;  %8921 = vmatmul.mubr.bf16.gmra.mrb[192].mxu1 %v7189_v8  ;;  %v16030_v56 = vpack.c.bf16 %v7916_v14, %v7915_v44  ;;  %v6931_v25 = vpop.permute.xlu1 %6930  ;;  %v17253_v21 = vld [vmem:[#allocation63_spill] sm:$0xff] }
 0x758   : > { %8928 = vmatprep.mubr.bf16.mxu1 %v7286_v49  ;;  %v5722_v8 = vadd.f32 %v15781_v0, %v17253_v21  ;;  %v16044_v61 = vld [vmem:[#allocation2 + $0xd8] sm:$0xff]  ;;  %v5727_v21 = vadd.f32 %v15781_v0, %v17256_v29 }
 0x759   : > { %v6723_v11 = vmax.f32 %v6611_v12, 0.0  ;;  %v6614_v15 = vadd.f32 %v11847_v35, %v17251_v17  ;;  %11617 = vmatmul.mubr.bf16.gmra.mrb[0].mxu0 %v16030_v56  ;;  %17254 = vst [vmem:[#allocation52_spill] sm:$0xff] %v16044_v61 }
 0x75a   : > { %v6946_v41 = vpop.permute.xlu0 %6945 }
 0x75b   : > { %v7059_v52 = vmul.f32 %v6926_v16, %v6723_v11  ;;  %v6724_v2 = vmax.f32 %v6614_v15, 0.0 }
 0x75c   : > { %v6393_v44 = vpop.f32.mrb[64].mxu1  ;;  %v16040_v14 = vld [vmem:[#allocation2 + $0xdf] sm:$0xff] }
 0x75d   : > { %7107 = vst [vmem:[#allocation2 + $0xf0] sm:$0xff] %v7059_v52  ;;  %v7060_v49 = vmul.f32 %v6931_v25, %v6724_v2  ;;  %v11849_v43 = vadd.f32 %v6393_v44, %v5719_v55  ;;  %v6395_v12 = vpop.f32.mrb[65].mxu1  ;;  %v7190_v17 = vpack.c.bf16 %v16040_v14, %v16025_v1  ;;  %v7287_v35 = vpack.c.bf16 %v7059_v52, %v7058_v27  ;;  %v16046_v31 = vld [vmem:[#allocation2 + $0xe0] sm:$0xff] }
 0x75e   : > { %17255 = vst [vmem:[#allocation47_spill] sm:$0xff] %v16046_v31  ;;  %v6396_v15 = vpop.f32.mrb[66].mxu1  ;;  %v7917_v16 = vld [vmem:[#allocation2 + $0xd9] sm:$0xff]  ;;  %v7918_v11 = vld [vmem:[#allocation2 + $0xe1] sm:$0xff]  ;;  %v6956_v4 = vpop.permute.xlu0 %6955 }
 0x75f   : > { %v16048_v63 = vld [vmem:[#allocation2 + $0xe7] sm:$0xff]  ;;  %7108 = vst [vmem:[#allocation2 + $0xf8] sm:$0xff] %v7060_v49  ;;  %v6619_v55 = vadd.f32 %v11849_v43, %v15735_v23  ;;  %v11851_v2 = vadd.f32 %v6396_v15, %v5722_v8  ;;  %v6398_v25 = vpop.f32.mrb[67].mxu1  ;;  %8929 = vmatmul.mubr.bf16.gmra.mrb[196].mxu1 %v7190_v17  ;;  %v16053_v44 = vpack.c.bf16 %v7918_v11, %v7917_v16  ;;  %v6941_v8 = vpop.permute.xlu1 %6940 }
 0x760   : > { %8936 = vmatprep.mubr.bf16.mxu1 %v7287_v35  ;;  %v17257_v43 = vld [vmem:[#allocation51_spill] sm:$0xff] }
 0x761   : > { %v6725_v52 = vmax.f32 %v6619_v55, 0.0  ;;  %v6622_v12 = vadd.f32 %v11851_v2, %v15739_v24  ;;  %11620 = vmatprep.mubr.bf16.mxu0 %v16053_v44  ;;  %v5730_v17 = vadd.f32 %v15781_v0, %v17257_v43  ;;  %v16067_v25 = vld [vmem:[#allocation2 + $0xe8] sm:$0xff]  ;;  %v17262_v0 = vld [vmem:[#allocation42_spill] sm:$0xff] }
 0x762   : > { %17258 = vst [vmem:[#allocation53_spill] sm:$0xff] %v16067_v25  ;;  %v6966_v39 = vpop.permute.xlu0 %6965 }
 0x763   : > { %v7061_v61 = vmul.f32 %v6936_v48, %v6725_v52  ;;  %v6726_v23 = vmax.f32 %v6622_v12, 0.0 }
 0x764   : > { %v6401_v15 = vpop.f32.mrb[68].mxu1  ;;  %v16063_v16 = vld [vmem:[#allocation2 + $0xef] sm:$0xff] }
 0x765   : > { %7109 = vst [vmem:[#allocation2 + $0x100] sm:$0xff] %v7061_v61  ;;  %v7062_v35 = vmul.f32 %v6941_v8, %v6726_v23  ;;  %v11853_v11 = vadd.f32 %v6401_v15, %v5727_v21  ;;  %v6403_v55 = vpop.f32.mrb[69].mxu1  ;;  %v7191_v24 = vpack.c.bf16 %v16063_v16, %v16048_v63  ;;  %v7288_v2 = vpack.c.bf16 %v7061_v61, %v7060_v49  ;;  %v16069_v29 = vld [vmem:[#allocation2 + $0xf0] sm:$0xff]  ;;  %v17260_v23 = vld [vmem:[#allocation54_spill] sm:$0xff] }
 0x766   : > { %17259 = vst [vmem:[#allocation57_spill] sm:$0xff] %v16069_v29  ;;  %v6404_v48 = vpop.f32.mrb[70].mxu1  ;;  %v7919_v52 = vld [vmem:[#allocation2 + $0xe9] sm:$0xff]  ;;  %v7920_v12 = vld [vmem:[#allocation2 + $0xf1] sm:$0xff]  ;;  %v6976_v18 = vpop.permute.xlu0 %6975 }
 0x767   : > { %v16071_v27 = vld [vmem:[#allocation2 + $0xf7] sm:$0xff]  ;;  %7110 = vst [vmem:[#allocation2 + $0x108] sm:$0xff] %v7062_v35  ;;  %v6627_v21 = vadd.f32 %v11853_v11, %v17260_v23  ;;  %v11855_v8 = vadd.f32 %v6404_v48, %v5730_v17  ;;  %v6406_v43 = vpop.f32.mrb[71].mxu1  ;;  %8937 = vmatmul.mubr.bf16.gmra.mrb[200].mxu1 %v7191_v24  ;;  %v16076_v15 = vpack.c.bf16 %v7920_v12, %v7919_v52  ;;  %v6951_v24 = vpop.permute.xlu1 %6950 }
 0x768   : > { %8944 = vmatprep.mubr.bf16.mxu1 %v7288_v2  ;;  %v17261_v55 = vld [vmem:[#allocation61_spill] sm:$0xff]  ;;  %v5735_v11 = vadd.f32 %v16082_v57, %v17262_v0 }
 0x769   : > { %v6727_v61 = vmax.f32 %v6627_v21, 0.0  ;;  %v6630_v31 = vadd.f32 %v11855_v8, %v17261_v55  ;;  %11621 = vmatmul.mubr.bf16.gmra.mrb[4].mxu0 %v16076_v15  ;;  %v17263_v52 = vld [vmem:[#allocation45_spill] sm:$0xff] }
 0x76a   : > { %v5738_v12 = vadd.f32 %v16082_v57, %v17263_v52  ;;  %v16092_v25 = vld [vmem:[#allocation2 + $0xf8] sm:$0xff]  ;;  %v5743_v52 = vadd.f32 %v16082_v57, %v17267_v50  ;;  %v6986_v5 = vpop.permute.xlu0 %6985 }
 0x76b   : > { %v7063_v17 = vmul.f32 %v6946_v41, %v6727_v61  ;;  %v6728_v48 = vmax.f32 %v6630_v31, 0.0  ;;  %17264 = vst [vmem:[#allocation35_spill] sm:$0xff] %v16092_v25 }
 0x76c   : > { %v6409_v23 = vpop.f32.mrb[72].mxu1  ;;  %v16088_v43 = vld [vmem:[#allocation2 + $0xff] sm:$0xff] }
 0x76d   : > { %7111 = vst [vmem:[#allocation2 + $0x110] sm:$0xff] %v7063_v17  ;;  %v7064_v2 = vmul.f32 %v6951_v24, %v6728_v48  ;;  %v11857_v21 = vadd.f32 %v6409_v23, %v5735_v11  ;;  %v6411_v8 = vpop.f32.mrb[73].mxu1  ;;  %v7192_v55 = vpack.c.bf16 %v16088_v43, %v16071_v27  ;;  %v7289_v49 = vpack.c.bf16 %v7063_v17, %v7062_v35  ;;  %v16094_v0 = vld [vmem:[#allocation2 + $0x100] sm:$0xff] }
 0x76e   : > { %17265 = vst [vmem:[#allocation63_spill] sm:$0xff] %v16094_v0  ;;  %v6412_v41 = vpop.f32.mrb[74].mxu1  ;;  %v7921_v31 = vld [vmem:[#allocation2 + $0xf9] sm:$0xff]  ;;  %v7922_v61 = vld [vmem:[#allocation2 + $0x101] sm:$0xff]  ;;  %v17272_v0 = vld [vmem:[#allocation64_spill] sm:$0xff]  ;;  %v6996_v58 = vpop.permute.xlu0 %6995 }
 0x76f   : > { %v16096_v29 = vld [vmem:[#allocation2 + $0x107] sm:$0xff]  ;;  %7112 = vst [vmem:[#allocation2 + $0x118] sm:$0xff] %v7064_v2  ;;  %v6635_v11 = vadd.f32 %v11857_v21, %v15746_v59  ;;  %v11859_v48 = vadd.f32 %v6412_v41, %v5738_v12  ;;  %v6414_v24 = vpop.f32.mrb[75].mxu1  ;;  %8945 = vmatmul.mubr.bf16.gmra.mrb[204].mxu1 %v7192_v55  ;;  %v16101_v23 = vpack.c.bf16 %v7922_v61, %v7921_v31  ;;  %v6961_v12 = vpop.permute.xlu1 %6960  ;;  %v17268_v21 = vld [vmem:[#allocation60_spill] sm:$0xff] }
 0x770   : > { %8952 = vmatprep.mubr.bf16.mxu1 %v7289_v49  ;;  %v17266_v8 = vld [vmem:[#allocation62_spill] sm:$0xff]  ;;  %v5746_v55 = vadd.f32 %v16082_v57, %v17268_v21  ;;  %v5751_v21 = vadd.f32 %v16082_v57, %v17273_v32 }
 0x771   : > { %v6729_v17 = vmax.f32 %v6635_v11, 0.0  ;;  %v6638_v51 = vadd.f32 %v11859_v48, %v17266_v8  ;;  %11624 = vmatprep.mubr.bf16.mxu0 %v16101_v23  ;;  %v16115_v8 = vld [vmem:[#allocation2 + $0x108] sm:$0xff] }
 0x772   : > { %17269 = vst [vmem:[#allocation33_spill] sm:$0xff] %v16115_v8  ;;  %v7006_v45 = vpop.permute.xlu0 %7005 }
 0x773   : > { %v7065_v25 = vmul.f32 %v6956_v4, %v6729_v17  ;;  %v6730_v59 = vmax.f32 %v6638_v51, 0.0 }
 0x774   : > { %v6417_v41 = vpop.f32.mrb[76].mxu1  ;;  %v16111_v31 = vld [vmem:[#allocation2 + $0x10f] sm:$0xff] }
 0x775   : > { %7113 = vst [vmem:[#allocation2 + $0x120] sm:$0xff] %v7065_v25  ;;  %v7066_v49 = vmul.f32 %v6961_v12, %v6730_v59  ;;  %v11861_v61 = vadd.f32 %v6417_v41, %v5743_v52  ;;  %v6419_v11 = vpop.f32.mrb[77].mxu1  ;;  %v7193_v48 = vpack.c.bf16 %v16111_v31, %v16096_v29  ;;  %v7290_v24 = vpack.c.bf16 %v7065_v25, %v7064_v2  ;;  %v16117_v50 = vld [vmem:[#allocation2 + $0x110] sm:$0xff]  ;;  %v17271_v59 = vld [vmem:[#allocation58_spill] sm:$0xff] }
 0x776   : > { %17270 = vst [vmem:[#allocation51_spill] sm:$0xff] %v16117_v50  ;;  %v6420_v51 = vpop.f32.mrb[78].mxu1  ;;  %v7923_v4 = vld [vmem:[#allocation2 + $0x109] sm:$0xff]  ;;  %v7924_v17 = vld [vmem:[#allocation2 + $0x111] sm:$0xff] }
 0x777   : > { %v16119_v35 = vld [vmem:[#allocation2 + $0x117] sm:$0xff]  ;;  %7114 = vst [vmem:[#allocation2 + $0x128] sm:$0xff] %v7066_v49  ;;  %v6643_v52 = vadd.f32 %v11861_v61, %v17271_v59  ;;  %v11863_v12 = vadd.f32 %v6420_v51, %v5746_v55  ;;  %v6422_v41 = vpop.f32.mrb[79].mxu1  ;;  %8953 = vmatmul.mubr.bf16.gmra.mrb[208].mxu1 %v7193_v48  ;;  %v16124_v11 = vpack.c.bf16 %v7924_v17, %v7923_v4  ;;  %v6971_v55 = vpop.permute.xlu1 %6970  ;;  %v17274_v51 = vld [vmem:[#allocation43_spill] sm:$0xff] }
 0x778   : > { %8960 = vmatprep.mubr.bf16.mxu1 %v7290_v24  ;;  %v5754_v48 = vadd.f32 %v16082_v57, %v17274_v51  ;;  %v16138_v41 = vld [vmem:[#allocation2 + $0x118] sm:$0xff]  ;;  %v17278_v50 = vld [vmem:[#allocation71_spill] sm:$0xff]  ;;  %v5759_v51 = vadd.f32 %v16082_v57, %v17279_v22 }
 0x779   : > { %v6731_v2 = vmax.f32 %v6643_v52, 0.0  ;;  %v6646_v6 = vadd.f32 %v11863_v12, %v17272_v0  ;;  %11625 = vmatmul.mubr.bf16.gmra.mrb[8].mxu0 %v16124_v11  ;;  %17275 = vst [vmem:[#allocation54_spill] sm:$0xff] %v16138_v41  ;;  %v17284_v41 = vld [vmem:[#allocation44_spill] sm:$0xff] }
 0x77b   : > { %v7067_v8 = vmul.f32 %v6966_v39, %v6731_v2  ;;  %v6732_v61 = vmax.f32 %v6646_v6, 0.0 }
 0x77c   : > { %v6425_v4 = vpop.f32.mrb[80].mxu1  ;;  %v16134_v17 = vld [vmem:[#allocation2 + $0x11f] sm:$0xff] }
 0x77d   : > { %7115 = vst [vmem:[#allocation2 + $0x130] sm:$0xff] %v7067_v8  ;;  %v7068_v24 = vmul.f32 %v6971_v55, %v6732_v61  ;;  %v11865_v59 = vadd.f32 %v6425_v4, %v5751_v21  ;;  %v6427_v52 = vpop.f32.mrb[81].mxu1  ;;  %v7194_v0 = vpack.c.bf16 %v16134_v17, %v16119_v35  ;;  %v7291_v12 = vpack.c.bf16 %v7067_v8, %v7066_v49  ;;  %v16140_v32 = vld [vmem:[#allocation2 + $0x120] sm:$0xff]  ;;  %v17277_v61 = vld [vmem:[#allocation65_spill] sm:$0xff] }
 0x77e   : > { %17276 = vst [vmem:[#allocation61_spill] sm:$0xff] %v16140_v32  ;;  %v6428_v6 = vpop.f32.mrb[82].mxu1  ;;  %v7925_v39 = vld [vmem:[#allocation2 + $0x119] sm:$0xff]  ;;  %v7926_v2 = vld [vmem:[#allocation2 + $0x121] sm:$0xff] }
 0x77f   : > { %v16142_v25 = vld [vmem:[#allocation2 + $0x127] sm:$0xff]  ;;  %7116 = vst [vmem:[#allocation2 + $0x138] sm:$0xff] %v7068_v24  ;;  %v6651_v21 = vadd.f32 %v11865_v59, %v17277_v61  ;;  %v11867_v55 = vadd.f32 %v6428_v6, %v5754_v48  ;;  %v6430_v4 = vpop.f32.mrb[83].mxu1  ;;  %8961 = vmatmul.mubr.bf16.gmra.mrb[212].mxu1 %v7194_v0  ;;  %v16147_v52 = vpack.c.bf16 %v7926_v2, %v7925_v39  ;;  %v6981_v48 = vpop.permute.xlu1 %6980 }
 0x780   : > { %8968 = vmatprep.mubr.bf16.mxu1 %v7291_v12  ;;  %v17280_v6 = vld [vmem:[#allocation38_spill] sm:$0xff]  ;;  %v16161_v4 = vld [vmem:[#allocation2 + $0x128] sm:$0xff] }
 0x781   : > { %v6733_v8 = vmax.f32 %v6651_v21, 0.0  ;;  %v6654_v34 = vadd.f32 %v11867_v55, %v17278_v50  ;;  %11628 = vmatprep.mubr.bf16.mxu0 %v16147_v52  ;;  %v5762_v0 = vadd.f32 %v16082_v57, %v17280_v6  ;;  %17281 = vst [vmem:[#allocation42_spill] sm:$0xff] %v16161_v4  ;;  %v5767_v6 = vadd.f32 %v16082_v57, %v17285_v13  ;;  %v17290_v4 = vld [vmem:[#allocation75_spill] sm:$0xff] }
 0x783   : > { %v7069_v32 = vmul.f32 %v6976_v18, %v6733_v8  ;;  %v6734_v59 = vmax.f32 %v6654_v34, 0.0 }
 0x784   : > { %v6433_v39 = vpop.f32.mrb[84].mxu1  ;;  %v16157_v2 = vld [vmem:[#allocation2 + $0x12f] sm:$0xff] }
 0x785   : > { %7117 = vst [vmem:[#allocation2 + $0x140] sm:$0xff] %v7069_v32  ;;  %v7070_v12 = vmul.f32 %v6981_v48, %v6734_v59  ;;  %v11869_v61 = vadd.f32 %v6433_v39, %v5759_v51  ;;  %v6435_v21 = vpop.f32.mrb[85].mxu1  ;;  %v7195_v50 = vpack.c.bf16 %v16157_v2, %v16142_v25  ;;  %v7292_v55 = vpack.c.bf16 %v7069_v32, %v7068_v24  ;;  %v16163_v22 = vld [vmem:[#allocation2 + $0x130] sm:$0xff]  ;;  %v17283_v59 = vld [vmem:[#allocation31_spill] sm:$0xff] }
 0x786   : > { %17282 = vst [vmem:[#allocation45_spill] sm:$0xff] %v16163_v22  ;;  %v6436_v34 = vpop.f32.mrb[86].mxu1  ;;  %v7927_v18 = vld [vmem:[#allocation2 + $0x129] sm:$0xff]  ;;  %v7928_v8 = vld [vmem:[#allocation2 + $0x131] sm:$0xff] }
 0x787   : > { %v16165_v49 = vld [vmem:[#allocation2 + $0x137] sm:$0xff]  ;;  %7118 = vst [vmem:[#allocation2 + $0x148] sm:$0xff] %v7070_v12  ;;  %v6659_v51 = vadd.f32 %v11869_v61, %v17283_v59  ;;  %v11871_v48 = vadd.f32 %v6436_v34, %v5762_v0  ;;  %v6438_v39 = vpop.f32.mrb[87].mxu1  ;;  %8969 = vmatmul.mubr.bf16.gmra.mrb[216].mxu1 %v7195_v50  ;;  %v16170_v21 = vpack.c.bf16 %v7928_v8, %v7927_v18  ;;  %v6991_v0 = vpop.permute.xlu1 %6990 }
 0x788   : > { %8976 = vmatprep.mubr.bf16.mxu1 %v7292_v55  ;;  %v17286_v34 = vld [vmem:[#allocation40_spill] sm:$0xff]  ;;  %v16184_v39 = vld [vmem:[#allocation2 + $0x138] sm:$0xff] }
 0x789   : > { %v6735_v32 = vmax.f32 %v6659_v51, 0.0  ;;  %v6662_v28 = vadd.f32 %v11871_v48, %v17284_v41  ;;  %11629 = vmatmul.mubr.bf16.gmra.mrb[12].mxu0 %v16170_v21  ;;  %v5770_v50 = vadd.f32 %v16082_v57, %v17286_v34  ;;  %17287 = vst [vmem:[#allocation62_spill] sm:$0xff] %v16184_v39  ;;  %v5775_v34 = vadd.f32 %v16082_v57, %v17291_v19  ;;  %v17296_v39 = vld [vmem:[#allocation74_spill] sm:$0xff] }
 0x78b   : > { %v7071_v22 = vmul.f32 %v6986_v5, %v6735_v32  ;;  %v6736_v61 = vmax.f32 %v6662_v28, 0.0 }
 0x78c   : > { %v6441_v18 = vpop.f32.mrb[88].mxu1  ;;  %v16180_v8 = vld [vmem:[#allocation2 + $0x13f] sm:$0xff] }
 0x78d   : > { %7119 = vst [vmem:[#allocation2 + $0x150] sm:$0xff] %v7071_v22  ;;  %v7072_v55 = vmul.f32 %v6991_v0, %v6736_v61  ;;  %v11873_v59 = vadd.f32 %v6441_v18, %v5767_v6  ;;  %v6443_v51 = vpop.f32.mrb[89].mxu1  ;;  %v7196_v41 = vpack.c.bf16 %v16180_v8, %v16165_v49  ;;  %v7293_v48 = vpack.c.bf16 %v7071_v22, %v7070_v12  ;;  %v16186_v13 = vld [vmem:[#allocation2 + $0x140] sm:$0xff]  ;;  %v17289_v61 = vld [vmem:[#allocation73_spill] sm:$0xff] }
 0x78e   : > { %17288 = vst [vmem:[#allocation56_spill] sm:$0xff] %v16186_v13  ;;  %v6444_v5 = vpop.f32.mrb[90].mxu1  ;;  %v7929_v28 = vld [vmem:[#allocation2 + $0x139] sm:$0xff]  ;;  %v7930_v32 = vld [vmem:[#allocation2 + $0x141] sm:$0xff] }
 0x78f   : > { %v16188_v24 = vld [vmem:[#allocation2 + $0x147] sm:$0xff]  ;;  %7120 = vst [vmem:[#allocation2 + $0x158] sm:$0xff] %v7072_v55  ;;  %v6667_v6 = vadd.f32 %v11873_v59, %v17289_v61  ;;  %v11875_v0 = vadd.f32 %v6444_v5, %v5770_v50  ;;  %v6446_v18 = vpop.f32.mrb[91].mxu1  ;;  %8977 = vmatmul.mubr.bf16.gmra.mrb[220].mxu1 %v7196_v41  ;;  %v16193_v51 = vpack.c.bf16 %v7930_v32, %v7929_v28  ;;  %v7001_v50 = vpop.permute.xlu1 %7000 }
 0x790   : > { %8984 = vmatprep.mubr.bf16.mxu1 %v7293_v48  ;;  %v17292_v5 = vld [vmem:[#allocation66_spill] sm:$0xff]  ;;  %v16207_v18 = vld [vmem:[#allocation2 + $0x148] sm:$0xff] }
 0x791   : > { %v6737_v22 = vmax.f32 %v6667_v6, 0.0  ;;  %v6670_v40 = vadd.f32 %v11875_v0, %v17290_v4  ;;  %11632 = vmatprep.mubr.bf16.mxu0 %v16193_v51  ;;  %v5778_v41 = vadd.f32 %v16082_v57, %v17292_v5  ;;  %17293 = vst [vmem:[#allocation60_spill] sm:$0xff] %v16207_v18  ;;  %v5783_v5 = vadd.f32 %v16082_v57, %v17297_v33  ;;  %v7016_v18 = vpop.permute.xlu0 %7015 }
 0x793   : > { %v7073_v13 = vmul.f32 %v6996_v58, %v6737_v22  ;;  %v6738_v59 = vmax.f32 %v6670_v40, 0.0 }
 0x794   : > { %v6449_v28 = vpop.f32.mrb[92].mxu1  ;;  %v16203_v32 = vld [vmem:[#allocation2 + $0x14f] sm:$0xff] }
 0x795   : > { %7121 = vst [vmem:[#allocation2 + $0x160] sm:$0xff] %v7073_v13  ;;  %v7074_v48 = vmul.f32 %v7001_v50, %v6738_v59  ;;  %v11877_v61 = vadd.f32 %v6449_v28, %v5775_v34  ;;  %v6451_v6 = vpop.f32.mrb[93].mxu1  ;;  %v7197_v4 = vpack.c.bf16 %v16203_v32, %v16188_v24  ;;  %v7294_v0 = vpack.c.bf16 %v7073_v13, %v7072_v55  ;;  %v16209_v19 = vld [vmem:[#allocation2 + $0x150] sm:$0xff] }
 0x796   : > { %17294 = vst [vmem:[#allocation58_spill] sm:$0xff] %v16209_v19  ;;  %v6452_v40 = vpop.f32.mrb[94].mxu1  ;;  %v7931_v58 = vld [vmem:[#allocation2 + $0x149] sm:$0xff]  ;;  %v7932_v22 = vld [vmem:[#allocation2 + $0x151] sm:$0xff] }
 0x797   : > { %v16211_v12 = vld [vmem:[#allocation2 + $0x157] sm:$0xff]  ;;  %7122 = vst [vmem:[#allocation2 + $0x168] sm:$0xff] %v7074_v48  ;;  %v11879_v50 = vadd.f32 %v6452_v40, %v5778_v41  ;;  %v6454_v28 = vpop.f32.mrb[95].mxu1  ;;  %8985 = vmatmul.mubr.bf16.gmra.mrb[224].mxu1 %v7197_v4  ;;  %v16216_v6 = vpack.c.bf16 %v7932_v22, %v7931_v58  ;;  %v7011_v41 = vpop.permute.xlu1 %7010 }
 0x798   : > { %v17295_v59 = vld [vmem:[#allocation72_spill] sm:$0xff]  ;;  %8992 = vmatprep.mubr.bf16.mxu1 %v7294_v0  ;;  %v16230_v28 = vld [vmem:[#allocation2 + $0x158] sm:$0xff] }
 0x799   : > { %v6675_v34 = vadd.f32 %v11877_v61, %v17295_v59  ;;  %v6678_v47 = vadd.f32 %v11879_v50, %v17296_v39  ;;  %11633 = vmatmul.mubr.bf16.gmra.mrb[16].mxu0 %v16216_v6  ;;  %v17298_v40 = vld [vmem:[#allocation68_spill] sm:$0xff]  ;;  %17299 = vst [vmem:[#allocation64_spill] sm:$0xff] %v16230_v28 }
 0x79a   : > { %v5786_v4 = vadd.f32 %v16082_v57, %v17298_v40  ;;  %v5791_v40 = vadd.f32 %v16082_v57, %v17301_v53 }
 0x79b   : > { %v6739_v13 = vmax.f32 %v6675_v34, 0.0  ;;  %v6740_v61 = vmax.f32 %v6678_v47, 0.0 }
 0x79c   : > { %v6457_v58 = vpop.f32.mrb[96].mxu1  ;;  %v16226_v22 = vld [vmem:[#allocation2 + $0x15f] sm:$0xff] }
 0x79d   : > { %v7075_v19 = vmul.f32 %v7006_v45, %v6739_v13  ;;  %v7076_v0 = vmul.f32 %v7011_v41, %v6740_v61  ;;  %v11881_v59 = vadd.f32 %v6457_v58, %v5783_v5  ;;  %v6459_v34 = vpop.f32.mrb[97].mxu1  ;;  %v7198_v39 = vpack.c.bf16 %v16226_v22, %v16211_v12  ;;  %v16232_v33 = vld [vmem:[#allocation2 + $0x160] sm:$0xff] }
 0x79e   : > { %17300 = vst [vmem:[#allocation41_spill] sm:$0xff] %v16232_v33  ;;  %v6460_v45 = vpop.f32.mrb[98].mxu1  ;;  %v7933_v47 = vld [vmem:[#allocation2 + $0x159] sm:$0xff]  ;;  %v7934_v13 = vld [vmem:[#allocation2 + $0x161] sm:$0xff] }
 0x79f   : > { %7123 = vst [vmem:[#allocation2 + $0x170] sm:$0xff] %v7075_v19  ;;  %v7295_v50 = vpack.c.bf16 %v7075_v19, %v7074_v48  ;;  %v16234_v55 = vld [vmem:[#allocation2 + $0x167] sm:$0xff]  ;;  %7124 = vst [vmem:[#allocation2 + $0x178] sm:$0xff] %v7076_v0  ;;  %v6683_v5 = vadd.f32 %v11881_v59, %v15869_v30  ;;  %v11883_v61 = vadd.f32 %v6460_v45, %v5786_v4  ;;  %v6462_v41 = vpop.f32.mrb[99].mxu1  ;;  %8993 = vmatmul.mubr.bf16.gmra.mrb[228].mxu1 %v7198_v39  ;;  %v7021_v4 = vpop.permute.xlu1 %7020 }
 0x7a0   : > { %v16239_v58 = vpack.c.bf16 %v7934_v13, %v7933_v47  ;;  %v17302_v59 = vld [vmem:[#allocation70_spill] sm:$0xff]  ;;  %v16253_v41 = vld [vmem:[#allocation2 + $0x168] sm:$0xff] }
 0x7a1   : > { %9000 = vmatprep.mubr.bf16.mxu1 %v7295_v50  ;;  %v6741_v19 = vmax.f32 %v6683_v5, 0.0  ;;  %v6686_v34 = vadd.f32 %v11883_v61, %v15882_v38  ;;  %v5794_v39 = vadd.f32 %v16082_v57, %v17302_v59  ;;  %17303 = vst [vmem:[#allocation43_spill] sm:$0xff] %v16253_v41  ;;  %v7422_v41 = vld [vmem:[#allocation2 + $0x47] sm:$0xff] }
 0x7a2   : > { %11636 = vmatprep.mubr.bf16.mxu0 %v16239_v58 }
 0x7a3   : > { %v7077_v33 = vmul.f32 %v7016_v18, %v6741_v19  ;;  %v6742_v30 = vmax.f32 %v6686_v34, 0.0 }
 0x7a4   : > { %v6465_v45 = vpop.f32.mrb[100].mxu1 }
 0x7a5   : > { %7125 = vst [vmem:[#allocation2 + $0x180] sm:$0xff] %v7077_v33  ;;  %v7078_v50 = vmul.f32 %v7021_v4, %v6742_v30  ;;  %v11885_v13 = vadd.f32 %v6465_v45, %v5791_v40  ;;  %v6467_v5 = vpop.f32.mrb[101].mxu1  ;;  %v7296_v61 = vpack.c.bf16 %v7077_v33, %v7076_v0 }
 0x7a6   : > { %v16249_v47 = vld [vmem:[#allocation2 + $0x16f] sm:$0xff]  ;;  %v6468_v18 = vpop.f32.mrb[102].mxu1  ;;  %v16257_v48 = vld [vmem:[#allocation2 + $0x177] sm:$0xff]  ;;  %v7026_v5 = vpop.permute.xlu0 %7025 }
 0x7a7   : > { %v7199_v38 = vpack.c.bf16 %v16249_v47, %v16234_v55  ;;  %v16255_v53 = vld [vmem:[#allocation2 + $0x170] sm:$0xff]  ;;  %7126 = vst [vmem:[#allocation2 + $0x188] sm:$0xff] %v7078_v50  ;;  %v6691_v40 = vadd.f32 %v11885_v13, %v15863_v37  ;;  %v11887_v30 = vadd.f32 %v6468_v18, %v5794_v39  ;;  %v6470_v4 = vpop.f32.mrb[103].mxu1  ;;  %v7418_v50 = vld [vmem:[#allocation2 + $0x27] sm:$0xff]  ;;  %v16272_v18 = vld [vmem:[#allocation2 + $0x178] sm:$0xff] }
 0x7a8   : > { %17304 = vst [vmem:[#allocation65_spill] sm:$0xff] %v16255_v53  ;;  %v7935_v19 = vld [vmem:[#allocation2 + $0x169] sm:$0xff]  ;;  %v7936_v34 = vld [vmem:[#allocation2 + $0x171] sm:$0xff]  ;;  %v7031_v53 = vpop.permute.xlu1 %7030  ;;  %17305 = vst [vmem:[#allocation71_spill] sm:$0xff] %v16272_v18 }
 0x7a9   : > { %9001 = vmatmul.mubr.bf16.gmra.mrb[232].mxu1 %v7199_v38  ;;  %v16262_v59 = vpack.c.bf16 %v7936_v34, %v7935_v19  ;;  %v6743_v33 = vmax.f32 %v6691_v40, 0.0  ;;  %v6694_v45 = vadd.f32 %v11887_v30, %v15875_v9  ;;  %v7417_v38 = vld [vmem:[#allocation2 + $0x1f] sm:$0xff]  ;;  %v7420_v4 = vld [vmem:[#allocation2 + $0x37] sm:$0xff]  ;;  %v13063_v18 = vld [vmem:[#allocation16 + $0x108] sm:$0xff]  }
 0x7aa   : > { %9008 = vmatprep.mubr.bf16.mxu1 %v7296_v61  ;;  %v7465_v9 = vpack.c.bf16 %v7418_v50, %v7417_v38  ;;  %v7419_v38 = vld [vmem:[#allocation2 + $0x2f] sm:$0xff] }
 0x7ab   : > { %11637 = vmatmul.mubr.bf16.gmra.mrb[20].mxu0 %v16262_v59  ;;  %v7079_v28 = vmul.f32 %v7026_v5, %v6743_v33  ;;  %v6744_v57 = vmax.f32 %v6694_v45, 0.0  ;;  %v13062_v33 = vld [vmem:[#allocation16 + $0x100] sm:$0xff]  }
 0x7ac   : > { %v16268_v37 = vld [vmem:[#allocation2 + $0x17f] sm:$0xff] }
 0x7ad   : > { %7127 = vst [vmem:[#allocation2 + $0x190] sm:$0xff] %v7079_v28  ;;  %v7080_v39 = vmul.f32 %v7031_v53, %v6744_v57  ;;  %v7200_v13 = vpack.c.bf16 %v16268_v37, %v16257_v48  ;;  %v16274_v61 = vld [vmem:[#allocation2 + $0x180] sm:$0xff]  ;;  %v7321_v28 = vld [vmem:[#allocation2 + $0x9] sm:$0xff]  ;;  %v7322_v53 = vld [vmem:[#allocation2 + $0x11] sm:$0xff] }
 0x7ae   : > { %17306 = vst [vmem:[#allocation59_spill] sm:$0xff] %v16274_v61  ;;  %v7937_v19 = vld [vmem:[#allocation2 + $0x179] sm:$0xff]  ;;  %v7938_v34 = vld [vmem:[#allocation2 + $0x181] sm:$0xff]  ;;  %v7369_v57 = vpack.c.bf16 %v7322_v53, %v7321_v28 }
 0x7af   : > { %7128 = vst [vmem:[#allocation2 + $0x198] sm:$0xff] %v7080_v39  ;;  %v16278_v30 = vpack.c.bf16 %v7938_v34, %v7937_v19  ;;  %v7942_v45 = vld [vmem:[#allocation2 + $0x1a1] sm:$0xff] }
 0x7b0   : > { %v16281_v5 = vld [vmem:[#allocation2 + $0x187] sm:$0xff] }
 0x7b1   : > { %9009 = vmatmul.mubr.bf16.gmra.mrb[236].mxu1 %v7200_v13  ;;  %17307 = vst [vmem:[#allocation38_spill] sm:$0xff] %v16278_v30  ;;  %11640 = vmatprep.mubr.bf16.mxu0 %v16278_v30  ;;  %v16285_v0 = vld [vmem:[#allocation2 + $0x188] sm:$0xff]  ;;  %v7421_v30 = vld [vmem:[#allocation2 + $0x3f] sm:$0xff] }
 0x7b2   : > { %9049 = vmatprep.mubr.bf16.mxu1 %v7465_v9  ;;  %v7466_v9 = vpack.c.bf16 %v7420_v4, %v7419_v38  ;;  %v13064_v4 = vld [vmem:[#allocation16 + $0x110] sm:$0xff]   ;;  %v13135_v38 = vld [vmem:[#allocation2 + $0x21] sm:$0xff]  ;;  %v7467_v28 = vpack.c.bf16 %v7422_v41, %v7421_v30  ;;  %v13067_v41 = vld [vmem:[#allocation16 + $0x128] sm:$0xff]  }
 0x7b3   : > { %v7370_v13 = vpack.c.bf16 %v13135_v38, %v7323_v42  ;;  %v7426_v30 = vld [vmem:[#allocation2 + $0x67] sm:$0xff]  ;;  %v13069_v38 = vld [vmem:[#allocation16 + $0x138] sm:$0xff]  }
 0x7b4   : > { %v16283_v50 = vld [vmem:[#allocation2 + $0x18f] sm:$0xff] }
 0x7b5   : > { %v16287_v39 = vld [vmem:[#allocation2 + $0x190] sm:$0xff] }
 0x7b6   : > { %v7939_v19 = vld [vmem:[#allocation2 + $0x189] sm:$0xff]  ;;  %v7940_v34 = vld [vmem:[#allocation2 + $0x191] sm:$0xff]  ;;  %v7941_v40 = vld [vmem:[#allocation2 + $0x199] sm:$0xff] }
 0x7b7   : > { %v7966_v53 = vpack.c.bf16 %v7940_v34, %v7939_v19  ;;  %v7967_v61 = vpack.c.bf16 %v7942_v45, %v7941_v40  ;;  %v13065_v40 = vld [vmem:[#allocation16 + $0x118] sm:$0xff]   ;;  %v13137_v45 = vld [vmem:[#allocation2 + $0x31] sm:$0xff] }
 0x7b8   : > { %v13138_v19 = vld [vmem:[#allocation2 + $0x39] sm:$0xff]  ;;  %v13139_v34 = vld [vmem:[#allocation2 + $0x41] sm:$0xff] }
 0x7b9   : > { %9050 = vmatmul.mubr.bf16.vlgmr.msra.gmra.mrb[144].mxu1 %v7369_v57  ;;  %11641 = vmatmul.mubr.bf16.gmra.mrb[24].mxu0 %v7966_v53  ;;  %v7424_v57 = vld [vmem:[#allocation2 + $0x57] sm:$0xff]  ;;  %v7425_v53 = vld [vmem:[#allocation2 + $0x5f] sm:$0xff] }
 0x7ba   : > { %9057 = vmatprep.mubr.bf16.mxu1 %v7466_v9  ;;  %9243 = vmatpush1.bf16.msra.mxu1 %v13062_v33  ;;  %v13066_v33 = vld [vmem:[#allocation16 + $0x120] sm:$0xff]  }
 0x7bb   : > { %9244 = vmatprep.subr.bf16.mxu1 %v17037_v60  ;;  %11644 = vmatprep.mubr.bf16.mxu0 %v7967_v61  ;;  %v13136_v61 = vld [vmem:[#allocation2 + $0x29] sm:$0xff] }
 0x7bc   : > { %v7371_v9 = vpack.c.bf16 %v13137_v45, %v13136_v61  ;;  %v13141_v61 = vld [vmem:[#allocation2 + $0x51] sm:$0xff] }
 0x7be   : > { %9245 = vmatpush1.bf16.msra.mxu1 %v13063_v18  ;;  %v7423_v18 = vld [vmem:[#allocation2 + $0x4f] sm:$0xff] }
 0x7bf   : > { %9246 = vmatprep.subr.bf16.mxu1 %v17037_v60  ;;  %v7468_v42 = vpack.c.bf16 %v7424_v57, %v7423_v18  ;;  %v13070_v57 = vld [vmem:[#allocation16 + $0x140] sm:$0xff]  }
 0x7c1   : > { %9058 = vmatmul.mubr.bf16.gmra.mrb[148].mxu1 %v7370_v13  ;;  %v13068_v13 = vld [vmem:[#allocation16 + $0x130] sm:$0xff]  }
 0x7c2   : > { %9065 = vmatprep.mubr.bf16.mxu1 %v7467_v28  ;;  %9247 = vmatpush1.bf16.msra.mxu1 %v13064_v4  ;;  %v7372_v28 = vpack.c.bf16 %v13139_v34, %v13138_v19  ;;  %v7469_v4 = vpack.c.bf16 %v7426_v30, %v7425_v53  ;;  %v13072_v30 = vld [vmem:[#allocation16 + $0x150] sm:$0xff]   ;;  %v13143_v19 = vld [vmem:[#allocation2 + $0x61] sm:$0xff] }
 0x7c3   : > { %9248 = vmatprep.subr.bf16.mxu1 %v17037_v60 }
 0x7c6   : > { %9249 = vmatpush1.bf16.msra.mxu1 %v13065_v40  ;;  %v7428_v40 = vld [vmem:[#allocation2 + $0x77] sm:$0xff] }
 0x7c7   : > { %9250 = vmatprep.subr.bf16.mxu1 %v17037_v60 }
 0x7c9   : > { %9066 = vmatmul.mubr.bf16.gmra.mrb[152].mxu1 %v7371_v9  ;;  %v7427_v9 = vld [vmem:[#allocation2 + $0x6f] sm:$0xff] }
 0x7ca   : > { %9073 = vmatprep.mubr.bf16.mxu1 %v7468_v42  ;;  %9251 = vmatpush1.bf16.msra.mxu1 %v13066_v33  ;;  %v13140_v33 = vld [vmem:[#allocation2 + $0x49] sm:$0xff]  ;;  %v7470_v18 = vpack.c.bf16 %v7428_v40, %v7427_v9 }
 0x7cb   : > { %9252 = vmatprep.subr.bf16.mxu1 %v17037_v60  ;;  %v7373_v45 = vpack.c.bf16 %v13141_v61, %v13140_v33  ;;  %v13071_v42 = vld [vmem:[#allocation16 + $0x148] sm:$0xff]  }
 0x7cc   : > { %v13144_v40 = vld [vmem:[#allocation2 + $0x69] sm:$0xff] }
 0x7cd   : > { %v7431_v61 = vld [vmem:[#allocation2 + $0x8f] sm:$0xff] }
 0x7ce   : > { %9253 = vmatpush1.bf16.msra.mxu1 %v13067_v41  ;;  %v7430_v41 = vld [vmem:[#allocation2 + $0x87] sm:$0xff] }
 0x7cf   : > { %9254 = vmatprep.subr.bf16.mxu1 %v17037_v60 }
 0x7d1   : > { %9074 = vmatmul.mubr.bf16.gmra.mrb[156].mxu1 %v7372_v28  ;;  %v7429_v28 = vld [vmem:[#allocation2 + $0x7f] sm:$0xff] }
 0x7d2   : > { %9081 = vmatprep.mubr.bf16.mxu1 %v7469_v4  ;;  %9255 = vmatpush1.bf16.msra.mxu1 %v13068_v13  ;;  %v13142_v13 = vld [vmem:[#allocation2 + $0x59] sm:$0xff]  ;;  %v7471_v53 = vpack.c.bf16 %v7430_v41, %v7429_v28 }
 0x7d3   : > { %9256 = vmatprep.subr.bf16.mxu1 %v17037_v60  ;;  %v7374_v34 = vpack.c.bf16 %v13143_v19, %v13142_v13  ;;  %v13073_v4 = vld [vmem:[#allocation16 + $0x158] sm:$0xff]   ;;  %v13076_v41 = vld [vmem:[#allocation16 + $0x170] sm:$0xff]  }
 0x7d4   : > { %v13147_v13 = vld [vmem:[#allocation2 + $0x79] sm:$0xff]  ;;  %v13148_v19 = vld [vmem:[#allocation2 + $0x81] sm:$0xff] }
 0x7d6   : > { %9257 = vmatpush1.bf16.msra.mxu1 %v13069_v38  ;;  %v13074_v38 = vld [vmem:[#allocation16 + $0x160] sm:$0xff]  }
 0x7d7   : > { %9258 = vmatprep.subr.bf16.mxu1 %v17037_v60 }
 0x7d9   : > { %9082 = vmatmul.mubr.bf16.gmra.mrb[160].mxu1 %v7373_v45  ;;  %v13146_v45 = vld [vmem:[#allocation2 + $0x97] sm:$0xff] }
 0x7da   : > { %9089 = vmatprep.mubr.bf16.mxu1 %v7470_v18  ;;  %9259 = vmatpush1.bf16.msra.mxu1 %v13070_v57  ;;  %v13145_v57 = vld [vmem:[#allocation2 + $0x71] sm:$0xff]  ;;  %v7472_v9 = vpack.c.bf16 %v13146_v45, %v7431_v61  ;;  %v17309_v61 = vpack.c.bf16 %v15979_v62, %v15971_v46  ;;  %v16323_v45 = vld [vmem:[#allocation2 + $0xa1] sm:$0xff]  ;;  %v17311_v46 = vpack.c.bf16 %v16025_v1, %v16017_v54 }
 0x7db   : > { %9260 = vmatprep.subr.bf16.mxu1 %v17037_v60  ;;  %v7375_v33 = vpack.c.bf16 %v13145_v57, %v13144_v40  ;;  %v13075_v18 = vld [vmem:[#allocation16 + $0x168] sm:$0xff]  }
 0x7dc   : > { %v13149_v40 = vld [vmem:[#allocation2 + $0x89] sm:$0xff]  ;;  %v13150_v57 = vld [vmem:[#allocation2 + $0x91] sm:$0xff] }
 0x7de   : > { %9261 = vmatpush1.bf16.msra.mxu1 %v13071_v42 }
 0x7df   : > { %9262 = vmatprep.subr.bf16.mxu1 %v17037_v60 }
 0x7e1   : > { %9090 = vmatmul.mubr.bf16.gmra.mrb[164].mxu1 %v7374_v34  ;;  %v7376_v34 = vpack.c.bf16 %v13148_v19, %v13147_v13  ;;  %v17310_v19 = vpack.c.bf16 %v16002_v26, %v15994_v7  ;;  %v17312_v26 = vpack.c.bf16 %v16048_v63, %v16040_v14 }
 0x7e2   : > { %9097 = vmatprep.mubr.bf16.mxu1 %v7471_v53  ;;  %9263 = vmatpush1.bf16.msra.mxu1 %v13072_v30 }
 0x7e3   : > { %9264 = vmatprep.subr.bf16.mxu1 %v17037_v60 }
 0x7e6   : > { %9265 = vmatpush1.bf16.msra.mxu1 %v13073_v4  ;;  %v17308_v4 = vpack.c.bf16 %v15957_v3, %v15946_v10  ;;  %v13151_v3 = vld [vmem:[#allocation2 + $0x99] sm:$0xff] }
 0x7e7   : > { %9266 = vmatprep.subr.bf16.mxu1 %v17037_v60 }
 0x7e9   : > { %9098 = vmatmul.mubr.bf16.gmra.mrb[168].mxu1 %v7375_v33  ;;  %v7377_v33 = vpack.c.bf16 %v13150_v57, %v13149_v40  ;;  %v17330_v57 = vld [vmem:[#allocation38_spill] sm:$0xff] }
 0x7ea   : > { %9105 = vmatprep.mubr.bf16.mxu1 %v7472_v9  ;;  %9267 = vmatpush1.bf16.msra.mxu1 %v13074_v38  ;;  %v13077_v38 = vld [vmem:[#allocation16 + $0x178] sm:$0xff]  }
 0x7eb   : > { %9268 = vmatprep.subr.bf16.mxu1 %v17037_v60 }
 0x7ed   : > { %v16306_v42 = vpop.f32.mrb[240].mxu0 }
 0x7ee   : > { %9269 = vmatpush1.bf16.msra.mxu1 %v13075_v18  ;;  %v16308_v30 = vpop.f32.mrb[241].mxu0  ;;  %v7378_v18 = vpack.c.bf16 %v16323_v45, %v13151_v3  ;;  %v7514_v3 = vld [vmem:[#allocation2 + $0x28] sm:$0xff] }
 0x7ef   : > { %9270 = vmatprep.subr.bf16.mxu1 %v17037_v60  ;;  %v16311_v28 = vpop.f32.mrb[242].mxu0 }
 0x7f0   : > { %v16313_v53 = vpop.f32.mrb[243].mxu0 }
 0x7f1   : > { %9106 = vmatmul.mubr.bf16.gmra.mrb[172].mxu1 %v7376_v34 }
 0x7f2   : > { %9113 = vmatprep.mubr.bf16.mxu1 %v17308_v4  ;;  %9271 = vmatpush1.bf16.msra.mxu1 %v13076_v41 }
 0x7f3   : > { %9272 = vmatprep.subr.bf16.mxu1 %v17037_v60 }
 0x7f6   : > { %9273 = vmatpush1.bf16.msra.mxu1 %v13077_v38 }
 0x7f7   : > { %9467 = vmatprep.subr.bf16.mxu1 %v17037_v60 }
 0x7f9   : > { %9114 = vmatmul.mubr.bf16.gmra.mrb[176].mxu1 %v7377_v33  ;;  %v17332_v33 = vld [vmem:[#allocation77_spill] sm:$0xff] }
 0x7fa   : > { %9121 = vmatprep.mubr.bf16.mxu1 %v17309_v61 }
 0x7fd   : > { %v16325_v9 = vpop.f32.mrb[244].mxu0 }
 0x7fe   : > { %v16327_v10 = vpop.f32.mrb[245].mxu0 }
 0x7ff   : > { %v16330_v41 = vpop.f32.mrb[246].mxu0 }
 0x800   : > { %v16332_v13 = vpop.f32.mrb[247].mxu0 }
 0x801   : > { %9122 = vmatmul.mubr.bf16.gmra.mrb[180].mxu1 %v7378_v18  ;;  %v7513_v18 = vld [vmem:[#allocation2 + $0x20] sm:$0xff] }
 0x802   : > { %9129 = vmatprep.mubr.bf16.mxu1 %v17310_v19  ;;  %v13078_v19 = vld [vmem:[#allocation16 + $0x180] sm:$0xff]  }
 0x809   : > { %9130 = vmatmul.mubr.bf16.gmra.mrb[184].mxu1 %v15984_v20  ;;  %v17313_v20 = vpack.c.bf16 %v16071_v27, %v16063_v16 }
 0x80a   : > { %9137 = vmatprep.mubr.bf16.mxu1 %v17311_v46  ;;  %v7561_v46 = vpack.c.bf16 %v7514_v3, %v7513_v18  ;;  %v13153_v3 = vld [vmem:[#allocation2 + $0x40] sm:$0xff]  ;;  %v13154_v18 = vld [vmem:[#allocation2 + $0x48] sm:$0xff] }
 0x80d   : > { %v16341_v62 = vpop.f32.mrb[248].mxu0 }
 0x80e   : > { %v16343_v34 = vpop.f32.mrb[249].mxu0 }
 0x80f   : > { %v16345_v4 = vpop.f32.mrb[250].mxu0 }
 0x810   : > { %v16347_v38 = vpop.f32.mrb[251].mxu0 }
 0x811   : > { %9138 = vmatmul.mubr.bf16.gmra.mrb[188].mxu1 %v16007_v36  ;;  %v17314_v36 = vpack.c.bf16 %v16096_v29, %v16088_v43  ;;  %v17317_v29 = vpack.c.bf16 %v16165_v49, %v16157_v2 }
 0x812   : > { %9145 = vmatprep.mubr.bf16.mxu1 %v17312_v26  ;;  %v17335_v26 = vld [vmem:[#allocation78_spill] sm:$0xff] }
 0x819   : > { %9146 = vmatmul.mubr.bf16.gmra.mrb[192].mxu1 %v16030_v56  ;;  %v17315_v56 = vpack.c.bf16 %v16119_v35, %v16111_v31 }
 0x81a   : > { %9153 = vmatprep.mubr.bf16.mxu1 %v17313_v20 }
 0x81c   : > { %v16357_v7 = vpop.f32.mrb[252].mxu0 }
 0x81d   : > { %v16359_v1 = vpop.f32.mrb[253].mxu0 }
 0x81e   : > { %v16361_v54 = vpop.f32.mrb[254].mxu0 }
 0x81f   : > { %v16363_v40 = vpop.f32.mrb[255].mxu0 }
 0x821   : > { %9154 = vmatmul.mubr.bf16.gmra.mrb[196].mxu1 %v16053_v44  ;;  %v17316_v44 = vpack.c.bf16 %v16142_v25, %v16134_v17 }
 0x822   : > { %9161 = vmatprep.mubr.bf16.mxu1 %v17314_v36  ;;  %v13079_v36 = vld [vmem:[#allocation16 + $0x188] sm:$0xff]  }
 0x829   : > { %9162 = vmatmul.mubr.bf16.gmra.mrb[200].mxu1 %v16076_v15 }
 0x82a   : > { %9169 = vmatprep.mubr.bf16.mxu1 %v17315_v56 }
 0x82c   : > { %v16373_v63 = vpop.f32.mrb[0].mxu0 }
 0x82d   : > { %v16375_v14 = vpop.f32.mrb[1].mxu0 }
 0x82e   : > { %v16377_v27 = vpop.f32.mrb[2].mxu0 }
 0x82f   : > { %v16379_v16 = vpop.f32.mrb[3].mxu0 }
 0x831   : > { %9170 = vmatmul.mubr.bf16.gmra.mrb[204].mxu1 %v16101_v23  ;;  %v17318_v23 = vpack.c.bf16 %v16188_v24, %v16180_v8 }
 0x832   : > { %9177 = vmatprep.mubr.bf16.mxu1 %v17316_v44  ;;  %v7515_v44 = vld [vmem:[#allocation2 + $0x30] sm:$0xff] }
 0x839   : > { %9178 = vmatmul.mubr.bf16.gmra.mrb[208].mxu1 %v16124_v11  ;;  %v17319_v11 = vpack.c.bf16 %v16211_v12, %v16203_v32  ;;  %v7487_v32 = vpack.c.bf16 %v16281_v5, %v16268_v37 }
 0x83a   : > { %9185 = vmatprep.mubr.bf16.mxu1 %v17317_v29  ;;  %v13080_v29 = vld [vmem:[#allocation16 + $0x190] sm:$0xff]  }
 0x83c   : > { %v16389_v15 = vpop.f32.mrb[4].mxu0 }
 0x83d   : > { %v16391_v43 = vpop.f32.mrb[5].mxu0 }
 0x83e   : > { %v16393_v35 = vpop.f32.mrb[6].mxu0 }
 0x83f   : > { %v16395_v31 = vpop.f32.mrb[7].mxu0 }
 0x841   : > { %9186 = vmatmul.mubr.bf16.gmra.mrb[212].mxu1 %v16147_v52  ;;  %v17320_v52 = vpack.c.bf16 %v16234_v55, %v16226_v22  ;;  %v16432_v55 = vld [vmem:[#allocation2 + $0x197] sm:$0xff] }
 0x842   : > { %9193 = vmatprep.mubr.bf16.mxu1 %v17318_v23 }
 0x849   : > { %9194 = vmatmul.mubr.bf16.gmra.mrb[216].mxu1 %v16170_v21  ;;  %v17321_v21 = vpack.c.bf16 %v16257_v48, %v16249_v47 }
 0x84a   : > { %9201 = vmatprep.mubr.bf16.mxu1 %v17319_v11  ;;  %v13152_v11 = vld [vmem:[#allocation2 + $0x38] sm:$0xff] }
 0x84c   : > { %v16405_v25 = vpop.f32.mrb[8].mxu0 }
 0x84d   : > { %v16407_v17 = vpop.f32.mrb[9].mxu0 }
 0x84e   : > { %v16409_v49 = vpop.f32.mrb[10].mxu0 }
 0x84f   : > { %v16411_v2 = vpop.f32.mrb[11].mxu0 }
 0x851   : > { %9202 = vmatmul.mubr.bf16.gmra.mrb[220].mxu1 %v16193_v51 }
 0x852   : > { %9209 = vmatprep.mubr.bf16.mxu1 %v17320_v52  ;;  %v7562_v52 = vpack.c.bf16 %v13152_v11, %v7515_v44  ;;  %v13084_v44 = vld [vmem:[#allocation16 + $0x1b0] sm:$0xff]  }
 0x853   : > { %v13155_v11 = vld [vmem:[#allocation2 + $0x50] sm:$0xff] }
 0x859   : > { %9210 = vmatmul.mubr.bf16.gmra.mrb[224].mxu1 %v16216_v6  ;;  %v7488_v6 = vpack.c.bf16 %v16432_v55, %v16283_v50 }
 0x85a   : > { %9217 = vmatprep.mubr.bf16.mxu1 %v17321_v21 }
 0x85c   : > { %v16421_v24 = vpop.f32.mrb[12].mxu0 }
 0x85d   : > { %17322 = vst [vmem:[#allocation31_spill] sm:$0xff] %v16421_v24  ;;  %v16423_v8 = vpop.f32.mrb[13].mxu0  ;;  %v17383_v24 = vld [vmem:[#allocation87_spill] sm:$0xff] }
 0x85e   : > { %17323 = vst [vmem:[#allocation44_spill] sm:$0xff] %v16423_v8  ;;  %v16425_v12 = vpop.f32.mrb[14].mxu0  ;;  %v7709_v8 = vld [vmem:[#allocation2 + $0x57] sm:$0xff] }
 0x85f   : > { %17324 = vst [vmem:[#allocation39_spill] sm:$0xff] %v16425_v12  ;;  %v16429_v51 = vpop.f32.mrb[15].mxu0 }
 0x860   : > { %17325 = vst [vmem:[#allocation40_spill] sm:$0xff] %v16429_v51 }
 0x861   : > { %9218 = vmatmul.mubr.bf16.gmra.mrb[228].mxu1 %v16239_v58  ;;  %v17331_v58 = vld [vmem:[#allocation76_spill] sm:$0xff] }
 0x862   : > { %9225 = vmatprep.mubr.bf16.mxu1 %v7487_v32  ;;  %v17333_v61 = vpack.c.bf16 %v17331_v58, %v17332_v33  ;;  %v13081_v33 = vld [vmem:[#allocation16 + $0x198] sm:$0xff]  }
 0x869   : > { %9226 = vmatmul.mubr.bf16.gmra.mrb[232].mxu1 %v16262_v59  ;;  %v17334_v59 = vld [vmem:[#allocation79_spill] sm:$0xff] }
 0x86a   : > { %9233 = vmatprep.mubr.bf16.mxu1 %v7488_v6  ;;  %v17336_v20 = vpack.c.bf16 %v17334_v59, %v17335_v26  ;;  %v17341_v6 = vld [vmem:[#allocation83_spill] sm:$0xff]  ;;  %v17345_v59 = vld [vmem:[#allocation86_spill] sm:$0xff] }
 0x86c   : > { %v16437_v22 = vpop.f32.mrb[16].mxu0 }
 0x86d   : > { %17326 = vst [vmem:[#allocation73_spill] sm:$0xff] %v16437_v22  ;;  %v16439_v48 = vpop.f32.mrb[17].mxu0  ;;  %v7655_v22 = vld [vmem:[#allocation2 + $0x191] sm:$0xff] }
 0x86e   : > { %17327 = vst [vmem:[#allocation75_spill] sm:$0xff] %v16439_v48  ;;  %v16441_v47 = vpop.f32.mrb[18].mxu0  ;;  %v17380_v48 = vld [vmem:[#allocation84_spill] sm:$0xff] }
 0x86f   : > { %17328 = vst [vmem:[#allocation46_spill] sm:$0xff] %v16441_v47  ;;  %v16443_v37 = vpop.f32.mrb[19].mxu0 }
 0x870   : > { %17329 = vst [vmem:[#allocation66_spill] sm:$0xff] %v16443_v37  ;;  %v16516_v37 = vld [vmem:[#allocation2 + $0x198] sm:$0xff] }
 0x871   : > { %9234 = vmatmul.mubr.bf16.gmra.mrb[236].mxu1 %v17330_v57  ;;  %v17342_v57 = vld [vmem:[#allocation82_spill] sm:$0xff] }
 0x872   : > { %9274 = vmatprep.mubr.bf16.mxu1 %v17333_v61  ;;  %v17343_v58 = vpack.c.bf16 %v17341_v6, %v17342_v57  ;;  %v13082_v61 = vld [vmem:[#allocation16 + $0x1a0] sm:$0xff]  }
 0x879   : > { %9275 = vmatmul.mubr.bf16.vlgmr.msra.gmra.mrb[144].mxu1 %v7561_v46  ;;  %v17344_v46 = vld [vmem:[#allocation88_spill] sm:$0xff] }
 0x87a   : > { %9282 = vmatprep.mubr.bf16.mxu1 %v17336_v20  ;;  %9468 = vmatpush1.bf16.msra.mxu1 %v13078_v19  ;;  %v7563_v19 = vpack.c.bf16 %v13154_v18, %v13153_v3  ;;  %v17346_v26 = vpack.c.bf16 %v17344_v46, %v17345_v59  ;;  %v13083_v20 = vld [vmem:[#allocation16 + $0x1a8] sm:$0xff]   ;;  %v13085_v18 = vld [vmem:[#allocation16 + $0x1b8] sm:$0xff]  }
 0x87b   : > { %9469 = vmatprep.subr.bf16.mxu1 %v17037_v60  ;;  %v13157_v46 = vld [vmem:[#allocation2 + $0x60] sm:$0xff]  ;;  %v13158_v59 = vld [vmem:[#allocation2 + $0x68] sm:$0xff] }
 0x87e   : > { %v16453_v56 = vpop.f32.mrb[20].mxu0  ;;  %9470 = vmatpush1.bf16.msra.mxu1 %v13079_v36 }
 0x87f   : > { %17337 = vst [vmem:[#allocation72_spill] sm:$0xff] %v16453_v56  ;;  %v16455_v23 = vpop.f32.mrb[21].mxu0  ;;  %9471 = vmatprep.subr.bf16.mxu1 %v17037_v60  ;;  %v7652_v56 = vld [vmem:[#allocation2 + $0x179] sm:$0xff] }
 0x880   : > { %17338 = vst [vmem:[#allocation74_spill] sm:$0xff] %v16455_v23  ;;  %v16458_v21 = vpop.f32.mrb[22].mxu0  ;;  %v7654_v23 = vld [vmem:[#allocation2 + $0x189] sm:$0xff] }
 0x881   : > { %17339 = vst [vmem:[#allocation67_spill] sm:$0xff] %v16458_v21  ;;  %v16460_v32 = vpop.f32.mrb[23].mxu0  ;;  %9283 = vmatmul.mubr.bf16.gmra.mrb[148].mxu1 %v7562_v52  ;;  %v13156_v52 = vld [vmem:[#allocation2 + $0x58] sm:$0xff] }
 0x882   : > { %17340 = vst [vmem:[#allocation68_spill] sm:$0xff] %v16460_v32  ;;  %9290 = vmatprep.mubr.bf16.mxu1 %v17343_v58  ;;  %9472 = vmatpush1.bf16.msra.mxu1 %v13080_v29  ;;  %v7564_v6 = vpack.c.bf16 %v13156_v52, %v13155_v11  ;;  %v17355_v11 = vld [vmem:[#allocation94_spill] sm:$0xff] }
 0x883   : > { %9473 = vmatprep.subr.bf16.mxu1 %v17037_v60 }
 0x886   : > { %9474 = vmatpush1.bf16.msra.mxu1 %v13081_v33  ;;  %v17351_v33 = vld [vmem:[#allocation91_spill] sm:$0xff] }
 0x887   : > { %9475 = vmatprep.subr.bf16.mxu1 %v17037_v60 }
 0x889   : > { %9291 = vmatmul.mubr.bf16.gmra.mrb[152].mxu1 %v7563_v19  ;;  %v13086_v19 = vld [vmem:[#allocation16 + $0x1c0] sm:$0xff]  }
 0x88a   : > { %9298 = vmatprep.mubr.bf16.mxu1 %v17346_v26  ;;  %9476 = vmatpush1.bf16.msra.mxu1 %v13082_v61  ;;  %v17352_v61 = vld [vmem:[#allocation90_spill] sm:$0xff]  ;;  %v7565_v26 = vpack.c.bf16 %v13158_v59, %v13157_v46 }
 0x88b   : > { %9477 = vmatprep.subr.bf16.mxu1 %v17037_v60  ;;  %v17353_v3 = vpack.c.bf16 %v17351_v33, %v17352_v61  ;;  %v13159_v33 = vld [vmem:[#allocation2 + $0x70] sm:$0xff]  ;;  %v13160_v61 = vld [vmem:[#allocation2 + $0x78] sm:$0xff]  ;;  %v17358_v46 = vld [vmem:[#allocation98_spill] sm:$0xff] }
 0x88c   : > { %v16471_v36 = vpop.f32.mrb[24].mxu0 }
 0x88d   : > { %17347 = vst [vmem:[#allocation69_spill] sm:$0xff] %v16471_v36  ;;  %v16473_v29 = vpop.f32.mrb[25].mxu0 }
 0x88e   : > { %9478 = vmatpush1.bf16.msra.mxu1 %v13083_v20  ;;  %17348 = vst [vmem:[#allocation70_spill] sm:$0xff] %v16473_v29  ;;  %v16476_v57 = vpop.f32.mrb[26].mxu0  ;;  %v17354_v20 = vld [vmem:[#allocation95_spill] sm:$0xff] }
 0x88f   : > { %9479 = vmatprep.subr.bf16.mxu1 %v17037_v60  ;;  %17349 = vst [vmem:[#allocation38_spill] sm:$0xff] %v16476_v57  ;;  %v16478_v58 = vpop.f32.mrb[27].mxu0  ;;  %v17356_v52 = vpack.c.bf16 %v17354_v20, %v17355_v11  ;;  %v13161_v20 = vld [vmem:[#allocation2 + $0x80] sm:$0xff]  ;;  %v13162_v11 = vld [vmem:[#allocation2 + $0x88] sm:$0xff]  ;;  %v13168_v57 = vld [vmem:[#allocation2 + $0xb8] sm:$0xff] }
 0x890   : > { %17350 = vst [vmem:[#allocation76_spill] sm:$0xff] %v16478_v58 }
 0x891   : > { %9299 = vmatmul.mubr.bf16.gmra.mrb[156].mxu1 %v7564_v6  ;;  %v13087_v6 = vld [vmem:[#allocation16 + $0x1c8] sm:$0xff]  }
 0x892   : > { %9306 = vmatprep.mubr.bf16.mxu1 %v17353_v3  ;;  %9480 = vmatpush1.bf16.msra.mxu1 %v13084_v44  ;;  %v13088_v44 = vld [vmem:[#allocation16 + $0x1d0] sm:$0xff]   ;;  %v7566_v3 = vpack.c.bf16 %v13160_v61, %v13159_v33  ;;  %v17361_v33 = vld [vmem:[#allocation55_spill] sm:$0xff] }
 0x893   : > { %9481 = vmatprep.subr.bf16.mxu1 %v17037_v60 }
 0x896   : > { %9482 = vmatpush1.bf16.msra.mxu1 %v13085_v18  ;;  %v17357_v18 = vld [vmem:[#allocation99_spill] sm:$0xff] }
 0x897   : > { %9483 = vmatprep.subr.bf16.mxu1 %v17037_v60  ;;  %v17359_v59 = vpack.c.bf16 %v17357_v18, %v17358_v46  ;;  %v13092_v18 = vld [vmem:[#allocation16 + $0x1f0] sm:$0xff]  }
 0x898   : > { %v13163_v46 = vld [vmem:[#allocation2 + $0x90] sm:$0xff] }
 0x899   : > { %9307 = vmatmul.mubr.bf16.gmra.mrb[160].mxu1 %v7565_v26  ;;  %v13089_v26 = vld [vmem:[#allocation16 + $0x1d8] sm:$0xff]  }
 0x89a   : > { %9314 = vmatprep.mubr.bf16.mxu1 %v17356_v52  ;;  %9484 = vmatpush1.bf16.msra.mxu1 %v13086_v19  ;;  %v13090_v19 = vld [vmem:[#allocation16 + $0x1e0] sm:$0xff]   ;;  %v7567_v52 = vpack.c.bf16 %v13162_v11, %v13161_v20  ;;  %v13093_v11 = vld [vmem:[#allocation16 + $0x1f8] sm:$0xff]  }
 0x89b   : > { %9485 = vmatprep.subr.bf16.mxu1 %v17037_v60 }
 0x89e   : > { %9486 = vmatpush1.bf16.msra.mxu1 %v13087_v6  ;;  %v17360_v6 = vld [vmem:[#allocation34_spill] sm:$0xff] }
 0x89f   : > { %9487 = vmatprep.subr.bf16.mxu1 %v17037_v60  ;;  %v17362_v61 = vpack.c.bf16 %v17360_v6, %v17361_v33  ;;  %v13166_v6 = vld [vmem:[#allocation2 + $0xa8] sm:$0xff] }
 0x8a1   : > { %9315 = vmatmul.mubr.bf16.gmra.mrb[164].mxu1 %v7566_v3  ;;  %v13091_v3 = vld [vmem:[#allocation16 + $0x1e8] sm:$0xff]  }
 0x8a2   : > { %9322 = vmatprep.mubr.bf16.mxu1 %v17359_v59  ;;  %9488 = vmatpush1.bf16.msra.mxu1 %v13088_v44  ;;  %v7626_v44 = vld [vmem:[#allocation2 + $0xa9] sm:$0xff]  ;;  %v13164_v59 = vld [vmem:[#allocation2 + $0x98] sm:$0xff] }
 0x8a3   : > { %9489 = vmatprep.subr.bf16.mxu1 %v17037_v60  ;;  %v7665_v20 = vpack.c.bf16 %v7626_v44, %v16323_v45  ;;  %v7629_v45 = vld [vmem:[#allocation2 + $0xc1] sm:$0xff] }
 0x8a6   : > { %9490 = vmatpush1.bf16.msra.mxu1 %v13089_v26  ;;  %v7568_v26 = vpack.c.bf16 %v13164_v59, %v13163_v46  ;;  %v7630_v46 = vld [vmem:[#allocation2 + $0xc9] sm:$0xff] }
 0x8a7   : > { %9491 = vmatprep.subr.bf16.mxu1 %v17037_v60  ;;  %v13167_v59 = vld [vmem:[#allocation2 + $0xb0] sm:$0xff]  ;;  %v7667_v44 = vpack.c.bf16 %v7630_v46, %v7629_v45  ;;  %v13173_v46 = vld [vmem:[#allocation2 + $0xe0] sm:$0xff] }
 0x8a8   : > { %v7570_v36 = vpack.c.bf16 %v13168_v57, %v13167_v59  ;;  %v7636_v57 = vld [vmem:[#allocation2 + $0xf9] sm:$0xff]  ;;  %v7635_v45 = vld [vmem:[#allocation2 + $0xf1] sm:$0xff] }
 0x8a9   : > { %9323 = vmatmul.mubr.bf16.gmra.mrb[168].mxu1 %v7567_v52  ;;  %v13165_v52 = vld [vmem:[#allocation2 + $0xa0] sm:$0xff] }
 0x8aa   : > { %9330 = vmatprep.mubr.bf16.mxu1 %v17362_v61  ;;  %9492 = vmatpush1.bf16.msra.mxu1 %v13090_v19  ;;  %v7628_v19 = vld [vmem:[#allocation2 + $0xb9] sm:$0xff]  ;;  %v7569_v33 = vpack.c.bf16 %v13166_v6, %v13165_v52  ;;  %v7627_v61 = vld [vmem:[#allocation2 + $0xb1] sm:$0xff]  ;;  %v7634_v52 = vld [vmem:[#allocation2 + $0xe9] sm:$0xff] }
 0x8ab   : > { %9493 = vmatprep.subr.bf16.mxu1 %v17037_v60  ;;  %v13172_v6 = vld [vmem:[#allocation2 + $0xd8] sm:$0xff] }
 0x8ae   : > { %9494 = vmatpush1.bf16.msra.mxu1 %v13091_v3  ;;  %v7666_v3 = vpack.c.bf16 %v7628_v19, %v7627_v61  ;;  %v13171_v19 = vld [vmem:[#allocation2 + $0xd0] sm:$0xff]  ;;  %v7633_v61 = vld [vmem:[#allocation2 + $0xe1] sm:$0xff] }
 0x8af   : > { %9495 = vmatprep.subr.bf16.mxu1 %v17037_v60 }
 0x8b1   : > { %9331 = vmatmul.mubr.bf16.gmra.mrb[172].mxu1 %v7568_v26  ;;  %v13169_v26 = vld [vmem:[#allocation2 + $0xc0] sm:$0xff] }
 0x8b2   : > { %9338 = vmatprep.mubr.bf16.mxu1 %v7665_v20  ;;  %9496 = vmatpush1.bf16.msra.mxu1 %v13092_v18  ;;  %v7632_v18 = vld [vmem:[#allocation2 + $0xd9] sm:$0xff] }
 0x8b3   : > { %9497 = vmatprep.subr.bf16.mxu1 %v17037_v60  ;;  %v13170_v60 = vld [vmem:[#allocation2 + $0xc8] sm:$0xff] }
 0x8b4   : > { %v7571_v20 = vpack.c.bf16 %v13170_v60, %v13169_v26  ;;  %v7638_v26 = vld [vmem:[#allocation2 + $0x109] sm:$0xff]  ;;  %v13176_v60 = vld [vmem:[#allocation2 + $0xf8] sm:$0xff] }
 0x8b6   : > { %9498 = vmatpush1.bf16.msra.mxu1 %v13093_v11  ;;  %v7631_v11 = vld [vmem:[#allocation2 + $0xd1] sm:$0xff] }
 0x8b7   : > { %v7668_v58 = vpack.c.bf16 %v7632_v18, %v7631_v11  ;;  %v13175_v18 = vld [vmem:[#allocation2 + $0xf0] sm:$0xff] }
 0x8b9   : > { %9339 = vmatmul.mubr.bf16.gmra.mrb[176].mxu1 %v7569_v33  ;;  %v7572_v33 = vpack.c.bf16 %v13172_v6, %v13171_v19  ;;  %v7640_v19 = vld [vmem:[#allocation2 + $0x119] sm:$0xff]  ;;  %v13178_v6 = vld [vmem:[#allocation2 + $0x108] sm:$0xff] }
 0x8ba   : > { %9346 = vmatprep.mubr.bf16.mxu1 %v7666_v3  ;;  %v7669_v3 = vpack.c.bf16 %v7634_v52, %v7633_v61  ;;  %v13177_v52 = vld [vmem:[#allocation2 + $0x100] sm:$0xff]  ;;  %v7639_v61 = vld [vmem:[#allocation2 + $0x111] sm:$0xff] }
 0x8c1   : > { %9347 = vmatmul.mubr.bf16.gmra.mrb[180].mxu1 %v7570_v36  ;;  %v13174_v36 = vld [vmem:[#allocation2 + $0xe8] sm:$0xff] }
 0x8c2   : > { %9354 = vmatprep.mubr.bf16.mxu1 %v7667_v44  ;;  %v7573_v59 = vpack.c.bf16 %v13174_v36, %v13173_v46  ;;  %v7670_v44 = vpack.c.bf16 %v7636_v57, %v7635_v45  ;;  %v7642_v46 = vld [vmem:[#allocation2 + $0x129] sm:$0xff]  ;;  %v17363_v36 = vld [vmem:[#allocation54_spill] sm:$0xff] }
 0x8c3   : > { %v13179_v57 = vld [vmem:[#allocation2 + $0x110] sm:$0xff]  ;;  %v7641_v45 = vld [vmem:[#allocation2 + $0x121] sm:$0xff] }
 0x8c9   : > { %9355 = vmatmul.mubr.bf16.gmra.mrb[184].mxu1 %v7571_v20  ;;  %v7637_v20 = vld [vmem:[#allocation2 + $0x101] sm:$0xff] }
 0x8ca   : > { %9362 = vmatprep.mubr.bf16.mxu1 %v7668_v58  ;;  %v7574_v58 = vpack.c.bf16 %v13176_v60, %v13175_v18  ;;  %v7671_v11 = vpack.c.bf16 %v7638_v26, %v7637_v20  ;;  %v7644_v18 = vld [vmem:[#allocation2 + $0x139] sm:$0xff]  ;;  %v7643_v20 = vld [vmem:[#allocation2 + $0x131] sm:$0xff] }
 0x8cb   : > { %v13180_v26 = vld [vmem:[#allocation2 + $0x120] sm:$0xff] }
 0x8cc   : > { %v17364_v60 = vld [vmem:[#allocation42_spill] sm:$0xff] }
 0x8d1   : > { %9363 = vmatmul.mubr.bf16.gmra.mrb[188].mxu1 %v7572_v33  ;;  %v7575_v33 = vpack.c.bf16 %v13178_v6, %v13177_v52  ;;  %v7646_v52 = vld [vmem:[#allocation2 + $0x149] sm:$0xff]  ;;  %v17366_v6 = vld [vmem:[#allocation62_spill] sm:$0xff] }
 0x8d2   : > { %9370 = vmatprep.mubr.bf16.mxu1 %v7669_v3  ;;  %v7672_v3 = vpack.c.bf16 %v7640_v19, %v7639_v61  ;;  %v17365_v19 = vld [vmem:[#allocation45_spill] sm:$0xff]  ;;  %v7645_v61 = vld [vmem:[#allocation2 + $0x141] sm:$0xff] }
 0x8d9   : > { %9371 = vmatmul.mubr.bf16.gmra.mrb[192].mxu1 %v7573_v59  ;;  %v7576_v59 = vpack.c.bf16 %v17363_v36, %v13179_v57  ;;  %v7648_v57 = vld [vmem:[#allocation2 + $0x159] sm:$0xff] }
 0x8da   : > { %9378 = vmatprep.mubr.bf16.mxu1 %v7670_v44  ;;  %v7673_v44 = vpack.c.bf16 %v7642_v46, %v7641_v45  ;;  %v17367_v46 = vld [vmem:[#allocation56_spill] sm:$0xff] }
 0x8e1   : > { %9379 = vmatmul.mubr.bf16.gmra.mrb[196].mxu1 %v7574_v58  ;;  %v7577_v58 = vpack.c.bf16 %v17364_v60, %v13180_v26  ;;  %v7650_v26 = vld [vmem:[#allocation2 + $0x169] sm:$0xff] }
 0x8e2   : > { %9386 = vmatprep.mubr.bf16.mxu1 %v7671_v11  ;;  %v7674_v11 = vpack.c.bf16 %v7644_v18, %v7643_v20  ;;  %v17369_v18 = vld [vmem:[#allocation58_spill] sm:$0xff] }
 0x8e9   : > { %9387 = vmatmul.mubr.bf16.gmra.mrb[200].mxu1 %v7575_v33  ;;  %v7578_v33 = vpack.c.bf16 %v17366_v6, %v17365_v19 }
 0x8ea   : > { %9394 = vmatprep.mubr.bf16.mxu1 %v7672_v3  ;;  %v7675_v3 = vpack.c.bf16 %v7646_v52, %v7645_v61  ;;  %v17371_v52 = vld [vmem:[#allocation41_spill] sm:$0xff] }
 0x8f1   : > { %9395 = vmatmul.mubr.bf16.gmra.mrb[204].mxu1 %v7576_v59  ;;  %v17368_v59 = vld [vmem:[#allocation60_spill] sm:$0xff] }
 0x8f2   : > { %9402 = vmatprep.mubr.bf16.mxu1 %v7673_v44  ;;  %v7579_v45 = vpack.c.bf16 %v17368_v59, %v17367_v46  ;;  %v7647_v44 = vld [vmem:[#allocation2 + $0x151] sm:$0xff] }
 0x8f3   : > { %v7676_v29 = vpack.c.bf16 %v7648_v57, %v7647_v44  ;;  %v17373_v57 = vld [vmem:[#allocation65_spill] sm:$0xff]  ;;  %v7653_v44 = vld [vmem:[#allocation2 + $0x181] sm:$0xff] }
 0x8f4   : > { %v7679_v47 = vpack.c.bf16 %v7654_v23, %v7653_v44  ;;  %v7706_v23 = vld [vmem:[#allocation2 + $0x3f] sm:$0xff] }
 0x8f5   : > { %v17379_v44 = vld [vmem:[#allocation85_spill] sm:$0xff] }
 0x8f6   : > { %v17381_v12 = vpack.c.bf16 %v17379_v44, %v17380_v48  ;;  %v17389_v44 = vld [vmem:[#allocation96_spill] sm:$0xff] }
 0x8f9   : > { %9403 = vmatmul.mubr.bf16.gmra.mrb[208].mxu1 %v7577_v58  ;;  %v17370_v58 = vld [vmem:[#allocation64_spill] sm:$0xff] }
 0x8fa   : > { %9410 = vmatprep.mubr.bf16.mxu1 %v7674_v11  ;;  %v7580_v20 = vpack.c.bf16 %v17370_v58, %v17369_v18  ;;  %v7649_v11 = vld [vmem:[#allocation2 + $0x161] sm:$0xff] }
 0x8fb   : > { %v7677_v21 = vpack.c.bf16 %v7650_v26, %v7649_v11  ;;  %v7656_v26 = vld [vmem:[#allocation2 + $0x199] sm:$0xff] }
 0x8fc   : > { %v7680_v11 = vpack.c.bf16 %v7656_v26, %v7655_v22  ;;  %v7708_v22 = vld [vmem:[#allocation2 + $0x4f] sm:$0xff]  ;;  %v7707_v26 = vld [vmem:[#allocation2 + $0x47] sm:$0xff] }
 0x901   : > { %9411 = vmatmul.mubr.bf16.gmra.mrb[212].mxu1 %v7578_v33  ;;  %v17372_v33 = vld [vmem:[#allocation43_spill] sm:$0xff] }
 0x902   : > { %9418 = vmatprep.mubr.bf16.mxu1 %v7675_v3  ;;  %v7581_v61 = vpack.c.bf16 %v17372_v33, %v17371_v52  ;;  %v7651_v3 = vld [vmem:[#allocation2 + $0x171] sm:$0xff] }
 0x903   : > { %v7678_v32 = vpack.c.bf16 %v7652_v56, %v7651_v3  ;;  %v7584_v56 = vpack.c.bf16 %v16516_v37, %v16287_v39 }
 0x909   : > { %9419 = vmatmul.mubr.bf16.gmra.mrb[216].mxu1 %v7579_v45  ;;  %v17374_v45 = vld [vmem:[#allocation71_spill] sm:$0xff] }
 0x90a   : > { %9426 = vmatprep.mubr.bf16.mxu1 %v7676_v29  ;;  %v7582_v29 = vpack.c.bf16 %v17374_v45, %v17373_v57 }
 0x911   : > { %9427 = vmatmul.mubr.bf16.gmra.mrb[220].mxu1 %v7580_v20  ;;  %v17375_v20 = vld [vmem:[#allocation59_spill] sm:$0xff] }
 0x912   : > { %9434 = vmatprep.mubr.bf16.mxu1 %v7677_v21  ;;  %v7583_v21 = vpack.c.bf16 %v16285_v0, %v17375_v20 }
 0x919   : > { %9435 = vmatmul.mubr.bf16.gmra.mrb[224].mxu1 %v7581_v61  ;;  %v17377_v61 = vld [vmem:[#allocation80_spill] sm:$0xff] }
 0x91a   : > { %9442 = vmatprep.mubr.bf16.mxu1 %v7678_v32  ;;  %v17376_v32 = vld [vmem:[#allocation81_spill] sm:$0xff] }
 0x91b   : > { %v17378_v3 = vpack.c.bf16 %v17376_v32, %v17377_v61  ;;  %v17385_v61 = vld [vmem:[#allocation93_spill] sm:$0xff] }
 0x921   : > { %9443 = vmatmul.mubr.bf16.gmra.mrb[228].mxu1 %v7582_v29 }
 0x922   : > { %9450 = vmatprep.mubr.bf16.mxu1 %v7679_v47  ;;  %v7705_v47 = vld [vmem:[#allocation2 + $0x37] sm:$0xff] }
 0x923   : > { %v7753_v29 = vpack.c.bf16 %v7706_v23, %v7705_v47  ;;  %v7712_v47 = vld [vmem:[#allocation2 + $0x6f] sm:$0xff] }
 0x929   : > { %9451 = vmatmul.mubr.bf16.gmra.mrb[232].mxu1 %v7583_v21  ;;  %v7754_v21 = vpack.c.bf16 %v7708_v22, %v7707_v26  ;;  %v7714_v26 = vld [vmem:[#allocation2 + $0x7f] sm:$0xff] }
 0x92a   : > { %9458 = vmatprep.mubr.bf16.mxu1 %v7680_v11  ;;  %v17382_v11 = vld [vmem:[#allocation89_spill] sm:$0xff] }
 0x92b   : > { %v17384_v51 = vpack.c.bf16 %v17382_v11, %v17383_v24  ;;  %v17392_v11 = vld [vmem:[#allocation100_spill] sm:$0xff] }
 0x931   : > { %9459 = vmatmul.mubr.bf16.gmra.mrb[236].mxu1 %v7584_v56  ;;  %v7710_v56 = vld [vmem:[#allocation2 + $0x5f] sm:$0xff] }
 0x932   : > { %9499 = vmatprep.mubr.bf16.mxu1 %v17378_v3  ;;  %v7755_v32 = vpack.c.bf16 %v7710_v56, %v7709_v8  ;;  %v17386_v3 = vld [vmem:[#allocation92_spill] sm:$0xff] }
 0x933   : > { %v17387_v23 = vpack.c.bf16 %v17385_v61, %v17386_v3  ;;  %v7716_v56 = vld [vmem:[#allocation2 + $0x8f] sm:$0xff] }
 0x934   : > { %v17394_v3 = vld [vmem:[#allocation103_spill] sm:$0xff] }
 0x939   : > { %9500 = vmatmul.mubr.bf16.vlgmr.msra.gmra.mrb[144].mxu1 %v7753_v29  ;;  %v7711_v29 = vld [vmem:[#allocation2 + $0x67] sm:$0xff] }
 0x93a   : > { %9507 = vmatprep.mubr.bf16.mxu1 %v17381_v12  ;;  %v7756_v48 = vpack.c.bf16 %v7712_v47, %v7711_v29  ;;  %v17388_v12 = vld [vmem:[#allocation97_spill] sm:$0xff] }
 0x93b   : > { %v17390_v22 = vpack.c.bf16 %v17388_v12, %v17389_v44  ;;  %v7718_v29 = vld [vmem:[#allocation2 + $0x9f] sm:$0xff]  ;;  %v7943_v44 = vld [vmem:[#allocation2 + $0x1a9] sm:$0xff] }
 0x941   : > { %9508 = vmatmul.mubr.bf16.gmra.mrb[148].mxu1 %v7754_v21  ;;  %v7713_v21 = vld [vmem:[#allocation2 + $0x77] sm:$0xff] }
 0x942   : > { %9515 = vmatprep.mubr.bf16.mxu1 %v17384_v51  ;;  %v7757_v24 = vpack.c.bf16 %v7714_v26, %v7713_v21  ;;  %v17391_v51 = vld [vmem:[#allocation101_spill] sm:$0xff]  ;;  %v17397_v26 = vld [vmem:[#allocation32_spill] sm:$0xff] }
 0x943   : > { %v17393_v8 = vpack.c.bf16 %v17391_v51, %v17392_v11  ;;  %v17398_v21 = vld [vmem:[#allocation48_spill] sm:$0xff] }
 0x944   : > { %v7720_v11 = vld [vmem:[#allocation2 + $0xaf] sm:$0xff] }
 0x949   : > { %9516 = vmatmul.mubr.bf16.gmra.mrb[152].mxu1 %v7755_v32  ;;  %v7715_v32 = vld [vmem:[#allocation2 + $0x87] sm:$0xff] }
 0x94a   : > { %9523 = vmatprep.mubr.bf16.mxu1 %v17387_v23  ;;  %v7758_v61 = vpack.c.bf16 %v7716_v56, %v7715_v32  ;;  %v17395_v23 = vld [vmem:[#allocation102_spill] sm:$0xff] }
 0x94b   : > { %v17396_v47 = vpack.c.bf16 %v17394_v3, %v17395_v23  ;;  %v13094_v32 = vld [vmem:[#allocation19] sm:$0xff]   ;;  %v17400_v3 = vld [vmem:[#allocation49_spill] sm:$0xff] }
 0x94c   : > { %v17401_v23 = vld [vmem:[#allocation50_spill] sm:$0xff]  ;;  %11648 = vmatprep.subr.bf16.mxu0 %v13094_v32 }
 0x94d   : > { %11649 = vmatpush3.bf16.msra.mxu0 %v13094_v32  ;;  %v17407_v32 = vld [vmem:[#allocation52_spill] sm:$0xff] }
 0x951   : > { %9524 = vmatmul.mubr.bf16.gmra.mrb[156].mxu1 %v7756_v48  ;;  %v7717_v48 = vld [vmem:[#allocation2 + $0x97] sm:$0xff] }
 0x952   : > { %9531 = vmatprep.mubr.bf16.mxu1 %v17390_v22  ;;  %v7759_v12 = vpack.c.bf16 %v7718_v29, %v7717_v48  ;;  %v7944_v22 = vld [vmem:[#allocation2 + $0x1b1] sm:$0xff]  ;;  %v7722_v29 = vld [vmem:[#allocation2 + $0xbf] sm:$0xff] }
 0x953   : > { %v7968_v51 = vpack.c.bf16 %v7944_v22, %v7943_v44  ;;  %v13096_v48 = vld [vmem:[#allocation19 + $0x10] sm:$0xff]   ;;  %v13097_v44 = vld [vmem:[#allocation19 + $0x18] sm:$0xff]  }
 0x954   : > { %v17403_v22 = vld [vmem:[#allocation37_spill] sm:$0xff] }
 0x955   : > { %11645 = vmatmul.mubr.bf16.gmra.mrb[28].mxu0 %v7968_v51  ;;  %v7724_v51 = vld [vmem:[#allocation2 + $0xcf] sm:$0xff] }
 0x959   : > { %9532 = vmatmul.mubr.bf16.gmra.mrb[160].mxu1 %v7757_v24  ;;  %v17399_v24 = vpack.c.bf16 %v17397_v26, %v17398_v21  ;;  %v17404_v21 = vld [vmem:[#allocation36_spill] sm:$0xff] }
 0x95a   : > { %9539 = vmatprep.mubr.bf16.mxu1 %v17393_v8  ;;  %v7719_v8 = vld [vmem:[#allocation2 + $0xa7] sm:$0xff] }
 0x95b   : > { %v7760_v56 = vpack.c.bf16 %v7720_v11, %v7719_v8  ;;  %v7723_v11 = vld [vmem:[#allocation2 + $0xc7] sm:$0xff] }
 0x95c   : > { %v7762_v8 = vpack.c.bf16 %v7724_v51, %v7723_v11  ;;  %v17412_v51 = vld [vmem:[#allocation63_spill] sm:$0xff] }
 0x961   : > { %9540 = vmatmul.mubr.bf16.gmra.mrb[164].mxu1 %v7758_v61  ;;  %v13095_v61 = vld [vmem:[#allocation19 + $0x8] sm:$0xff]  }
 0x962   : > { %9547 = vmatprep.mubr.bf16.mxu1 %v17396_v47  ;;  %v17402_v47 = vpack.c.bf16 %v17400_v3, %v17401_v23  ;;  %11650 = vmatprep.subr.bf16.mxu0 %v13095_v61  ;;  %v7726_v23 = vld [vmem:[#allocation2 + $0xdf] sm:$0xff] }
 0x963   : > { %11651 = vmatpush3.bf16.msra.mxu0 %v13095_v61  ;;  %v7725_v61 = vld [vmem:[#allocation2 + $0xd7] sm:$0xff] }
 0x964   : > { %11652 = vmatprep.subr.bf16.mxu0 %v13096_v48 }
 0x967   : > { %11653 = vmatpush3.bf16.msra.mxu0 %v13096_v48 }
 0x968   : > { %11654 = vmatprep.subr.bf16.mxu0 %v13097_v44 }
 0x969   : > { %9548 = vmatmul.mubr.bf16.gmra.mrb[168].mxu1 %v7759_v12  ;;  %v7721_v12 = vld [vmem:[#allocation2 + $0xb7] sm:$0xff] }
 0x96a   : > { %9555 = vmatprep.mubr.bf16.mxu1 %v17399_v24  ;;  %v7761_v26 = vpack.c.bf16 %v7722_v29, %v7721_v12  ;;  %v17405_v24 = vpack.c.bf16 %v17403_v22, %v17404_v21  ;;  %v17409_v29 = vld [vmem:[#allocation57_spill] sm:$0xff]  ;;  %v7728_v22 = vld [vmem:[#allocation2 + $0xef] sm:$0xff]  ;;  %v7727_v21 = vld [vmem:[#allocation2 + $0xe7] sm:$0xff] }
 0x96b   : > { %11655 = vmatpush3.bf16.msra.mxu0 %v13097_v44  ;;  %v17410_v12 = vld [vmem:[#allocation53_spill] sm:$0xff]  ;;  %v7764_v48 = vpack.c.bf16 %v7728_v22, %v7727_v21  ;;  %v17413_v44 = vld [vmem:[#allocation35_spill] sm:$0xff] }
 0x96c   : > { %v17414_v11 = vpack.c.bf16 %v17412_v51, %v17413_v44  ;;  %v7731_v22 = vld [vmem:[#allocation2 + $0x107] sm:$0xff]  ;;  %v7734_v51 = vld [vmem:[#allocation2 + $0x11f] sm:$0xff]  ;;  %v7733_v44 = vld [vmem:[#allocation2 + $0x117] sm:$0xff] }
 0x971   : > { %9556 = vmatmul.mubr.bf16.gmra.mrb[172].mxu1 %v7760_v56  ;;  %v17406_v56 = vld [vmem:[#allocation47_spill] sm:$0xff] }
 0x972   : > { %9563 = vmatprep.mubr.bf16.mxu1 %v17402_v47  ;;  %v17408_v3 = vpack.c.bf16 %v17406_v56, %v17407_v32  ;;  %v7763_v47 = vpack.c.bf16 %v7726_v23, %v7725_v61  ;;  %v7730_v56 = vld [vmem:[#allocation2 + $0xff] sm:$0xff]  ;;  %v7729_v32 = vld [vmem:[#allocation2 + $0xf7] sm:$0xff]  ;;  %v17415_v61 = vld [vmem:[#allocation51_spill] sm:$0xff] }
 0x973   : > { %v13100_v23 = vld [vmem:[#allocation19 + $0x30] sm:$0xff]  }
 0x979   : > { %9564 = vmatmul.mubr.bf16.gmra.mrb[176].mxu1 %v7761_v26  ;;  %v17411_v26 = vpack.c.bf16 %v17409_v29, %v17410_v12  ;;  %v7732_v12 = vld [vmem:[#allocation2 + $0x10f] sm:$0xff] }
 0x97a   : > { %9571 = vmatprep.mubr.bf16.mxu1 %v17405_v24  ;;  %v13098_v24 = vld [vmem:[#allocation19 + $0x20] sm:$0xff]   ;;  %v7766_v21 = vpack.c.bf16 %v7732_v12, %v7731_v22  ;;  %v7740_v12 = vld [vmem:[#allocation2 + $0x14f] sm:$0xff] }
 0x97b   : > { %11656 = vmatprep.subr.bf16.mxu0 %v13098_v24  ;;  %v7742_v22 = vld [vmem:[#allocation2 + $0x15f] sm:$0xff] }
 0x97c   : > { %11657 = vmatpush3.bf16.msra.mxu0 %v13098_v24 }
 0x981   : > { %9572 = vmatmul.mubr.bf16.gmra.mrb[180].mxu1 %v7762_v8  ;;  %v13099_v8 = vld [vmem:[#allocation19 + $0x28] sm:$0xff]  }
 0x982   : > { %9579 = vmatprep.mubr.bf16.mxu1 %v17408_v3  ;;  %11658 = vmatprep.subr.bf16.mxu0 %v13099_v8  ;;  %v7765_v3 = vpack.c.bf16 %v7730_v56, %v7729_v32  ;;  %v7736_v56 = vld [vmem:[#allocation2 + $0x12f] sm:$0xff]  ;;  %v7735_v32 = vld [vmem:[#allocation2 + $0x127] sm:$0xff] }
 0x983   : > { %11659 = vmatpush3.bf16.msra.mxu0 %v13099_v8  ;;  %v17420_v8 = vpack.c.bf16 %v17365_v19, %v17364_v60  ;;  %v17423_v19 = vpack.c.bf16 %v17371_v52, %v17370_v58  ;;  %v17426_v52 = vpack.c.bf16 %v16287_v39, %v16285_v0  ;;  %v16591_v0 = vld [vmem:[#allocation17] ss:$0 sm:$0xff] }
 0x984   : > { %11660 = vmatprep.subr.bf16.mxu0 %v13100_v23 }
 0x987   : > { %11661 = vmatpush3.bf16.msra.mxu0 %v13100_v23  ;;  %v17421_v23 = vpack.c.bf16 %v17367_v46, %v17366_v6  ;;  %v17424_v46 = vpack.c.bf16 %v17373_v57, %v17372_v33  ;;  %v17427_v57 = vpack.c.bf16 %v16283_v50, %v16281_v5 }
 0x989   : > { %9580 = vmatmul.mubr.bf16.gmra.mrb[184].mxu1 %v7763_v47  ;;  %v17416_v47 = vld [vmem:[#allocation33_spill] sm:$0xff] }
 0x98a   : > { %9587 = vmatprep.mubr.bf16.mxu1 %v17411_v26  ;;  %v17417_v29 = vpack.c.bf16 %v17415_v61, %v17416_v47  ;;  %v13101_v26 = vld [vmem:[#allocation19 + $0x38] sm:$0xff]  }
 0x98b   : > { %11662 = vmatprep.subr.bf16.mxu0 %v13101_v26  ;;  %v7738_v61 = vld [vmem:[#allocation2 + $0x13f] sm:$0xff]  ;;  %v7737_v47 = vld [vmem:[#allocation2 + $0x137] sm:$0xff] }
 0x98c   : > { %11663 = vmatpush3.bf16.msra.mxu0 %v13101_v26  ;;  %v7739_v26 = vld [vmem:[#allocation2 + $0x147] sm:$0xff] }
 0x98d   : > { %v7770_v60 = vpack.c.bf16 %v7740_v12, %v7739_v26 }
 0x991   : > { %9588 = vmatmul.mubr.bf16.gmra.mrb[188].mxu1 %v7764_v48  ;;  %v17418_v48 = vld [vmem:[#allocation61_spill] sm:$0xff] }
 0x992   : > { %9595 = vmatprep.mubr.bf16.mxu1 %v17414_v11  ;;  %v17419_v24 = vpack.c.bf16 %v17418_v48, %v17363_v36  ;;  %v7767_v11 = vpack.c.bf16 %v7734_v51, %v7733_v44  ;;  %v7769_v36 = vpack.c.bf16 %v7738_v61, %v7737_v47  ;;  %v7744_v48 = vld [vmem:[#allocation2 + $0x16f] sm:$0xff]  ;;  %v7746_v51 = vld [vmem:[#allocation2 + $0x17f] sm:$0xff]  ;;  %v7745_v44 = vld [vmem:[#allocation2 + $0x177] sm:$0xff] }
 0x993   : > { %v7773_v58 = vpack.c.bf16 %v7746_v51, %v7745_v44 }
 0x999   : > { %9596 = vmatmul.mubr.bf16.gmra.mrb[192].mxu1 %v7765_v3  ;;  %v7768_v3 = vpack.c.bf16 %v7736_v56, %v7735_v32  ;;  %v7752_v32 = vld [vmem:[#allocation2 + $0x1af] sm:$0xff] }
 0x99a   : > { %9603 = vmatprep.mubr.bf16.mxu1 %v17417_v29  ;;  %v17422_v29 = vpack.c.bf16 %v17369_v18, %v17368_v59  ;;  %v17425_v18 = vpack.c.bf16 %v17375_v20, %v17374_v45  ;;  %v7751_v20 = vld [vmem:[#allocation2 + $0x1a7] sm:$0xff] }
 0x9a1   : > { %9604 = vmatmul.mubr.bf16.gmra.mrb[196].mxu1 %v7766_v21  ;;  %v7741_v21 = vld [vmem:[#allocation2 + $0x157] sm:$0xff] }
 0x9a2   : > { %9611 = vmatprep.mubr.bf16.mxu1 %v17419_v24  ;;  %v7771_v6 = vpack.c.bf16 %v7742_v22, %v7741_v21  ;;  %v7743_v24 = vld [vmem:[#allocation2 + $0x167] sm:$0xff] }
 0x9a3   : > { %v7772_v59 = vpack.c.bf16 %v7744_v48, %v7743_v24 }
 0x9a9   : > { %9612 = vmatmul.mubr.bf16.gmra.mrb[200].mxu1 %v7767_v11  ;;  %v13181_v11 = vld [vmem:[#allocation2 + $0x8] sm:$0xff] }
 0x9aa   : > { %9619 = vmatprep.mubr.bf16.mxu1 %v17420_v8  ;;  %v7871_v33 = vpack.c.bf16 %v13181_v11, %v16516_v37  ;;  %v7750_v8 = vld [vmem:[#allocation2 + $0x19f] sm:$0xff]  ;;  %v7872_v56 = vpack.c.bf16 %v13181_v11, %v13181_v11 }
 0x9ab   : > { %v7775_v45 = vpack.c.bf16 %v7750_v8, %v16432_v55 }
 0x9b1   : > { %9620 = vmatmul.mubr.bf16.gmra.mrb[204].mxu1 %v7768_v3  ;;  %v7776_v3 = vpack.c.bf16 %v7752_v32, %v7751_v20 }
 0x9b2   : > { %9627 = vmatprep.mubr.bf16.mxu1 %v17421_v23 }
 0x9b9   : > { %9628 = vmatmul.mubr.bf16.gmra.mrb[208].mxu1 %v7769_v36 }
 0x9ba   : > { %9635 = vmatprep.mubr.bf16.mxu1 %v17422_v29 }
 0x9c1   : > { %9636 = vmatmul.mubr.bf16.gmra.mrb[212].mxu1 %v7770_v60 }
 0x9c2   : > { %9643 = vmatprep.mubr.bf16.mxu1 %v17423_v19 }
 0x9c9   : > { %9644 = vmatmul.mubr.bf16.gmra.mrb[216].mxu1 %v7771_v6 }
 0x9ca   : > { %9651 = vmatprep.mubr.bf16.mxu1 %v17424_v46 }
 0x9d1   : > { %9652 = vmatmul.mubr.bf16.gmra.mrb[220].mxu1 %v7772_v59 }
 0x9d2   : > { %9659 = vmatprep.mubr.bf16.mxu1 %v17425_v18 }
 0x9d9   : > { %9660 = vmatmul.mubr.bf16.gmra.mrb[224].mxu1 %v7773_v58 }
 0x9da   : > { %9667 = vmatprep.mubr.bf16.mxu1 %v17426_v52 }
 0x9e1   : > { %9668 = vmatmul.mubr.bf16.gmra.mrb[228].mxu1 %v17427_v57 }
 0x9e2   : > { %9675 = vmatprep.mubr.bf16.mxu1 %v7871_v33 }
 0x9e9   : > { %9676 = vmatmul.mubr.bf16.gmra.mrb[232].mxu1 %v7775_v45 }
 0x9ea   : > { %9683 = vmatprep.mubr.bf16.mxu1 %v7872_v56 }
 0x9f1   : > { %9684 = vmatmul.mubr.bf16.gmra.mrb[236].mxu1 %v7776_v3 }
 0xa0c   : > { %v9501_v39 = vpop.f32.mrb[144].mxu1 }
 0xa0d   : > { %v11888_v37 = vadd.f32 %v16591_v0, %v9501_v39  ;;  %v9503_v23 = vpop.f32.mrb[145].mxu1 }
 0xa0e   : > { %v9504_v61 = vpop.f32.mrb[146].mxu1 }
 0xa0f   : > { %v9727_v5 = vadd.f32 %v11888_v37, %v16308_v30  ;;  %v11889_v50 = vadd.f32 %v16591_v0, %v9504_v61  ;;  %v9506_v47 = vpop.f32.mrb[147].mxu1 }
 0xa11   : > { %v9730_v55 = vadd.f32 %v11889_v50, %v16313_v53  ;;  %v9917_v36 = vmax.f32 %v9727_v5, 0.0 }
 0xa13   : > { %v9918_v29 = vmax.f32 %v9730_v55, 0.0 }
 0xa14   : > { %v9509_v12 = vpop.f32.mrb[148].mxu1 }
 0xa15   : > { %v11890_v26 = vadd.f32 %v16591_v0, %v9509_v12  ;;  %v9511_v60 = vpop.f32.mrb[149].mxu1  ;;  %v9965_v19 = vpack.c.bf16 %v9918_v29, %v9917_v36 }
 0xa16   : > { %v9512_v22 = vpop.f32.mrb[150].mxu1 }
 0xa17   : > { %v9735_v21 = vadd.f32 %v11890_v26, %v16306_v42  ;;  %v11891_v6 = vadd.f32 %v16591_v0, %v9512_v22  ;;  %v9514_v46 = vpop.f32.mrb[151].mxu1  ;;  %11664 = vmatprep.mubr.bf16.mxu0 %v9965_v19 }
 0xa19   : > { %v9738_v30 = vadd.f32 %v11891_v6, %v16311_v28  ;;  %v9919_v48 = vmax.f32 %v9735_v21, 0.0 }
 0xa1b   : > { %v9920_v24 = vmax.f32 %v9738_v30, 0.0 }
 0xa1c   : > { %v9517_v59 = vpop.f32.mrb[152].mxu1 }
 0xa1d   : > { %v9966_v53 = vpack.c.bf16 %v9920_v24, %v9919_v48  ;;  %v11892_v18 = vadd.f32 %v16591_v0, %v9517_v59  ;;  %v9519_v51 = vpop.f32.mrb[153].mxu1 }
 0xa1e   : > { %v9520_v44 = vpop.f32.mrb[154].mxu1 }
 0xa1f   : > { %v9743_v58 = vadd.f32 %v11892_v18, %v16327_v10  ;;  %v11893_v52 = vadd.f32 %v16591_v0, %v9520_v44  ;;  %v9522_v11 = vpop.f32.mrb[155].mxu1  ;;  %11665 = vmatmul.mubr.bf16.vlgmr.msra.gmra.mrb[32].mxu0 %v9966_v53 }
 0xa21   : > { %v9746_v42 = vadd.f32 %v11893_v52, %v16332_v13  ;;  %v9921_v33 = vmax.f32 %v9743_v58, 0.0 }
 0xa23   : > { %v9922_v57 = vmax.f32 %v9746_v42, 0.0 }
 0xa24   : > { %v9525_v8 = vpop.f32.mrb[156].mxu1 }
 0xa25   : > { %v11894_v28 = vadd.f32 %v16591_v0, %v9525_v8  ;;  %v9527_v56 = vpop.f32.mrb[157].mxu1  ;;  %v9967_v45 = vpack.c.bf16 %v9922_v57, %v9921_v33 }
 0xa26   : > { %v9528_v20 = vpop.f32.mrb[158].mxu1 }
 0xa27   : > { %v9751_v32 = vadd.f32 %v11894_v28, %v16325_v9  ;;  %v11895_v3 = vadd.f32 %v16591_v0, %v9528_v20  ;;  %v9530_v39 = vpop.f32.mrb[159].mxu1  ;;  %11668 = vmatprep.mubr.bf16.mxu0 %v9967_v45 }
 0xa29   : > { %v9754_v10 = vadd.f32 %v11895_v3, %v16330_v41  ;;  %v9923_v37 = vmax.f32 %v9751_v32, 0.0 }
 0xa2b   : > { %v9924_v23 = vmax.f32 %v9754_v10, 0.0 }
 0xa2c   : > { %v9533_v61 = vpop.f32.mrb[160].mxu1 }
 0xa2d   : > { %v9968_v13 = vpack.c.bf16 %v9924_v23, %v9923_v37  ;;  %v11896_v5 = vadd.f32 %v16591_v0, %v9533_v61  ;;  %v9535_v50 = vpop.f32.mrb[161].mxu1 }
 0xa2e   : > { %v9536_v47 = vpop.f32.mrb[162].mxu1 }
 0xa2f   : > { %v9759_v55 = vadd.f32 %v11896_v5, %v16343_v34  ;;  %v11897_v36 = vadd.f32 %v16591_v0, %v9536_v47  ;;  %v9538_v29 = vpop.f32.mrb[163].mxu1  ;;  %11669 = vmatmul.mubr.bf16.gmra.mrb[36].mxu0 %v9968_v13 }
 0xa31   : > { %v9762_v9 = vadd.f32 %v11897_v36, %v16347_v38  ;;  %v9925_v12 = vmax.f32 %v9759_v55, 0.0 }
 0xa33   : > { %v9926_v26 = vmax.f32 %v9762_v9, 0.0 }
 0xa34   : > { %v9541_v60 = vpop.f32.mrb[164].mxu1 }
 0xa35   : > { %v11898_v41 = vadd.f32 %v16591_v0, %v9541_v60  ;;  %v9543_v19 = vpop.f32.mrb[165].mxu1  ;;  %v9969_v22 = vpack.c.bf16 %v9926_v26, %v9925_v12 }
 0xa36   : > { %v9544_v21 = vpop.f32.mrb[166].mxu1 }
 0xa37   : > { %v9767_v6 = vadd.f32 %v11898_v41, %v16341_v62  ;;  %v11899_v46 = vadd.f32 %v16591_v0, %v9544_v21  ;;  %v9546_v30 = vpop.f32.mrb[167].mxu1  ;;  %11672 = vmatprep.mubr.bf16.mxu0 %v9969_v22  ;;  %v16620_v62 = vpop.f32.mrb[28].mxu0 }
 0xa38   : > { %v16622_v11 = vpop.f32.mrb[29].mxu0 }
 0xa39   : > { %v9770_v34 = vadd.f32 %v11899_v46, %v16345_v4  ;;  %v9927_v48 = vmax.f32 %v9767_v6, 0.0  ;;  %v16625_v42 = vpop.f32.mrb[30].mxu0 }
 0xa3a   : > { %v16627_v33 = vpop.f32.mrb[31].mxu0 }
 0xa3b   : > { %v9928_v24 = vmax.f32 %v9770_v34, 0.0 }
 0xa3c   : > { %v9549_v59 = vpop.f32.mrb[168].mxu1 }
 0xa3d   : > { %v9970_v38 = vpack.c.bf16 %v9928_v24, %v9927_v48  ;;  %v11900_v53 = vadd.f32 %v16591_v0, %v9549_v59  ;;  %v9551_v18 = vpop.f32.mrb[169].mxu1 }
 0xa3e   : > { %v9552_v51 = vpop.f32.mrb[170].mxu1 }
 0xa3f   : > { %v9775_v44 = vadd.f32 %v11900_v53, %v16359_v1  ;;  %v11901_v58 = vadd.f32 %v16591_v0, %v9552_v51  ;;  %v9554_v52 = vpop.f32.mrb[171].mxu1  ;;  %11673 = vmatmul.mubr.bf16.gmra.mrb[40].mxu0 %v9970_v38 }
 0xa41   : > { %v9778_v4 = vadd.f32 %v11901_v58, %v16363_v40  ;;  %v9929_v57 = vmax.f32 %v9775_v44, 0.0 }
 0xa43   : > { %v9930_v8 = vmax.f32 %v9778_v4, 0.0 }
 0xa44   : > { %v9557_v28 = vpop.f32.mrb[172].mxu1 }
 0xa45   : > { %v11902_v56 = vadd.f32 %v16591_v0, %v9557_v28  ;;  %v9559_v1 = vpop.f32.mrb[173].mxu1  ;;  %v9971_v45 = vpack.c.bf16 %v9930_v8, %v9929_v57 }
 0xa46   : > { %v9560_v20 = vpop.f32.mrb[174].mxu1 }
 0xa47   : > { %v9783_v32 = vadd.f32 %v11902_v56, %v16357_v7  ;;  %v11903_v3 = vadd.f32 %v16591_v0, %v9560_v20  ;;  %v9562_v39 = vpop.f32.mrb[175].mxu1  ;;  %11676 = vmatprep.mubr.bf16.mxu0 %v9971_v45 }
 0xa49   : > { %v9786_v40 = vadd.f32 %v11903_v3, %v16361_v54  ;;  %v9931_v10 = vmax.f32 %v9783_v32, 0.0 }
 0xa4b   : > { %v9932_v37 = vmax.f32 %v9786_v40, 0.0 }
 0xa4c   : > { %v9565_v23 = vpop.f32.mrb[176].mxu1 }
 0xa4d   : > { %v9972_v61 = vpack.c.bf16 %v9932_v37, %v9931_v10  ;;  %v11904_v13 = vadd.f32 %v16591_v0, %v9565_v23  ;;  %v9567_v5 = vpop.f32.mrb[177].mxu1 }
 0xa4e   : > { %v9568_v50 = vpop.f32.mrb[178].mxu1 }
 0xa4f   : > { %v9791_v47 = vadd.f32 %v11904_v13, %v16375_v14  ;;  %v11905_v55 = vadd.f32 %v16591_v0, %v9568_v50  ;;  %v9570_v36 = vpop.f32.mrb[179].mxu1  ;;  %11677 = vmatmul.mubr.bf16.gmra.mrb[44].mxu0 %v9972_v61 }
 0xa51   : > { %v9794_v7 = vadd.f32 %v11905_v55, %v16379_v16  ;;  %v9933_v29 = vmax.f32 %v9791_v47, 0.0 }
 0xa53   : > { %v9934_v9 = vmax.f32 %v9794_v7, 0.0 }
 0xa54   : > { %v9573_v12 = vpop.f32.mrb[180].mxu1 }
 0xa55   : > { %v11906_v54 = vadd.f32 %v16591_v0, %v9573_v12  ;;  %v9575_v26 = vpop.f32.mrb[181].mxu1  ;;  %v9973_v60 = vpack.c.bf16 %v9934_v9, %v9933_v29 }
 0xa56   : > { %v9576_v41 = vpop.f32.mrb[182].mxu1 }
 0xa57   : > { %v9799_v19 = vadd.f32 %v11906_v54, %v16373_v63  ;;  %v11907_v22 = vadd.f32 %v16591_v0, %v9576_v41  ;;  %v9578_v21 = vpop.f32.mrb[183].mxu1  ;;  %11680 = vmatprep.mubr.bf16.mxu0 %v9973_v60  ;;  %v17428_v60 = vld [vmem:[#allocation44_spill] sm:$0xff] }
 0xa59   : > { %v9802_v14 = vadd.f32 %v11907_v22, %v16377_v27  ;;  %v9935_v6 = vmax.f32 %v9799_v19, 0.0 }
 0xa5b   : > { %v9936_v46 = vmax.f32 %v9802_v14, 0.0 }
 0xa5c   : > { %v9581_v30 = vpop.f32.mrb[184].mxu1 }
 0xa5d   : > { %v9974_v16 = vpack.c.bf16 %v9936_v46, %v9935_v6  ;;  %v11908_v34 = vadd.f32 %v16591_v0, %v9581_v30  ;;  %v9583_v48 = vpop.f32.mrb[185].mxu1 }
 0xa5e   : > { %v9584_v24 = vpop.f32.mrb[186].mxu1  ;;  %v17430_v48 = vld [vmem:[#allocation31_spill] sm:$0xff] }
 0xa5f   : > { %v9807_v59 = vadd.f32 %v11908_v34, %v16391_v43  ;;  %v11909_v38 = vadd.f32 %v16591_v0, %v9584_v24  ;;  %v9586_v53 = vpop.f32.mrb[187].mxu1  ;;  %11681 = vmatmul.mubr.bf16.gmra.mrb[48].mxu0 %v9974_v16 }
 0xa60   : > { %v17431_v53 = vld [vmem:[#allocation39_spill] sm:$0xff] }
 0xa61   : > { %v9810_v63 = vadd.f32 %v11909_v38, %v16395_v31  ;;  %v9937_v18 = vmax.f32 %v9807_v59, 0.0 }
 0xa63   : > { %v9938_v51 = vmax.f32 %v9810_v63, 0.0 }
 0xa64   : > { %v9589_v44 = vpop.f32.mrb[188].mxu1 }
 0xa65   : > { %v11910_v27 = vadd.f32 %v16591_v0, %v9589_v44  ;;  %v9591_v58 = vpop.f32.mrb[189].mxu1  ;;  %v9975_v52 = vpack.c.bf16 %v9938_v51, %v9937_v18 }
 0xa66   : > { %v9592_v4 = vpop.f32.mrb[190].mxu1 }
 0xa67   : > { %v9815_v57 = vadd.f32 %v11910_v27, %v16389_v15  ;;  %v11911_v8 = vadd.f32 %v16591_v0, %v9592_v4  ;;  %v9594_v28 = vpop.f32.mrb[191].mxu1  ;;  %11684 = vmatprep.mubr.bf16.mxu0 %v9975_v52 }
 0xa69   : > { %v9818_v43 = vadd.f32 %v11911_v8, %v16393_v35  ;;  %v9939_v56 = vmax.f32 %v9815_v57, 0.0  ;;  %v17432_v57 = vld [vmem:[#allocation75_spill] sm:$0xff] }
 0xa6b   : > { %v9940_v1 = vmax.f32 %v9818_v43, 0.0 }
 0xa6c   : > { %v9597_v45 = vpop.f32.mrb[192].mxu1 }
 0xa6d   : > { %v9976_v31 = vpack.c.bf16 %v9940_v1, %v9939_v56  ;;  %v11912_v20 = vadd.f32 %v16591_v0, %v9597_v45  ;;  %v9599_v32 = vpop.f32.mrb[193].mxu1  ;;  %v17433_v56 = vld [vmem:[#allocation66_spill] sm:$0xff] }
 0xa6e   : > { %v9600_v3 = vpop.f32.mrb[194].mxu1 }
 0xa6f   : > { %v9823_v39 = vadd.f32 %v11912_v20, %v16407_v17  ;;  %v11913_v40 = vadd.f32 %v16591_v0, %v9600_v3  ;;  %v9602_v10 = vpop.f32.mrb[195].mxu1  ;;  %11685 = vmatmul.mubr.bf16.gmra.mrb[52].mxu0 %v9976_v31 }
 0xa70   : > { %v17434_v10 = vld [vmem:[#allocation73_spill] sm:$0xff] }
 0xa71   : > { %v9826_v15 = vadd.f32 %v11913_v40, %v16411_v2  ;;  %v9941_v37 = vmax.f32 %v9823_v39, 0.0 }
 0xa73   : > { %v9942_v23 = vmax.f32 %v9826_v15, 0.0 }
 0xa74   : > { %v9605_v61 = vpop.f32.mrb[196].mxu1 }
 0xa75   : > { %v11914_v35 = vadd.f32 %v16591_v0, %v9605_v61  ;;  %v9607_v13 = vpop.f32.mrb[197].mxu1  ;;  %v9977_v5 = vpack.c.bf16 %v9942_v23, %v9941_v37  ;;  %v17435_v61 = vld [vmem:[#allocation46_spill] sm:$0xff] }
 0xa76   : > { %v9608_v50 = vpop.f32.mrb[198].mxu1 }
 0xa77   : > { %v9831_v47 = vadd.f32 %v11914_v35, %v16405_v25  ;;  %v11915_v55 = vadd.f32 %v16591_v0, %v9608_v50  ;;  %v9610_v36 = vpop.f32.mrb[199].mxu1  ;;  %11688 = vmatprep.mubr.bf16.mxu0 %v9977_v5  ;;  %v17429_v25 = vld [vmem:[#allocation40_spill] sm:$0xff] }
 0xa79   : > { %v9834_v17 = vadd.f32 %v11915_v55, %v16409_v49  ;;  %v9943_v7 = vmax.f32 %v9831_v47, 0.0 }
 0xa7b   : > { %v9944_v29 = vmax.f32 %v9834_v17, 0.0 }
 0xa7c   : > { %v9613_v9 = vpop.f32.mrb[200].mxu1 }
 0xa7d   : > { %v9978_v2 = vpack.c.bf16 %v9944_v29, %v9943_v7  ;;  %v11916_v12 = vadd.f32 %v16591_v0, %v9613_v9  ;;  %v9615_v54 = vpop.f32.mrb[201].mxu1  ;;  %v17436_v7 = vld [vmem:[#allocation74_spill] sm:$0xff] }
 0xa7e   : > { %v9616_v26 = vpop.f32.mrb[202].mxu1 }
 0xa7f   : > { %v9839_v41 = vadd.f32 %v11916_v12, %v17428_v60  ;;  %v11917_v19 = vadd.f32 %v16591_v0, %v9616_v26  ;;  %v9618_v22 = vpop.f32.mrb[203].mxu1  ;;  %11689 = vmatmul.mubr.bf16.gmra.mrb[56].mxu0 %v9978_v2  ;;  %v17437_v12 = vld [vmem:[#allocation68_spill] sm:$0xff] }
 0xa81   : > { %v9842_v21 = vadd.f32 %v11917_v19, %v17429_v25  ;;  %v9945_v14 = vmax.f32 %v9839_v41, 0.0 }
 0xa83   : > { %v9946_v6 = vmax.f32 %v9842_v21, 0.0 }
 0xa84   : > { %v9621_v46 = vpop.f32.mrb[204].mxu1 }
 0xa85   : > { %v11918_v49 = vadd.f32 %v16591_v0, %v9621_v46  ;;  %v9623_v30 = vpop.f32.mrb[205].mxu1  ;;  %v9979_v16 = vpack.c.bf16 %v9946_v6, %v9945_v14  ;;  %v17438_v14 = vld [vmem:[#allocation72_spill] sm:$0xff] }
 0xa86   : > { %v9624_v34 = vpop.f32.mrb[206].mxu1  ;;  %v17439_v30 = vld [vmem:[#allocation67_spill] sm:$0xff] }
 0xa87   : > { %v9847_v24 = vadd.f32 %v11918_v49, %v17430_v48  ;;  %v11919_v59 = vadd.f32 %v16591_v0, %v9624_v34  ;;  %v9626_v38 = vpop.f32.mrb[207].mxu1  ;;  %11692 = vmatprep.mubr.bf16.mxu0 %v9979_v16 }
 0xa89   : > { %v9850_v63 = vadd.f32 %v11919_v59, %v17431_v53  ;;  %v9947_v18 = vmax.f32 %v9847_v24, 0.0 }
 0xa8b   : > { %v9948_v51 = vmax.f32 %v9850_v63, 0.0 }
 0xa8c   : > { %v9629_v44 = vpop.f32.mrb[208].mxu1 }
 0xa8d   : > { %v9980_v27 = vpack.c.bf16 %v9948_v51, %v9947_v18  ;;  %v11920_v58 = vadd.f32 %v16591_v0, %v9629_v44  ;;  %v9631_v52 = vpop.f32.mrb[209].mxu1  ;;  %v17440_v18 = vld [vmem:[#allocation70_spill] sm:$0xff] }
 0xa8e   : > { %v9632_v4 = vpop.f32.mrb[210].mxu1 }
 0xa8f   : > { %v9855_v8 = vadd.f32 %v11920_v58, %v17432_v57  ;;  %v11921_v28 = vadd.f32 %v16591_v0, %v9632_v4  ;;  %v9634_v43 = vpop.f32.mrb[211].mxu1  ;;  %11693 = vmatmul.mubr.bf16.gmra.mrb[60].mxu0 %v9980_v27  ;;  %v17441_v58 = vld [vmem:[#allocation76_spill] sm:$0xff] }
 0xa91   : > { %v9858_v1 = vadd.f32 %v11921_v28, %v17433_v56  ;;  %v9949_v45 = vmax.f32 %v9855_v8, 0.0 }
 0xa93   : > { %v9950_v31 = vmax.f32 %v9858_v1, 0.0 }
 0xa94   : > { %v9637_v20 = vpop.f32.mrb[212].mxu1 }
 0xa95   : > { %v11922_v32 = vadd.f32 %v16591_v0, %v9637_v20  ;;  %v9639_v3 = vpop.f32.mrb[213].mxu1  ;;  %v9981_v39 = vpack.c.bf16 %v9950_v31, %v9949_v45  ;;  %v17442_v45 = vld [vmem:[#allocation69_spill] sm:$0xff] }
 0xa96   : > { %v9640_v40 = vpop.f32.mrb[214].mxu1  ;;  %v17443_v3 = vld [vmem:[#allocation38_spill] sm:$0xff] }
 0xa97   : > { %v9863_v15 = vadd.f32 %v11922_v32, %v17434_v10  ;;  %v11923_v37 = vadd.f32 %v16591_v0, %v9640_v40  ;;  %v9642_v23 = vpop.f32.mrb[215].mxu1  ;;  %11696 = vmatprep.mubr.bf16.mxu0 %v9981_v39 }
 0xa99   : > { %v9866_v35 = vadd.f32 %v11923_v37, %v17435_v61  ;;  %v9951_v13 = vmax.f32 %v9863_v15, 0.0 }
 0xa9b   : > { %v9952_v5 = vmax.f32 %v9866_v35, 0.0 }
 0xa9c   : > { %v9645_v50 = vpop.f32.mrb[216].mxu1 }
 0xa9d   : > { %v9982_v47 = vpack.c.bf16 %v9952_v5, %v9951_v13  ;;  %v11924_v55 = vadd.f32 %v16591_v0, %v9645_v50  ;;  %v9647_v36 = vpop.f32.mrb[217].mxu1 }
 0xa9e   : > { %v9648_v17 = vpop.f32.mrb[218].mxu1 }
 0xa9f   : > { %v9871_v29 = vadd.f32 %v11924_v55, %v17436_v7  ;;  %v11925_v9 = vadd.f32 %v16591_v0, %v9648_v17  ;;  %v9650_v2 = vpop.f32.mrb[219].mxu1  ;;  %11697 = vmatmul.mubr.bf16.gmra.mrb[64].mxu0 %v9982_v47 }
 0xaa1   : > { %v9874_v54 = vadd.f32 %v11925_v9, %v17437_v12  ;;  %v9953_v26 = vmax.f32 %v9871_v29, 0.0 }
 0xaa3   : > { %v9954_v60 = vmax.f32 %v9874_v54, 0.0 }
 0xaa4   : > { %v9653_v41 = vpop.f32.mrb[220].mxu1 }
 0xaa5   : > { %v11926_v19 = vadd.f32 %v16591_v0, %v9653_v41  ;;  %v9655_v22 = vpop.f32.mrb[221].mxu1  ;;  %v9983_v25 = vpack.c.bf16 %v9954_v60, %v9953_v26 }
 0xaa6   : > { %v9656_v21 = vpop.f32.mrb[222].mxu1  ;;  %v16697_v22 = vld [vmem:[#allocation20] ss:$0 sm:$0xff] }
 0xaa7   : > { %v9879_v6 = vadd.f32 %v11926_v19, %v17438_v14  ;;  %v11927_v46 = vadd.f32 %v16591_v0, %v9656_v21  ;;  %v9658_v49 = vpop.f32.mrb[223].mxu1  ;;  %11700 = vmatprep.mubr.bf16.mxu0 %v9983_v25 }
 0xaa9   : > { %v9882_v16 = vadd.f32 %v11927_v46, %v17439_v30  ;;  %v9955_v34 = vmax.f32 %v9879_v6, 0.0 }
 0xaab   : > { %v9956_v48 = vmax.f32 %v9882_v16, 0.0 }
 0xaac   : > { %v9661_v24 = vpop.f32.mrb[224].mxu1 }
 0xaad   : > { %v9984_v59 = vpack.c.bf16 %v9956_v48, %v9955_v34  ;;  %v11928_v38 = vadd.f32 %v16591_v0, %v9661_v24  ;;  %v9663_v53 = vpop.f32.mrb[225].mxu1 }
 0xaae   : > { %v9664_v63 = vpop.f32.mrb[226].mxu1 }
 0xaaf   : > { %v9887_v51 = vadd.f32 %v11928_v38, %v17440_v18  ;;  %v11929_v44 = vadd.f32 %v16591_v0, %v9664_v63  ;;  %v9666_v27 = vpop.f32.mrb[227].mxu1  ;;  %11701 = vmatmul.mubr.bf16.gmra.mrb[68].mxu0 %v9984_v59 }
 0xab1   : > { %v9890_v52 = vadd.f32 %v11929_v44, %v17441_v58  ;;  %v9957_v4 = vmax.f32 %v9887_v51, 0.0 }
 0xab3   : > { %v9958_v57 = vmax.f32 %v9890_v52, 0.0 }
 0xab4   : > { %v9669_v8 = vpop.f32.mrb[228].mxu1 }
 0xab5   : > { %v11930_v28 = vadd.f32 %v16591_v0, %v9669_v8  ;;  %v9671_v43 = vpop.f32.mrb[229].mxu1  ;;  %v9985_v56 = vpack.c.bf16 %v9958_v57, %v9957_v4 }
 0xab6   : > { %v9672_v1 = vpop.f32.mrb[230].mxu1 }
 0xab7   : > { %v9895_v31 = vadd.f32 %v11930_v28, %v17442_v45  ;;  %v11931_v20 = vadd.f32 %v16591_v0, %v9672_v1  ;;  %v9674_v32 = vpop.f32.mrb[231].mxu1  ;;  %11704 = vmatprep.mubr.bf16.mxu0 %v9985_v56 }
 0xab9   : > { %v9898_v39 = vadd.f32 %v11931_v20, %v17443_v3  ;;  %v9959_v40 = vmax.f32 %v9895_v31, 0.0 }
 0xabb   : > { %v9960_v10 = vmax.f32 %v9898_v39, 0.0 }
 0xabc   : > { %v9677_v15 = vpop.f32.mrb[232].mxu1 }
 0xabd   : > { %v9986_v37 = vpack.c.bf16 %v9960_v10, %v9959_v40  ;;  %v11932_v23 = vadd.f32 %v16591_v0, %v9677_v15  ;;  %v9679_v61 = vpop.f32.mrb[233].mxu1 }
 0xabe   : > { %v9680_v35 = vpop.f32.mrb[234].mxu1 }
 0xabf   : > { %v11933_v13 = vadd.f32 %v16591_v0, %v9680_v35  ;;  %v9903_v5 = vadd.f32 %v11932_v23, %v16622_v11  ;;  %v9682_v50 = vpop.f32.mrb[235].mxu1  ;;  %11705 = vmatmul.mubr.bf16.gmra.mrb[72].mxu0 %v9986_v37 }
 0xac1   : > { %v9906_v47 = vadd.f32 %v11933_v13, %v16627_v33  ;;  %v9961_v55 = vmax.f32 %v9903_v5, 0.0 }
 0xac3   : > { %v9962_v36 = vmax.f32 %v9906_v47, 0.0 }
 0xac4   : > { %v9685_v17 = vpop.f32.mrb[236].mxu1 }
 0xac5   : > { %v9987_v7 = vpack.c.bf16 %v9962_v36, %v9961_v55  ;;  %v11934_v29 = vadd.f32 %v16591_v0, %v9685_v17  ;;  %v9687_v9 = vpop.f32.mrb[237].mxu1 }
 0xac6   : > { %v9688_v2 = vpop.f32.mrb[238].mxu1 }
 0xac7   : > { %v9911_v12 = vadd.f32 %v11934_v29, %v16620_v62  ;;  %v11935_v54 = vadd.f32 %v16591_v0, %v9688_v2  ;;  %v9690_v26 = vpop.f32.mrb[239].mxu1  ;;  %11708 = vmatprep.mubr.bf16.mxu0 %v9987_v7 }
 0xac9   : > { %v9914_v11 = vadd.f32 %v11935_v54, %v16625_v42  ;;  %v9963_v60 = vmax.f32 %v9911_v12, 0.0 }
 0xacb   : > { %v9964_v41 = vmax.f32 %v9914_v11, 0.0 }
 0xacd   : > { %v9988_v33 = vpack.c.bf16 %v9964_v41, %v9963_v60 }
 0xacf   : > { %11709 = vmatmul.mubr.bf16.gmra.mrb[76].mxu0 %v9988_v33 }
 0xaf2   : > { %v11666_v19 = vpop.f32.mrb[32].mxu0 }
 0xaf3   : > { %v10094_v25 = vpop.f32.mrb[33].mxu0  ;;  %v10103_v14 = vadd.f32 %v11666_v19, %v16697_v22 }
 0xaf4   : > { %v11667_v21 = vpop.f32.mrb[34].mxu0  ;;  %v10095_v0 = vadd.f32 %v16697_v22, %v10094_v25 }
 0xaf5   : > { %v10106_v62 = vadd.f32 %v11667_v21, %v16697_v22  ;;  %v10097_v6 = vpop.f32.mrb[35].mxu0 }
 0xaf6   : > { %v10098_v46 = vadd.f32 %v16697_v22, %v10097_v6 }
 0xaf7   : > { %v11170_v42 = vpack.c.bf16 %v10106_v62, %v10103_v14 }
 0xaf8   : > { %v11165_v49 = vpack.c.bf16 %v10098_v46, %v10095_v0 }
 0xaf9   : > { %11305 = vst [vmem:[%s16705_s3 + $0x8] sm:$0xff] %v11170_v42  }
 0xafa   : > { %11166 = vst [vmem:[%s16705_s3] sm:$0xff] %v11165_v49  }
 0xb02   : > { %v11670_v30 = vpop.f32.mrb[36].mxu0 }
 0xb03   : > { %v10110_v16 = vpop.f32.mrb[37].mxu0  ;;  %v10119_v48 = vadd.f32 %v11670_v30, %v16697_v22 }
 0xb04   : > { %v11671_v34 = vpop.f32.mrb[38].mxu0  ;;  %v10111_v38 = vadd.f32 %v16697_v22, %v10110_v16 }
 0xb05   : > { %v10122_v24 = vadd.f32 %v11671_v34, %v16697_v22  ;;  %v10113_v59 = vpop.f32.mrb[39].mxu0 }
 0xb06   : > { %v10114_v53 = vadd.f32 %v16697_v22, %v10113_v59 }
 0xb07   : > { %v11180_v63 = vpack.c.bf16 %v10122_v24, %v10119_v48 }
 0xb08   : > { %v11175_v18 = vpack.c.bf16 %v10114_v53, %v10111_v38 }
 0xb09   : > { %11307 = vst [vmem:[%s16705_s3 + $0x18] sm:$0xff] %v11180_v63  }
 0xb0a   : > { %11306 = vst [vmem:[%s16705_s3 + $0x10] sm:$0xff] %v11175_v18  }
 0xb12   : > { %v11674_v51 = vpop.f32.mrb[40].mxu0 }
 0xb13   : > { %v10126_v44 = vpop.f32.mrb[41].mxu0  ;;  %v10135_v58 = vadd.f32 %v11674_v51, %v16697_v22 }
 0xb14   : > { %v11675_v27 = vpop.f32.mrb[42].mxu0  ;;  %v10127_v57 = vadd.f32 %v16697_v22, %v10126_v44 }
 0xb15   : > { %v10138_v52 = vadd.f32 %v11675_v27, %v16697_v22  ;;  %v10129_v4 = vpop.f32.mrb[43].mxu0 }
 0xb16   : > { %v10130_v8 = vadd.f32 %v16697_v22, %v10129_v4 }
 0xb17   : > { %v11190_v28 = vpack.c.bf16 %v10138_v52, %v10135_v58 }
 0xb18   : > { %v11185_v43 = vpack.c.bf16 %v10130_v8, %v10127_v57 }
 0xb19   : > { %11309 = vst [vmem:[%s16705_s3 + $0x28] sm:$0xff] %v11190_v28  }
 0xb1a   : > { %11308 = vst [vmem:[%s16705_s3 + $0x20] sm:$0xff] %v11185_v43  }
 0xb22   : > { %v11678_v56 = vpop.f32.mrb[44].mxu0 }
 0xb23   : > { %v10142_v1 = vpop.f32.mrb[45].mxu0  ;;  %v10151_v31 = vadd.f32 %v11678_v56, %v16697_v22 }
 0xb24   : > { %v11679_v45 = vpop.f32.mrb[46].mxu0  ;;  %v10143_v3 = vadd.f32 %v16697_v22, %v10142_v1 }
 0xb25   : > { %v10154_v20 = vadd.f32 %v11679_v45, %v16697_v22  ;;  %v10145_v32 = vpop.f32.mrb[47].mxu0 }
 0xb26   : > { %v10146_v39 = vadd.f32 %v16697_v22, %v10145_v32 }
 0xb27   : > { %v11200_v40 = vpack.c.bf16 %v10154_v20, %v10151_v31 }
 0xb28   : > { %v11195_v10 = vpack.c.bf16 %v10146_v39, %v10143_v3 }
 0xb29   : > { %11311 = vst [vmem:[%s16705_s3 + $0x38] sm:$0xff] %v11200_v40  }
 0xb2a   : > { %11310 = vst [vmem:[%s16705_s3 + $0x30] sm:$0xff] %v11195_v10  }
 0xb32   : > { %v11682_v15 = vpop.f32.mrb[48].mxu0 }
 0xb33   : > { %v10158_v37 = vpop.f32.mrb[49].mxu0  ;;  %v10167_v61 = vadd.f32 %v11682_v15, %v16697_v22 }
 0xb34   : > { %v11683_v23 = vpop.f32.mrb[50].mxu0  ;;  %v10159_v5 = vadd.f32 %v16697_v22, %v10158_v37 }
 0xb35   : > { %v10170_v35 = vadd.f32 %v11683_v23, %v16697_v22  ;;  %v10161_v13 = vpop.f32.mrb[51].mxu0 }
 0xb36   : > { %v10162_v50 = vadd.f32 %v16697_v22, %v10161_v13 }
 0xb37   : > { %v11210_v47 = vpack.c.bf16 %v10170_v35, %v10167_v61 }
 0xb38   : > { %v11205_v55 = vpack.c.bf16 %v10162_v50, %v10159_v5 }
 0xb39   : > { %11313 = vst [vmem:[%s16705_s3 + $0x48] sm:$0xff] %v11210_v47  }
 0xb3a   : > { %11312 = vst [vmem:[%s16705_s3 + $0x40] sm:$0xff] %v11205_v55  }
 0xb42   : > { %v11686_v36 = vpop.f32.mrb[52].mxu0 }
 0xb43   : > { %v10174_v17 = vpop.f32.mrb[53].mxu0  ;;  %v10183_v29 = vadd.f32 %v11686_v36, %v16697_v22 }
 0xb44   : > { %v11687_v7 = vpop.f32.mrb[54].mxu0  ;;  %v10175_v12 = vadd.f32 %v16697_v22, %v10174_v17 }
 0xb45   : > { %v10186_v9 = vadd.f32 %v11687_v7, %v16697_v22  ;;  %v10177_v2 = vpop.f32.mrb[55].mxu0 }
 0xb46   : > { %v10178_v54 = vadd.f32 %v16697_v22, %v10177_v2 }
 0xb47   : > { %v11220_v26 = vpack.c.bf16 %v10186_v9, %v10183_v29 }
 0xb48   : > { %v11215_v11 = vpack.c.bf16 %v10178_v54, %v10175_v12 }
 0xb49   : > { %11315 = vst [vmem:[%s16705_s3 + $0x58] sm:$0xff] %v11220_v26  }
 0xb4a   : > { %11314 = vst [vmem:[%s16705_s3 + $0x50] sm:$0xff] %v11215_v11  }
 0xb52   : > { %v11690_v60 = vpop.f32.mrb[56].mxu0 }
 0xb53   : > { %v10190_v41 = vpop.f32.mrb[57].mxu0  ;;  %v10199_v19 = vadd.f32 %v11690_v60, %v16697_v22 }
 0xb54   : > { %v11691_v33 = vpop.f32.mrb[58].mxu0  ;;  %v10191_v14 = vadd.f32 %v16697_v22, %v10190_v41 }
 0xb55   : > { %v10202_v25 = vadd.f32 %v11691_v33, %v16697_v22  ;;  %v10193_v21 = vpop.f32.mrb[59].mxu0 }
 0xb56   : > { %v10194_v62 = vadd.f32 %v16697_v22, %v10193_v21 }
 0xb57   : > { %v11230_v6 = vpack.c.bf16 %v10202_v25, %v10199_v19 }
 0xb58   : > { %v11225_v0 = vpack.c.bf16 %v10194_v62, %v10191_v14 }
 0xb59   : > { %11317 = vst [vmem:[%s16705_s3 + $0x68] sm:$0xff] %v11230_v6  }
 0xb5a   : > { %11316 = vst [vmem:[%s16705_s3 + $0x60] sm:$0xff] %v11225_v0  }
 0xb62   : > { %v11694_v46 = vpop.f32.mrb[60].mxu0 }
 0xb63   : > { %v10206_v42 = vpop.f32.mrb[61].mxu0  ;;  %v10215_v30 = vadd.f32 %v11694_v46, %v16697_v22 }
 0xb64   : > { %v11695_v49 = vpop.f32.mrb[62].mxu0  ;;  %v10207_v48 = vadd.f32 %v16697_v22, %v10206_v42 }
 0xb65   : > { %v10218_v16 = vadd.f32 %v11695_v49, %v16697_v22  ;;  %v10209_v34 = vpop.f32.mrb[63].mxu0 }
 0xb66   : > { %v10210_v24 = vadd.f32 %v16697_v22, %v10209_v34 }
 0xb67   : > { %v11240_v59 = vpack.c.bf16 %v10218_v16, %v10215_v30 }
 0xb68   : > { %v11235_v38 = vpack.c.bf16 %v10210_v24, %v10207_v48 }
 0xb69   : > { %11319 = vst [vmem:[%s16705_s3 + $0x78] sm:$0xff] %v11240_v59  }
 0xb6a   : > { %11318 = vst [vmem:[%s16705_s3 + $0x70] sm:$0xff] %v11235_v38  }
 0xb72   : > { %v11698_v53 = vpop.f32.mrb[64].mxu0 }
 0xb73   : > { %v10222_v63 = vpop.f32.mrb[65].mxu0  ;;  %v10231_v51 = vadd.f32 %v11698_v53, %v16697_v22 }
 0xb74   : > { %v11699_v18 = vpop.f32.mrb[66].mxu0  ;;  %v10223_v58 = vadd.f32 %v16697_v22, %v10222_v63 }
 0xb75   : > { %v10234_v44 = vadd.f32 %v11699_v18, %v16697_v22  ;;  %v10225_v27 = vpop.f32.mrb[67].mxu0 }
 0xb76   : > { %v10226_v52 = vadd.f32 %v16697_v22, %v10225_v27 }
 0xb77   : > { %v11250_v4 = vpack.c.bf16 %v10234_v44, %v10231_v51 }
 0xb78   : > { %v11245_v57 = vpack.c.bf16 %v10226_v52, %v10223_v58 }
 0xb79   : > { %11321 = vst [vmem:[%s16705_s3 + $0x88] sm:$0xff] %v11250_v4  }
 0xb7a   : > { %11320 = vst [vmem:[%s16705_s3 + $0x80] sm:$0xff] %v11245_v57  }
 0xb82   : > { %v11702_v8 = vpop.f32.mrb[68].mxu0 }
 0xb83   : > { %v10238_v28 = vpop.f32.mrb[69].mxu0  ;;  %v10247_v56 = vadd.f32 %v11702_v8, %v16697_v22 }
 0xb84   : > { %v11703_v43 = vpop.f32.mrb[70].mxu0  ;;  %v10239_v31 = vadd.f32 %v16697_v22, %v10238_v28 }
 0xb85   : > { %v10250_v1 = vadd.f32 %v11703_v43, %v16697_v22  ;;  %v10241_v45 = vpop.f32.mrb[71].mxu0 }
 0xb86   : > { %v10242_v20 = vadd.f32 %v16697_v22, %v10241_v45 }
 0xb87   : > { %v11260_v32 = vpack.c.bf16 %v10250_v1, %v10247_v56 }
 0xb88   : > { %v11255_v3 = vpack.c.bf16 %v10242_v20, %v10239_v31 }
 0xb89   : > { %11323 = vst [vmem:[%s16705_s3 + $0x98] sm:$0xff] %v11260_v32  }
 0xb8a   : > { %11322 = vst [vmem:[%s16705_s3 + $0x90] sm:$0xff] %v11255_v3  }
 0xb92   : > { %v11706_v39 = vpop.f32.mrb[72].mxu0 }
 0xb93   : > { %v10254_v40 = vpop.f32.mrb[73].mxu0  ;;  %v10263_v15 = vadd.f32 %v11706_v39, %v16697_v22 }
 0xb94   : > { %v11707_v10 = vpop.f32.mrb[74].mxu0  ;;  %v10255_v61 = vadd.f32 %v16697_v22, %v10254_v40 }
 0xb95   : > { %v10266_v37 = vadd.f32 %v11707_v10, %v16697_v22  ;;  %v10257_v23 = vpop.f32.mrb[75].mxu0 }
 0xb96   : > { %v10258_v35 = vadd.f32 %v16697_v22, %v10257_v23 }
 0xb97   : > { %v11270_v13 = vpack.c.bf16 %v10266_v37, %v10263_v15 }
 0xb98   : > { %v11265_v5 = vpack.c.bf16 %v10258_v35, %v10255_v61 }
 0xb99   : > { %11325 = vst [vmem:[%s16705_s3 + $0xa8] sm:$0xff] %v11270_v13  }
 0xb9a   : > { %11324 = vst [vmem:[%s16705_s3 + $0xa0] sm:$0xff] %v11265_v5  }
 0xba2   : > { %v11710_v50 = vpop.f32.mrb[76].mxu0 }
 0xba3   : > { %v10270_v47 = vpop.f32.mrb[77].mxu0  ;;  %v10279_v36 = vadd.f32 %v11710_v50, %v16697_v22 }
 0xba4   : > { %v11711_v55 = vpop.f32.mrb[78].mxu0  ;;  %v10271_v29 = vadd.f32 %v16697_v22, %v10270_v47 }
 0xba5   : > { %v10282_v17 = vadd.f32 %v11711_v55, %v16697_v22  ;;  %v10273_v7 = vpop.f32.mrb[79].mxu0 }
 0xba6   : > { %v10274_v9 = vadd.f32 %v16697_v22, %v10273_v7 }
 0xba7   : > { %v11280_v2 = vpack.c.bf16 %v10282_v17, %v10279_v36 }
 0xba8   : > { %v11275_v12 = vpack.c.bf16 %v10274_v9, %v10271_v29 }
 0xba9   : > { %11327 = vst [vmem:[%s16705_s3 + $0xb8] sm:$0xff] %v11280_v2  }
 0xbaa   : > { %11326 = vst [vmem:[%s16705_s3 + $0xb0] sm:$0xff] %v11275_v12  }
 0xbab   : > { %13477 = shalt.err (!%p13474_p0)
}
 0xbac   : > { %s13478_s10 = scalar_lea.hbm %s16778_s24, 3072  ;;  %s13482_s22 = scalar_lea.hbm %s17444_s29, 6144 }
 0xbad   : > { %p13479_p5 = scmp.ne.s32.totalorder %s16778_s24, %s13478_s10  ;;  %p13483_p4 = scmp.lt.u32.totalorder %s16778_s24, %s17444_s29 }
 0xbae   : > { %p13484_p12 = scmp.lt.u32.totalorder %s13482_s22, %s13478_s10  ;;  %p13486_p1 = scmp.lt.u32.totalorder %s13478_s10, %s16778_s24 }
 0xbaf   : > { %p13480_p9 = pnand %p13479_p5, %p17445_p3 }
 0xbb0   : > { %p13485_p13 = por %p13484_p12, %p13483_p4 }
 0xbb1   : > { %p13481_p7 = pneg %p13480_p9 }
 0xbb2   : > { %p13487_p2 = por %p13486_p1, %p13485_p13 }
 0xbb4   : > { %p13488_p8 = pnand %p13487_p2, %p13481_p7 }
 0xbb6   : > { %13491 = shalt.err (!%p13488_p8)
}
 0xbb7   : > { %s13570_s25 = smov 64   ;;  %s13571_s21 = smov 4  }
 0xbb8   : > { %12746 = dma.vmem_to_hbm [thread:$0]  (%p17445_p3), %s16780_s11, 3072, %s16778_s24, %s10526_s19, %s13570_s25, %s13570_s25, %s13571_s21  }
 0xbb9 PF: > { %s10554_s12 = sand.u32 1, %s13538_s13   ;;  %p17446_p6 = scmp.ne.s32.totalorder %s16977_s20, 0 }
 0xbba   : > { %p17447_p10 = scmp.ge.s32.totalorder %s13550_s16, 2  ;;  %s10555_s1 = scalar_lea.sflag [#allocation7], %s10554_s12 }
 0xbbc   : > { %p12781_p11 = pnand %p17447_p10, %p17446_p6 }
 0xbbe   : > { %13533 = dma.done.wait (!%p12781_p11), %s10555_s1, 3072  }
 0xbbf   : > { %13535 = vsyncadd (!%p12781_p11), %s10555_s1, 4294964224  ;;  %p28_p0 = scmp.ge.s32.totalorder %s13871_s23, 4   ;;  %s17448_s13 = smov %s13542_s14 }
 0xbc0   : > { %s17449_s14 = smov %s13546_s15  ;;  %s17450_s15 = smov %s13883_s27 }
 0xbc1   : > { %s17451_s16 = smov %s13871_s23  ;;  %30 = sbr.rel (!%p28_p0) target bundleno = 14 (0xe), region = 159 }
 0xbc8   :  { %10560 = vsyncpa [#allocation6], 1 }
 0xbc9   :  { %10562 = vsyncpa [#allocation6 + $0x1], 1 }
 0xbca   :  { %10563 = vsyncpa [#allocation9], 1 }
 0xbcb   :  { %10564 = vsyncpa [#allocation12], 1 }
 0xbcc   :  { %10565 = vsyncpa [#allocation15], 1 }
 0xbcd   :  { %10566 = vsyncpa [#allocation18], 1 }
 0xbce   :  { %10567 = vsyncpa [#allocation21], 1 }
 0xbcf   :  { %10568 = vsyncpa [#allocation7], 1 }
 0xbd0   :  { %10570 = vsyncpa [#allocation7 + $0x1], 1 }

</bundles_post_ra>
